<compile_context>
chip_gen: v5e
topology: v5e:2x2
jax: 0.10.0
libtpu: 0.0.40
codegen_flags: <defaults>
</compile_context>

<pallas_src>
import functools

import jax
import jax.numpy as jnp
from jax import lax
from jax.experimental import pallas as pl
from jax.experimental.pallas import tpu as pltpu


def _round_up(v, m):
    return ((v + m - 1) // m) * m


# ----------------------------------------------------------------------------
# Kernel 1: streamed mean + covariance + covariance diagonal for a [B, N, D]
#           stack.  Grid = (B, N tiles); outputs are VMEM-resident accumulators
#           finalized in place on the last N step.
# ----------------------------------------------------------------------------
def _stats_kernel(x_ref, mu_ref, sigma_ref, diag_ref, *,
                  n_true, tile_n, needs_mask, mxu_dtype):
    i = pl.program_id(1)

    @pl.when(i == 0)
    def _():
        mu_ref[...] = jnp.zeros_like(mu_ref)
        sigma_ref[...] = jnp.zeros_like(sigma_ref)
        diag_ref[...] = jnp.zeros_like(diag_ref)

    x = x_ref[...].astype(jnp.float32)                          # (TN, D)
    if needs_mask:
        # Last tile may overhang N: zero invalid rows (exact -- zero rows add
        # nothing to the sums / X^T X).  Avoids a full HBM pad copy of X.
        rows = i * tile_n + lax.broadcasted_iota(jnp.int32, (tile_n, 1), 0)
        x = jnp.where(rows < int(n_true), x, 0.0)

    mu_ref[...] += jnp.sum(x, axis=0, keepdims=True)            # (1, D)
    diag_ref[...] += jnp.sum(x * x, axis=0, keepdims=True)      # (1, D)
    # X^T X without materializing the transpose: contract the sample axis.
    xm = x.astype(mxu_dtype)
    sigma_ref[...] += lax.dot_general(
        xm, xm, dimension_numbers=(((0,), (0,)), ((), ())),
        preferred_element_type=jnp.float32)                     # (D, D)

    @pl.when(i == pl.num_programs(1) - 1)
    def _():
        # One-pass covariance: sigma = (X^T X - n * mu mu^T) / (n - 1).
        # NOTE: f32 one-pass is mathematically equal to torch's centered cov
        # but can lose precision if means >> stddevs; validated at small scale.
        inv_n = 1.0 / n_true
        inv_nm1 = 1.0 / (n_true - 1.0)
        mu = mu_ref[...] * inv_n                                 # (1, D)
        mu_ref[...] = mu
        outer = lax.dot_general(                                 # runs once
            mu, mu, dimension_numbers=(((0,), (0,)), ((), ())),
            preferred_element_type=jnp.float32)                  # (D, D)
        sigma_ref[...] = (sigma_ref[...] - n_true * outer) * inv_nm1
        diag_ref[...] = (diag_ref[...] - n_true * mu * mu) * inv_nm1


def mean_cov(x, *, tile_n=None, mxu_dtype=jnp.float32):
    """Return (mu [B,1,D], sigma [B,D,D], diag(sigma) [B,1,D]) of [B,N,D]."""
    b, n, d = x.shape

    if tile_n is None:
        # Budget ~16 MiB for the double-buffered input stream so that together
        # with the resident DxD f32 accumulator (+ writeback buffer) the kernel
        # stays under ~56 MiB -> safe on v7x's 64 MiB VMEM.  On v5e/v6e
        # (128 MiB physical) this still amortizes the ~0.35us/step overhead.
        tile_n = max(8, (16 * 1024 * 1024) // (2 * d * 4))
        tile_n = min(2048, tile_n)
    tile_n = max(8, _round_up(min(tile_n, _round_up(n, 8)), 8))
    needs_mask = (n % tile_n) != 0
    n_tiles = pl.cdiv(n, tile_n)
    # TODO(synk): for D <= ~256 (DMA-bound regime) pipeline_mode=pl.Buffered(3)
    # on the X BlockSpec can hide more DMA latency; left at the default depth.

    need_bytes = (2 * tile_n * d * 4        # double-buffered input tile
                  + 2 * d * d * 4           # resident sigma + writeback buffer
                  + 8 * d * 4) + (4 << 20)
    vmem_limit = int(min(96 << 20, max(32 << 20, need_bytes)))

    kernel = functools.partial(
        _stats_kernel, n_true=float(n), tile_n=tile_n,
        needs_mask=needs_mask, mxu_dtype=mxu_dtype)

    mu, sigma, diag = pl.pallas_call(
        kernel,
        out_shape=(jax.ShapeDtypeStruct((b, 1, d), jnp.float32),
                   jax.ShapeDtypeStruct((b, d, d), jnp.float32),
                   jax.ShapeDtypeStruct((b, 1, d), jnp.float32)),
        grid_spec=pltpu.PrefetchScalarGridSpec(
            num_scalar_prefetch=0,
            grid=(b, n_tiles),
            in_specs=[pl.BlockSpec((None, tile_n, d), lambda bb, i: (bb, i, 0))],
            out_specs=(pl.BlockSpec((None, 1, d), lambda bb, i: (bb, 0, 0)),
                       pl.BlockSpec((None, d, d), lambda bb, i: (bb, 0, 0)),
                       pl.BlockSpec((None, 1, d), lambda bb, i: (bb, 0, 0)))),
        compiler_params=pltpu.CompilerParams(
            dimension_semantics=("parallel", "arbitrary"),   # N axis = reduction
            vmem_limit_bytes=vmem_limit),
    )(x)
    return mu, sigma, diag


# ----------------------------------------------------------------------------
# Kernel 2: tiled fused congruence transform
#   M = (Q diag(s))^T @ Sx @ (Q diag(s)),  s = sqrt(clamp(l, 0))
# Same eigenvalues as Sy^{1/2} Sx Sy^{1/2}.  The t_i = A_i^T @ Sx row panel is
# computed once per i (at j == 0) into VMEM scratch and reused across j, so the
# two matmuls stay fused (no HBM round trip) and the working set fits VMEM on
# every generation at production D.
# ----------------------------------------------------------------------------
def _pick_tile(d):
    for t in (512, 256, 128):
        if d % t == 0:
            return t
    return d


def _congruence_kernel(qi_ref, li_ref, qj_ref, lj_ref, sx_ref, out_ref, t_ref):
    j = pl.program_id(1)

    @pl.when(j == 0)
    def _():
        si = jnp.sqrt(jnp.maximum(li_ref[...].astype(jnp.float32), 0.0))   # (1,TM)
        ai = qi_ref[...].astype(jnp.float32) * si          # (D,TM) column scale
        # t_i = A_i^T @ Sx -- contract the row axis directly (no transpose).
        t_ref[...] = lax.dot_general(
            ai, sx_ref[...], dimension_numbers=(((0,), (0,)), ((), ())),
            preferred_element_type=jnp.float32)                            # (TM,D)

    sj = jnp.sqrt(jnp.maximum(lj_ref[...].astype(jnp.float32), 0.0))       # (1,TN)
    aj = qj_ref[...].astype(jnp.float32) * sj                              # (D,TN)
    out_ref[...] = jnp.dot(t_ref[...], aj,
                           preferred_element_type=jnp.float32)             # (TM,TN)


def congruence_transform(q, l_row, sigma_x, *, tile=None):
    d = q.shape[0]
    if tile is None:
        tile = _pick_tile(d)
    tm = tn = tile
    grid = (d // tm, d // tn)

    need_bytes = (d * d * 4 + tm * d * 4
                  + 2 * (d * tm * 4 + d * tn * 4 + tm * tn * 4 + 2 * tn * 4)
                  ) + (4 << 20)
    vmem_limit = int(min(96 << 20, max(32 << 20, need_bytes)))

    return pl.pallas_call(
        _congruence_kernel,
        out_shape=jax.ShapeDtypeStruct((d, d), jnp.float32),
        grid_spec=pltpu.PrefetchScalarGridSpec(
            num_scalar_prefetch=0,
            grid=grid,
            in_specs=[pl.BlockSpec((d, tm), lambda i, j: (0, i)),   # Q cols (i)
                      pl.BlockSpec((1, tm), lambda i, j: (0, i)),   # l (i)
                      pl.BlockSpec((d, tn), lambda i, j: (0, j)),   # Q cols (j)
                      pl.BlockSpec((1, tn), lambda i, j: (0, j)),   # l (j)
                      pl.BlockSpec((d, d), lambda i, j: (0, 0))],   # Sx resident
            out_specs=pl.BlockSpec((tm, tn), lambda i, j: (i, j)),
            scratch_shapes=[pltpu.VMEM((tm, d), jnp.float32)]),     # t_i panel
        compiler_params=pltpu.CompilerParams(
            dimension_semantics=("parallel", "arbitrary"),
            vmem_limit_bytes=vmem_limit),
    )(q, l_row, q, l_row, sigma_x)


# ----------------------------------------------------------------------------
# FID.forward equivalent
# ----------------------------------------------------------------------------
@jax.jit
def fid_forward(real_feats, fake_feats):
    if real_feats.shape == fake_feats.shape:
        # One stats kernel for both feature sets; leading "parallel" axis uses
        # both TensorCores on v7x.
        feats = jnp.stack([real_feats, fake_feats], axis=0)     # [2, N, D]
        mu, sigma, diag = mean_cov(feats)
        mu_x, sigma_x, diag_x = mu[0], sigma[0], diag[0]
        mu_y, sigma_y, diag_y = mu[1], sigma[1], diag[1]
    else:
        mu_x, sigma_x, diag_x = [t[0] for t in mean_cov(real_feats[None])]
        mu_y, sigma_y, diag_y = [t[0] for t in mean_cov(fake_feats[None])]

    # TODO(synk): symmetric eigendecomposition (torch.linalg.eigh) has no Pallas
    # equivalent; it stays in plain JAX (XLA's eigh) and dominates wall time at
    # production D.
    l_y, q_y = jnp.linalg.eigh(sigma_y)

    # tr(sqrtm(Sy^{1/2} Sx Sy^{1/2})) from eigenvalues of the congruent matrix.
    m = congruence_transform(q_y, l_y.reshape(1, -1), sigma_x)
    m = 0.5 * (m + m.T)                      # symmetrize f32 round-off (cheap)
    l_m = jnp.linalg.eigvalsh(m)
    tr_sqrt_m = jnp.sum(jnp.sqrt(jnp.maximum(l_m, 0.0)))

    diff = mu_x - mu_y
    fid = (jnp.sum(diff * diff)
           + jnp.sum(diag_x) + jnp.sum(diag_y)
           - 2.0 * tr_sqrt_m)
    return fid


if __name__ == "__main__":
    key = jax.random.PRNGKey(0)
    k1, k2 = jax.random.split(key)
    n, d = 32, 128  # small stand-in for (N, 2048) Inception features
    real_feats = jax.random.normal(k1, (n, d), dtype=jnp.float32)
    fake_feats = jax.random.normal(k2, (n, d), dtype=jnp.float32) * 1.1 + 0.05

    fid_val = fid_forward(real_feats, fake_feats)
    jax.block_until_ready(fid_val)
    assert bool(jnp.isfinite(fid_val)), "FID is not finite"
    print("KERNEL_OK")
</pallas_src>

<mosaic_0001>
module attributes {stable_mosaic.version = 11 : i64} {
  func.func @_stats_kernel(%arg0: i32, %arg1: i32, %arg2: memref<1x32x128xf32, #tpu.memory_space<vmem>>, %arg3: memref<1x1x128xf32, #tpu.memory_space<vmem>>, %arg4: memref<1x128x128xf32, #tpu.memory_space<vmem>>, %arg5: memref<1x1x128xf32, #tpu.memory_space<vmem>>) attributes {dimension_semantics = [#tpu.dimension_semantics<parallel>, #tpu.dimension_semantics<arbitrary>], iteration_bounds = array<i64: 2, 1>, scalar_prefetch = 0 : i64, scratch_operands = 0 : i64, tpu.core_type = #tpu.core_type<tc>, window_params = [{transform_indices = @transform_0, window_bounds = array<i64: 1, 32, 128>}, {transform_indices = @transform_1, window_bounds = array<i64: 1, 1, 128>}, {transform_indices = @transform_2, window_bounds = array<i64: 1, 128, 128>}, {transform_indices = @transform_3, window_bounds = array<i64: 1, 1, 128>}]} {
    %c0_i32 = arith.constant 0 : i32
    %0 = arith.cmpi eq, %arg1, %c0_i32 : i32
    %1 = arith.extui %0 : i1 to i32
    %c0_i32_0 = arith.constant 0 : i32
    %2 = arith.cmpi ne, %1, %c0_i32_0 : i32
    scf.if %2 {
      %cst_25 = arith.constant 0.000000e+00 : f32
      %32 = vector.broadcast %cst_25 : f32 to vector<1x128xf32>
      %c0_26 = arith.constant 0 : index
      %c0_27 = arith.constant 0 : index
      %c0_28 = arith.constant 0 : index
      %33 = vector.load %arg3[%c0_26, %c0_27, %c0_28] : memref<1x1x128xf32, #tpu.memory_space<vmem>>, vector<1x1x128xf32>
      %34 = vector.shape_cast %33 : vector<1x1x128xf32> to vector<1x128xf32>
      %35 = vector.shape_cast %32 : vector<1x128xf32> to vector<1x1x128xf32>
      tpu.vector_store %arg3[%c0_26, %c0_27, %c0_28], %35 {strides = array<i32>} : memref<1x1x128xf32, #tpu.memory_space<vmem>>, vector<1x1x128xf32>,
      %cst_29 = arith.constant 0.000000e+00 : f32
      %36 = vector.broadcast %cst_29 : f32 to vector<128x128xf32>
      %c0_30 = arith.constant 0 : index
      %c0_31 = arith.constant 0 : index
      %c0_32 = arith.constant 0 : index
      %37 = vector.load %arg4[%c0_30, %c0_31, %c0_32] : memref<1x128x128xf32, #tpu.memory_space<vmem>>, vector<1x128x128xf32>
      %38 = vector.shape_cast %37 : vector<1x128x128xf32> to vector<128x128xf32>
      %39 = vector.shape_cast %36 : vector<128x128xf32> to vector<1x128x128xf32>
      tpu.vector_store %arg4[%c0_30, %c0_31, %c0_32], %39 {strides = array<i32>} : memref<1x128x128xf32, #tpu.memory_space<vmem>>, vector<1x128x128xf32>,
      %cst_33 = arith.constant 0.000000e+00 : f32
      %40 = vector.broadcast %cst_33 : f32 to vector<1x128xf32>
      %c0_34 = arith.constant 0 : index
      %c0_35 = arith.constant 0 : index
      %c0_36 = arith.constant 0 : index
      %41 = vector.load %arg5[%c0_34, %c0_35, %c0_36] : memref<1x1x128xf32, #tpu.memory_space<vmem>>, vector<1x1x128xf32>
      %42 = vector.shape_cast %41 : vector<1x1x128xf32> to vector<1x128xf32>
      %43 = vector.shape_cast %40 : vector<1x128xf32> to vector<1x1x128xf32>
      tpu.vector_store %arg5[%c0_34, %c0_35, %c0_36], %43 {strides = array<i32>} : memref<1x1x128xf32, #tpu.memory_space<vmem>>, vector<1x1x128xf32>,
    } else {
    }
    %c0 = arith.constant 0 : index
    %c0_1 = arith.constant 0 : index
    %c0_2 = arith.constant 0 : index
    %3 = vector.load %arg2[%c0, %c0_1, %c0_2] : memref<1x32x128xf32, #tpu.memory_space<vmem>>, vector<1x32x128xf32>
    %4 = vector.shape_cast %3 : vector<1x32x128xf32> to vector<32x128xf32>
    %c0_3 = arith.constant 0 : index
    %c0_4 = arith.constant 0 : index
    %c0_5 = arith.constant 0 : index
    %5 = vector.load %arg3[%c0_3, %c0_4, %c0_5] : memref<1x1x128xf32, #tpu.memory_space<vmem>>, vector<1x1x128xf32>
    %6 = vector.shape_cast %5 : vector<1x1x128xf32> to vector<1x128xf32>
    %cst = arith.constant dense<0.000000e+00> : vector<128xf32>
    %7 = vector.multi_reduction <add>, %4, %cst [0] : vector<32x128xf32> to vector<128xf32>
    %8 = vector.shape_cast %7 : vector<128xf32> to vector<1x128xf32>
    %9 = arith.addf %6, %8 : vector<1x128xf32>
    %c0_6 = arith.constant 0 : index
    %c0_7 = arith.constant 0 : index
    %c0_8 = arith.constant 0 : index
    %10 = vector.load %arg3[%c0_6, %c0_7, %c0_8] : memref<1x1x128xf32, #tpu.memory_space<vmem>>, vector<1x1x128xf32>
    %11 = vector.shape_cast %10 : vector<1x1x128xf32> to vector<1x128xf32>
    %12 = vector.shape_cast %9 : vector<1x128xf32> to vector<1x1x128xf32>
    tpu.vector_store %arg3[%c0_6, %c0_7, %c0_8], %12 {strides = array<i32>} : memref<1x1x128xf32, #tpu.memory_space<vmem>>, vector<1x1x128xf32>,
    %c0_9 = arith.constant 0 : index
    %c0_10 = arith.constant 0 : index
    %c0_11 = arith.constant 0 : index
    %13 = vector.load %arg5[%c0_9, %c0_10, %c0_11] : memref<1x1x128xf32, #tpu.memory_space<vmem>>, vector<1x1x128xf32>
    %14 = vector.shape_cast %13 : vector<1x1x128xf32> to vector<1x128xf32>
    %15 = arith.mulf %4, %4 : vector<32x128xf32>
    %cst_12 = arith.constant dense<0.000000e+00> : vector<128xf32>
    %16 = vector.multi_reduction <add>, %15, %cst_12 [0] : vector<32x128xf32> to vector<128xf32>
    %17 = vector.shape_cast %16 : vector<128xf32> to vector<1x128xf32>
    %18 = arith.addf %14, %17 : vector<1x128xf32>
    %c0_13 = arith.constant 0 : index
    %c0_14 = arith.constant 0 : index
    %c0_15 = arith.constant 0 : index
    %19 = vector.load %arg5[%c0_13, %c0_14, %c0_15] : memref<1x1x128xf32, #tpu.memory_space<vmem>>, vector<1x1x128xf32>
    %20 = vector.shape_cast %19 : vector<1x1x128xf32> to vector<1x128xf32>
    %21 = vector.shape_cast %18 : vector<1x128xf32> to vector<1x1x128xf32>
    tpu.vector_store %arg5[%c0_13, %c0_14, %c0_15], %21 {strides = array<i32>} : memref<1x1x128xf32, #tpu.memory_space<vmem>>, vector<1x1x128xf32>,
    %c0_16 = arith.constant 0 : index
    %c0_17 = arith.constant 0 : index
    %c0_18 = arith.constant 0 : index
    %22 = vector.load %arg4[%c0_16, %c0_17, %c0_18] : memref<1x128x128xf32, #tpu.memory_space<vmem>>, vector<1x128x128xf32>
    %23 = vector.shape_cast %22 : vector<1x128x128xf32> to vector<128x128xf32>
    %cst_19 = arith.constant dense<0.000000e+00> : vector<128x128xf32>
    %24 = tpu.matmul %4, %4, %cst_19 {dimension_numbers = #tpu.dot_dimension_numbers<[0], [0], [1], [1], [0, 1, 1, 1], [], []>} : vector<32x128xf32>, vector<32x128xf32>, vector<128x128xf32> -> vector<128x128xf32>
    %25 = arith.addf %23, %24 : vector<128x128xf32>
    %c0_20 = arith.constant 0 : index
    %c0_21 = arith.constant 0 : index
    %c0_22 = arith.constant 0 : index
    %26 = vector.load %arg4[%c0_20, %c0_21, %c0_22] : memref<1x128x128xf32, #tpu.memory_space<vmem>>, vector<1x128x128xf32>
    %27 = vector.shape_cast %26 : vector<1x128x128xf32> to vector<128x128xf32>
    %28 = vector.shape_cast %25 : vector<128x128xf32> to vector<1x128x128xf32>
    tpu.vector_store %arg4[%c0_20, %c0_21, %c0_22], %28 {strides = array<i32>} : memref<1x128x128xf32, #tpu.memory_space<vmem>>, vector<1x128x128xf32>,
    %c0_i32_23 = arith.constant 0 : i32
    %29 = arith.cmpi eq, %arg1, %c0_i32_23 : i32
    %30 = arith.extui %29 : i1 to i32
    %c0_i32_24 = arith.constant 0 : i32
    %31 = arith.cmpi ne, %30, %c0_i32_24 : i32
    scf.if %31 {
      %c0_25 = arith.constant 0 : index
      %c0_26 = arith.constant 0 : index
      %c0_27 = arith.constant 0 : index
      %32 = vector.load %arg3[%c0_25, %c0_26, %c0_27] : memref<1x1x128xf32, #tpu.memory_space<vmem>>, vector<1x1x128xf32>
      %33 = vector.shape_cast %32 : vector<1x1x128xf32> to vector<1x128xf32>
      %cst_28 = arith.constant 3.125000e-02 : f32
      %34 = vector.broadcast %cst_28 : f32 to vector<1x128xf32>
      %35 = arith.mulf %33, %34 : vector<1x128xf32>
      %c0_29 = arith.constant 0 : index
      %c0_30 = arith.constant 0 : index
      %c0_31 = arith.constant 0 : index
      %36 = vector.load %arg3[%c0_29, %c0_30, %c0_31] : memref<1x1x128xf32, #tpu.memory_space<vmem>>, vector<1x1x128xf32>
      %37 = vector.shape_cast %36 : vector<1x1x128xf32> to vector<1x128xf32>
      %38 = vector.shape_cast %35 : vector<1x128xf32> to vector<1x1x128xf32>
      tpu.vector_store %arg3[%c0_29, %c0_30, %c0_31], %38 {strides = array<i32>} : memref<1x1x128xf32, #tpu.memory_space<vmem>>, vector<1x1x128xf32>,
      %cst_32 = arith.constant dense<0.000000e+00> : vector<128x128xf32>
      %39 = tpu.matmul %35, %35, %cst_32 {dimension_numbers = #tpu.dot_dimension_numbers<[0], [0], [1], [1], [0, 1, 1, 1], [], []>} : vector<1x128xf32>, vector<1x128xf32>, vector<128x128xf32> -> vector<128x128xf32>
      %c0_33 = arith.constant 0 : index
      %c0_34 = arith.constant 0 : index
      %c0_35 = arith.constant 0 : index
      %40 = vector.load %arg4[%c0_33, %c0_34, %c0_35] : memref<1x128x128xf32, #tpu.memory_space<vmem>>, vector<1x128x128xf32>
      %41 = vector.shape_cast %40 : vector<1x128x128xf32> to vector<128x128xf32>
      %cst_36 = arith.constant 3.200000e+01 : f32
      %42 = vector.broadcast %cst_36 : f32 to vector<128x128xf32>
      %43 = arith.mulf %42, %39 : vector<128x128xf32>
      %44 = arith.subf %41, %43 : vector<128x128xf32>
      %cst_37 = arith.constant 0.0322580636 : f32
      %45 = vector.broadcast %cst_37 : f32 to vector<128x128xf32>
      %46 = arith.mulf %44, %45 : vector<128x128xf32>
      %c0_38 = arith.constant 0 : index
      %c0_39 = arith.constant 0 : index
      %c0_40 = arith.constant 0 : index
      %47 = vector.load %arg4[%c0_38, %c0_39, %c0_40] : memref<1x128x128xf32, #tpu.memory_space<vmem>>, vector<1x128x128xf32>
      %48 = vector.shape_cast %47 : vector<1x128x128xf32> to vector<128x128xf32>
      %49 = vector.shape_cast %46 : vector<128x128xf32> to vector<1x128x128xf32>
      tpu.vector_store %arg4[%c0_38, %c0_39, %c0_40], %49 {strides = array<i32>} : memref<1x128x128xf32, #tpu.memory_space<vmem>>, vector<1x128x128xf32>,
      %c0_41 = arith.constant 0 : index
      %c0_42 = arith.constant 0 : index
      %c0_43 = arith.constant 0 : index
      %50 = vector.load %arg5[%c0_41, %c0_42, %c0_43] : memref<1x1x128xf32, #tpu.memory_space<vmem>>, vector<1x1x128xf32>
      %51 = vector.shape_cast %50 : vector<1x1x128xf32> to vector<1x128xf32>
      %cst_44 = arith.constant 3.200000e+01 : f32
      %52 = vector.broadcast %cst_44 : f32 to vector<1x128xf32>
      %53 = arith.mulf %52, %35 : vector<1x128xf32>
      %54 = arith.mulf %53, %35 : vector<1x128xf32>
      %55 = arith.subf %51, %54 : vector<1x128xf32>
      %cst_45 = arith.constant 0.0322580636 : f32
      %56 = vector.broadcast %cst_45 : f32 to vector<1x128xf32>
      %57 = arith.mulf %55, %56 : vector<1x128xf32>
      %c0_46 = arith.constant 0 : index
      %c0_47 = arith.constant 0 : index
      %c0_48 = arith.constant 0 : index
      %58 = vector.load %arg5[%c0_46, %c0_47, %c0_48] : memref<1x1x128xf32, #tpu.memory_space<vmem>>, vector<1x1x128xf32>
      %59 = vector.shape_cast %58 : vector<1x1x128xf32> to vector<1x128xf32>
      %60 = vector.shape_cast %57 : vector<1x128xf32> to vector<1x1x128xf32>
      tpu.vector_store %arg5[%c0_46, %c0_47, %c0_48], %60 {strides = array<i32>} : memref<1x1x128xf32, #tpu.memory_space<vmem>>, vector<1x1x128xf32>,
    } else {
    }
    return
  }
  func.func @transform_0(%arg0: i32, %arg1: i32) -> (i32, i32, i32) {
    %c0_i32 = arith.constant 0 : i32
    %c0_i32_0 = arith.constant 0 : i32
    return %arg0, %arg1, %c0_i32 : i32, i32, i32
  }
  func.func @transform_1(%arg0: i32, %arg1: i32) -> (i32, i32, i32) {
    %c0_i32 = arith.constant 0 : i32
    %c0_i32_0 = arith.constant 0 : i32
    %c0_i32_1 = arith.constant 0 : i32
    return %arg0, %c0_i32, %c0_i32_0 : i32, i32, i32
  }
  func.func @transform_2(%arg0: i32, %arg1: i32) -> (i32, i32, i32) {
    %c0_i32 = arith.constant 0 : i32
    %c0_i32_0 = arith.constant 0 : i32
    %c0_i32_1 = arith.constant 0 : i32
    return %arg0, %c0_i32, %c0_i32_0 : i32, i32, i32
  }
  func.func @transform_3(%arg0: i32, %arg1: i32) -> (i32, i32, i32) {
    %c0_i32 = arith.constant 0 : i32
    %c0_i32_0 = arith.constant 0 : i32
    %c0_i32_1 = arith.constant 0 : i32
    return %arg0, %c0_i32, %c0_i32_0 : i32, i32, i32
  }
}

module attributes {stable_mosaic.version = 11 : i64} {
  func.func @_congruence_kernel(%arg0: i32, %arg1: i32, %arg2: memref<128x128xf32, #tpu.memory_space<vmem>>, %arg3: memref<1x128xf32, #tpu.memory_space<vmem>>, %arg4: memref<128x128xf32, #tpu.memory_space<vmem>>, %arg5: memref<1x128xf32, #tpu.memory_space<vmem>>, %arg6: memref<128x128xf32, #tpu.memory_space<vmem>>, %arg7: memref<128x128xf32, #tpu.memory_space<vmem>>, %arg8: memref<128x128xf32, #tpu.memory_space<vmem>>) attributes {dimension_semantics = [#tpu.dimension_semantics<parallel>, #tpu.dimension_semantics<arbitrary>], iteration_bounds = array<i64: 1, 1>, scalar_prefetch = 0 : i64, scratch_operands = 1 : i64, tpu.core_type = #tpu.core_type<tc>, window_params = [{transform_indices = @transform_0, window_bounds = array<i64: 128, 128>}, {transform_indices = @transform_1, window_bounds = array<i64: 1, 128>}, {transform_indices = @transform_2, window_bounds = array<i64: 128, 128>}, {transform_indices = @transform_3, window_bounds = array<i64: 1, 128>}, {pipeline_mode = #tpu.pipeline_mode<synchronous>, transform_indices = @transform_4, window_bounds = array<i64: 128, 128>}, {transform_indices = @transform_5, window_bounds = array<i64: 128, 128>}]} {
    %c0_i32 = arith.constant 0 : i32
    %0 = arith.cmpi eq, %arg1, %c0_i32 : i32
    %1 = arith.extui %0 : i1 to i32
    %c0_i32_0 = arith.constant 0 : i32
    %2 = arith.cmpi ne, %1, %c0_i32_0 : i32
    scf.if %2 {
      %c0_9 = arith.constant 0 : index
      %c0_10 = arith.constant 0 : index
      %13 = vector.load %arg3[%c0_9, %c0_10] : memref<1x128xf32, #tpu.memory_space<vmem>>, vector<1x128xf32>
      %cst_11 = arith.constant 0.000000e+00 : f32
      %14 = vector.broadcast %cst_11 : f32 to vector<1x128xf32>
      %15 = arith.maximumf %13, %14 : vector<1x128xf32>
      %16 = math.sqrt %15 : vector<1x128xf32>
      %c0_12 = arith.constant 0 : index
      %c0_13 = arith.constant 0 : index
      %17 = vector.load %arg2[%c0_12, %c0_13] : memref<128x128xf32, #tpu.memory_space<vmem>>, vector<128x128xf32>
      %18 = vector.broadcast %16 : vector<1x128xf32> to vector<128x128xf32>
      %19 = arith.mulf %17, %18 : vector<128x128xf32>
      %c0_14 = arith.constant 0 : index
      %c0_15 = arith.constant 0 : index
      %20 = vector.load %arg6[%c0_14, %c0_15] : memref<128x128xf32, #tpu.memory_space<vmem>>, vector<128x128xf32>
      %cst_16 = arith.constant dense<0.000000e+00> : vector<128x128xf32>
      %21 = tpu.matmul %19, %20, %cst_16 {dimension_numbers = #tpu.dot_dimension_numbers<[0], [0], [1], [1], [0, 1, 1, 1], [], []>} : vector<128x128xf32>, vector<128x128xf32>, vector<128x128xf32> -> vector<128x128xf32>
      %c0_17 = arith.constant 0 : index
      %c0_18 = arith.constant 0 : index
      %22 = vector.load %arg8[%c0_17, %c0_18] : memref<128x128xf32, #tpu.memory_space<vmem>>, vector<128x128xf32>
      tpu.vector_store %arg8[%c0_17, %c0_18], %21 {strides = array<i32>} : memref<128x128xf32, #tpu.memory_space<vmem>>, vector<128x128xf32>,
    } else {
    }
    %c0 = arith.constant 0 : index
    %c0_1 = arith.constant 0 : index
    %3 = vector.load %arg5[%c0, %c0_1] : memref<1x128xf32, #tpu.memory_space<vmem>>, vector<1x128xf32>
    %cst = arith.constant 0.000000e+00 : f32
    %4 = vector.broadcast %cst : f32 to vector<1x128xf32>
    %5 = arith.maximumf %3, %4 : vector<1x128xf32>
    %6 = math.sqrt %5 : vector<1x128xf32>
    %c0_2 = arith.constant 0 : index
    %c0_3 = arith.constant 0 : index
    %7 = vector.load %arg4[%c0_2, %c0_3] : memref<128x128xf32, #tpu.memory_space<vmem>>, vector<128x128xf32>
    %8 = vector.broadcast %6 : vector<1x128xf32> to vector<128x128xf32>
    %9 = arith.mulf %7, %8 : vector<128x128xf32>
    %c0_4 = arith.constant 0 : index
    %c0_5 = arith.constant 0 : index
    %10 = vector.load %arg8[%c0_4, %c0_5] : memref<128x128xf32, #tpu.memory_space<vmem>>, vector<128x128xf32>
    %cst_6 = arith.constant dense<0.000000e+00> : vector<128x128xf32>
    %11 = tpu.matmul %10, %9, %cst_6 {dimension_numbers = #tpu.dot_dimension_numbers<[1], [0], [0], [1], [0, 0, 1, 1], [], []>} : vector<128x128xf32>, vector<128x128xf32>, vector<128x128xf32> -> vector<128x128xf32>
    %c0_7 = arith.constant 0 : index
    %c0_8 = arith.constant 0 : index
    %12 = vector.load %arg7[%c0_7, %c0_8] : memref<128x128xf32, #tpu.memory_space<vmem>>, vector<128x128xf32>
    tpu.vector_store %arg7[%c0_7, %c0_8], %11 {strides = array<i32>} : memref<128x128xf32, #tpu.memory_space<vmem>>, vector<128x128xf32>,
    return
  }
  func.func @transform_0(%arg0: i32, %arg1: i32) -> (i32, i32) {
    %c0_i32 = arith.constant 0 : i32
    %c0_i32_0 = arith.constant 0 : i32
    return %c0_i32, %arg0 : i32, i32
  }
  func.func @transform_1(%arg0: i32, %arg1: i32) -> (i32, i32) {
    %c0_i32 = arith.constant 0 : i32
    %c0_i32_0 = arith.constant 0 : i32
    return %c0_i32, %arg0 : i32, i32
  }
  func.func @transform_2(%arg0: i32, %arg1: i32) -> (i32, i32) {
    %c0_i32 = arith.constant 0 : i32
    %c0_i32_0 = arith.constant 0 : i32
    return %c0_i32, %arg1 : i32, i32
  }
  func.func @transform_3(%arg0: i32, %arg1: i32) -> (i32, i32) {
    %c0_i32 = arith.constant 0 : i32
    %c0_i32_0 = arith.constant 0 : i32
    return %c0_i32, %arg1 : i32, i32
  }
  func.func @transform_4(%arg0: i32, %arg1: i32) -> (i32, i32) {
    %c0_i32 = arith.constant 0 : i32
    %c0_i32_0 = arith.constant 0 : i32
    %c0_i32_1 = arith.constant 0 : i32
    return %c0_i32, %c0_i32_0 : i32, i32
  }
  func.func @transform_5(%arg0: i32, %arg1: i32) -> (i32, i32) {
    %c0_i32 = arith.constant 0 : i32
    return %arg0, %arg1 : i32, i32
  }
}

</mosaic_0001>

<bundles_post_ra>
// kernel: custom-call.2
= control target key start
LH: loop header
LB: loop body
LE: loop exit
PB: predicated region body
PF: predicated region fallthrough
CT: control target
= control target key end

     0   :  { %s8008_s0 = inlined_call_operand.vmem [shape: f32[64,64], index: 0, kind: input, shape index: {}]   ;;  %s8009_s1 = inlined_call_operand.vmem [shape: f32[64,64], index: 1, kind: input, shape index: {}]   ;;  %s8010_s2 = inlined_call_operand.vmem [shape: f32[64,64], index: 2, kind: input, shape index: {}]   ;;  %s8011_s3 = inlined_call_operand.vmem [shape: f32[64,64], index: 3, kind: input, shape index: {}]   ;;  %s8012_s4 = inlined_call_operand.vmem [shape: f32[64], index: 4, kind: output, shape index: {0}]   ;;  %s8013_s5 = inlined_call_operand.vmem [shape: f32[64], index: 5, kind: output, shape index: {1}]   ;;  %s8014_s6 = inlined_call_operand.vmem [shape: f32[64,64], index: 6, kind: output, shape index: {2}]   ;;  %s8015_s7 = inlined_call_operand.vmem [shape: f32[64,64], index: 7, kind: output, shape index: {3}]   ;;  %s8016_s8 = inlined_call_operand.vmem [shape: f32[64,64], index: 8, kind: output, shape index: {4}]   ;;  %s8017_s9 = inlined_call_operand.vmem [shape: f32[64,64], index: 9, kind: output, shape index: {5}]  }
   0x1   :  { %8025 = sst [smem:[#allocation30_spill]] %s8012_s4 }
   0x2   :  { %8026 = sst [smem:[#allocation31_spill]] %s8013_s5 }
   0x3   :  { %8027 = sst [smem:[#allocation32_spill]] %s8014_s6 }
   0x4   :  { %8028 = sst [smem:[#allocation33_spill]] %s8015_s7 }
   0x5   :  { %8029 = sst [smem:[#allocation34_spill]] %s8016_s8 }
   0x6   :  { %8030 = sst [smem:[#allocation35_spill]] %s8017_s9 }
   0x7   :  { %s20_s11 = scalar_lea.vmem %s8008_s0, 56 }
   0x8   :  { %p4235_p0 = scmp.gt.s32.totalorder %s8008_s0, %s20_s11 }
   0x9   :  { %s6162_s14 = smov (!%p4235_p0), [#allocation0]   ;;  %s6166_s17 = smov (!%p4235_p0), %s8008_s0  }
   0xa   :  { %4236 = sbr.rel (%p4235_p0) target bundleno = 23 (0x17), region = 835 }
   0xf LB: > { %v54_v0 = vld [vmem:[%s6168_s17] sm:$0xff]  ;;  %s56_s17 = scalar_lea.vmem %s6168_s17, 8   ;;  %s6168_s17 = sphi %s6166_s17, %s56_s17   ;;  %s6164_s14 = sphi %s6162_s14, %s57_s14  }
  0x10   : > { %55 = vst [vmem:[%s6164_s14] sm:$0xff] %v54_v0  ;;  %s57_s14 = scalar_lea.vmem %s6164_s14, 8   ;;  %p51_p1 = scmp.gt.s32.totalorder %s56_s17, %s20_s11 }
  0x12   :  { %53 = sbr.rel (!%p51_p1) target bundleno = 15 (0xf), region = 841 }
  0x17 PF:  { %s76_s20 = scalar_lea.vmem %s8009_s1, 56 }
  0x18   :  { %p4255_p2 = scmp.gt.s32.totalorder %s8009_s1, %s76_s20 }
  0x19   :  { %s6170_s0 = smov (!%p4255_p2), [#allocation1]   ;;  %s6174_s25 = smov (!%p4255_p2), %s8009_s1  }
  0x1a   :  { %4256 = sbr.rel (%p4255_p2) target bundleno = 39 (0x27), region = 857 }
  0x1f LB: > { %v110_v1 = vld [vmem:[%s6176_s25] sm:$0xff]  ;;  %s112_s25 = scalar_lea.vmem %s6176_s25, 8   ;;  %s6176_s25 = sphi %s6174_s25, %s112_s25   ;;  %s6172_s0 = sphi %s6170_s0, %s113_s0  }
  0x20   : > { %111 = vst [vmem:[%s6172_s0] sm:$0xff] %v110_v1  ;;  %s113_s0 = scalar_lea.vmem %s6172_s0, 8   ;;  %p107_p3 = scmp.gt.s32.totalorder %s112_s25, %s76_s20 }
  0x22   :  { %109 = sbr.rel (!%p107_p3) target bundleno = 31 (0x1f), region = 863 }
  0x27 PF:  { %s132_s28 = scalar_lea.vmem %s8010_s2, 56 }
  0x28   :  { %p4275_p4 = scmp.gt.s32.totalorder %s8010_s2, %s132_s28 }
  0x29   :  { %s6178_s1 = smov (!%p4275_p4), [#allocation2]   ;;  %s6182_s12 = smov (!%p4275_p4), %s8010_s2  }
  0x2a   :  { %4276 = sbr.rel (%p4275_p4) target bundleno = 55 (0x37), region = 879 }
  0x2f LB: > { %v166_v2 = vld [vmem:[%s6184_s12] sm:$0xff]  ;;  %s168_s12 = scalar_lea.vmem %s6184_s12, 8   ;;  %s6184_s12 = sphi %s6182_s12, %s168_s12   ;;  %s6180_s1 = sphi %s6178_s1, %s169_s1  }
  0x30   : > { %167 = vst [vmem:[%s6180_s1] sm:$0xff] %v166_v2  ;;  %s169_s1 = scalar_lea.vmem %s6180_s1, 8   ;;  %p163_p5 = scmp.gt.s32.totalorder %s168_s12, %s132_s28 }
  0x32   :  { %165 = sbr.rel (!%p163_p5) target bundleno = 47 (0x2f), region = 885 }
  0x37 PF:  { %s188_s15 = scalar_lea.vmem %s8011_s3, 56 }
  0x38   :  { %p4295_p6 = scmp.gt.s32.totalorder %s8011_s3, %s188_s15 }
  0x39   :  { %s6186_s2 = smov (!%p4295_p6), [#allocation3]   ;;  %s6190_s20 = smov (!%p4295_p6), %s8011_s3  }
  0x3a   :  { %4296 = sbr.rel (%p4295_p6) target bundleno = 71 (0x47), region = 901 }
  0x3f LB: > { %v222_v3 = vld [vmem:[%s6192_s20] sm:$0xff]  ;;  %s224_s20 = scalar_lea.vmem %s6192_s20, 8   ;;  %s6192_s20 = sphi %s6190_s20, %s224_s20   ;;  %s6188_s2 = sphi %s6186_s2, %s225_s2  }
  0x40   : > { %223 = vst [vmem:[%s6188_s2] sm:$0xff] %v222_v3  ;;  %s225_s2 = scalar_lea.vmem %s6188_s2, 8   ;;  %p219_p7 = scmp.gt.s32.totalorder %s224_s20, %s188_s15 }
  0x42   :  { %221 = sbr.rel (!%p219_p7) target bundleno = 63 (0x3f), region = 907 }
  0x47 PF:  { %s235_s21 = smov [#allocation12]  ;;  %v236_v4 = vld [vmem:[#allocation0] sm:$0xff]  ;;  %v240_v5 = vld [vmem:[#allocation0 + $0x8] sm:$0xff]  ;;  %v244_v6 = vld [vmem:[#allocation0 + $0x10] sm:$0xff]  ;;  %s266_s3 = smov [#allocation13]  ;;  %v6234_v36 = vmov 0.0   ;;  %v420_v37 = vlaneseq }
  0x48   :  { %237 = vst [vmem:[%s235_s21] sm:$0xff] %v236_v4  ;;  %v248_v7 = vld [vmem:[#allocation0 + $0x18] sm:$0xff]  ;;  %v252_v8 = vld [vmem:[#allocation0 + $0x20] sm:$0xff]  ;;  %v256_v9 = vld [vmem:[#allocation0 + $0x28] sm:$0xff]  ;;  %s297_s22 = smov [#allocation14]  ;;  %s328_s0 = smov [#allocation15] }
  0x49   :  { %4740 = vst [vmem:[%s235_s21 + $0x8] sm:$0xff] %v240_v5  ;;  %v260_v10 = vld [vmem:[#allocation0 + $0x30] sm:$0xff]  ;;  %v264_v11 = vld [vmem:[#allocation0 + $0x38] sm:$0xff]  ;;  %v267_v12 = vld [vmem:[#allocation1] sm:$0xff]  ;;  %v6323_v38 = vshrl.u32 %v420_v37, 7  ;;  %v6325_v39 = vand.u32 127, %v420_v37 }
  0x4a   :  { %4741 = vst [vmem:[%s235_s21 + $0x10] sm:$0xff] %v244_v6  ;;  %v271_v13 = vld [vmem:[#allocation1 + $0x8] sm:$0xff]  ;;  %v275_v14 = vld [vmem:[#allocation1 + $0x10] sm:$0xff]  ;;  %v279_v15 = vld [vmem:[#allocation1 + $0x18] sm:$0xff]  ;;  %s6328_s23 = smov [#allocation8]  ;;  %s6345_s24 = smov [#allocation11] }
  0x4b   :  { %4742 = vst [vmem:[%s235_s21 + $0x18] sm:$0xff] %v248_v7  ;;  %v283_v16 = vld [vmem:[#allocation1 + $0x20] sm:$0xff]  ;;  %v287_v17 = vld [vmem:[#allocation1 + $0x28] sm:$0xff]  ;;  %v291_v18 = vld [vmem:[#allocation1 + $0x30] sm:$0xff]  ;;  %v425_v38 = vmov %v6323_v38  ;;  %v422_v39 = vmov %v6325_v39  ;;  %s4313_s25 = smov [#allocation12]  ;;  %s6385_s26 = smov [#allocation13] }
  0x4c   :  { %4743 = vst [vmem:[%s235_s21 + $0x20] sm:$0xff] %v252_v8  ;;  %v295_v19 = vld [vmem:[#allocation1 + $0x38] sm:$0xff]  ;;  %v298_v20 = vld [vmem:[#allocation2] sm:$0xff]  ;;  %v302_v21 = vld [vmem:[#allocation2 + $0x8] sm:$0xff]  ;;  %v435_v40 = vadd.s32 8, %v425_v38  ;;  %v442_v41 = vadd.s32 16, %v425_v38  ;;  %vm429_vm0 = vcmp.eq.s32.totalorder %v425_v38, %v422_v39 }
  0x4d   :  { %4744 = vst [vmem:[%s235_s21 + $0x28] sm:$0xff] %v256_v9  ;;  %v306_v22 = vld [vmem:[#allocation2 + $0x10] sm:$0xff]  ;;  %v310_v23 = vld [vmem:[#allocation2 + $0x18] sm:$0xff]  ;;  %v314_v24 = vld [vmem:[#allocation2 + $0x20] sm:$0xff]  ;;  %v449_v42 = vadd.s32 24, %v425_v38  ;;  %v456_v44 = vadd.s32 32, %v425_v38 }
  0x4e   :  { %4745 = vst [vmem:[%s235_s21 + $0x30] sm:$0xff] %v260_v10  ;;  %v318_v25 = vld [vmem:[#allocation2 + $0x28] sm:$0xff]  ;;  %v322_v26 = vld [vmem:[#allocation2 + $0x30] sm:$0xff]  ;;  %v326_v27 = vld [vmem:[#allocation2 + $0x38] sm:$0xff]  ;;  %vm436_vm1 = vcmp.eq.s32.totalorder %v435_v40, %v422_v39  ;;  %v463_v46 = vadd.s32 40, %v425_v38  ;;  %vm443_vm2 = vcmp.eq.s32.totalorder %v442_v41, %v422_v39  ;;  %v470_v48 = vadd.s32 48, %v425_v38 }
  0x4f   :  { %4746 = vst [vmem:[%s235_s21 + $0x38] sm:$0xff] %v264_v11  ;;  %v329_v28 = vld [vmem:[#allocation3] sm:$0xff]  ;;  %v333_v29 = vld [vmem:[#allocation3 + $0x8] sm:$0xff]  ;;  %v337_v30 = vld [vmem:[#allocation3 + $0x10] sm:$0xff]  ;;  %vm450_vm3 = vcmp.eq.s32.totalorder %v449_v42, %v422_v39  ;;  %v477_v51 = vadd.s32 56, %v425_v38  ;;  %v487_v38 = vmov %v6323_v38  ;;  %vm457_vm4 = vcmp.eq.s32.totalorder %v456_v44, %v422_v39  ;;  %s6422_s27 = smov [#allocation14] }
  0x50   :  { %268 = vst [vmem:[%s266_s3] sm:$0xff] %v267_v12  ;;  %v341_v31 = vld [vmem:[#allocation3 + $0x18] sm:$0xff]  ;;  %v345_v32 = vld [vmem:[#allocation3 + $0x20] sm:$0xff]  ;;  %v349_v33 = vld [vmem:[#allocation3 + $0x28] sm:$0xff]  ;;  %vm464_vm5 = vcmp.eq.s32.totalorder %v463_v46, %v422_v39  ;;  %v484_v39 = vmov %v6325_v39  ;;  %vm471_vm6 = vcmp.eq.s32.totalorder %v470_v48, %v422_v39  ;;  %v497_v58 = vadd.s32 8, %v487_v38  ;;  %s6452_s28 = smov [#allocation15] }
  0x51   :  { %4747 = vst [vmem:[%s266_s3 + $0x8] sm:$0xff] %v271_v13  ;;  %v353_v34 = vld [vmem:[#allocation3 + $0x30] sm:$0xff]  ;;  %v357_v35 = vld [vmem:[#allocation3 + $0x38] sm:$0xff]  ;;  %v504_v59 = vadd.s32 16, %v487_v38  ;;  %vm478_vm7 = vcmp.eq.s32.totalorder %v477_v51, %v422_v39  ;;  %v511_v62 = vadd.s32 24, %v487_v38  ;;  %v518_v0 = vadd.s32 32, %v487_v38 }
  0x52   :  { %4748 = vst [vmem:[%s266_s3 + $0x10] sm:$0xff] %v275_v14  ;;  %vm491_vm8 = vcmp.eq.s32.totalorder %v487_v38, %v484_v39  ;;  %v525_v2 = vadd.s32 40, %v487_v38  ;;  %vm498_vm9 = vcmp.eq.s32.totalorder %v497_v58, %v484_v39  ;;  %v532_v4 = vadd.s32 48, %v487_v38 }
  0x53   :  { %4749 = vst [vmem:[%s266_s3 + $0x18] sm:$0xff] %v279_v15  ;;  %vm505_vm10 = vcmp.eq.s32.totalorder %v504_v59, %v484_v39  ;;  %vm512_vm11 = vcmp.eq.s32.totalorder %v511_v62, %v484_v39  ;;  %v539_v5 = vadd.s32 56, %v487_v38  ;;  %vm519_vm12 = vcmp.eq.s32.totalorder %v518_v0, %v484_v39 }
  0x54   :  { %4750 = vst [vmem:[%s266_s3 + $0x20] sm:$0xff] %v283_v16  ;;  %vm526_vm13 = vcmp.eq.s32.totalorder %v525_v2, %v484_v39  ;;  %vm533_vm14 = vcmp.eq.s32.totalorder %v532_v4, %v484_v39  ;;  %v4392_v38 = vmov %v6323_v38 }
  0x55   :  { %4751 = vst [vmem:[%s266_s3 + $0x28] sm:$0xff] %v287_v17  ;;  %vm540_vm15 = vcmp.eq.s32.totalorder %v539_v5, %v484_v39  ;;  %v4451_v38 = vmov %v6323_v38 }
  0x56   :  { %4752 = vst [vmem:[%s266_s3 + $0x30] sm:$0xff] %v291_v18  ;;  %v4801_v40 = vld [vmem:[%s4313_s25 + $0x30] sm:$0xff]  ;;  %v4802_v44 = vld [vmem:[%s4313_s25 + $0x38] sm:$0xff]  ;;  %v4312_v38 = vmov %v6323_v38 }
  0x57   :  { %4753 = vst [vmem:[%s266_s3 + $0x38] sm:$0xff] %v295_v19  ;;  %v4337_v0 = vadd.s32 16, %v4312_v38 }
  0x58   :  { %299 = vst [vmem:[%s297_s22] sm:$0xff] %v298_v20 }
  0x59   :  { %4754 = vst [vmem:[%s297_s22 + $0x8] sm:$0xff] %v302_v21 }
  0x5a   :  { %4755 = vst [vmem:[%s297_s22 + $0x10] sm:$0xff] %v306_v22  ;;  %v4319_v22 = vld [vmem:[%s4313_s25] sm:$0xff] }
  0x5b   :  { %4756 = vst [vmem:[%s297_s22 + $0x18] sm:$0xff] %v310_v23  ;;  %v4796_v23 = vld [vmem:[%s4313_s25 + $0x8] sm:$0xff] }
  0x5c   :  { %4757 = vst [vmem:[%s297_s22 + $0x20] sm:$0xff] %v314_v24  ;;  %v4797_v24 = vld [vmem:[%s4313_s25 + $0x10] sm:$0xff] }
  0x5d   :  { %4758 = vst [vmem:[%s297_s22 + $0x28] sm:$0xff] %v318_v25 }
  0x5e   :  { %4759 = vst [vmem:[%s297_s22 + $0x30] sm:$0xff] %v322_v26  ;;  %v4399_v48 = vld [vmem:[%s6385_s26] sm:$0xff] }
  0x5f   :  { %4760 = vst [vmem:[%s297_s22 + $0x38] sm:$0xff] %v326_v27  ;;  %v4806_v4 = vld [vmem:[%s6385_s26 + $0x20] sm:$0xff] }
  0x60   :  { %330 = vst [vmem:[%s328_s0] sm:$0xff] %v329_v28  ;;  %v4798_v28 = vld [vmem:[%s4313_s25 + $0x18] sm:$0xff] }
  0x61   :  { %4761 = vst [vmem:[%s328_s0 + $0x8] sm:$0xff] %v333_v29  ;;  %v4799_v29 = vld [vmem:[%s4313_s25 + $0x20] sm:$0xff] }
  0x62   :  { %4762 = vst [vmem:[%s328_s0 + $0x10] sm:$0xff] %v337_v30 }
  0x63   :  { %4763 = vst [vmem:[%s328_s0 + $0x18] sm:$0xff] %v341_v31 }
  0x64   :  { %4764 = vst [vmem:[%s328_s0 + $0x20] sm:$0xff] %v345_v32 }
  0x65   :  { %4765 = vst [vmem:[%s328_s0 + $0x28] sm:$0xff] %v349_v33 }
  0x66   :  { %4766 = vst [vmem:[%s328_s0 + $0x30] sm:$0xff] %v353_v34  ;;  %v4800_v34 = vld [vmem:[%s4313_s25 + $0x28] sm:$0xff] }
  0x67   :  { %4767 = vst [vmem:[%s328_s0 + $0x38] sm:$0xff] %v357_v35 }
  0x68   :  { %359 = vst [vmem:[#allocation8] sm:$0xff] %v6234_v36 }
  0x69   :  { %361 = vst [vmem:[#allocation8 + $0x8] sm:$0xff] %v6234_v36 }
  0x6a   :  { %363 = vst [vmem:[#allocation8 + $0x10] sm:$0xff] %v6234_v36 }
  0x6b   :  { %365 = vst [vmem:[#allocation8 + $0x18] sm:$0xff] %v6234_v36 }
  0x6c   :  { %367 = vst [vmem:[#allocation8 + $0x20] sm:$0xff] %v6234_v36 }
  0x6d   :  { %369 = vst [vmem:[#allocation8 + $0x28] sm:$0xff] %v6234_v36 }
  0x6e   :  { %371 = vst [vmem:[#allocation8 + $0x30] sm:$0xff] %v6234_v36 }
  0x6f   :  { %373 = vst [vmem:[#allocation8 + $0x38] sm:$0xff] %v6234_v36 }
  0x70   :  { %374 = vst [vmem:[#allocation9] sm:$0xff] %v6234_v36 }
  0x71   :  { %376 = vst [vmem:[#allocation9 + $0x8] sm:$0xff] %v6234_v36 }
  0x72   :  { %378 = vst [vmem:[#allocation9 + $0x10] sm:$0xff] %v6234_v36 }
  0x73   :  { %380 = vst [vmem:[#allocation9 + $0x18] sm:$0xff] %v6234_v36 }
  0x74   :  { %382 = vst [vmem:[#allocation9 + $0x20] sm:$0xff] %v6234_v36 }
  0x75   :  { %384 = vst [vmem:[#allocation9 + $0x28] sm:$0xff] %v6234_v36 }
  0x76   :  { %386 = vst [vmem:[#allocation9 + $0x30] sm:$0xff] %v6234_v36  ;;  %v426_v43 = vld [vmem:[%s6328_s23] sm:$0xff]  ;;  %v4768_v45 = vld [vmem:[%s6328_s23 + $0x8] sm:$0xff]  ;;  %v4770_v47 = vld [vmem:[%s6328_s23 + $0x10] sm:$0xff] }
  0x77   :  { %388 = vst [vmem:[#allocation9 + $0x38] sm:$0xff] %v6234_v36  ;;  %v430_v49 = vsel %vm429_vm0, 1.0, %v426_v43  ;;  %v4772_v50 = vld [vmem:[%s6328_s23 + $0x18] sm:$0xff]  ;;  %v437_v52 = vsel %vm436_vm1, 1.0, %v4768_v45  ;;  %v4774_v53 = vld [vmem:[%s6328_s23 + $0x20] sm:$0xff]  ;;  %v444_v54 = vsel %vm443_vm2, 1.0, %v4770_v47 }
  0x78   :  { %389 = vst [vmem:[#allocation10] sm:$0xff] %v6234_v36  ;;  %v4776_v55 = vld [vmem:[%s6328_s23 + $0x28] sm:$0xff]  ;;  %v451_v56 = vsel %vm450_vm3, 1.0, %v4772_v50  ;;  %v4778_v57 = vld [vmem:[%s6328_s23 + $0x30] sm:$0xff]  ;;  %v458_v60 = vsel %vm457_vm4, 1.0, %v4774_v53  ;;  %v4780_v61 = vld [vmem:[%s6328_s23 + $0x38] sm:$0xff] }
  0x79   :  { %391 = vst [vmem:[#allocation10 + $0x8] sm:$0xff] %v6234_v36  ;;  %v465_v63 = vsel %vm464_vm5, 1.0, %v4776_v55  ;;  %v472_v1 = vsel %vm471_vm6, 1.0, %v4778_v57  ;;  %v479_v3 = vsel %vm478_vm7, 1.0, %v4780_v61  ;;  %vm4317_vm0 = vcmp.lt.s32.totalorder %v6325_v39, 64  ;;  %v4804_v57 = vld [vmem:[%s6385_s26 + $0x10] sm:$0xff] }
  0x7a   :  { %393 = vst [vmem:[#allocation10 + $0x10] sm:$0xff] %v6234_v36  ;;  %v4389_v39 = vmov %v6325_v39  ;;  %v4320_v25 = vsel %vm4317_vm0, %v4319_v22, 0.0  ;;  %v4326_v26 = vsel %vm4317_vm0, %v4796_v23, 0.0  ;;  %v4335_v27 = vsel %vm4317_vm0, %v4797_v24, 0.0  ;;  %v4805_v61 = vld [vmem:[%s6385_s26 + $0x18] sm:$0xff] }
  0x7b   :  { %395 = vst [vmem:[#allocation10 + $0x18] sm:$0xff] %v6234_v36  ;;  %v4448_v39 = vmov %v6325_v39  ;;  %v4321_v30 = vmul.f32 %v4320_v25, %v4320_v25  ;;  %v4327_v31 = vmul.f32 %v4326_v26, %v4326_v26  ;;  %v4336_v32 = vmul.f32 %v4335_v27, %v4335_v27  ;;  %v4809_v27 = vld [vmem:[%s6385_s26 + $0x38] sm:$0xff] }
  0x7c   :  { %397 = vst [vmem:[#allocation10 + $0x20] sm:$0xff] %v6234_v36  ;;  %v4344_v33 = vsel %vm4317_vm0, %v4798_v28, 0.0  ;;  %v4353_v35 = vsel %vm4317_vm0, %v4799_v29, 0.0  ;;  %v4362_v41 = vsel %vm4317_vm0, %v4800_v34, 0.0  ;;  %v4371_v45 = vsel %vm4317_vm0, %v4801_v40, 0.0 }
  0x7d   :  { %399 = vst [vmem:[#allocation10 + $0x28] sm:$0xff] %v6234_v36  ;;  %v4345_v37 = vmul.f32 %v4344_v33, %v4344_v33  ;;  %v4354_v43 = vmul.f32 %v4353_v35, %v4353_v35  ;;  %v4363_v47 = vmul.f32 %v4362_v41, %v4362_v41  ;;  %v6391_v39 = vmov %v6325_v39  ;;  %v4458_v33 = vld [vmem:[%s6422_s27] sm:$0xff]  ;;  %v4810_v41 = vld [vmem:[%s6422_s27 + $0x8] sm:$0xff] }
  0x7e   :  { %401 = vst [vmem:[#allocation10 + $0x30] sm:$0xff] %v6234_v36  ;;  %v4372_v51 = vmul.f32 %v4371_v45, %v4371_v45  ;;  %v4400_v53 = vsel %vm4317_vm0, %v4399_v48, 0.0  ;;  %vm4322_vm1 = vcmp.eq.s32.totalorder %v4312_v38, %v6391_v39  ;;  %vm4338_vm3 = vcmp.eq.s32.totalorder %v4337_v0, %v6391_v39 }
  0x7f   :  { %403 = vst [vmem:[#allocation10 + $0x38] sm:$0xff] %v6234_v36  ;;  %v4323_v62 = vsel %vm4322_vm1, 0.0, %v4321_v30  ;;  %v4382_v24 = vadd.s32 56, %v4312_v38  ;;  %v4442_v35 = vsel %vm4317_vm0, %v4809_v27, 0.0  ;;  %v4465_v48 = vsel %vm4317_vm0, %v4810_v41, 0.0 }
  0x80   :  { %404 = vst [vmem:[#allocation11] sm:$0xff] %v6234_v36 }
  0x81   :  { %406 = vst [vmem:[#allocation11 + $0x8] sm:$0xff] %v6234_v36 }
  0x82   :  { %408 = vst [vmem:[#allocation11 + $0x10] sm:$0xff] %v6234_v36 }
  0x83   :  { %410 = vst [vmem:[#allocation11 + $0x18] sm:$0xff] %v6234_v36 }
  0x84   :  { %412 = vst [vmem:[#allocation11 + $0x20] sm:$0xff] %v6234_v36 }
  0x85   :  { %414 = vst [vmem:[#allocation11 + $0x28] sm:$0xff] %v6234_v36 }
  0x86   :  { %416 = vst [vmem:[#allocation11 + $0x30] sm:$0xff] %v6234_v36 }
  0x87   :  { %418 = vst [vmem:[#allocation11 + $0x38] sm:$0xff] %v6234_v36  ;;  %v4332_v36 = vadd.f32 %v4327_v31, %v4321_v30 }
  0x88   :  { %431 = vst [vmem:[%s6328_s23] sm:$0xff] %v430_v49  ;;  %v4380_v49 = vsel %vm4317_vm0, %v4802_v44, 0.0 }
  0x89   :  { %4769 = vst [vmem:[%s6328_s23 + $0x8] sm:$0xff] %v437_v52  ;;  %v4341_v42 = vadd.f32 %v4336_v32, %v4332_v36  ;;  %v4803_v52 = vld [vmem:[%s6385_s26 + $0x8] sm:$0xff] }
  0x8a   :  { %4771 = vst [vmem:[%s6328_s23 + $0x10] sm:$0xff] %v444_v54  ;;  %v4328_v54 = vadd.s32 8, %v4312_v38  ;;  %v4406_v58 = vsel %vm4317_vm0, %v4803_v52, 0.0  ;;  %v4812_v52 = vld [vmem:[%s6422_s27 + $0x18] sm:$0xff] }
  0x8b   :  { %4773 = vst [vmem:[%s6328_s23 + $0x18] sm:$0xff] %v451_v56  ;;  %v4350_v46 = vadd.f32 %v4345_v37, %v4341_v42  ;;  %v4381_v56 = vmul.f32 %v4380_v49, %v4380_v49 }
  0x8c   :  { %4775 = vst [vmem:[%s6328_s23 + $0x20] sm:$0xff] %v458_v60  ;;  %v6403_v60 = vmul.f32 %v4400_v53, %v4400_v53  ;;  %vm4329_vm2 = vcmp.eq.s32.totalorder %v4328_v54, %v6391_v39 }
  0x8d   :  { %4777 = vst [vmem:[%s6328_s23 + $0x28] sm:$0xff] %v465_v63  ;;  %v4359_v50 = vadd.f32 %v4354_v43, %v4350_v46  ;;  %v4412_v63 = vsel %vm4317_vm0, %v4804_v57, 0.0  ;;  %v4330_v5 = vsel %vm4329_vm2, 0.0, %v4327_v31  ;;  %v4443_v46 = vmul.f32 %v4442_v35, %v4442_v35  ;;  %v4813_v57 = vld [vmem:[%s6422_s27 + $0x20] sm:$0xff] }
  0x8e   :  { %4779 = vst [vmem:[%s6328_s23 + $0x30] sm:$0xff] %v472_v1  ;;  %v488_v6 = vld [vmem:[%s6345_s24] sm:$0xff]  ;;  %v4782_v7 = vld [vmem:[%s6345_s24 + $0x8] sm:$0xff]  ;;  %v4784_v8 = vld [vmem:[%s6345_s24 + $0x10] sm:$0xff]  ;;  %v4346_v1 = vadd.s32 24, %v4312_v38  ;;  %v4483_v0 = vsel %vm4317_vm0, %v4813_v57, 0.0 }
  0x8f   :  { %4781 = vst [vmem:[%s6328_s23 + $0x38] sm:$0xff] %v479_v3  ;;  %v492_v9 = vsel %vm491_vm8, 1.0, %v488_v6  ;;  %v499_v10 = vsel %vm498_vm9, 1.0, %v4782_v7  ;;  %v506_v11 = vsel %vm505_vm10, 1.0, %v4784_v8  ;;  %v4786_v12 = vld [vmem:[%s6345_s24 + $0x18] sm:$0xff]  ;;  %v4788_v13 = vld [vmem:[%s6345_s24 + $0x20] sm:$0xff]  ;;  %v4368_v55 = vadd.f32 %v4363_v47, %v4359_v50 }
  0x90   :  { %493 = vst [vmem:[%s6345_s24] sm:$0xff] %v492_v9  ;;  %v513_v14 = vsel %vm512_vm11, 1.0, %v4786_v12  ;;  %v4790_v15 = vld [vmem:[%s6345_s24 + $0x28] sm:$0xff]  ;;  %v4792_v16 = vld [vmem:[%s6345_s24 + $0x30] sm:$0xff]  ;;  %v520_v17 = vsel %vm519_vm12, 1.0, %v4788_v13  ;;  %v4794_v18 = vld [vmem:[%s6345_s24 + $0x38] sm:$0xff]  ;;  %v4407_v3 = vmul.f32 %v4406_v58, %v4406_v58  ;;  %v4355_v6 = vadd.s32 32, %v4312_v38 }
  0x91   :  { %4783 = vst [vmem:[%s6345_s24 + $0x8] sm:$0xff] %v499_v10  ;;  %v527_v19 = vsel %vm526_vm13, 1.0, %v4790_v15  ;;  %v534_v20 = vsel %vm533_vm14, 1.0, %v4792_v16  ;;  %v541_v21 = vsel %vm540_vm15, 1.0, %v4794_v18  ;;  %v4377_v59 = vadd.f32 %v4372_v51, %v4368_v55 }
  0x92   :  { %4785 = vst [vmem:[%s6345_s24 + $0x10] sm:$0xff] %v506_v11  ;;  %v4418_v7 = vsel %vm4317_vm0, %v4805_v61, 0.0  ;;  %v4331_v8 = vadd.f32 %v4330_v5, %v4323_v62  ;;  %vm4347_vm4 = vcmp.eq.s32.totalorder %v4346_v1, %v6391_v39  ;;  %v4413_v10 = vmul.f32 %v4412_v63, %v4412_v63  ;;  %v4807_v11 = vld [vmem:[%s6385_s26 + $0x28] sm:$0xff]  ;;  %v4815_v5 = vld [vmem:[%s6422_s27 + $0x30] sm:$0xff] }
  0x93   :  { %4787 = vst [vmem:[%s6345_s24 + $0x18] sm:$0xff] %v513_v14  ;;  %v4386_v2 = vadd.f32 %v4381_v56, %v4377_v59  ;;  %v4339_v12 = vsel %vm4338_vm3, 0.0, %v4336_v32  ;;  %v4348_v13 = vsel %vm4347_vm4, 0.0, %v4345_v37  ;;  %v4424_v14 = vsel %vm4317_vm0, %v4806_v4, 0.0  ;;  %v4814_v63 = vld [vmem:[%s6422_s27 + $0x28] sm:$0xff] }
  0x94   :  { %4789 = vst [vmem:[%s6345_s24 + $0x20] sm:$0xff] %v520_v17  ;;  %v4340_v15 = vadd.f32 %v4339_v12, %v4331_v8  ;;  %vm4356_vm5 = vcmp.eq.s32.totalorder %v4355_v6, %v6391_v39  ;;  %v4364_v16 = vadd.s32 40, %v4312_v38  ;;  %v4419_v18 = vmul.f32 %v4418_v7, %v4418_v7  ;;  %v4816_v8 = vld [vmem:[%s6422_s27 + $0x38] sm:$0xff] }
  0x95   :  { %4791 = vst [vmem:[%s6345_s24 + $0x28] sm:$0xff] %v527_v19  ;;  %v4403_v9 = vadd.f32 %v6403_v60, %v4386_v2  ;;  %v4808_v19 = vld [vmem:[%s6385_s26 + $0x30] sm:$0xff]  ;;  %v4430_v22 = vsel %vm4317_vm0, %v4807_v11, 0.0  ;;  %v4425_v26 = vmul.f32 %v4424_v14, %v4424_v14  ;;  %vm4383_vm8 = vcmp.eq.s32.totalorder %v4382_v24, %v6391_v39 }
  0x96   :  { %4793 = vst [vmem:[%s6345_s24 + $0x30] sm:$0xff] %v534_v20  ;;  %v4357_v20 = vsel %vm4356_vm5, 0.0, %v4354_v43  ;;  %v4349_v23 = vadd.f32 %v4348_v13, %v4340_v15  ;;  %vm4365_vm6 = vcmp.eq.s32.totalorder %v4364_v16, %v6391_v39  ;;  %v4436_v29 = vsel %vm4317_vm0, %v4808_v19, 0.0  ;;  %v4517_v13 = vld [vmem:[%s6452_s28] sm:$0xff] }
  0x97   :  { %4795 = vst [vmem:[%s6345_s24 + $0x38] sm:$0xff] %v541_v21  ;;  %v4409_v17 = vadd.f32 %v4407_v3, %v4403_v9  ;;  %v4373_v21 = vadd.s32 48, %v4312_v38  ;;  %v4366_v28 = vsel %vm4365_vm6, 0.0, %v4363_v47  ;;  %v4431_v32 = vmul.f32 %v4430_v22, %v4430_v22  ;;  %v4811_v47 = vld [vmem:[%s6422_s27 + $0x10] sm:$0xff] }
  0x98   :  { %v4358_v30 = vadd.f32 %v4357_v20, %v4349_v23  ;;  %v4437_v40 = vmul.f32 %v4436_v29, %v4436_v29  ;;  %v4384_v42 = vsel %vm4383_vm8, 0.0, %v4381_v56  ;;  %v4459_v43 = vsel %vm4317_vm0, %v4458_v33, 0.0  ;;  %v4818_v23 = vld [vmem:[%s6452_s28 + $0x10] sm:$0xff]  ;;  %v4820_v33 = vld [vmem:[%s6452_s28 + $0x20] sm:$0xff] }
  0x99   :  { %v4415_v25 = vadd.f32 %v4413_v10, %v4409_v17  ;;  %vm4374_vm7 = vcmp.eq.s32.totalorder %v4373_v21, %v6391_v39  ;;  %v4471_v53 = vsel %vm4317_vm0, %v4811_v47, 0.0  ;;  %v4466_v56 = vmul.f32 %v4465_v48, %v4465_v48 }
  0x9a   :  { %v4375_v34 = vsel %vm4374_vm7, 0.0, %v4372_v51  ;;  %v4367_v36 = vadd.f32 %v4366_v28, %v4358_v30  ;;  %v4460_v51 = vmul.f32 %v4459_v43, %v4459_v43  ;;  %v4477_v58 = vsel %vm4317_vm0, %v4812_v52, 0.0  ;;  %v4819_v28 = vld [vmem:[%s6452_s28 + $0x18] sm:$0xff] }
  0x9b   :  { %v4421_v31 = vadd.f32 %v4419_v18, %v4415_v25  ;;  %v4472_v62 = vmul.f32 %v4471_v53, %v4471_v53  ;;  %v4478_v4 = vmul.f32 %v4477_v58, %v4477_v58  ;;  %v4495_v9 = vsel %vm4317_vm0, %v4815_v5, 0.0 }
  0x9c   :  { %v4376_v44 = vadd.f32 %v4375_v34, %v4367_v36  ;;  %v4501_v14 = vsel %vm4317_vm0, %v4816_v8, 0.0  ;;  %v4496_v17 = vmul.f32 %v4495_v9, %v4495_v9  ;;  %v4518_v19 = vsel %vm4317_vm0, %v4517_v13, 0.0 }
  0x9d   :  { %v4427_v37 = vadd.f32 %v4425_v26, %v4421_v31  ;;  %v4502_v22 = vmul.f32 %v4501_v14, %v4501_v14  ;;  %v4519_v27 = vmul.f32 %v4518_v19, %v4518_v19  ;;  %v4535_v29 = vsel %vm4317_vm0, %v4818_v23, 0.0 }
  0x9e   :  { %v4385_v49 = vadd.f32 %v4384_v42, %v4376_v44  ;;  %v4544_v34 = vsel %vm4317_vm0, %v4819_v28, 0.0  ;;  %v4553_v41 = vsel %vm4317_vm0, %v4820_v33, 0.0  ;;  %v4510_v38 = vmov %v6323_v38 }
  0x9f   :  { %v4433_v45 = vadd.f32 %v4431_v32, %v4427_v37  ;;  %v4536_v37 = vmul.f32 %v4535_v29, %v4535_v29  ;;  %v4545_v44 = vmul.f32 %v4544_v34, %v4544_v34  ;;  %v4507_v39 = vmov %v6325_v39 }
  0xa0   :  { %v4402_v54 = vadd.f32 %v6403_v60, %v4385_v49  ;;  %v4489_v60 = vsel %vm4317_vm0, %v4814_v63, 0.0  ;;  %v4554_v49 = vmul.f32 %v4553_v41, %v4553_v41  ;;  %v4528_v53 = vadd.s32 8, %v4510_v38 }
  0xa1   :  { %v4439_v50 = vadd.f32 %v4437_v40, %v4433_v45  ;;  %v4490_v12 = vmul.f32 %v4489_v60, %v4489_v60  ;;  %v4822_v45 = vld [vmem:[%s6452_s28 + $0x30] sm:$0xff]  ;;  %vm4520_vm9 = vcmp.eq.s32.totalorder %v4510_v38, %v4507_v39  ;;  %v4537_v58 = vadd.s32 16, %v4510_v38 }
  0xa2   :  { %v4408_v59 = vadd.f32 %v4407_v3, %v4402_v54  ;;  %v4484_v3 = vmul.f32 %v4483_v0, %v4483_v0  ;;  %vm4529_vm10 = vcmp.eq.s32.totalorder %v4528_v53, %v4507_v39  ;;  %v4546_v63 = vadd.s32 24, %v4510_v38 }
  0xa3   :  { %v4445_v55 = vadd.f32 %v4443_v46, %v4439_v50  ;;  %v4823_v50 = vld [vmem:[%s6452_s28 + $0x38] sm:$0xff]  ;;  %vm4538_vm11 = vcmp.eq.s32.totalorder %v4537_v58, %v4507_v39  ;;  %v4555_v5 = vadd.s32 32, %v4510_v38  ;;  %v4582_v14 = vadd.s32 56, %v4510_v38 }
  0xa4   :  { %v4414_v1 = vadd.f32 %v4413_v10, %v4408_v59  ;;  %vm4547_vm12 = vcmp.eq.s32.totalorder %v4546_v63, %v4507_v39  ;;  %v4539_v9 = vsel %vm4538_vm11, 0.0, %v4536_v37 }
  0xa5   :  { %v4462_v61 = vadd.f32 %v4460_v51, %v4445_v55  ;;  %vm4556_vm13 = vcmp.eq.s32.totalorder %v4555_v5, %v4507_v39  ;;  %vm4583_vm1 = vcmp.eq.s32.totalorder %v4582_v14, %v4507_v39 }
  0xa6   :  { %v4420_v6 = vadd.f32 %v4419_v18, %v4414_v1  ;;  %v4817_v18 = vld [vmem:[%s6452_s28 + $0x8] sm:$0xff] }
  0xa7   :  { %v4468_v2 = vadd.f32 %v4466_v56, %v4462_v61  ;;  %v4526_v24 = vsel %vm4317_vm0, %v4817_v18, 0.0 }
  0xa8   :  { %v4426_v11 = vadd.f32 %v4425_v26, %v4420_v6 }
  0xa9   :  { %v4474_v7 = vadd.f32 %v4472_v62, %v4468_v2  ;;  %v4521_v2 = vsel %vm4520_vm9, 0.0, %v4519_v27 }
  0xaa   :  { %v4432_v15 = vadd.f32 %v4431_v32, %v4426_v11  ;;  %v4527_v32 = vmul.f32 %v4526_v24, %v4526_v24 }
  0xab   :  { %v4480_v10 = vadd.f32 %v4478_v4, %v4474_v7 }
  0xac   :  { %v4438_v20 = vadd.f32 %v4437_v40, %v4432_v15  ;;  %v4821_v40 = vld [vmem:[%s6452_s28 + $0x28] sm:$0xff]  ;;  %v4530_v6 = vsel %vm4529_vm10, 0.0, %v4527_v32  ;;  %v4557_v15 = vsel %vm4556_vm13, 0.0, %v4554_v49 }
  0xad   :  { %v4486_v16 = vadd.f32 %v4484_v3, %v4480_v10  ;;  %v4573_v10 = vadd.s32 48, %v4510_v38 }
  0xae   :  { %v4444_v25 = vadd.f32 %v4443_v46, %v4438_v20  ;;  %v4562_v46 = vsel %vm4317_vm0, %v4821_v40, 0.0 }
  0xaf   :  { %v4492_v21 = vadd.f32 %v4490_v12, %v4486_v16  ;;  %v4563_v55 = vmul.f32 %v4562_v46, %v4562_v46  ;;  %vm4574_vm15 = vcmp.eq.s32.totalorder %v4573_v10, %v4507_v39 }
  0xb0   :  { %v4461_v30 = vadd.f32 %v4460_v51, %v4444_v25  ;;  %v4571_v51 = vsel %vm4317_vm0, %v4822_v45, 0.0 }
  0xb1   :  { %v4498_v26 = vadd.f32 %v4496_v17, %v4492_v21  ;;  %v4572_v61 = vmul.f32 %v4571_v51, %v4571_v51 }
  0xb2   :  { %v4467_v35 = vadd.f32 %v4466_v56, %v4461_v30  ;;  %v4580_v56 = vsel %vm4317_vm0, %v4823_v50, 0.0 }
  0xb3   :  { %v4504_v31 = vadd.f32 %v4502_v22, %v4498_v26  ;;  %v4581_v1 = vmul.f32 %v4580_v56, %v4580_v56  ;;  %v4575_v19 = vsel %vm4574_vm15, 0.0, %v4572_v61 }
  0xb4   :  { %v4473_v42 = vadd.f32 %v4472_v62, %v4467_v35 }
  0xb5   :  { %v4523_v36 = vadd.f32 %v4519_v27, %v4504_v31  ;;  %v4584_v21 = vsel %vm4583_vm1, 0.0, %v4581_v1 }
  0xb6   :  { %v4479_v47 = vadd.f32 %v4478_v4, %v4473_v42 }
  0xb7   :  { %v4532_v43 = vadd.f32 %v4527_v32, %v4523_v36 }
  0xb8   :  { %v4485_v52 = vadd.f32 %v4484_v3, %v4479_v47  ;;  %v4564_v3 = vadd.s32 40, %v4510_v38 }
  0xb9   :  { %v4541_v48 = vadd.f32 %v4536_v37, %v4532_v43 }
  0xba   :  { %v4491_v57 = vadd.f32 %v4490_v12, %v4485_v52  ;;  %v4548_v12 = vsel %vm4547_vm12, 0.0, %v4545_v44  ;;  %vm4565_vm14 = vcmp.eq.s32.totalorder %v4564_v3, %v4507_v39 }
  0xbb   :  { %v4550_v54 = vadd.f32 %v4545_v44, %v4541_v48 }
  0xbc   :  { %v4497_v62 = vadd.f32 %v4496_v17, %v4491_v57  ;;  %v4566_v17 = vsel %vm4565_vm14, 0.0, %v4563_v55 }
  0xbd   :  { %v4559_v59 = vadd.f32 %v4554_v49, %v4550_v54 }
  0xbe   :  { %v4503_v4 = vadd.f32 %v4502_v22, %v4497_v62 }
  0xbf   :  { %v4568_v0 = vadd.f32 %v4563_v55, %v4559_v59 }
  0xc0   :  { %v4522_v7 = vadd.f32 %v4521_v2, %v4503_v4 }
  0xc1   :  { %v4577_v60 = vadd.f32 %v4572_v61, %v4568_v0 }
  0xc2   :  { %v4531_v11 = vadd.f32 %v4530_v6, %v4522_v7 }
  0xc3   :  { %v4586_v8 = vadd.f32 %v4581_v1, %v4577_v60 }
  0xc4   :  { %v4540_v13 = vadd.f32 %v4539_v9, %v4531_v11 }
  0xc5   :  { %4587 = vadd.xlane.f32.xlu0 %v4586_v8 }
  0xc6   :  { %v4549_v16 = vadd.f32 %v4548_v12, %v4540_v13 }
  0xc8   :  { %v4558_v18 = vadd.f32 %v4557_v15, %v4549_v16 }
  0xca   :  { %v4567_v20 = vadd.f32 %v4566_v17, %v4558_v18 }
  0xcc   :  { %v4576_v22 = vadd.f32 %v4575_v19, %v4567_v20 }
  0xce   :  { %v4585_v23 = vadd.f32 %v4584_v21, %v4576_v22 }
  0xd0   :  { %4595 = vadd.xlane.f32.xlu0 %v4585_v23 }
 0x138   :  { %v4588_v24 = vpop.xlane.xlu0 %4587 }
 0x139   :  { %v4589_v25 = vrot.slane %v4588_v24, 4 }
 0x13b   :  { %v4590_v26 = vadd.f32 %v4589_v25, %v4588_v24 }
 0x13d   :  { %v4591_v27 = vrot.slane %v4590_v26, 2 }
 0x13f   :  { %v4592_v31 = vadd.f32 %v4591_v27, %v4590_v26 }
 0x141   :  { %v4593_v34 = vrot.slane %v4592_v31, 1 }
 0x143   :  { %v4596_v28 = vpop.xlane.xlu0 %4595  ;;  %v4594_v37 = vadd.f32 %v4593_v34, %v4592_v31 }
 0x144   :  { %v4597_v29 = vrot.slane %v4596_v28, 4 }
 0x146   :  { %v4598_v30 = vadd.f32 %v4597_v29, %v4596_v28 }
 0x148   :  { %v4599_v32 = vrot.slane %v4598_v30, 2 }
 0x14a   :  { %v4600_v33 = vadd.f32 %v4599_v32, %v4598_v30 }
 0x14c   :  { %v4601_v35 = vrot.slane %v4600_v33, 1 }
 0x14e   :  { %v4602_v36 = vadd.f32 %v4601_v35, %v4600_v33 }
 0x150   :  { %5443 = vpush %v4602_v36 }
 0x151   :  { %5445 = vpush %v4594_v37 }
 0x181   :  { %s5444_s29 = spop %5443 }
 0x182   :  { %s5446_s30 = spop %5445 }
 0x183   :  { %s4605_s1 = smul.f32 1e-10, %s5446_s30 }
 0x185   :  { %p4606_p8 = scmp.le.f32.partialorder %s5444_s29, %s4605_s1 }
 0x186   :  { %s6485_s10 = smov (!%p4606_p8), 0  }
 0x187   :  { %4609 = sbr.rel (%p4606_p8) target bundleno = 1488 (0x5d0), region = 923 }
 0x18c LB: > { %8031 = sst [smem:[#allocation25_spill]] %s6196_s10  ;;  %s6490_s11 = smov 0   ;;  %s6196_s10 = sphi %s6485_s10, %s8043_s10  }
 0x18d LB: >> { %8032 = sst [smem:[#allocation26_spill]] %s6200_s11  ;;  %s6200_s11 = sphi %s6490_s11, %s870_s11  }
 0x18e   : >> { %s6495_s12 = smov [#allocation12]  ;;  %v875_v39 = vmov %v6325_v39  ;;  %v878_v38 = vmov %v6323_v38  ;;  %s6508_s13 = smov [#allocation13] }
 0x18f   : >> { %v6500_v39 = vmov %v6325_v39  ;;  %v940_v38 = vmov %v6323_v38  ;;  %v879_v40 = vld [vmem:[%s6495_s12] sm:$0xff]  ;;  %vm882_vm2 = vcmp.eq.s32.totalorder %v878_v38, %v875_v39  ;;  %v4824_v41 = vld [vmem:[%s6495_s12 + $0x8] sm:$0xff]  ;;  %v887_v42 = vadd.s32 8, %v878_v38  ;;  %v4825_v46 = vld [vmem:[%s6495_s12 + $0x10] sm:$0xff]  ;;  %s6522_s14 = smov [#allocation15]  ;;  %s872_s15 = smov [#allocation16] }
 0x190   : >> { %v893_v43 = vadd.s32 16, %v878_v38  ;;  %v899_v44 = vadd.s32 24, %v878_v38  ;;  %v883_v45 = vsel %vm882_vm2, %v879_v40, 0.0  ;;  %v905_v47 = vadd.s32 32, %v878_v38  ;;  %v4826_v49 = vld [vmem:[%s6495_s12 + $0x18] sm:$0xff]  ;;  %v4827_v52 = vld [vmem:[%s6495_s12 + $0x20] sm:$0xff] }
 0x191   : >> { %v911_v48 = vadd.s32 40, %v878_v38  ;;  %vm944_vm3 = vcmp.eq.s32.totalorder %v940_v38, %v6500_v39  ;;  %vm888_vm4 = vcmp.eq.s32.totalorder %v887_v42, %v875_v39  ;;  %v917_v50 = vadd.s32 48, %v878_v38  ;;  %v941_v54 = vld [vmem:[%s6508_s13] sm:$0xff]  ;;  %v4828_v56 = vld [vmem:[%s6495_s12 + $0x28] sm:$0xff]  ;;  %v4829_v62 = vld [vmem:[%s6495_s12 + $0x30] sm:$0xff]  ;;  %s934_s16 = smov [#allocation17] }
 0x192   : >> { %vm894_vm5 = vcmp.eq.s32.totalorder %v893_v43, %v875_v39  ;;  %vm900_vm6 = vcmp.eq.s32.totalorder %v899_v44, %v875_v39  ;;  %v889_v51 = vsel %vm888_vm4, %v4824_v41, %v883_v45  ;;  %vm906_vm7 = vcmp.eq.s32.totalorder %v905_v47, %v875_v39  ;;  %v4831_v58 = vld [vmem:[%s6508_s13 + $0x8] sm:$0xff]  ;;  %v4832_v63 = vld [vmem:[%s6508_s13 + $0x10] sm:$0xff]  ;;  %v4830_v4 = vld [vmem:[%s6495_s12 + $0x38] sm:$0xff]  ;;  %s1061_s17 = smov [#allocation17]  ;;  %s996_s2 = smov [#allocation18] }
 0x193   : >> { %vm912_vm8 = vcmp.eq.s32.totalorder %v911_v48, %v875_v39  ;;  %v923_v53 = vadd.s32 56, %v878_v38  ;;  %v895_v55 = vsel %vm894_vm5, %v4825_v46, %v889_v51  ;;  %vm918_vm9 = vcmp.eq.s32.totalorder %v917_v50, %v875_v39  ;;  %v4833_v5 = vld [vmem:[%s6508_s13 + $0x18] sm:$0xff]  ;;  %v4834_v8 = vld [vmem:[%s6508_s13 + $0x20] sm:$0xff]  ;;  %v4835_v10 = vld [vmem:[%s6508_s13 + $0x28] sm:$0xff]  ;;  %s1059_s18 = smov [#allocation16]  ;;  %s1063_s19 = smov [#allocation18] }
 0x194   : >> { %v945_v57 = vsel %vm944_vm3, %v941_v54, 0.0  ;;  %v949_v59 = vadd.s32 8, %v940_v38  ;;  %v901_v61 = vsel %vm900_vm6, %v4826_v49, %v895_v55  ;;  %v955_v0 = vadd.s32 16, %v940_v38  ;;  %v4836_v14 = vld [vmem:[%s6508_s13 + $0x30] sm:$0xff]  ;;  %v1003_v17 = vld [vmem:[%s6522_s14] sm:$0xff]  ;;  %v4837_v20 = vld [vmem:[%s6508_s13 + $0x38] sm:$0xff] }
 0x195   : >> { %vm924_vm10 = vcmp.eq.s32.totalorder %v923_v53, %v875_v39  ;;  %v961_v1 = vadd.s32 24, %v940_v38  ;;  %v907_v2 = vsel %vm906_vm7, %v4827_v52, %v901_v61  ;;  %v967_v60 = vadd.s32 32, %v940_v38  ;;  %v4838_v25 = vld [vmem:[%s6522_s14 + $0x8] sm:$0xff]  ;;  %v4839_v28 = vld [vmem:[%s6522_s14 + $0x10] sm:$0xff]  ;;  %v4840_v34 = vld [vmem:[%s6522_s14 + $0x18] sm:$0xff]  ;;  %s1138_s20 = smov [#allocation19] }
 0x196   : >> { %vm950_vm11 = vcmp.eq.s32.totalorder %v949_v59, %v6500_v39  ;;  %v973_v6 = vadd.s32 40, %v940_v38  ;;  %v913_v7 = vsel %vm912_vm8, %v4828_v56, %v907_v2  ;;  %vm956_vm12 = vcmp.eq.s32.totalorder %v955_v0, %v6500_v39  ;;  %v4841_v37 = vld [vmem:[%s6522_s14 + $0x20] sm:$0xff]  ;;  %v4842_v43 = vld [vmem:[%s6522_s14 + $0x28] sm:$0xff]  ;;  %v4843_v45 = vld [vmem:[%s6522_s14 + $0x30] sm:$0xff]  ;;  %s1140_s21 = smov [#allocation20]  ;;  %s1057_s3 = smov [#allocation21] }
 0x197   : >> { %v951_v3 = vsel %vm950_vm11, %v4831_v58, %v945_v57  ;;  %vm962_vm13 = vcmp.eq.s32.totalorder %v961_v1, %v6500_v39  ;;  %v919_v9 = vsel %vm918_vm9, %v4829_v62, %v913_v7  ;;  %vm968_vm14 = vcmp.eq.s32.totalorder %v967_v60, %v6500_v39  ;;  %v4844_v51 = vld [vmem:[%s6522_s14 + $0x38] sm:$0xff]  ;;  %s1058_s22 = smov [#allocation22]  ;;  %s1142_s3 = smov %s1057_s3 }
 0x198   : >> { %v957_v11 = vsel %vm956_vm12, %v4832_v63, %v951_v3  ;;  %vm974_vm15 = vcmp.eq.s32.totalorder %v973_v6, %v6500_v39  ;;  %v925_v12 = vsel %vm924_vm10, %v4830_v4, %v919_v9  ;;  %v979_v15 = vadd.s32 48, %v940_v38  ;;  %s1144_s22 = smov %s1058_s22  ;;  %s1177_s0 = smov [#allocation21] }
 0x199   : >> { %v963_v13 = vsel %vm962_vm13, %v4833_v5, %v957_v11  ;;  %v985_v16 = vadd.s32 56, %v940_v38  ;;  %v926_v18 = vrot.slane %v925_v12, 4  ;;  %v999_v39 = vmov %v6325_v39  ;;  %s1146_s23 = smov [#allocation21]  ;;  %s1161_s24 = smov [#allocation21] }
 0x19a   : >> { %v969_v19 = vsel %vm968_vm14, %v4834_v8, %v963_v13  ;;  %v1002_v38 = vmov %v6323_v38  ;;  %vm980_vm1 = vcmp.eq.s32.totalorder %v979_v15, %v6500_v39  ;;  %s1209_s25 = smov [#allocation21]  ;;  %s1193_s26 = smov [#allocation21] }
 0x19b   : >> { %v975_v21 = vsel %vm974_vm15, %v4835_v10, %v969_v19  ;;  %vm986_vm2 = vcmp.eq.s32.totalorder %v985_v16, %v6500_v39  ;;  %vm1006_vm3 = vcmp.eq.s32.totalorder %v1002_v38, %v999_v39  ;;  %v927_v22 = vadd.f32 %v926_v18, %v925_v12  ;;  %s1225_s27 = smov [#allocation21]  ;;  %s1241_s28 = smov [#allocation21] }
 0x19c   : >> { %v981_v23 = vsel %vm980_vm1, %v4836_v14, %v975_v21  ;;  %v1007_v24 = vsel %vm1006_vm3, %v1003_v17, 0.0  ;;  %v1011_v26 = vadd.s32 8, %v1002_v38  ;;  %v1017_v29 = vadd.s32 16, %v1002_v38  ;;  %s1304_s29 = smov [#allocation22]  ;;  %s1288_s30 = smov [#allocation22] }
 0x19d   : >> { %v987_v27 = vsel %vm986_vm2, %v4837_v20, %v981_v23  ;;  %v1023_v30 = vadd.s32 24, %v1002_v38  ;;  %v1029_v31 = vadd.s32 32, %v1002_v38  ;;  %v928_v32 = vrot.slane %v927_v22, 2  ;;  %s1352_s1 = smov [#allocation22]  ;;  %s1273_s12 = smov [#allocation22] }
 0x19e   : >> { %v988_v33 = vrot.slane %v987_v27, 4  ;;  %vm1012_vm4 = vcmp.eq.s32.totalorder %v1011_v26, %v999_v39  ;;  %v1035_v35 = vadd.s32 40, %v1002_v38  ;;  %vm1018_vm5 = vcmp.eq.s32.totalorder %v1017_v29, %v999_v39  ;;  %s1320_s13 = smov [#allocation22]  ;;  %s1257_s14 = smov [#allocation21] }
 0x19f   : >> { %v1013_v36 = vsel %vm1012_vm4, %v4838_v25, %v1007_v24  ;;  %vm1024_vm6 = vcmp.eq.s32.totalorder %v1023_v30, %v999_v39  ;;  %vm1030_vm7 = vcmp.eq.s32.totalorder %v1029_v31, %v999_v39  ;;  %v929_v40 = vadd.f32 %v928_v32, %v927_v22  ;;  %s7371_s9 = smov [#allocation15]  ;;  %s7383_s8 = smov [#allocation14] }
 0x1a0   : >> { %v989_v41 = vadd.f32 %v988_v33, %v987_v27  ;;  %v1019_v42 = vsel %vm1018_vm5, %v4839_v28, %v1013_v36  ;;  %vm1036_vm8 = vcmp.eq.s32.totalorder %v1035_v35, %v999_v39  ;;  %v1041_v46 = vadd.s32 48, %v1002_v38  ;;  %8033 = sst [smem:[#allocation27_spill]] %s7383_s8  ;;  %s7385_s7 = smov [#allocation15] }
 0x1a1   : >> { %v1025_v44 = vsel %vm1024_vm6, %v4840_v34, %v1019_v42  ;;  %v1047_v47 = vadd.s32 56, %v1002_v38  ;;  %v930_v48 = vrot.slane %v929_v40, 1  ;;  %v1184_v38 = vmov %v6323_v38  ;;  %s7399_s6 = smov [#allocation14]  ;;  %s7401_s5 = smov [#allocation15] }
 0x1a2   : >> { %v990_v49 = vrot.slane %v989_v41, 2  ;;  %v1031_v50 = vsel %vm1030_vm7, %v4841_v37, %v1025_v44  ;;  %vm1042_vm9 = vcmp.eq.s32.totalorder %v1041_v46, %v999_v39  ;;  %v1168_v38 = vmov %v6323_v38  ;;  %8034 = sst [smem:[#allocation28_spill]] %s7399_s6  ;;  %s8035_s4 = smov 127  }
 0x1a3   : >> { %v1037_v52 = vsel %vm1036_vm8, %v4842_v43, %v1031_v50  ;;  %vm1048_vm10 = vcmp.eq.s32.totalorder %v1047_v47, %v999_v39  ;;  %v931_v53 = vadd.f32 %v930_v48, %v929_v40  ;;  %v1181_v39 = vmov %v6325_v39  ;;  %s7411_s10 = smov [#allocation14]  ;;  %s7413_s11 = smov [#allocation15] }
 0x1a4   : >> { %v991_v54 = vadd.f32 %v990_v49, %v989_v41  ;;  %v1043_v55 = vsel %vm1042_vm9, %v4843_v45, %v1037_v52  ;;  %v1150_v39 = vmov %v6325_v39 }
 0x1a5   : >> { %v1049_v56 = vsel %vm1048_vm10, %v4844_v51, %v1043_v55  ;;  %932 = vst [vmem:[%s872_s15] sm:$0x1] %v931_v53  ;;  %v1165_v39 = vmov %v6325_v39  ;;  %s1336_s15 = smov [#allocation22] }
 0x1a6   : >> { %v992_v57 = vrot.slane %v991_v54, 1  ;;  %v1050_v58 = vrot.slane %v1049_v56, 4 }
 0x1a8   : >> { %v993_v59 = vadd.f32 %v992_v57, %v991_v54  ;;  %v1051_v61 = vadd.f32 %v1050_v58, %v1049_v56 }
 0x1aa   : >> { %994 = vst [vmem:[%s934_s16] sm:$0x1] %v993_v59  ;;  %v1052_v62 = vrot.slane %v1051_v61, 2  ;;  %s1368_s16 = smov [#allocation22] }
 0x1ac   : >> { %v1053_v63 = vadd.f32 %v1052_v62, %v1051_v61  ;;  %v1060_v8 = vld [vmem:[%s1059_s18] sm:$0xff]  ;;  %s1174_s18 = smov [#allocation23] }
 0x1ad   : >> { %v1114_v32 = vand.u32 2147483647, %v1060_v8 }
 0x1ae   : >> { %v1054_v0 = vrot.slane %v1053_v63, 1 }
 0x1b0   : >> { %v1055_v1 = vadd.f32 %v1054_v0, %v1053_v63  ;;  %v1185_v0 = vadd.s32 16, %v1184_v38  ;;  %v1153_v38 = vmov %v6323_v38 }
 0x1b1   : >> { %v6547_v2 = vld [vmem:[%s1061_s17] sm:$0xff]  ;;  %s1384_s17 = smov [#allocation22] }
 0x1b2   : >> { %1056 = vst [vmem:[%s996_s2] sm:$0x1] %v1055_v1  ;;  %v1066_v4 = vmul.f32 2.0, %v6547_v2  ;;  %v1115_v42 = vand.u32 2147483647, %v6547_v2  ;;  %v1169_v1 = vadd.s32 8, %v1168_v38  ;;  %v1216_v38 = vmov %v6323_v38  ;;  %s1159_s2 = smov [#allocation23] }
 0x1b3   : >> { %v1200_v38 = vmov %v6323_v38 }
 0x1b4   : >> { %5922 = vrcp.f32 %v1066_v4  ;;  %v1078_v6 = vand.u32 2147483648, %v1066_v4  ;;  %vm1072_vm11 = vweird.f32 %v1066_v4  ;;  %v1076_v3 = vand.u32 2147483647, %v1066_v4 }
 0x1b6   : >> { %v1079_v10 = vor.u32 1.1754944e-38, %v1078_v6  ;;  %vm1077_vm14 = vcmp.eq.f32.partialorder %v1076_v3, 8.507059e+37 }
 0x1b9   : >> { %v1064_v9 = vld [vmem:[%s1063_s19] sm:$0xff]  ;;  %s1190_s19 = smov [#allocation23] }
 0x1ba   : >> { %v5923_v5 = vpop.eup %5922  ;;  %v1065_v12 = vsub.f32 %v1064_v9, %v1060_v8  ;;  %v1116_v33 = vand.u32 2147483647, %v1064_v9 }
 0x1bb   : >> { %v1068_v60 = vmul.f32 %v5923_v5, %v1066_v4  ;;  %vm1073_vm12 = vweird.f32 %v5923_v5 }
 0x1bc   : >> { %vm1074_vm13 = vmor %vm1072_vm11, %vm1073_vm12  ;;  %v1117_v35 = vmin.f32 %v1114_v32, %v1116_v33  ;;  %vm1186_vm11 = vcmp.eq.s32.totalorder %v1185_v0, %v1181_v39  ;;  %vm1155_vm12 = vcmp.eq.s32.totalorder %v1153_v38, %v1150_v39  ;;  %v1232_v38 = vmov %v6323_v38 }
 0x1bd   : >> { %v1069_v7 = vsub.f32 1.0, %v1068_v60  ;;  %v1201_v60 = vadd.s32 24, %v1200_v38 }
 0x1be   : >> { %v1118_v43 = vmul.f32 1.1920929e-08, %v1117_v35 }
 0x1bf   : >> { %v1070_v11 = vmul.f32 %v5923_v5, %v1069_v7 }
 0x1c0   : >> { %vm1119_vm7 = vcmp.le.f32.partialorder %v1115_v42, %v1118_v43 }
 0x1c1   : >> { %v1071_v13 = vadd.f32 %v5923_v5, %v1070_v11 }
 0x1c3   : >> { %v1075_v14 = vsel %vm1074_vm13, %v5923_v5, %v1071_v13  ;;  %vm1170_vm13 = vcmp.eq.s32.totalorder %v1169_v1, %v1165_v39  ;;  %v1213_v39 = vmov %v6325_v39  ;;  %v1217_v5 = vadd.s32 32, %v1216_v38 }
 0x1c4   : >> { %v1080_v15 = vsel %vm1077_vm14, %v1079_v10, %v1075_v14  ;;  %v1197_v39 = vmov %v6325_v39 }
 0x1c5   : >> { %v1081_v16 = vmul.f32 %v1080_v15, %v1065_v12  ;;  %v1229_v39 = vmov %v6325_v39  ;;  %vm1218_vm14 = vcmp.eq.s32.totalorder %v1217_v5, %v1213_v39 }
 0x1c7   : >> { %v1083_v17 = vmul.f32 %v1081_v16, %v1081_v16  ;;  %vm1082_vm2 = vcmp.ge.f32.partialorder %v1081_v16, 0.0 }
 0x1c9   : >> { %v1084_v18 = vadd.f32 1.0, %v1083_v17 }
 0x1cb   : >> { %5924 = vrsqrt.f32 %v1084_v18  ;;  %vm1092_vm15 = vcmp.eq.f32.partialorder %v1084_v18, inf  ;;  %v1095_v25 = vand.u32 2147483648, %v1084_v18  ;;  %vm1094_vm1 = vcmp.eq.f32.partialorder %v1084_v18, 0.0 }
 0x1d1   : >> { %v5925_v19 = vpop.eup %5924 }
 0x1d2   : >> { %v1086_v20 = vmul.f32 %v5925_v19, %v1084_v18 }
 0x1d4   : >> { %v1087_v21 = vmul.f32 %v5925_v19, %v1086_v20 }
 0x1d6   : >> { %v1088_v22 = vmul.f32 0.5, %v1087_v21 }
 0x1d8   : >> { %v1089_v23 = vsub.f32 1.5, %v1088_v22 }
 0x1da   : >> { %v1090_v24 = vmul.f32 %v5925_v19, %v1089_v23 }
 0x1dc   : >> { %v1091_v26 = vmul.f32 %v1090_v24, %v1084_v18 }
 0x1de   : >> { %v1093_v27 = vsel %vm1092_vm15, %v1084_v18, %v1091_v26  ;;  %vm1202_vm15 = vcmp.eq.s32.totalorder %v1201_v60, %v1197_v39 }
 0x1df   : >> { %v1096_v28 = vsel %vm1094_vm1, %v1095_v25, %v1093_v27 }
 0x1e0   : >> { %v1097_v29 = vxor.u32 2147483648, %v1096_v28 }
 0x1e2   : >> { %v1098_v30 = vsel %vm1082_vm2, %v1096_v28, %v1097_v29 }
 0x1e3   : >> { %v1099_v31 = vadd.f32 %v1098_v30, %v1081_v16 }
 0x1e5   : >> { %5926 = vrcp.f32 %v1099_v31  ;;  %v1111_v37 = vand.u32 2147483648, %v1099_v31  ;;  %vm1105_vm3 = vweird.f32 %v1099_v31  ;;  %v1109_v41 = vand.u32 2147483647, %v1099_v31 }
 0x1e7   : >> { %v1112_v45 = vor.u32 1.1754944e-38, %v1111_v37  ;;  %vm1110_vm6 = vcmp.eq.f32.partialorder %v1109_v41, 8.507059e+37 }
 0x1eb   : >> { %v5927_v34 = vpop.eup %5926 }
 0x1ec   : >> { %v1101_v36 = vmul.f32 %v5927_v34, %v1099_v31  ;;  %vm1106_vm4 = vweird.f32 %v5927_v34 }
 0x1ed   : >> { %vm1107_vm5 = vmor %vm1105_vm3, %vm1106_vm4 }
 0x1ee   : >> { %v1102_v40 = vsub.f32 1.0, %v1101_v36 }
 0x1f0   : >> { %v1103_v44 = vmul.f32 %v5927_v34, %v1102_v40 }
 0x1f2   : >> { %v1104_v46 = vadd.f32 %v5927_v34, %v1103_v44 }
 0x1f4   : >> { %v1108_v47 = vsel %vm1107_vm5, %v5927_v34, %v1104_v46 }
 0x1f5   : >> { %v1113_v48 = vsel %vm1110_vm6, %v1112_v45, %v1108_v47 }
 0x1f6   : >> { %v1120_v49 = vsel %vm1119_vm7, 0.0, %v1113_v48 }
 0x1f7   : >> { %v1121_v50 = vmul.f32 %v1120_v49, %v1120_v49  ;;  %v1134_v51 = vmul.f32 %v1120_v49, %v6547_v2 }
 0x1f9   : >> { %v1122_v52 = vadd.f32 1.0, %v1121_v50  ;;  %v1135_v53 = vsub.f32 %v1060_v8, %v1134_v51  ;;  %v1137_v54 = vadd.f32 %v1134_v51, %v1064_v9  ;;  %v1233_v8 = vadd.s32 40, %v1232_v38 }
 0x1fa   : >> { %v1248_v38 = vmov %v6323_v38 }
 0x1fb   : >> { %5928 = vrsqrt.f32 %v1122_v52  ;;  %1139 = vst [vmem:[%s1138_s20] sm:$0xff] %v1135_v53  ;;  %vm1129_vm8 = vweird.f32 %v1122_v52  ;;  %vm1234_vm1 = vcmp.eq.s32.totalorder %v1233_v8, %v1229_v39  ;;  %v1311_v38 = vmov %v6323_v38  ;;  %s1206_s20 = smov [#allocation23] }
 0x1fc   : >> { %1141 = vst [vmem:[%s1140_s21] sm:$0xff] %v1137_v54  ;;  %v1295_v38 = vmov %v6323_v38  ;;  %v1249_v16 = vadd.s32 48, %v1248_v38  ;;  %v1312_v17 = vadd.s32 16, %v1311_v38  ;;  %v1245_v39 = vmov %v6325_v39  ;;  %s1222_s21 = smov [#allocation23] }
 0x1fd   : >> { %v1308_v39 = vmov %v6325_v39  ;;  %v1296_v18 = vadd.s32 8, %v1295_v38  ;;  %v1359_v38 = vmov %v6323_v38 }
 0x1fe   : >> { %v1292_v39 = vmov %v6325_v39  ;;  %vm1250_vm2 = vcmp.eq.s32.totalorder %v1249_v16, %v1245_v39  ;;  %vm1313_vm3 = vcmp.eq.s32.totalorder %v1312_v17, %v1308_v39  ;;  %v1327_v38 = vmov %v6323_v38 }
 0x1ff   : >> { %vm1297_vm4 = vcmp.eq.s32.totalorder %v1296_v18, %v1292_v39  ;;  %v1360_v25 = vadd.s32 40, %v1359_v38  ;;  %v1356_v39 = vmov %v6325_v39  ;;  %v1280_v38 = vmov %v6323_v38 }
 0x200   : >> { %v1277_v39 = vmov %v6325_v39  ;;  %v1328_v26 = vadd.s32 24, %v1327_v38 }
 0x201   : >> { %v5929_v55 = vpop.eup %5928  ;;  %v1324_v39 = vmov %v6325_v39  ;;  %vm1361_vm5 = vcmp.eq.s32.totalorder %v1360_v25, %v1356_v39  ;;  %vm1282_vm6 = vcmp.eq.s32.totalorder %v1280_v38, %v1277_v39  ;;  %v1264_v38 = vmov %v6323_v38 }
 0x202   : >> { %v1124_v56 = vmul.f32 %v5929_v55, %v1122_v52  ;;  %vm1130_vm9 = vweird.f32 %v5929_v55  ;;  %vm1329_vm7 = vcmp.eq.s32.totalorder %v1328_v26, %v1324_v39  ;;  %v1343_v38 = vmov %v6323_v38 }
 0x203   : >> { %vm1131_vm10 = vmor %vm1129_vm8, %vm1130_vm9  ;;  %v1375_v38 = vmov %v6323_v38  ;;  %v1265_v33 = vadd.s32 56, %v1264_v38  ;;  %v1344_v34 = vadd.s32 32, %v1343_v38  ;;  %v1261_v39 = vmov %v6325_v39 }
 0x204   : >> { %v1125_v57 = vmul.f32 %v5929_v55, %v1124_v56  ;;  %v1340_v39 = vmov %v6325_v39  ;;  %v1376_v35 = vadd.s32 48, %v1375_v38  ;;  %v1391_v38 = vmov %v6323_v38 }
 0x205   : >> { %v1372_v39 = vmov %v6325_v39  ;;  %vm1266_vm8 = vcmp.eq.s32.totalorder %v1265_v33, %v1261_v39  ;;  %vm1345_vm9 = vcmp.eq.s32.totalorder %v1344_v34, %v1340_v39  ;;  %v1392_v44 = vadd.s32 56, %v1391_v38 }
 0x206   : >> { %v1126_v58 = vmul.f32 0.5, %v1125_v57 }
 0x208   : >> { %v1127_v59 = vsub.f32 1.5, %v1126_v58 }
 0x20a   : >> { %v1128_v61 = vmul.f32 %v5929_v55, %v1127_v59 }
 0x20c   : >> { %v1132_v62 = vsel %vm1131_vm10, %v5929_v55, %v1128_v61  ;;  %vm1377_vm10 = vcmp.eq.s32.totalorder %v1376_v35, %v1372_v39  ;;  %v1388_v39 = vmov %v6325_v39 }
 0x20d   : >> { %1143 = vst [vmem:[%s1142_s3] sm:$0xff] %v1132_v62  ;;  %v1133_v63 = vmul.f32 %v1132_v62, %v1120_v49  ;;  %s1238_s3 = smov [#allocation23] }
 0x20f   : >> { %1145 = vst [vmem:[%s1144_s22] sm:$0xff] %v1133_v63  ;;  %s1254_s22 = smov [#allocation23] }
 0x214   : >> { %v1178_v2 = vld [vmem:[%s1177_s0] ss:$0 sm:$0xff]  ;;  %s1286_s0 = smov [#allocation24] }
 0x215   : >> { %v1147_v4 = vld [vmem:[%s1146_s23] ss:$0 sm:$0xff]  ;;  %v1187_v6 = vsel %vm1186_vm11, %v1178_v2, 0.0  ;;  %vm1393_vm11 = vcmp.eq.s32.totalorder %v1392_v44, %v1388_v39  ;;  %s1301_s23 = smov [#allocation24]  ;;  %v1964_v39 = vmov %v6325_v39 }
 0x216   : >> { %v1156_v7 = vsel %vm1155_vm12, %v1147_v4, 0.0  ;;  %v1162_v3 = vld [vmem:[%s1161_s24] ss:$0 sm:$0xff]  ;;  %1188 = vadd.xlane.f32.xlu2 %v1187_v6  ;;  %s1317_s24 = smov [#allocation24]  ;;  %vm2704_vm12 = vcmp.eq.s32.totalorder %v6323_v38, 0 }
 0x217   : >> { %1157 = vadd.xlane.f32.xlu0 %v1156_v7  ;;  %v1171_v9 = vsel %vm1170_vm13, %v1162_v3, 0.0  ;;  %v1210_v11 = vld [vmem:[%s1209_s25] ss:$0 sm:$0xff]  ;;  %s1333_s25 = smov [#allocation24]  ;;  %vm2794_vm13 = vcmp.eq.s32.totalorder %v6323_v38, 7  ;;  %v1967_v38 = vmov %v6323_v38 }
 0x218   : >> { %1172 = vadd.xlane.f32.xlu1 %v1171_v9  ;;  %v1194_v10 = vld [vmem:[%s1193_s26] ss:$0 sm:$0xff]  ;;  %v1219_v13 = vsel %vm1218_vm14, %v1210_v11, 0.0  ;;  %s1270_s26 = smov [#allocation23]  ;;  %vm1971_vm14 = vcmp.eq.s32.totalorder %v1967_v38, %v1964_v39 }
 0x219   : >> { %v1226_v12 = vld [vmem:[%s1225_s27] ss:$0 sm:$0xff]  ;;  %v1203_v14 = vsel %vm1202_vm15, %v1194_v10, 0.0  ;;  %s1349_s27 = smov [#allocation24] }
 0x21a   : >> { %v1235_v15 = vsel %vm1234_vm1, %v1226_v12, 0.0  ;;  %v1242_v19 = vld [vmem:[%s1241_s28] ss:$0 sm:$0xff]  ;;  %s1365_s28 = smov [#allocation24] }
 0x21b   : >> { %v1305_v20 = vld [vmem:[%s1304_s29] ss:$0 sm:$0xff]  ;;  %v1251_v22 = vsel %vm1250_vm2, %v1242_v19, 0.0  ;;  %s1381_s29 = smov [#allocation24] }
 0x21c   : >> { %v1289_v21 = vld [vmem:[%s1288_s30] ss:$0 sm:$0xff]  ;;  %v1314_v23 = vsel %vm1313_vm3, %v1305_v20, 0.0  ;;  %s1397_s30 = smov [#allocation24] }
 0x21d   : >> { %v1298_v24 = vsel %vm1297_vm4, %v1289_v21, 0.0  ;;  %v1353_v27 = vld [vmem:[%s1352_s1] ss:$0 sm:$0xff]  ;;  %s1400_s1 = smov [#allocation23] }
 0x21e   : >> { %1220 = vadd.xlane.f32.xlu2 %v1219_v13  ;;  %v1274_v28 = vld [vmem:[%s1273_s12] ss:$0 sm:$0xff]  ;;  %v1362_v30 = vsel %vm1361_vm5, %v1353_v27, 0.0  ;;  %s6584_s12 = smov [#allocation12] }
 0x21f   : >> { %1204 = vadd.xlane.f32.xlu0 %v1203_v14  ;;  %v1321_v29 = vld [vmem:[%s1320_s13] ss:$0 sm:$0xff]  ;;  %v1283_v31 = vsel %vm1282_vm6, %v1274_v28, 0.0  ;;  %s6586_s13 = smov [#allocation13] }
 0x220   : >> { %1236 = vadd.xlane.f32.xlu1 %v1235_v15  ;;  %v1330_v32 = vsel %vm1329_vm7, %v1321_v29, 0.0  ;;  %v1258_v36 = vld [vmem:[%s1257_s14] ss:$0 sm:$0xff]  ;;  %s6588_s14 = smov [#allocation14] }
 0x221   : >> { %v1337_v37 = vld [vmem:[%s1336_s15] ss:$0 sm:$0xff]  ;;  %v1267_v41 = vsel %vm1266_vm8, %v1258_v36, 0.0  ;;  %s6590_s15 = smov [#allocation15] }
 0x222   : >> { %v1369_v40 = vld [vmem:[%s1368_s16] ss:$0 sm:$0xff]  ;;  %v1346_v42 = vsel %vm1345_vm9, %v1337_v37, 0.0  ;;  %s3024_s16 = smov [#allocation23] }
 0x223   : >> { %v1378_v43 = vsel %vm1377_vm10, %v1369_v40, 0.0  ;;  %v1385_v45 = vld [vmem:[%s1384_s17] ss:$0 sm:$0xff]  ;;  %s6594_s17 = smov [#allocation8] }
 0x224   : >> { %v1394_v46 = vsel %vm1393_vm11, %v1385_v45, 0.0  ;;  %v1408_v0 = vld [vmem:[%s6584_s12] sm:$0xff] }
 0x225   : >> { %v1409_v1 = vld [vmem:[%s6586_s13] sm:$0xff] }
 0x226   : >> { %1315 = vadd.xlane.f32.xlu2 %v1314_v23  ;;  %v1410_v2 = vld [vmem:[%s6588_s14] sm:$0xff] }
 0x227   : >> { %1252 = vadd.xlane.f32.xlu0 %v1251_v22  ;;  %v1411_v4 = vld [vmem:[%s6590_s15] sm:$0xff] }
 0x228   : >> { %1299 = vadd.xlane.f32.xlu1 %v1298_v24  ;;  %v3032_v60 = vld [vmem:[%s6594_s17] sm:$0xff] }
 0x22e   : >> { %1363 = vadd.xlane.f32.xlu2 %v1362_v30 }
 0x22f   : >> { %1284 = vadd.xlane.f32.xlu0 %v1283_v31 }
 0x230   : >> { %1331 = vadd.xlane.f32.xlu1 %v1330_v32 }
 0x236   : >> { %1268 = vadd.xlane.f32.xlu2 %v1267_v41 }
 0x237   : >> { %1347 = vadd.xlane.f32.xlu0 %v1346_v42 }
 0x238   : >> { %1379 = vadd.xlane.f32.xlu1 %v1378_v43 }
 0x23f   : >> { %1395 = vadd.xlane.f32.xlu0 %v1394_v46 }
 0x289   : >> { %v1189_v47 = vpop.xlane.xlu2 %1188 }
 0x28a   : >> { %v1158_v48 = vpop.xlane.xlu0 %1157 }
 0x28b   : >> { %1160 = vst [vmem:[%s1159_s2] sm:$0xff] %v1158_v48  ;;  %v1173_v49 = vpop.xlane.xlu1 %1172  ;;  %s6596_s2 = smov [#allocation9] }
 0x28c   : >> { %4845 = vst [vmem:[%s1174_s18 + $0x8] sm:$0xff] %v1173_v49  ;;  %s1402_s18 = smov [#allocation24]  ;;  %v3033_v6 = vld [vmem:[%s6596_s2] sm:$0xff] }
 0x28d   : >> { %4846 = vst [vmem:[%s1190_s19 + $0x10] sm:$0xff] %v1189_v47  ;;  %s6600_s19 = smov [#allocation10] }
 0x28e   : >> { %v3034_v16 = vld [vmem:[%s6600_s19] sm:$0xff] }
 0x291   : >> { %v1221_v50 = vpop.xlane.xlu2 %1220 }
 0x292   : >> { %v1205_v51 = vpop.xlane.xlu0 %1204 }
 0x293   : >> { %4847 = vst [vmem:[%s1206_s20 + $0x18] sm:$0xff] %v1205_v51  ;;  %v1237_v52 = vpop.xlane.xlu1 %1236  ;;  %s3026_s20 = smov [#allocation24] }
 0x294   : >> { %4848 = vst [vmem:[%s1222_s21 + $0x20] sm:$0xff] %v1221_v50  ;;  %s6604_s21 = smov [#allocation11] }
 0x295   : >> { %4849 = vst [vmem:[%s1238_s3 + $0x28] sm:$0xff] %v1237_v52  ;;  %v3035_v20 = vld [vmem:[%s6604_s21] sm:$0xff]  ;;  %s1428_s3 = smov [#allocation23] }
 0x299   : >> { %v1316_v54 = vpop.xlane.xlu2 %1315 }
 0x29a   : >> { %v1253_v53 = vpop.xlane.xlu0 %1252 }
 0x29b   : >> { %4850 = vst [vmem:[%s1254_s22 + $0x30] sm:$0xff] %v1253_v53  ;;  %v1300_v55 = vpop.xlane.xlu1 %1299  ;;  %s6612_s22 = smov [#allocation12] }
 0x2a1   : >> { %v1364_v56 = vpop.xlane.xlu2 %1363 }
 0x2a2   : >> { %v1285_v57 = vpop.xlane.xlu0 %1284 }
 0x2a3   : >> { %1287 = vst [vmem:[%s1286_s0] sm:$0xff] %v1285_v57  ;;  %v1332_v58 = vpop.xlane.xlu1 %1331  ;;  %s1431_s0 = smov [#allocation24] }
 0x2a4   : >> { %4852 = vst [vmem:[%s1301_s23 + $0x8] sm:$0xff] %v1300_v55  ;;  %s6615_s23 = smov [#allocation13] }
 0x2a5   : >> { %4853 = vst [vmem:[%s1317_s24 + $0x10] sm:$0xff] %v1316_v54  ;;  %s6618_s24 = smov [#allocation14] }
 0x2a6   : >> { %4854 = vst [vmem:[%s1333_s25 + $0x18] sm:$0xff] %v1332_v58  ;;  %s6621_s25 = smov [#allocation15] }
 0x2a9   : >> { %v1269_v59 = vpop.xlane.xlu2 %1268 }
 0x2aa   : >> { %v1348_v61 = vpop.xlane.xlu0 %1347  ;;  %4851 = vst [vmem:[%s1270_s26 + $0x38] sm:$0xff] %v1269_v59  ;;  %s3052_s26 = smov [#allocation23] }
 0x2ab   : >> { %v1380_v62 = vpop.xlane.xlu1 %1379  ;;  %4855 = vst [vmem:[%s1349_s27 + $0x20] sm:$0xff] %v1348_v61  ;;  %s3055_s27 = smov [#allocation24] }
 0x2ac   : >> { %4856 = vst [vmem:[%s1365_s28 + $0x28] sm:$0xff] %v1364_v56  ;;  %s6625_s28 = smov [#allocation8] }
 0x2ad   : >> { %4857 = vst [vmem:[%s1381_s29 + $0x30] sm:$0xff] %v1380_v62  ;;  %s6628_s29 = smov [#allocation9] }
 0x2b1   : >> { %v1401_v5 = vld [vmem:[%s1400_s1] sm:$0xff]  ;;  %v4859_v35 = vld [vmem:[%s1428_s3 + $0x8] sm:$0xff]  ;;  %s6634_s1 = smov [#allocation11]  ;;  %s6666_s3 = smov [#allocation11] }
 0x2b2   : >> { %v1396_v63 = vpop.xlane.xlu0 %1395  ;;  %v3025_v7 = vld [vmem:[%s3024_s16] sm:$0xff]  ;;  %v1412_v3 = vmul.f32 %v1408_v0, %v1401_v5  ;;  %v1415_v8 = vmul.f32 %v1409_v1, %v1401_v5  ;;  %v1419_v9 = vmul.f32 %v1410_v2, %v1401_v5  ;;  %v1422_v11 = vmul.f32 %v1411_v4, %v1401_v5  ;;  %v5217_v49 = vld [vmem:[%s3052_s26 + $0x8] sm:$0xff]  ;;  %s6650_s16 = smov [#allocation14]  ;;  %s6685_s26 = smov [#allocation15] }
 0x2b3   : >> { %4858 = vst [vmem:[%s1397_s30 + $0x38] sm:$0xff] %v1396_v63  ;;  %v3036_v17 = vmul.f32 %v3032_v60, %v3025_v7  ;;  %v3039_v18 = vmul.f32 %v3033_v6, %v3025_v7  ;;  %v3043_v29 = vmul.f32 %v3034_v16, %v3025_v7  ;;  %v3046_v30 = vmul.f32 %v3035_v20, %v3025_v7  ;;  %s6631_s30 = smov [#allocation10] }
 0x2ba   : >> { %v1403_v10 = vld [vmem:[%s1402_s18] sm:$0xff]  ;;  %v4860_v36 = vld [vmem:[%s1431_s0 + $0x8] sm:$0xff]  ;;  %s3089_s18 = smov [#allocation24]  ;;  %s6676_s0 = smov [#allocation12] }
 0x2bb   : >> { %v1413_v12 = vmul.f32 %v1410_v2, %v1403_v10  ;;  %v1416_v13 = vmul.f32 %v1411_v4, %v1403_v10  ;;  %v1418_v14 = vmul.f32 %v1408_v0, %v1403_v10  ;;  %v1421_v15 = vmul.f32 %v1409_v1, %v1403_v10  ;;  %v3027_v19 = vld [vmem:[%s3026_s20] sm:$0xff]  ;;  %v5218_v52 = vld [vmem:[%s3055_s27 + $0x8] sm:$0xff]  ;;  %s6660_s20 = smov [#allocation9]  ;;  %s3120_s27 = smov [#allocation23] }
 0x2bc   : >> { %v3037_v25 = vmul.f32 %v3034_v16, %v3027_v19  ;;  %v3040_v26 = vmul.f32 %v3035_v20, %v3027_v19  ;;  %v3042_v27 = vmul.f32 %v3032_v60, %v3027_v19  ;;  %v3045_v28 = vmul.f32 %v3033_v6, %v3027_v19 }
 0x2bd   : >> { %v1414_v21 = vsub.f32 %v1412_v3, %v1413_v12  ;;  %v1417_v22 = vsub.f32 %v1415_v8, %v1416_v13  ;;  %v1420_v23 = vadd.f32 %v1419_v9, %v1418_v14  ;;  %v1423_v24 = vadd.f32 %v1422_v11, %v1421_v15 }
 0x2be   : >> { %v3038_v31 = vsub.f32 %v3036_v17, %v3037_v25  ;;  %v3041_v32 = vsub.f32 %v3039_v18, %v3040_v26  ;;  %v3044_v33 = vadd.f32 %v3043_v29, %v3042_v27  ;;  %v3047_v34 = vadd.f32 %v3046_v30, %v3045_v28 }
 0x2bf   : >> { %1424 = vst [vmem:[%s6584_s12] sm:$0xff] %v1414_v21  ;;  %s1462_s12 = smov [#allocation23] }
 0x2c0   : >> { %1425 = vst [vmem:[%s6586_s13] sm:$0xff] %v1417_v22  ;;  %s6644_s13 = smov [#allocation12]  ;;  %v4869_v9 = vld [vmem:[%s1462_s12 + $0x10] sm:$0xff]  ;;  %s6698_s12 = smov [#allocation11] }
 0x2c1   : >> { %1426 = vst [vmem:[%s6588_s14] sm:$0xff] %v1420_v23  ;;  %s1465_s14 = smov [#allocation24] }
 0x2c2   : >> { %1427 = vst [vmem:[%s6590_s15] sm:$0xff] %v1423_v24  ;;  %s6647_s15 = smov [#allocation13]  ;;  %v4870_v11 = vld [vmem:[%s1465_s14 + $0x10] sm:$0xff]  ;;  %s6708_s14 = smov [#allocation12] }
 0x2c3   : >> { %3048 = vst [vmem:[%s6594_s17] sm:$0xff] %v3038_v31  ;;  %s6653_s17 = smov [#allocation15]  ;;  %v5228_v24 = vld [vmem:[%s3089_s18 + $0x10] sm:$0xff]  ;;  %s3154_s18 = smov [#allocation23] }
 0x2c4   : >> { %3049 = vst [vmem:[%s6596_s2] sm:$0xff] %v3041_v32  ;;  %s3086_s2 = smov [#allocation23] }
 0x2c5   : >> { %3050 = vst [vmem:[%s6600_s19] sm:$0xff] %v3044_v33  ;;  %s6657_s19 = smov [#allocation8]  ;;  %v5227_v21 = vld [vmem:[%s3086_s2 + $0x10] sm:$0xff]  ;;  %s6717_s2 = smov [#allocation15] }
 0x2c6   : >> { %v4861_v37 = vld [vmem:[%s6612_s22 + $0x8] sm:$0xff]  ;;  %3051 = vst [vmem:[%s6604_s21] sm:$0xff] %v3047_v34  ;;  %s6663_s21 = smov [#allocation10] }
 0x2c7   : >> { %v4862_v40 = vld [vmem:[%s6615_s23 + $0x8] sm:$0xff]  ;;  %v1446_v41 = vmul.f32 %v4861_v37, %v4859_v35  ;;  %v1452_v42 = vmul.f32 %v4861_v37, %v4860_v36 }
 0x2c8   : >> { %v4863_v43 = vld [vmem:[%s6618_s24 + $0x8] sm:$0xff]  ;;  %v1449_v44 = vmul.f32 %v4862_v40, %v4859_v35  ;;  %v1455_v45 = vmul.f32 %v4862_v40, %v4860_v36 }
 0x2c9   : >> { %v4864_v46 = vld [vmem:[%s6621_s25 + $0x8] sm:$0xff]  ;;  %v1447_v47 = vmul.f32 %v4863_v43, %v4860_v36  ;;  %v1453_v48 = vmul.f32 %v4863_v43, %v4859_v35 }
 0x2ca   : >> { %v1450_v50 = vmul.f32 %v4864_v46, %v4860_v36  ;;  %v1456_v51 = vmul.f32 %v4864_v46, %v4859_v35  ;;  %v5219_v53 = vld [vmem:[%s6625_s28 + $0x8] sm:$0xff] }
 0x2cb   : >> { %v1448_v54 = vsub.f32 %v1446_v41, %v1447_v47  ;;  %v1454_v55 = vadd.f32 %v1453_v48, %v1452_v42  ;;  %v5220_v56 = vld [vmem:[%s6628_s29 + $0x8] sm:$0xff]  ;;  %v3070_v57 = vmul.f32 %v5219_v53, %v5217_v49  ;;  %v3076_v58 = vmul.f32 %v5219_v53, %v5218_v52 }
 0x2cc   : >> { %v1451_v59 = vsub.f32 %v1449_v44, %v1450_v50  ;;  %v1457_v61 = vadd.f32 %v1456_v51, %v1455_v45  ;;  %v5221_v62 = vld [vmem:[%s6631_s30 + $0x8] sm:$0xff]  ;;  %v3073_v63 = vmul.f32 %v5220_v56, %v5217_v49  ;;  %v3079_v0 = vmul.f32 %v5220_v56, %v5218_v52 }
 0x2cd   : >> { %4865 = vst [vmem:[%s6612_s22 + $0x8] sm:$0xff] %v1448_v54  ;;  %v5222_v1 = vld [vmem:[%s6634_s1 + $0x8] sm:$0xff]  ;;  %v3071_v2 = vmul.f32 %v5221_v62, %v5218_v52  ;;  %v3077_v4 = vmul.f32 %v5221_v62, %v5217_v49  ;;  %s1496_s22 = smov [#allocation23] }
 0x2ce   : >> { %4866 = vst [vmem:[%s6615_s23 + $0x8] sm:$0xff] %v1451_v59  ;;  %v3074_v5 = vmul.f32 %v5222_v1, %v5218_v52  ;;  %v3080_v60 = vmul.f32 %v5222_v1, %v5217_v49  ;;  %s1499_s23 = smov [#allocation24]  ;;  %v4879_v47 = vld [vmem:[%s1496_s22 + $0x18] sm:$0xff]  ;;  %s6730_s22 = smov [#allocation11] }
 0x2cf   : >> { %4867 = vst [vmem:[%s6618_s24 + $0x8] sm:$0xff] %v1454_v55  ;;  %v3072_v6 = vsub.f32 %v3070_v57, %v3071_v2  ;;  %v3078_v7 = vadd.f32 %v3077_v4, %v3076_v58  ;;  %s6679_s24 = smov [#allocation13]  ;;  %v4880_v48 = vld [vmem:[%s1499_s23 + $0x18] sm:$0xff]  ;;  %s6740_s23 = smov [#allocation12] }
 0x2d0   : >> { %4868 = vst [vmem:[%s6621_s25 + $0x8] sm:$0xff] %v1457_v61  ;;  %v3075_v3 = vsub.f32 %v3073_v63, %v3074_v5  ;;  %v3081_v8 = vadd.f32 %v3080_v60, %v3079_v0  ;;  %s6682_s25 = smov [#allocation14]  ;;  %v5237_v59 = vld [vmem:[%s3120_s27 + $0x18] sm:$0xff]  ;;  %s6749_s27 = smov [#allocation15] }
 0x2d1   : >> { %5223 = vst [vmem:[%s6625_s28 + $0x8] sm:$0xff] %v3072_v6  ;;  %s3123_s28 = smov [#allocation24] }
 0x2d2   : >> { %5224 = vst [vmem:[%s6628_s29 + $0x8] sm:$0xff] %v3075_v3  ;;  %s6689_s29 = smov [#allocation8]  ;;  %v5238_v63 = vld [vmem:[%s3123_s28 + $0x18] sm:$0xff]  ;;  %s3188_s28 = smov [#allocation23] }
 0x2d3   : >> { %5225 = vst [vmem:[%s6631_s30 + $0x8] sm:$0xff] %v3078_v7  ;;  %s6692_s30 = smov [#allocation9] }
 0x2d4   : >> { %v4871_v10 = vld [vmem:[%s6644_s13 + $0x10] sm:$0xff]  ;;  %5226 = vst [vmem:[%s6634_s1 + $0x8] sm:$0xff] %v3081_v8  ;;  %s6695_s1 = smov [#allocation10] }
 0x2d5   : >> { %v4872_v12 = vld [vmem:[%s6647_s15 + $0x10] sm:$0xff]  ;;  %v1480_v13 = vmul.f32 %v4871_v10, %v4869_v9  ;;  %v1486_v14 = vmul.f32 %v4871_v10, %v4870_v11 }
 0x2d6   : >> { %v4873_v15 = vld [vmem:[%s6650_s16 + $0x10] sm:$0xff]  ;;  %v1483_v16 = vmul.f32 %v4872_v12, %v4869_v9  ;;  %v1489_v17 = vmul.f32 %v4872_v12, %v4870_v11 }
 0x2d7   : >> { %v4874_v18 = vld [vmem:[%s6653_s17 + $0x10] sm:$0xff]  ;;  %v1481_v19 = vmul.f32 %v4873_v15, %v4870_v11  ;;  %v1487_v20 = vmul.f32 %v4873_v15, %v4869_v9 }
 0x2d8   : >> { %v1484_v22 = vmul.f32 %v4874_v18, %v4870_v11  ;;  %v1490_v23 = vmul.f32 %v4874_v18, %v4869_v9  ;;  %v5229_v25 = vld [vmem:[%s6657_s19 + $0x10] sm:$0xff] }
 0x2d9   : >> { %v1482_v26 = vsub.f32 %v1480_v13, %v1481_v19  ;;  %v1488_v27 = vadd.f32 %v1487_v20, %v1486_v14  ;;  %v5230_v28 = vld [vmem:[%s6660_s20 + $0x10] sm:$0xff]  ;;  %v3104_v29 = vmul.f32 %v5229_v25, %v5227_v21  ;;  %v3110_v30 = vmul.f32 %v5229_v25, %v5228_v24 }
 0x2da   : >> { %v1485_v31 = vsub.f32 %v1483_v16, %v1484_v22  ;;  %v1491_v32 = vadd.f32 %v1490_v23, %v1489_v17  ;;  %v5231_v33 = vld [vmem:[%s6663_s21 + $0x10] sm:$0xff]  ;;  %v3107_v34 = vmul.f32 %v5230_v28, %v5227_v21  ;;  %v3113_v35 = vmul.f32 %v5230_v28, %v5228_v24 }
 0x2db   : >> { %4875 = vst [vmem:[%s6644_s13 + $0x10] sm:$0xff] %v1482_v26  ;;  %v5232_v36 = vld [vmem:[%s6666_s3 + $0x10] sm:$0xff]  ;;  %v3105_v37 = vmul.f32 %v5231_v33, %v5228_v24  ;;  %v3111_v40 = vmul.f32 %v5231_v33, %v5227_v21  ;;  %s1530_s13 = smov [#allocation23] }
 0x2dc   : >> { %4876 = vst [vmem:[%s6647_s15 + $0x10] sm:$0xff] %v1485_v31  ;;  %v3108_v41 = vmul.f32 %v5232_v36, %v5228_v24  ;;  %v3114_v42 = vmul.f32 %v5232_v36, %v5227_v21  ;;  %s1533_s15 = smov [#allocation24]  ;;  %v4889_v19 = vld [vmem:[%s1530_s13 + $0x20] sm:$0xff]  ;;  %s6762_s13 = smov [#allocation11] }
 0x2dd   : >> { %4877 = vst [vmem:[%s6650_s16 + $0x10] sm:$0xff] %v1488_v27  ;;  %v3106_v43 = vsub.f32 %v3104_v29, %v3105_v37  ;;  %v3112_v44 = vadd.f32 %v3111_v40, %v3110_v30  ;;  %s6711_s16 = smov [#allocation13]  ;;  %v4890_v20 = vld [vmem:[%s1533_s15 + $0x20] sm:$0xff]  ;;  %s6772_s15 = smov [#allocation12] }
 0x2de   : >> { %4878 = vst [vmem:[%s6653_s17 + $0x10] sm:$0xff] %v1491_v32  ;;  %v3109_v45 = vsub.f32 %v3107_v34, %v3108_v41  ;;  %v3115_v46 = vadd.f32 %v3114_v42, %v3113_v35  ;;  %s6714_s17 = smov [#allocation14]  ;;  %v5247_v31 = vld [vmem:[%s3154_s18 + $0x20] sm:$0xff]  ;;  %s6781_s18 = smov [#allocation15] }
 0x2df   : >> { %5233 = vst [vmem:[%s6657_s19 + $0x10] sm:$0xff] %v3106_v43  ;;  %s3157_s19 = smov [#allocation24] }
 0x2e0   : >> { %5234 = vst [vmem:[%s6660_s20 + $0x10] sm:$0xff] %v3109_v45  ;;  %s6721_s20 = smov [#allocation8]  ;;  %v5248_v34 = vld [vmem:[%s3157_s19 + $0x20] sm:$0xff]  ;;  %s3222_s19 = smov [#allocation23] }
 0x2e1   : >> { %5235 = vst [vmem:[%s6663_s21 + $0x10] sm:$0xff] %v3112_v44  ;;  %s6724_s21 = smov [#allocation9] }
 0x2e2   : >> { %v4881_v49 = vld [vmem:[%s6676_s0 + $0x18] sm:$0xff]  ;;  %5236 = vst [vmem:[%s6666_s3 + $0x10] sm:$0xff] %v3115_v46  ;;  %s6727_s3 = smov [#allocation10] }
 0x2e3   : >> { %v4882_v50 = vld [vmem:[%s6679_s24 + $0x18] sm:$0xff]  ;;  %v1514_v51 = vmul.f32 %v4881_v49, %v4879_v47  ;;  %v1520_v52 = vmul.f32 %v4881_v49, %v4880_v48 }
 0x2e4   : >> { %v4883_v53 = vld [vmem:[%s6682_s25 + $0x18] sm:$0xff]  ;;  %v1517_v54 = vmul.f32 %v4882_v50, %v4879_v47  ;;  %v1523_v55 = vmul.f32 %v4882_v50, %v4880_v48 }
 0x2e5   : >> { %v4884_v56 = vld [vmem:[%s6685_s26 + $0x18] sm:$0xff]  ;;  %v1515_v57 = vmul.f32 %v4883_v53, %v4880_v48  ;;  %v1521_v58 = vmul.f32 %v4883_v53, %v4879_v47 }
 0x2e6   : >> { %v1518_v61 = vmul.f32 %v4884_v56, %v4880_v48  ;;  %v1524_v62 = vmul.f32 %v4884_v56, %v4879_v47  ;;  %v5239_v0 = vld [vmem:[%s6689_s29 + $0x18] sm:$0xff] }
 0x2e7   : >> { %v1516_v1 = vsub.f32 %v1514_v51, %v1515_v57  ;;  %v1522_v2 = vadd.f32 %v1521_v58, %v1520_v52  ;;  %v5240_v4 = vld [vmem:[%s6692_s30 + $0x18] sm:$0xff]  ;;  %v3138_v5 = vmul.f32 %v5239_v0, %v5237_v59  ;;  %v3144_v60 = vmul.f32 %v5239_v0, %v5238_v63 }
 0x2e8   : >> { %v1519_v6 = vsub.f32 %v1517_v54, %v1518_v61  ;;  %v1525_v7 = vadd.f32 %v1524_v62, %v1523_v55  ;;  %v5241_v3 = vld [vmem:[%s6695_s1 + $0x18] sm:$0xff]  ;;  %v3141_v8 = vmul.f32 %v5240_v4, %v5237_v59  ;;  %v3147_v9 = vmul.f32 %v5240_v4, %v5238_v63 }
 0x2e9   : >> { %4885 = vst [vmem:[%s6676_s0 + $0x18] sm:$0xff] %v1516_v1  ;;  %v5242_v11 = vld [vmem:[%s6698_s12 + $0x18] sm:$0xff]  ;;  %v3139_v10 = vmul.f32 %v5241_v3, %v5238_v63  ;;  %v3145_v12 = vmul.f32 %v5241_v3, %v5237_v59  ;;  %s1564_s0 = smov [#allocation23] }
 0x2ea   : >> { %4886 = vst [vmem:[%s6679_s24 + $0x18] sm:$0xff] %v1519_v6  ;;  %v3142_v13 = vmul.f32 %v5242_v11, %v5238_v63  ;;  %v3148_v14 = vmul.f32 %v5242_v11, %v5237_v59  ;;  %s1567_s24 = smov [#allocation24]  ;;  %v4899_v57 = vld [vmem:[%s1564_s0 + $0x28] sm:$0xff]  ;;  %s6794_s0 = smov [#allocation11] }
 0x2eb   : >> { %4887 = vst [vmem:[%s6682_s25 + $0x18] sm:$0xff] %v1522_v2  ;;  %v3140_v15 = vsub.f32 %v3138_v5, %v3139_v10  ;;  %v3146_v16 = vadd.f32 %v3145_v12, %v3144_v60  ;;  %s6743_s25 = smov [#allocation13]  ;;  %v4900_v58 = vld [vmem:[%s1567_s24 + $0x28] sm:$0xff]  ;;  %s6804_s24 = smov [#allocation12] }
 0x2ec   : >> { %4888 = vst [vmem:[%s6685_s26 + $0x18] sm:$0xff] %v1525_v7  ;;  %v3143_v17 = vsub.f32 %v3141_v8, %v3142_v13  ;;  %v3149_v18 = vadd.f32 %v3148_v14, %v3147_v9  ;;  %s6746_s26 = smov [#allocation14]  ;;  %v5257_v6 = vld [vmem:[%s3188_s28 + $0x28] sm:$0xff]  ;;  %s6813_s28 = smov [#allocation15] }
 0x2ed   : >> { %5243 = vst [vmem:[%s6689_s29 + $0x18] sm:$0xff] %v3140_v15  ;;  %s3191_s29 = smov [#allocation24] }
 0x2ee   : >> { %5244 = vst [vmem:[%s6692_s30 + $0x18] sm:$0xff] %v3143_v17  ;;  %s6753_s30 = smov [#allocation8]  ;;  %v5258_v8 = vld [vmem:[%s3191_s29 + $0x28] sm:$0xff]  ;;  %s3256_s29 = smov [#allocation23] }
 0x2ef   : >> { %5245 = vst [vmem:[%s6695_s1 + $0x18] sm:$0xff] %v3146_v16  ;;  %s6756_s1 = smov [#allocation9] }
 0x2f0   : >> { %v4891_v21 = vld [vmem:[%s6708_s14 + $0x20] sm:$0xff]  ;;  %5246 = vst [vmem:[%s6698_s12 + $0x18] sm:$0xff] %v3149_v18  ;;  %s6759_s12 = smov [#allocation10] }
 0x2f1   : >> { %v4892_v22 = vld [vmem:[%s6711_s16 + $0x20] sm:$0xff]  ;;  %v1548_v23 = vmul.f32 %v4891_v21, %v4889_v19  ;;  %v1554_v24 = vmul.f32 %v4891_v21, %v4890_v20 }
 0x2f2   : >> { %v4893_v25 = vld [vmem:[%s6714_s17 + $0x20] sm:$0xff]  ;;  %v1551_v26 = vmul.f32 %v4892_v22, %v4889_v19  ;;  %v1557_v27 = vmul.f32 %v4892_v22, %v4890_v20 }
 0x2f3   : >> { %v4894_v28 = vld [vmem:[%s6717_s2 + $0x20] sm:$0xff]  ;;  %v1549_v29 = vmul.f32 %v4893_v25, %v4890_v20  ;;  %v1555_v30 = vmul.f32 %v4893_v25, %v4889_v19 }
 0x2f4   : >> { %v1552_v32 = vmul.f32 %v4894_v28, %v4890_v20  ;;  %v1558_v33 = vmul.f32 %v4894_v28, %v4889_v19  ;;  %v5249_v35 = vld [vmem:[%s6721_s20 + $0x20] sm:$0xff] }
 0x2f5   : >> { %v1550_v36 = vsub.f32 %v1548_v23, %v1549_v29  ;;  %v1556_v37 = vadd.f32 %v1555_v30, %v1554_v24  ;;  %v5250_v40 = vld [vmem:[%s6724_s21 + $0x20] sm:$0xff]  ;;  %v3172_v41 = vmul.f32 %v5249_v35, %v5247_v31  ;;  %v3178_v42 = vmul.f32 %v5249_v35, %v5248_v34 }
 0x2f6   : >> { %v1553_v43 = vsub.f32 %v1551_v26, %v1552_v32  ;;  %v1559_v44 = vadd.f32 %v1558_v33, %v1557_v27  ;;  %v5251_v45 = vld [vmem:[%s6727_s3 + $0x20] sm:$0xff]  ;;  %v3175_v46 = vmul.f32 %v5250_v40, %v5247_v31  ;;  %v3181_v47 = vmul.f32 %v5250_v40, %v5248_v34 }
 0x2f7   : >> { %4895 = vst [vmem:[%s6708_s14 + $0x20] sm:$0xff] %v1550_v36  ;;  %v5252_v48 = vld [vmem:[%s6730_s22 + $0x20] sm:$0xff]  ;;  %v3173_v49 = vmul.f32 %v5251_v45, %v5248_v34  ;;  %v3179_v50 = vmul.f32 %v5251_v45, %v5247_v31  ;;  %s1598_s14 = smov [#allocation23] }
 0x2f8   : >> { %4896 = vst [vmem:[%s6711_s16 + $0x20] sm:$0xff] %v1553_v43  ;;  %v3176_v51 = vmul.f32 %v5252_v48, %v5248_v34  ;;  %v3182_v52 = vmul.f32 %v5252_v48, %v5247_v31  ;;  %s1601_s16 = smov [#allocation24]  ;;  %v4909_v29 = vld [vmem:[%s1598_s14 + $0x30] sm:$0xff]  ;;  %s6826_s14 = smov [#allocation11] }
 0x2f9   : >> { %4897 = vst [vmem:[%s6714_s17 + $0x20] sm:$0xff] %v1556_v37  ;;  %v3174_v53 = vsub.f32 %v3172_v41, %v3173_v49  ;;  %v3180_v54 = vadd.f32 %v3179_v50, %v3178_v42  ;;  %s6775_s17 = smov [#allocation13]  ;;  %v4910_v30 = vld [vmem:[%s1601_s16 + $0x30] sm:$0xff]  ;;  %s6864_s16 = smov [#allocation10] }
 0x2fa   : >> { %4898 = vst [vmem:[%s6717_s2 + $0x20] sm:$0xff] %v1559_v44  ;;  %v3177_v55 = vsub.f32 %v3175_v46, %v3176_v51  ;;  %v3183_v56 = vadd.f32 %v3182_v52, %v3181_v47  ;;  %s6778_s2 = smov [#allocation14]  ;;  %v5267_v43 = vld [vmem:[%s3222_s19 + $0x30] sm:$0xff]  ;;  %s6938_s19 = smov [#allocation11] }
 0x2fb   : >> { %5253 = vst [vmem:[%s6721_s20 + $0x20] sm:$0xff] %v3174_v53  ;;  %s3225_s20 = smov [#allocation24] }
 0x2fc   : >> { %5254 = vst [vmem:[%s6724_s21 + $0x20] sm:$0xff] %v3177_v55  ;;  %s6785_s21 = smov [#allocation8]  ;;  %v5268_v46 = vld [vmem:[%s3225_s20 + $0x30] sm:$0xff]  ;;  %s6962_s20 = smov [#allocation12] }
 0x2fd   : >> { %5255 = vst [vmem:[%s6727_s3 + $0x20] sm:$0xff] %v3180_v54  ;;  %s6788_s3 = smov [#allocation9] }
 0x2fe   : >> { %v4901_v59 = vld [vmem:[%s6740_s23 + $0x28] sm:$0xff]  ;;  %5256 = vst [vmem:[%s6730_s22 + $0x20] sm:$0xff] %v3183_v56  ;;  %s6791_s22 = smov [#allocation10] }
 0x2ff   : >> { %v4902_v61 = vld [vmem:[%s6743_s25 + $0x28] sm:$0xff]  ;;  %v1582_v62 = vmul.f32 %v4901_v59, %v4899_v57  ;;  %v1588_v63 = vmul.f32 %v4901_v59, %v4900_v58 }
 0x300   : >> { %v4903_v0 = vld [vmem:[%s6746_s26 + $0x28] sm:$0xff]  ;;  %v1585_v1 = vmul.f32 %v4902_v61, %v4899_v57  ;;  %v1591_v2 = vmul.f32 %v4902_v61, %v4900_v58 }
 0x301   : >> { %v4904_v4 = vld [vmem:[%s6749_s27 + $0x28] sm:$0xff]  ;;  %v1583_v5 = vmul.f32 %v4903_v0, %v4900_v58  ;;  %v1589_v60 = vmul.f32 %v4903_v0, %v4899_v57 }
 0x302   : >> { %v1586_v7 = vmul.f32 %v4904_v4, %v4900_v58  ;;  %v1592_v3 = vmul.f32 %v4904_v4, %v4899_v57  ;;  %v5259_v9 = vld [vmem:[%s6753_s30 + $0x28] sm:$0xff] }
 0x303   : >> { %v1584_v11 = vsub.f32 %v1582_v62, %v1583_v5  ;;  %v1590_v10 = vadd.f32 %v1589_v60, %v1588_v63  ;;  %v5260_v12 = vld [vmem:[%s6756_s1 + $0x28] sm:$0xff]  ;;  %v3206_v13 = vmul.f32 %v5259_v9, %v5257_v6  ;;  %v3212_v14 = vmul.f32 %v5259_v9, %v5258_v8 }
 0x304   : >> { %v1587_v15 = vsub.f32 %v1585_v1, %v1586_v7  ;;  %v1593_v16 = vadd.f32 %v1592_v3, %v1591_v2  ;;  %v5261_v17 = vld [vmem:[%s6759_s12 + $0x28] sm:$0xff]  ;;  %v3209_v18 = vmul.f32 %v5260_v12, %v5257_v6  ;;  %v3215_v19 = vmul.f32 %v5260_v12, %v5258_v8 }
 0x305   : >> { %4905 = vst [vmem:[%s6740_s23 + $0x28] sm:$0xff] %v1584_v11  ;;  %v5262_v20 = vld [vmem:[%s6762_s13 + $0x28] sm:$0xff]  ;;  %v3207_v21 = vmul.f32 %v5261_v17, %v5258_v8  ;;  %v3213_v22 = vmul.f32 %v5261_v17, %v5257_v6  ;;  %s1632_s23 = smov [#allocation23] }
 0x306   : >> { %4906 = vst [vmem:[%s6743_s25 + $0x28] sm:$0xff] %v1587_v15  ;;  %v3210_v23 = vmul.f32 %v5262_v20, %v5258_v8  ;;  %v3216_v24 = vmul.f32 %v5262_v20, %v5257_v6  ;;  %s1635_s25 = smov [#allocation24]  ;;  %v4919_v5 = vld [vmem:[%s1632_s23 + $0x38] sm:$0xff]  ;;  %s1696_s23 = smov [#allocation13] }
 0x307   : >> { %4907 = vst [vmem:[%s6746_s26 + $0x28] sm:$0xff] %v1590_v10  ;;  %v3208_v25 = vsub.f32 %v3206_v13, %v3207_v21  ;;  %v3214_v26 = vadd.f32 %v3213_v22, %v3212_v14  ;;  %s6807_s26 = smov [#allocation13]  ;;  %v4920_v60 = vld [vmem:[%s1635_s25 + $0x38] sm:$0xff]  ;;  %s1700_s25 = smov [#allocation15] }
 0x308   : >> { %4908 = vst [vmem:[%s6749_s27 + $0x28] sm:$0xff] %v1593_v16  ;;  %v3211_v27 = vsub.f32 %v3209_v18, %v3210_v23  ;;  %v3217_v28 = vadd.f32 %v3216_v24, %v3215_v19  ;;  %s6810_s27 = smov [#allocation14]  ;;  %v5277_v15 = vld [vmem:[%s3256_s29 + $0x38] sm:$0xff]  ;;  %s1728_s29 = smov [#allocation15] }
 0x309   : >> { %5263 = vst [vmem:[%s6753_s30 + $0x28] sm:$0xff] %v3208_v25  ;;  %s3259_s30 = smov [#allocation24] }
 0x30a   : >> { %5264 = vst [vmem:[%s6756_s1 + $0x28] sm:$0xff] %v3211_v27  ;;  %s6817_s1 = smov [#allocation8]  ;;  %v5278_v18 = vld [vmem:[%s3259_s30 + $0x38] sm:$0xff]  ;;  %s1750_s30 = smov [#allocation12] }
 0x30b   : >> { %5265 = vst [vmem:[%s6759_s12 + $0x28] sm:$0xff] %v3214_v26  ;;  %s6820_s12 = smov [#allocation9] }
 0x30c   : >> { %v4911_v31 = vld [vmem:[%s6772_s15 + $0x30] sm:$0xff]  ;;  %5266 = vst [vmem:[%s6762_s13 + $0x28] sm:$0xff] %v3217_v28  ;;  %s6823_s13 = smov [#allocation10] }
 0x30d   : >> { %v4912_v32 = vld [vmem:[%s6775_s17 + $0x30] sm:$0xff]  ;;  %v1616_v33 = vmul.f32 %v4911_v31, %v4909_v29  ;;  %v1622_v34 = vmul.f32 %v4911_v31, %v4910_v30 }
 0x30e   : >> { %v4913_v35 = vld [vmem:[%s6778_s2 + $0x30] sm:$0xff]  ;;  %v1619_v36 = vmul.f32 %v4912_v32, %v4909_v29  ;;  %v1625_v37 = vmul.f32 %v4912_v32, %v4910_v30 }
 0x30f   : >> { %v4914_v40 = vld [vmem:[%s6781_s18 + $0x30] sm:$0xff]  ;;  %v1617_v41 = vmul.f32 %v4913_v35, %v4910_v30  ;;  %v1623_v42 = vmul.f32 %v4913_v35, %v4909_v29 }
 0x310   : >> { %v1620_v44 = vmul.f32 %v4914_v40, %v4910_v30  ;;  %v1626_v45 = vmul.f32 %v4914_v40, %v4909_v29  ;;  %v5269_v47 = vld [vmem:[%s6785_s21 + $0x30] sm:$0xff] }
 0x311   : >> { %v1618_v48 = vsub.f32 %v1616_v33, %v1617_v41  ;;  %v1624_v49 = vadd.f32 %v1623_v42, %v1622_v34  ;;  %v5270_v50 = vld [vmem:[%s6788_s3 + $0x30] sm:$0xff]  ;;  %v3240_v51 = vmul.f32 %v5269_v47, %v5267_v43  ;;  %v3246_v52 = vmul.f32 %v5269_v47, %v5268_v46 }
 0x312   : >> { %v1621_v53 = vsub.f32 %v1619_v36, %v1620_v44  ;;  %v1627_v54 = vadd.f32 %v1626_v45, %v1625_v37  ;;  %v5271_v55 = vld [vmem:[%s6791_s22 + $0x30] sm:$0xff]  ;;  %v3243_v56 = vmul.f32 %v5270_v50, %v5267_v43  ;;  %v3249_v57 = vmul.f32 %v5270_v50, %v5268_v46 }
 0x313   : >> { %4915 = vst [vmem:[%s6772_s15 + $0x30] sm:$0xff] %v1618_v48  ;;  %v5272_v58 = vld [vmem:[%s6794_s0 + $0x30] sm:$0xff]  ;;  %v3241_v59 = vmul.f32 %v5271_v55, %v5268_v46  ;;  %v3247_v61 = vmul.f32 %v5271_v55, %v5267_v43  ;;  %s6840_s15 = smov [#allocation8] }
 0x314   : >> { %4916 = vst [vmem:[%s6775_s17 + $0x30] sm:$0xff] %v1621_v53  ;;  %v3244_v62 = vmul.f32 %v5272_v58, %v5268_v46  ;;  %v3250_v63 = vmul.f32 %v5272_v58, %v5267_v43  ;;  %s6907_s17 = smov [#allocation9] }
 0x315   : >> { %4917 = vst [vmem:[%s6778_s2 + $0x30] sm:$0xff] %v1624_v49  ;;  %v3242_v0 = vsub.f32 %v3240_v51, %v3241_v59  ;;  %v3248_v1 = vadd.f32 %v3247_v61, %v3246_v52  ;;  %s6924_s2 = smov [#allocation21] }
 0x316   : >> { %4918 = vst [vmem:[%s6781_s18 + $0x30] sm:$0xff] %v1627_v54  ;;  %v3245_v2 = vsub.f32 %v3243_v56, %v3244_v62  ;;  %v3251_v4 = vadd.f32 %v3250_v63, %v3249_v57  ;;  %s6931_s18 = smov [#allocation22] }
 0x317   : >> { %5273 = vst [vmem:[%s6785_s21 + $0x30] sm:$0xff] %v3242_v0  ;;  %s6969_s21 = smov [#allocation13] }
 0x318   : >> { %5274 = vst [vmem:[%s6788_s3 + $0x30] sm:$0xff] %v3245_v2  ;;  %s6975_s3 = smov [#allocation14] }
 0x319   : >> { %5275 = vst [vmem:[%s6791_s22 + $0x30] sm:$0xff] %v3248_v1  ;;  %s6977_s22 = smov [#allocation15] }
 0x31a   : >> { %v4921_v6 = vld [vmem:[%s6804_s24 + $0x38] sm:$0xff]  ;;  %5276 = vst [vmem:[%s6794_s0 + $0x30] sm:$0xff] %v3251_v4  ;;  %s1694_s0 = smov [#allocation12] }
 0x31b   : >> { %v4922_v7 = vld [vmem:[%s6807_s26 + $0x38] sm:$0xff]  ;;  %v1650_v3 = vmul.f32 %v4921_v6, %v4919_v5  ;;  %v1656_v8 = vmul.f32 %v4921_v6, %v4920_v60 }
 0x31c   : >> { %v4923_v9 = vld [vmem:[%s6810_s27 + $0x38] sm:$0xff]  ;;  %v1653_v11 = vmul.f32 %v4922_v7, %v4919_v5  ;;  %v1659_v10 = vmul.f32 %v4922_v7, %v4920_v60 }
 0x31d   : >> { %v4924_v12 = vld [vmem:[%s6813_s28 + $0x38] sm:$0xff]  ;;  %v1651_v13 = vmul.f32 %v4923_v9, %v4920_v60  ;;  %v1657_v14 = vmul.f32 %v4923_v9, %v4919_v5 }
 0x31e   : >> { %v1654_v16 = vmul.f32 %v4924_v12, %v4920_v60  ;;  %v1660_v17 = vmul.f32 %v4924_v12, %v4919_v5  ;;  %v5279_v19 = vld [vmem:[%s6817_s1 + $0x38] sm:$0xff] }
 0x31f   : >> { %v1652_v20 = vsub.f32 %v1650_v3, %v1651_v13  ;;  %v1658_v21 = vadd.f32 %v1657_v14, %v1656_v8  ;;  %v5280_v22 = vld [vmem:[%s6820_s12 + $0x38] sm:$0xff]  ;;  %v3274_v23 = vmul.f32 %v5279_v19, %v5277_v15  ;;  %v3280_v24 = vmul.f32 %v5279_v19, %v5278_v18 }
 0x320   : >> { %v1655_v25 = vsub.f32 %v1653_v11, %v1654_v16  ;;  %v1661_v26 = vadd.f32 %v1660_v17, %v1659_v10  ;;  %v5281_v27 = vld [vmem:[%s6823_s13 + $0x38] sm:$0xff]  ;;  %v3277_v28 = vmul.f32 %v5280_v22, %v5277_v15  ;;  %v3283_v29 = vmul.f32 %v5280_v22, %v5278_v18 }
 0x321   : >> { %4927 = vst [vmem:[%s6810_s27 + $0x38] sm:$0xff] %v1658_v21  ;;  %v5282_v30 = vld [vmem:[%s6826_s14 + $0x38] sm:$0xff]  ;;  %v3275_v31 = vmul.f32 %v5281_v27, %v5278_v18  ;;  %v3281_v32 = vmul.f32 %v5281_v27, %v5277_v15  ;;  %s1724_s27 = smov [#allocation13] }
 0x322   : >> { %v3278_v33 = vmul.f32 %v5282_v30, %v5278_v18  ;;  %v3284_v34 = vmul.f32 %v5282_v30, %v5277_v15  ;;  %4925 = vst [vmem:[%s6804_s24 + $0x38] sm:$0xff] %v1652_v20  ;;  %s1698_s24 = smov [#allocation14] }
 0x323   : >> { %v3276_v35 = vsub.f32 %v3274_v23, %v3275_v31  ;;  %v3282_v36 = vadd.f32 %v3281_v32, %v3280_v24  ;;  %4926 = vst [vmem:[%s6807_s26 + $0x38] sm:$0xff] %v1655_v25  ;;  %s1722_s26 = smov [#allocation12] }
 0x324   : >> { %v3279_v37 = vsub.f32 %v3277_v28, %v3278_v33  ;;  %v3285_v40 = vadd.f32 %v3284_v34, %v3283_v29  ;;  %4928 = vst [vmem:[%s6813_s28 + $0x38] sm:$0xff] %v1661_v26  ;;  %s1726_s28 = smov [#allocation14] }
 0x325   : >> { %5283 = vst [vmem:[%s6817_s1 + $0x38] sm:$0xff] %v3276_v35  ;;  %s1752_s1 = smov [#allocation13] }
 0x326   : >> { %5284 = vst [vmem:[%s6820_s12 + $0x38] sm:$0xff] %v3279_v37  ;;  %s1754_s12 = smov [#allocation14] }
 0x327   : >> { %5285 = vst [vmem:[%s6823_s13 + $0x38] sm:$0xff] %v3282_v36  ;;  %s1756_s13 = smov [#allocation15] }
 0x328   : >> { %5286 = vst [vmem:[%s6826_s14 + $0x38] sm:$0xff] %v3285_v40  ;;  %s1778_s14 = smov [#allocation12] }
 0x32c   : >> { %v3292_v41 = vld [vmem:[%s6840_s15] ss:$0 sm:$0xff]  ;;  %v5288_v43 = vld [vmem:[%s6840_s15 + $0x7] ss:$0 sm:$0xff]  ;;  %v5289_v45 = vld [vmem:[%s6840_s15 + $0x7] sm:$0xfe] }
 0x32d   : >> { %v5287_v42 = vld [vmem:[%s6840_s15 - $0x1] sm:$0xfe]  ;;  %v5290_v46 = vld [vmem:[%s6840_s15 + $0xf] ss:$0 sm:$0xff]  ;;  %v5292_v47 = vld [vmem:[%s6840_s15 + $0xf] sm:$0xfe]  ;;  %v3310_v48 = vsel %vm2704_vm12, %v5288_v43, %v5289_v45 }
 0x32e   : >> { %v3299_v44 = vsel %vm2704_vm12, %v3292_v41, %v5287_v42  ;;  %v3321_v49 = vsel %vm2704_vm12, %v5290_v46, %v5292_v47  ;;  %v5293_v50 = vld [vmem:[%s6840_s15 + $0x17] ss:$0 sm:$0xff]  ;;  %v5295_v51 = vld [vmem:[%s6840_s15 + $0x17] sm:$0xfe]  ;;  %v5296_v52 = vld [vmem:[%s6840_s15 + $0x1f] ss:$0 sm:$0xff] }
 0x32f   : >> { %3302 = vst [vmem:[%s6840_s15] sm:$0xff] %v3299_v44  ;;  %v3332_v53 = vsel %vm2704_vm12, %v5293_v50, %v5295_v51  ;;  %v5298_v54 = vld [vmem:[%s6840_s15 + $0x1f] sm:$0xfe]  ;;  %v5299_v55 = vld [vmem:[%s6840_s15 + $0x27] ss:$0 sm:$0xff]  ;;  %v5301_v57 = vld [vmem:[%s6840_s15 + $0x27] sm:$0xfe] }
 0x330   : >> { %5291 = vst [vmem:[%s6840_s15 + $0x8] sm:$0xff] %v3310_v48  ;;  %v3343_v56 = vsel %vm2704_vm12, %v5296_v52, %v5298_v54  ;;  %v5302_v58 = vld [vmem:[%s6840_s15 + $0x2f] ss:$0 sm:$0xff]  ;;  %v3354_v59 = vsel %vm2704_vm12, %v5299_v55, %v5301_v57  ;;  %v5304_v61 = vld [vmem:[%s6840_s15 + $0x2f] sm:$0xfe]  ;;  %v1674_v57 = vld [vmem:[%s6962_s20] sm:$0xff] }
 0x331   : >> { %5294 = vst [vmem:[%s6840_s15 + $0x10] sm:$0xff] %v3321_v49  ;;  %v5305_v62 = vld [vmem:[%s6840_s15 + $0x37] ss:$0 sm:$0xff]  ;;  %v3365_v63 = vsel %vm2704_vm12, %v5302_v58, %v5304_v61  ;;  %v5307_v0 = vld [vmem:[%s6840_s15 + $0x37] sm:$0xfe] }
 0x332   : >> { %5297 = vst [vmem:[%s6840_s15 + $0x18] sm:$0xff] %v3332_v53  ;;  %v5308_v1 = vld [vmem:[%s6840_s15 + $0x3f] ss:$0 sm:$0xff]  ;;  %v3376_v2 = vsel %vm2704_vm12, %v5305_v62, %v5307_v0  ;;  %v3380_v4 = vld [vmem:[%s6864_s16] ss:$0 sm:$0xff] }
 0x333   : >> { %5300 = vst [vmem:[%s6840_s15 + $0x20] sm:$0xff] %v3343_v56  ;;  %v5311_v5 = vld [vmem:[%s6864_s16 + $0x39] sm:$0x7f]  ;;  %v5312_v6 = vld [vmem:[%s6864_s16 + $0x38] ss:$0 sm:$0xff]  ;;  %v1675_v62 = vld [vmem:[%s6969_s21] sm:$0xff] }
 0x334   : >> { %5303 = vst [vmem:[%s6840_s15 + $0x28] sm:$0xff] %v3354_v59  ;;  %v3389_v60 = vsel %vm2794_vm13, %v5308_v1, %v5311_v5  ;;  %v5314_v7 = vld [vmem:[%s6864_s16 + $0x31] sm:$0x7f]  ;;  %v5315_v8 = vld [vmem:[%s6864_s16 + $0x30] ss:$0 sm:$0xff] }
 0x335   : >> { %5306 = vst [vmem:[%s6840_s15 + $0x30] sm:$0xff] %v3365_v63  ;;  %v3398_v3 = vsel %vm2794_vm13, %v5312_v6, %v5314_v7  ;;  %v5317_v9 = vld [vmem:[%s6864_s16 + $0x29] sm:$0x7f]  ;;  %v5318_v10 = vld [vmem:[%s6864_s16 + $0x28] ss:$0 sm:$0xff]  ;;  %v1677_v6 = vld [vmem:[%s6977_s22] sm:$0xff] }
 0x336   : >> { %5309 = vst [vmem:[%s6840_s15 + $0x38] sm:$0xff] %v3376_v2  ;;  %v3407_v11 = vsel %vm2794_vm13, %v5315_v8, %v5317_v9  ;;  %v5320_v12 = vld [vmem:[%s6864_s16 + $0x21] sm:$0x7f]  ;;  %v5321_v14 = vld [vmem:[%s6864_s16 + $0x20] ss:$0 sm:$0xff] }
 0x337   : >> { %5310 = vst [vmem:[%s6840_s15 + $0x1] sm:$0x1] %v3380_v4  ;;  %v3416_v13 = vsel %vm2794_vm13, %v5318_v10, %v5320_v12  ;;  %v5323_v15 = vld [vmem:[%s6864_s16 + $0x19] sm:$0x7f]  ;;  %v5324_v17 = vld [vmem:[%s6864_s16 + $0x18] ss:$0 sm:$0xff] }
 0x338   : >> { %5313 = vst [vmem:[%s6864_s16 + $0x38] sm:$0xff] %v3389_v60  ;;  %v3425_v16 = vsel %vm2794_vm13, %v5321_v14, %v5323_v15  ;;  %v5326_v18 = vld [vmem:[%s6864_s16 + $0x11] sm:$0x7f]  ;;  %v5327_v20 = vld [vmem:[%s6864_s16 + $0x10] ss:$0 sm:$0xff]  ;;  %v1676_v2 = vld [vmem:[%s6975_s3] sm:$0xff] }
 0x339   : >> { %5316 = vst [vmem:[%s6864_s16 + $0x30] sm:$0xff] %v3398_v3  ;;  %v3434_v19 = vsel %vm2794_vm13, %v5324_v17, %v5326_v18  ;;  %v5329_v21 = vld [vmem:[%s6864_s16 + $0x9] sm:$0x7f]  ;;  %v5330_v23 = vld [vmem:[%s6864_s16 + $0x8] ss:$0 sm:$0xff]  ;;  %s1780_s15 = smov [#allocation13] }
 0x33a   : >> { %5319 = vst [vmem:[%s6864_s16 + $0x28] sm:$0xff] %v3407_v11  ;;  %v3443_v22 = vsel %vm2794_vm13, %v5327_v20, %v5329_v21  ;;  %v5332_v24 = vld [vmem:[%s6864_s16 + $0x1] sm:$0x7f]  ;;  %v3456_v26 = vld [vmem:[%s6907_s17] ss:$0 sm:$0xff] }
 0x33b   : >> { %5322 = vst [vmem:[%s6864_s16 + $0x20] sm:$0xff] %v3416_v13  ;;  %v3451_v25 = vsel %vm2794_vm13, %v5330_v23, %v5332_v24  ;;  %v5333_v27 = vld [vmem:[%s6907_s17 - $0x1] sm:$0xfe]  ;;  %v5334_v29 = vld [vmem:[%s6907_s17 + $0x7] ss:$0 sm:$0xff] }
 0x33c   : >> { %5325 = vst [vmem:[%s6864_s16 + $0x18] sm:$0xff] %v3425_v16  ;;  %v3463_v28 = vsel %vm2704_vm12, %v3456_v26, %v5333_v27  ;;  %v5335_v30 = vld [vmem:[%s6907_s17 + $0x7] sm:$0xfe]  ;;  %v5336_v32 = vld [vmem:[%s6907_s17 + $0xf] ss:$0 sm:$0xff] }
 0x33d   : >> { %5328 = vst [vmem:[%s6864_s16 + $0x10] sm:$0xff] %v3434_v19  ;;  %v3474_v31 = vsel %vm2704_vm12, %v5334_v29, %v5335_v30  ;;  %v5338_v33 = vld [vmem:[%s6907_s17 + $0xf] sm:$0xfe]  ;;  %v5339_v35 = vld [vmem:[%s6907_s17 + $0x17] ss:$0 sm:$0xff] }
 0x33e   : >> { %5331 = vst [vmem:[%s6864_s16 + $0x8] sm:$0xff] %v3443_v22  ;;  %v3485_v34 = vsel %vm2704_vm12, %v5336_v32, %v5338_v33  ;;  %v5341_v36 = vld [vmem:[%s6907_s17 + $0x17] sm:$0xfe]  ;;  %v5342_v37 = vld [vmem:[%s6907_s17 + $0x1f] ss:$0 sm:$0xff] }
 0x33f   : >> { %3453 = vst [vmem:[%s6864_s16] sm:$0xff] %v3451_v25  ;;  %v3496_v40 = vsel %vm2704_vm12, %v5339_v35, %v5341_v36  ;;  %v5344_v41 = vld [vmem:[%s6907_s17 + $0x1f] sm:$0xfe]  ;;  %v5345_v42 = vld [vmem:[%s6907_s17 + $0x27] ss:$0 sm:$0xff]  ;;  %v5347_v43 = vld [vmem:[%s6907_s17 + $0x27] sm:$0xfe] }
 0x340   : >> { %3466 = vst [vmem:[%s6907_s17] sm:$0xff] %v3463_v28  ;;  %v3507_v44 = vsel %vm2704_vm12, %v5342_v37, %v5344_v41  ;;  %v5348_v45 = vld [vmem:[%s6907_s17 + $0x2f] ss:$0 sm:$0xff]  ;;  %v5350_v46 = vld [vmem:[%s6907_s17 + $0x2f] sm:$0xfe]  ;;  %v3518_v47 = vsel %vm2704_vm12, %v5345_v42, %v5347_v43  ;;  %v5351_v48 = vld [vmem:[%s6907_s17 + $0x37] ss:$0 sm:$0xff] }
 0x341   : >> { %5337 = vst [vmem:[%s6907_s17 + $0x8] sm:$0xff] %v3474_v31  ;;  %v5353_v49 = vld [vmem:[%s6907_s17 + $0x37] sm:$0xfe]  ;;  %v3529_v50 = vsel %vm2704_vm12, %v5348_v45, %v5350_v46  ;;  %v5354_v51 = vld [vmem:[%s6907_s17 + $0x3f] ss:$0 sm:$0xff]  ;;  %s1782_s16 = smov [#allocation14] }
 0x342   : >> { %5340 = vst [vmem:[%s6907_s17 + $0x10] sm:$0xff] %v3485_v34  ;;  %v6980_v52 = vld [vmem:[%s6924_s2] ss:$0 sm:$0xff]  ;;  %v3540_v54 = vsel %vm2704_vm12, %v5351_v48, %v5353_v49  ;;  %v5357_v55 = vld [vmem:[%s6938_s19 + $0x39] sm:$0x7f]  ;;  %s1806_s2 = smov [#allocation12] }
 0x343   : >> { %5343 = vst [vmem:[%s6907_s17 + $0x18] sm:$0xff] %v3496_v40  ;;  %v6983_v53 = vld [vmem:[%s6931_s18] ss:$0 sm:$0xff]  ;;  %v5358_v56 = vld [vmem:[%s6938_s19 + $0x38] ss:$0 sm:$0xff]  ;;  %v3553_v63 = vsel %vm2794_vm13, %v5354_v51, %v5357_v55  ;;  %v1678_v12 = vmul.f32 %v1674_v57, %v6980_v52  ;;  %v1682_v18 = vmul.f32 %v1675_v62, %v6980_v52  ;;  %v1684_v21 = vmul.f32 %v1676_v2, %v6980_v52  ;;  %s1808_s18 = smov [#allocation13] }
 0x344   : >> { %5346 = vst [vmem:[%s6907_s17 + $0x20] sm:$0xff] %v3507_v44  ;;  %v3544_v58 = vld [vmem:[%s6938_s19] ss:$0 sm:$0xff]  ;;  %v5360_v59 = vld [vmem:[%s6938_s19 + $0x31] sm:$0x7f]  ;;  %v1679_v13 = vmul.f32 %v1675_v62, %v6983_v53  ;;  %v1681_v17 = vmul.f32 %v1674_v57, %v6983_v53  ;;  %v1685_v22 = vmul.f32 %v1677_v6, %v6983_v53  ;;  %v1687_v24 = vmul.f32 %v1676_v2, %v6983_v53 }
 0x345   : >> { %5349 = vst [vmem:[%s6907_s17 + $0x28] sm:$0xff] %v3518_v47  ;;  %v5361_v61 = vld [vmem:[%s6938_s19 + $0x30] ss:$0 sm:$0xff]  ;;  %v5363_v0 = vld [vmem:[%s6938_s19 + $0x29] sm:$0x7f]  ;;  %v3562_v4 = vsel %vm2794_vm13, %v5358_v56, %v5360_v59  ;;  %v1688_v25 = vmul.f32 %v1677_v6, %v6980_v52 }
 0x346   : >> { %5352 = vst [vmem:[%s6907_s17 + $0x30] sm:$0xff] %v3529_v50  ;;  %v5364_v1 = vld [vmem:[%s6938_s19 + $0x28] ss:$0 sm:$0xff]  ;;  %v5366_v5 = vld [vmem:[%s6938_s19 + $0x21] sm:$0x7f]  ;;  %v3571_v7 = vsel %vm2794_vm13, %v5361_v61, %v5363_v0  ;;  %v1680_v27 = vsub.f32 %v1678_v12, %v1679_v13  ;;  %v1683_v28 = vadd.f32 %v1682_v18, %v1681_v17  ;;  %v1686_v29 = vsub.f32 %v1684_v21, %v1685_v22 }
 0x347   : >> { %5355 = vst [vmem:[%s6907_s17 + $0x38] sm:$0xff] %v3540_v54  ;;  %v5367_v60 = vld [vmem:[%s6938_s19 + $0x20] ss:$0 sm:$0xff]  ;;  %v5369_v3 = vld [vmem:[%s6938_s19 + $0x19] sm:$0x7f]  ;;  %v3580_v9 = vsel %vm2794_vm13, %v5364_v1, %v5366_v5  ;;  %v1689_v30 = vadd.f32 %v1688_v25, %v1687_v24 }
 0x348   : >> { %5356 = vst [vmem:[%s6907_s17 + $0x1] sm:$0x1] %v3544_v58  ;;  %v5370_v8 = vld [vmem:[%s6938_s19 + $0x18] ss:$0 sm:$0xff]  ;;  %v5372_v11 = vld [vmem:[%s6938_s19 + $0x11] sm:$0x7f]  ;;  %v3589_v14 = vsel %vm2794_vm13, %v5367_v60, %v5369_v3 }
 0x349   : >> { %5359 = vst [vmem:[%s6938_s19 + $0x38] sm:$0xff] %v3553_v63  ;;  %v5373_v10 = vld [vmem:[%s6938_s19 + $0x10] ss:$0 sm:$0xff]  ;;  %v5375_v15 = vld [vmem:[%s6938_s19 + $0x9] sm:$0x7f]  ;;  %v3598_v19 = vsel %vm2794_vm13, %v5370_v8, %v5372_v11  ;;  %s1784_s17 = smov [#allocation15] }
 0x34a   : >> { %5362 = vst [vmem:[%s6938_s19 + $0x30] sm:$0xff] %v3562_v4  ;;  %v5376_v16 = vld [vmem:[%s6938_s19 + $0x8] ss:$0 sm:$0xff]  ;;  %v5378_v20 = vld [vmem:[%s6938_s19 + $0x1] sm:$0x7f]  ;;  %v3607_v23 = vsel %vm2794_vm13, %v5373_v10, %v5375_v15 }
 0x34b   : >> { %5365 = vst [vmem:[%s6938_s19 + $0x28] sm:$0xff] %v3571_v7  ;;  %v3615_v26 = vsel %vm2794_vm13, %v5376_v16, %v5378_v20 }
 0x34c   : >> { %5368 = vst [vmem:[%s6938_s19 + $0x20] sm:$0xff] %v3580_v9 }
 0x34d   : >> { %5371 = vst [vmem:[%s6938_s19 + $0x18] sm:$0xff] %v3589_v14 }
 0x34e   : >> { %5374 = vst [vmem:[%s6938_s19 + $0x10] sm:$0xff] %v3598_v19 }
 0x34f   : >> { %5377 = vst [vmem:[%s6938_s19 + $0x8] sm:$0xff] %v3607_v23 }
 0x350   : >> { %3617 = vst [vmem:[%s6938_s19] sm:$0xff] %v3615_v26  ;;  %s1810_s19 = smov [#allocation14] }
 0x351   : >> { %1690 = vst [vmem:[%s6962_s20] sm:$0xff] %v1680_v27  ;;  %s1812_s20 = smov [#allocation15] }
 0x352   : >> { %1691 = vst [vmem:[%s6969_s21] sm:$0xff] %v1683_v28  ;;  %s1834_s21 = smov [#allocation12] }
 0x353   : >> { %1692 = vst [vmem:[%s6975_s3] sm:$0xff] %v1686_v29  ;;  %s1836_s3 = smov [#allocation13] }
 0x354   : >> { %1693 = vst [vmem:[%s6977_s22] sm:$0xff] %v1689_v30  ;;  %s1838_s22 = smov [#allocation14] }
 0x358   : >> { %v4929_v31 = vld [vmem:[%s1694_s0 + $0x8] sm:$0xff] }
 0x359   : >> { %v4930_v32 = vld [vmem:[%s1696_s23 + $0x8] sm:$0xff]  ;;  %v1706_v33 = vmul.f32 %v4929_v31, %v6980_v52  ;;  %v1709_v34 = vmul.f32 %v4929_v31, %v6983_v53 }
 0x35a   : >> { %v1707_v35 = vmul.f32 %v4930_v32, %v6983_v53  ;;  %v1710_v36 = vmul.f32 %v4930_v32, %v6980_v52  ;;  %v4931_v37 = vld [vmem:[%s1698_s24 + $0x8] sm:$0xff] }
 0x35b   : >> { %v4932_v40 = vld [vmem:[%s1700_s25 + $0x8] sm:$0xff]  ;;  %v1712_v41 = vmul.f32 %v4931_v37, %v6980_v52  ;;  %v1715_v42 = vmul.f32 %v4931_v37, %v6983_v53 }
 0x35c   : >> { %v1708_v43 = vsub.f32 %v1706_v33, %v1707_v35  ;;  %v1711_v44 = vadd.f32 %v1710_v36, %v1709_v34  ;;  %v1713_v45 = vmul.f32 %v4932_v40, %v6983_v53  ;;  %v1716_v46 = vmul.f32 %v4932_v40, %v6980_v52 }
 0x35e   : >> { %4933 = vst [vmem:[%s1694_s0 + $0x8] sm:$0xff] %v1708_v43  ;;  %v1714_v47 = vsub.f32 %v1712_v41, %v1713_v45  ;;  %v1717_v48 = vadd.f32 %v1716_v46, %v1715_v42  ;;  %s1840_s0 = smov [#allocation15] }
 0x35f   : >> { %4934 = vst [vmem:[%s1696_s23 + $0x8] sm:$0xff] %v1711_v44  ;;  %s1862_s23 = smov [#allocation12] }
 0x360   : >> { %4935 = vst [vmem:[%s1698_s24 + $0x8] sm:$0xff] %v1714_v47  ;;  %s1864_s24 = smov [#allocation13] }
 0x361   : >> { %4936 = vst [vmem:[%s1700_s25 + $0x8] sm:$0xff] %v1717_v48  ;;  %s1866_s25 = smov [#allocation14] }
 0x365   : >> { %v4937_v49 = vld [vmem:[%s1722_s26 + $0x10] sm:$0xff] }
 0x366   : >> { %v4938_v50 = vld [vmem:[%s1724_s27 + $0x10] sm:$0xff]  ;;  %v1734_v51 = vmul.f32 %v4937_v49, %v6980_v52  ;;  %v1737_v54 = vmul.f32 %v4937_v49, %v6983_v53 }
 0x367   : >> { %v1735_v55 = vmul.f32 %v4938_v50, %v6983_v53  ;;  %v1738_v56 = vmul.f32 %v4938_v50, %v6980_v52  ;;  %v4939_v57 = vld [vmem:[%s1726_s28 + $0x10] sm:$0xff] }
 0x368   : >> { %v4940_v58 = vld [vmem:[%s1728_s29 + $0x10] sm:$0xff]  ;;  %v1740_v59 = vmul.f32 %v4939_v57, %v6980_v52  ;;  %v1743_v61 = vmul.f32 %v4939_v57, %v6983_v53 }
 0x369   : >> { %v1736_v62 = vsub.f32 %v1734_v51, %v1735_v55  ;;  %v1739_v63 = vadd.f32 %v1738_v56, %v1737_v54  ;;  %v1741_v0 = vmul.f32 %v4940_v58, %v6983_v53  ;;  %v1744_v1 = vmul.f32 %v4940_v58, %v6980_v52 }
 0x36b   : >> { %4941 = vst [vmem:[%s1722_s26 + $0x10] sm:$0xff] %v1736_v62  ;;  %v1742_v2 = vsub.f32 %v1740_v59, %v1741_v0  ;;  %v1745_v4 = vadd.f32 %v1744_v1, %v1743_v61  ;;  %s1868_s26 = smov [#allocation15] }
 0x36c   : >> { %4942 = vst [vmem:[%s1724_s27 + $0x10] sm:$0xff] %v1739_v63  ;;  %s7107_s27 = smov [#allocation13] }
 0x36d   : >> { %4943 = vst [vmem:[%s1726_s28 + $0x10] sm:$0xff] %v1742_v2  ;;  %s7109_s28 = smov [#allocation12] }
 0x36e   : >> { %4944 = vst [vmem:[%s1728_s29 + $0x10] sm:$0xff] %v1745_v4  ;;  %s1891_s29 = smov [#allocation19] }
 0x372   : >> { %v4945_v5 = vld [vmem:[%s1750_s30 + $0x18] sm:$0xff] }
 0x373   : >> { %v4946_v60 = vld [vmem:[%s1752_s1 + $0x18] sm:$0xff]  ;;  %v1762_v6 = vmul.f32 %v4945_v5, %v6980_v52  ;;  %v1765_v7 = vmul.f32 %v4945_v5, %v6983_v53 }
 0x374   : >> { %v1763_v3 = vmul.f32 %v4946_v60, %v6983_v53  ;;  %v1766_v8 = vmul.f32 %v4946_v60, %v6980_v52  ;;  %v4947_v9 = vld [vmem:[%s1754_s12 + $0x18] sm:$0xff] }
 0x375   : >> { %v4948_v11 = vld [vmem:[%s1756_s13 + $0x18] sm:$0xff]  ;;  %v1768_v10 = vmul.f32 %v4947_v9, %v6980_v52  ;;  %v1771_v12 = vmul.f32 %v4947_v9, %v6983_v53 }
 0x376   : >> { %v1764_v13 = vsub.f32 %v1762_v6, %v1763_v3  ;;  %v1767_v14 = vadd.f32 %v1766_v8, %v1765_v7  ;;  %v1769_v15 = vmul.f32 %v4948_v11, %v6983_v53  ;;  %v1772_v16 = vmul.f32 %v4948_v11, %v6980_v52 }
 0x378   : >> { %4949 = vst [vmem:[%s1750_s30 + $0x18] sm:$0xff] %v1764_v13  ;;  %v1770_v17 = vsub.f32 %v1768_v10, %v1769_v15  ;;  %v1773_v18 = vadd.f32 %v1772_v16, %v1771_v12  ;;  %s7147_s30 = smov [#allocation15] }
 0x379   : >> { %4950 = vst [vmem:[%s1752_s1 + $0x18] sm:$0xff] %v1767_v14  ;;  %s2086_s1 = smov [#allocation20] }
 0x37a   : >> { %4951 = vst [vmem:[%s1754_s12 + $0x18] sm:$0xff] %v1770_v17  ;;  %s7174_s12 = smov [#allocation13] }
 0x37b   : >> { %4952 = vst [vmem:[%s1756_s13 + $0x18] sm:$0xff] %v1773_v18  ;;  %s8018_s13 = smov 127  }
 0x37f   : >> { %v4953_v19 = vld [vmem:[%s1778_s14 + $0x20] sm:$0xff] }
 0x380   : >> { %v4954_v20 = vld [vmem:[%s1780_s15 + $0x20] sm:$0xff]  ;;  %v1790_v21 = vmul.f32 %v4953_v19, %v6980_v52  ;;  %v1793_v22 = vmul.f32 %v4953_v19, %v6983_v53 }
 0x381   : >> { %v1791_v23 = vmul.f32 %v4954_v20, %v6983_v53  ;;  %v1794_v24 = vmul.f32 %v4954_v20, %v6980_v52  ;;  %v4955_v25 = vld [vmem:[%s1782_s16 + $0x20] sm:$0xff] }
 0x382   : >> { %v4956_v26 = vld [vmem:[%s1784_s17 + $0x20] sm:$0xff]  ;;  %v1796_v27 = vmul.f32 %v4955_v25, %v6980_v52  ;;  %v1799_v28 = vmul.f32 %v4955_v25, %v6983_v53  ;;  %v1991_v25 = vadd.s32 24, %v1967_v38 }
 0x383   : >> { %v1792_v29 = vsub.f32 %v1790_v21, %v1791_v23  ;;  %v1795_v30 = vadd.f32 %v1794_v24, %v1793_v22  ;;  %v1797_v31 = vmul.f32 %v4956_v26, %v6983_v53  ;;  %v1800_v32 = vmul.f32 %v4956_v26, %v6980_v52 }
 0x384   : >> { %v1977_v23 = vadd.s32 8, %v1967_v38  ;;  %v1984_v24 = vadd.s32 16, %v1967_v38  ;;  %v1998_v26 = vadd.s32 32, %v1967_v38  ;;  %v1897_v38 = vmov %v6323_v38 }
 0x385   : >> { %4957 = vst [vmem:[%s1778_s14 + $0x20] sm:$0xff] %v1792_v29  ;;  %v1798_v33 = vsub.f32 %v1796_v27, %v1797_v31  ;;  %v1801_v34 = vadd.f32 %v1800_v32, %v1799_v28  ;;  %vm1992_vm2 = vcmp.eq.s32.totalorder %v1991_v25, %v1964_v39  ;;  %v2019_v27 = vadd.s32 56, %v1967_v38  ;;  %s8023_s14 = smov 1  }
 0x386   : >> { %4958 = vst [vmem:[%s1780_s15 + $0x20] sm:$0xff] %v1795_v30  ;;  %vm1978_vm15 = vcmp.eq.s32.totalorder %v1977_v23, %v1964_v39  ;;  %vm1985_vm1 = vcmp.eq.s32.totalorder %v1984_v24, %v1964_v39  ;;  %v7112_v39 = vmov %v6325_v39  ;;  %v1909_v28 = vadd.s32 8, %v1897_v38  ;;  %s7217_s15 = smov [#allocation14] }
 0x387   : >> { %4959 = vst [vmem:[%s1782_s16 + $0x20] sm:$0xff] %v1798_v33  ;;  %vm1999_vm3 = vcmp.eq.s32.totalorder %v1998_v26, %v1964_v39  ;;  %vm2020_vm6 = vcmp.eq.s32.totalorder %v2019_v27, %v1964_v39  ;;  %vm1902_vm7 = vcmp.eq.s32.totalorder %v1897_v38, %v7112_v39  ;;  %s7225_s16 = smov [#allocation12] }
 0x388   : >> { %4960 = vst [vmem:[%s1784_s17 + $0x20] sm:$0xff] %v1801_v34  ;;  %vm1910_vm8 = vcmp.eq.s32.totalorder %v1909_v28, %v7112_v39  ;;  %s7227_s17 = smov [#allocation13] }
 0x38c   : >> { %v4961_v35 = vld [vmem:[%s1806_s2 + $0x28] sm:$0xff] }
 0x38d   : >> { %v4962_v36 = vld [vmem:[%s1808_s18 + $0x28] sm:$0xff]  ;;  %v1818_v37 = vmul.f32 %v4961_v35, %v6980_v52  ;;  %v1821_v40 = vmul.f32 %v4961_v35, %v6983_v53 }
 0x38e   : >> { %v1819_v41 = vmul.f32 %v4962_v36, %v6983_v53  ;;  %v1822_v42 = vmul.f32 %v4962_v36, %v6980_v52  ;;  %v4963_v43 = vld [vmem:[%s1810_s19 + $0x28] sm:$0xff] }
 0x38f   : >> { %v4964_v44 = vld [vmem:[%s1812_s20 + $0x28] sm:$0xff]  ;;  %v1824_v45 = vmul.f32 %v4963_v43, %v6980_v52  ;;  %v1827_v46 = vmul.f32 %v4963_v43, %v6983_v53  ;;  %v1925_v43 = vadd.s32 24, %v1897_v38 }
 0x390   : >> { %v1820_v47 = vsub.f32 %v1818_v37, %v1819_v41  ;;  %v1823_v48 = vadd.f32 %v1822_v42, %v1821_v40  ;;  %v1825_v49 = vmul.f32 %v4964_v44, %v6983_v53  ;;  %v1828_v50 = vmul.f32 %v4964_v44, %v6980_v52 }
 0x391   : >> { %v1917_v40 = vadd.s32 16, %v1897_v38  ;;  %vm1926_vm10 = vcmp.eq.s32.totalorder %v1925_v43, %v7112_v39 }
 0x392   : >> { %4965 = vst [vmem:[%s1806_s2 + $0x28] sm:$0xff] %v1820_v47  ;;  %v1826_v51 = vsub.f32 %v1824_v45, %v1825_v49  ;;  %v1829_v54 = vadd.f32 %v1828_v50, %v1827_v46  ;;  %v1898_v46 = vld [vmem:[%s1891_s29] ss:$0 sm:$0xff]  ;;  %v1933_v47 = vadd.s32 32, %v1897_v38  ;;  %v1941_v50 = vadd.s32 40, %v1897_v38  ;;  %s7234_s2 = smov [#allocation12] }
 0x393   : >> { %4966 = vst [vmem:[%s1808_s18 + $0x28] sm:$0xff] %v1823_v48  ;;  %vm1918_vm9 = vcmp.eq.s32.totalorder %v1917_v40, %v7112_v39  ;;  %s7265_s18 = smov [#allocation13]  ;;  %s7347_s29 = smov [#allocation14] }
 0x394   : >> { %4967 = vst [vmem:[%s1810_s19 + $0x28] sm:$0xff] %v1826_v51  ;;  %vm1934_vm11 = vcmp.eq.s32.totalorder %v1933_v47, %v7112_v39  ;;  %s7269_s19 = smov [#allocation12] }
 0x395   : >> { %4968 = vst [vmem:[%s1812_s20 + $0x28] sm:$0xff] %v1829_v54  ;;  %s7285_s20 = smov [#allocation13] }
 0x399   : >> { %v4969_v55 = vld [vmem:[%s1834_s21 + $0x30] sm:$0xff] }
 0x39a   : >> { %v4970_v56 = vld [vmem:[%s1836_s3 + $0x30] sm:$0xff]  ;;  %v1846_v57 = vmul.f32 %v4969_v55, %v6980_v52  ;;  %v1849_v58 = vmul.f32 %v4969_v55, %v6983_v53  ;;  %v1949_v55 = vadd.s32 48, %v1897_v38 }
 0x39b   : >> { %v1847_v59 = vmul.f32 %v4970_v56, %v6983_v53  ;;  %v1850_v61 = vmul.f32 %v4970_v56, %v6980_v52  ;;  %v4971_v62 = vld [vmem:[%s1838_s22 + $0x30] sm:$0xff] }
 0x39c   : >> { %v4972_v63 = vld [vmem:[%s1840_s0 + $0x30] sm:$0xff]  ;;  %v1852_v0 = vmul.f32 %v4971_v62, %v6980_v52  ;;  %v1855_v1 = vmul.f32 %v4971_v62, %v6983_v53 }
 0x39d   : >> { %v1848_v2 = vsub.f32 %v1846_v57, %v1847_v59  ;;  %v1851_v4 = vadd.f32 %v1850_v61, %v1849_v58  ;;  %v1853_v5 = vmul.f32 %v4972_v63, %v6983_v53  ;;  %v1856_v60 = vmul.f32 %v4972_v63, %v6980_v52 }
 0x39e   : >> { %v1957_v58 = vadd.s32 56, %v1897_v38 }
 0x39f   : >> { %4973 = vst [vmem:[%s1834_s21 + $0x30] sm:$0xff] %v1848_v2  ;;  %v1854_v6 = vsub.f32 %v1852_v0, %v1853_v5  ;;  %v1857_v7 = vadd.f32 %v1856_v60, %v1855_v1  ;;  %s7287_s21 = smov [#allocation12] }
 0x3a0   : >> { %4974 = vst [vmem:[%s1836_s3 + $0x30] sm:$0xff] %v1851_v4  ;;  %s7297_s3 = smov [#allocation13] }
 0x3a1   : >> { %4975 = vst [vmem:[%s1838_s22 + $0x30] sm:$0xff] %v1854_v6  ;;  %s7299_s22 = smov [#allocation12] }
 0x3a2   : >> { %4976 = vst [vmem:[%s1840_s0 + $0x30] sm:$0xff] %v1857_v7  ;;  %s7309_s0 = smov [#allocation13] }
 0x3a6   : >> { %v4977_v3 = vld [vmem:[%s1862_s23 + $0x38] sm:$0xff] }
 0x3a7   : >> { %v4978_v8 = vld [vmem:[%s1864_s24 + $0x38] sm:$0xff]  ;;  %v1877_v9 = vmul.f32 %v4977_v3, %v6983_v53  ;;  %v1874_v11 = vmul.f32 %v4977_v3, %v6980_v52 }
 0x3a8   : >> { %v1875_v10 = vmul.f32 %v4978_v8, %v6983_v53  ;;  %v1878_v12 = vmul.f32 %v4978_v8, %v6980_v52  ;;  %v4979_v13 = vld [vmem:[%s1866_s25 + $0x38] sm:$0xff]  ;;  %v7166_v8 = vld [vmem:[%s2086_s1] ss:$0 sm:$0xff]  ;;  %s7359_s1 = smov [#allocation14] }
 0x3a9   : >> { %v4980_v14 = vld [vmem:[%s1868_s26 + $0x38] sm:$0xff]  ;;  %v1883_v15 = vmul.f32 %v4979_v13, %v6983_v53  ;;  %v1880_v16 = vmul.f32 %v4979_v13, %v6980_v52 }
 0x3aa   : >> { %v1879_v17 = vadd.f32 %v1878_v12, %v1877_v9  ;;  %v1876_v18 = vsub.f32 %v1874_v11, %v1875_v10  ;;  %v1884_v19 = vmul.f32 %v4980_v14, %v6980_v52  ;;  %v1881_v20 = vmul.f32 %v4980_v14, %v6983_v53 }
 0x3ab   : >> { %v2005_v52 = vadd.s32 40, %v1967_v38  ;;  %v2012_v53 = vadd.s32 48, %v1967_v38  ;;  %v2092_v38 = vmov %v6323_v38 }
 0x3ac   : >> { %4982 = vst [vmem:[%s1864_s24 + $0x38] sm:$0xff] %v1879_v17  ;;  %v1885_v21 = vadd.f32 %v1884_v19, %v1883_v15  ;;  %v1882_v22 = vsub.f32 %v1880_v16, %v1881_v20  ;;  %v2104_v0 = vadd.s32 8, %v2092_v38  ;;  %v2112_v4 = vadd.s32 16, %v2092_v38  ;;  %s7321_s24 = smov [#allocation13] }
 0x3ad   : >> { %4981 = vst [vmem:[%s1862_s23 + $0x38] sm:$0xff] %v1876_v18  ;;  %vm2006_vm4 = vcmp.eq.s32.totalorder %v2005_v52, %v1964_v39  ;;  %vm2013_vm5 = vcmp.eq.s32.totalorder %v2012_v53, %v1964_v39  ;;  %v2120_v6 = vadd.s32 24, %v2092_v38  ;;  %v2128_v9 = vadd.s32 32, %v2092_v38  ;;  %s7311_s23 = smov [#allocation12] }
 0x3ae   : >> { %4984 = vst [vmem:[%s1868_s26 + $0x38] sm:$0xff] %v1885_v21  ;;  %v2136_v12 = vadd.s32 40, %v2092_v38  ;;  %v2144_v15 = vadd.s32 48, %v2092_v38  ;;  %v2152_v23 = vadd.s32 56, %v2092_v38  ;;  %s7333_s26 = smov [#allocation13] }
 0x3af   : >> { %4983 = vst [vmem:[%s1866_s25 + $0x38] sm:$0xff] %v1882_v22  ;;  %s7323_s25 = smov [#allocation12] }
 0x3b3   : >> { %v1968_v29 = vld [vmem:[%s7107_s27] sm:$0xff]  ;;  %v4999_v30 = vld [vmem:[%s7107_s27 + $0x8] sm:$0xff]  ;;  %v5001_v31 = vld [vmem:[%s7107_s27 + $0x10] sm:$0xff] }
 0x3b4   : >> { %v1972_v32 = vsel %vm1971_vm14, 0.0, %v1968_v29  ;;  %v1979_v33 = vsel %vm1978_vm15, 0.0, %v4999_v30  ;;  %v1986_v34 = vsel %vm1985_vm1, 0.0, %v5001_v31  ;;  %v5003_v35 = vld [vmem:[%s7107_s27 + $0x18] sm:$0xff]  ;;  %v5005_v36 = vld [vmem:[%s7107_s27 + $0x20] sm:$0xff]  ;;  %v5007_v37 = vld [vmem:[%s7107_s27 + $0x28] sm:$0xff]  ;;  %vm1942_vm14 = vcmp.eq.s32.totalorder %v1941_v50, %v7112_v39 }
 0x3b5   : >> { %1973 = vst [vmem:[%s7107_s27] sm:$0xff] %v1972_v32  ;;  %v1993_v41 = vsel %vm1992_vm2, 0.0, %v5003_v35  ;;  %v5009_v42 = vld [vmem:[%s7107_s27 + $0x30] sm:$0xff]  ;;  %v2000_v44 = vsel %vm1999_vm3, 0.0, %v5005_v36  ;;  %v5011_v45 = vld [vmem:[%s7107_s27 + $0x38] sm:$0xff]  ;;  %v2007_v48 = vsel %vm2006_vm4, 0.0, %v5007_v37  ;;  %v1899_v49 = vld [vmem:[%s7109_s28] sm:$0xff]  ;;  %v7150_v39 = vmov %v6325_v39 }
 0x3b6   : >> { %5000 = vst [vmem:[%s7107_s27 + $0x8] sm:$0xff] %v1979_v33  ;;  %v2014_v51 = vsel %vm2013_vm5, 0.0, %v5009_v42  ;;  %v4985_v54 = vld [vmem:[%s7109_s28 + $0x8] sm:$0xff]  ;;  %v2021_v56 = vsel %vm2020_vm6, 0.0, %v5011_v45  ;;  %v4987_v57 = vld [vmem:[%s7109_s28 + $0x10] sm:$0xff]  ;;  %v4989_v59 = vld [vmem:[%s7109_s28 + $0x18] sm:$0xff]  ;;  %v1903_v61 = vsel %vm1902_vm7, %v1898_v46, %v1899_v49  ;;  %vm1950_vm15 = vcmp.eq.s32.totalorder %v1949_v55, %v7112_v39 }
 0x3b7   : >> { %5002 = vst [vmem:[%s7107_s27 + $0x10] sm:$0xff] %v1986_v34  ;;  %v4991_v62 = vld [vmem:[%s7109_s28 + $0x20] sm:$0xff]  ;;  %v1911_v63 = vsel %vm1910_vm8, %v1898_v46, %v4985_v54  ;;  %v4993_v1 = vld [vmem:[%s7109_s28 + $0x28] sm:$0xff]  ;;  %v1919_v2 = vsel %vm1918_vm9, %v1898_v46, %v4987_v57  ;;  %v4995_v5 = vld [vmem:[%s7109_s28 + $0x30] sm:$0xff]  ;;  %v1927_v60 = vsel %vm1926_vm10, %v1898_v46, %v4989_v59  ;;  %vm1958_vm1 = vcmp.eq.s32.totalorder %v1957_v58, %v7112_v39 }
 0x3b8   : >> { %5004 = vst [vmem:[%s7107_s27 + $0x18] sm:$0xff] %v1993_v41  ;;  %v4997_v7 = vld [vmem:[%s7109_s28 + $0x38] sm:$0xff]  ;;  %v1935_v3 = vsel %vm1934_vm11, %v1898_v46, %v4991_v62  ;;  %vm2097_vm2 = vcmp.eq.s32.totalorder %v2092_v38, %v7150_v39  ;;  %v1943_v11 = vsel %vm1942_vm14, %v1898_v46, %v4993_v1  ;;  %v2094_v10 = vld [vmem:[%s7147_s30] sm:$0xff]  ;;  %vm2105_vm3 = vcmp.eq.s32.totalorder %v2104_v0, %v7150_v39  ;;  %v5027_v14 = vld [vmem:[%s7147_s30 + $0x8] sm:$0xff] }
 0x3b9   : >> { %5006 = vst [vmem:[%s7107_s27 + $0x20] sm:$0xff] %v2000_v44  ;;  %v1951_v13 = vsel %vm1950_vm15, %v1898_v46, %v4995_v5  ;;  %vm2113_vm4 = vcmp.eq.s32.totalorder %v2112_v4, %v7150_v39  ;;  %v1959_v16 = vsel %vm1958_vm1, %v1898_v46, %v4997_v7  ;;  %v5029_v17 = vld [vmem:[%s7147_s30 + $0x10] sm:$0xff]  ;;  %vm2121_vm5 = vcmp.eq.s32.totalorder %v2120_v6, %v7150_v39  ;;  %v5031_v19 = vld [vmem:[%s7147_s30 + $0x18] sm:$0xff]  ;;  %v5033_v22 = vld [vmem:[%s7147_s30 + $0x20] sm:$0xff] }
 0x3ba   : >> { %5008 = vst [vmem:[%s7107_s27 + $0x28] sm:$0xff] %v2007_v48  ;;  %v2098_v18 = vsel %vm2097_vm2, %v7166_v8, %v2094_v10  ;;  %vm2129_vm6 = vcmp.eq.s32.totalorder %v2128_v9, %v7150_v39  ;;  %v2106_v21 = vsel %vm2105_vm3, %v7166_v8, %v5027_v14  ;;  %v2029_v38 = vmov %v6323_v38  ;;  %v5035_v25 = vld [vmem:[%s7147_s30 + $0x28] sm:$0xff]  ;;  %v5037_v52 = vld [vmem:[%s7147_s30 + $0x30] sm:$0xff]  ;;  %v5039_v31 = vld [vmem:[%s7147_s30 + $0x38] sm:$0xff] }
 0x3bb   : >> { %5010 = vst [vmem:[%s7107_s27 + $0x30] sm:$0xff] %v2014_v51  ;;  %vm2137_vm7 = vcmp.eq.s32.totalorder %v2136_v12, %v7150_v39  ;;  %v2114_v24 = vsel %vm2113_vm4, %v7166_v8, %v5029_v17  ;;  %vm2145_vm8 = vcmp.eq.s32.totalorder %v2144_v15, %v7150_v39  ;;  %v2122_v26 = vsel %vm2121_vm5, %v7166_v8, %v5031_v19  ;;  %v2030_v33 = vld [vmem:[%s7217_s15] sm:$0xff]  ;;  %v5013_v35 = vld [vmem:[%s7217_s15 + $0x8] sm:$0xff]  ;;  %v5015_v42 = vld [vmem:[%s7217_s15 + $0x10] sm:$0xff] }
 0x3bc   : >> { %5012 = vst [vmem:[%s7107_s27 + $0x38] sm:$0xff] %v2021_v56  ;;  %v2130_v53 = vsel %vm2129_vm6, %v7166_v8, %v5033_v22  ;;  %v2026_v39 = vmov %v6325_v39  ;;  %v2039_v27 = vadd.s32 8, %v2029_v38  ;;  %v2138_v28 = vsel %vm2137_vm7, %v7166_v8, %v5035_v25  ;;  %v5017_v46 = vld [vmem:[%s7217_s15 + $0x18] sm:$0xff]  ;;  %v5019_v49 = vld [vmem:[%s7217_s15 + $0x20] sm:$0xff]  ;;  %v5021_v51 = vld [vmem:[%s7217_s15 + $0x28] sm:$0xff]  ;;  %s7335_s27 = smov [#allocation12] }
 0x3bd   : >> { %1904 = vst [vmem:[%s7109_s28] sm:$0xff] %v1903_v61  ;;  %v2046_v29 = vadd.s32 16, %v2029_v38  ;;  %vm2153_vm9 = vcmp.eq.s32.totalorder %v2152_v23, %v7150_v39  ;;  %v2146_v30 = vsel %vm2145_vm8, %v7166_v8, %v5037_v52  ;;  %v2053_v32 = vadd.s32 24, %v2029_v38  ;;  %v5023_v55 = vld [vmem:[%s7217_s15 + $0x30] sm:$0xff]  ;;  %v5025_v57 = vld [vmem:[%s7217_s15 + $0x38] sm:$0xff] }
 0x3be   : >> { %4986 = vst [vmem:[%s7109_s28 + $0x8] sm:$0xff] %v1911_v63  ;;  %vm2033_vm10 = vcmp.eq.s32.totalorder %v2029_v38, %v2026_v39  ;;  %v2060_v34 = vadd.s32 32, %v2029_v38  ;;  %vm2040_vm11 = vcmp.eq.s32.totalorder %v2039_v27, %v2026_v39  ;;  %v2067_v36 = vadd.s32 40, %v2029_v38 }
 0x3bf   : >> { %4988 = vst [vmem:[%s7109_s28 + $0x10] sm:$0xff] %v1919_v2  ;;  %v2154_v41 = vsel %vm2153_vm9, %v7166_v8, %v5039_v31  ;;  %vm2047_vm14 = vcmp.eq.s32.totalorder %v2046_v29, %v2026_v39  ;;  %v2074_v43 = vadd.s32 48, %v2029_v38  ;;  %v2034_v45 = vsel %vm2033_vm10, 0.0, %v2030_v33 }
 0x3c0   : >> { %4990 = vst [vmem:[%s7109_s28 + $0x18] sm:$0xff] %v1927_v60  ;;  %vm2054_vm15 = vcmp.eq.s32.totalorder %v2053_v32, %v2026_v39  ;;  %v2081_v47 = vadd.s32 56, %v2029_v38  ;;  %v2041_v48 = vsel %vm2040_vm11, 0.0, %v5013_v35  ;;  %vm2061_vm1 = vcmp.eq.s32.totalorder %v2060_v34, %v2026_v39 }
 0x3c1   : >> { %4992 = vst [vmem:[%s7109_s28 + $0x20] sm:$0xff] %v1935_v3  ;;  %v2048_v50 = vsel %vm2047_vm14, 0.0, %v5015_v42  ;;  %vm2068_vm2 = vcmp.eq.s32.totalorder %v2067_v36, %v2026_v39  ;;  %v2055_v54 = vsel %vm2054_vm15, 0.0, %v5017_v46  ;;  %vm2075_vm3 = vcmp.eq.s32.totalorder %v2074_v43, %v2026_v39 }
 0x3c2   : >> { %4994 = vst [vmem:[%s7109_s28 + $0x28] sm:$0xff] %v1943_v11  ;;  %v2062_v56 = vsel %vm2061_vm1, 0.0, %v5019_v49  ;;  %vm2082_vm4 = vcmp.eq.s32.totalorder %v2081_v47, %v2026_v39  ;;  %v2069_v58 = vsel %vm2068_vm2, 0.0, %v5021_v51  ;;  %v2076_v59 = vsel %vm2075_vm3, 0.0, %v5023_v55 }
 0x3c3   : >> { %v2179_v20 = vld [vmem:[%s7174_s12] sm:$0xff]  ;;  %4996 = vst [vmem:[%s7109_s28 + $0x30] sm:$0xff] %v1951_v13  ;;  %v5044_v40 = vld [vmem:[%s7227_s17 + $0x8] sm:$0xff]  ;;  %v5048_v61 = vld [vmem:[%s7265_s18 + $0x10] sm:$0xff]  ;;  %v2083_v62 = vsel %vm2082_vm4, 0.0, %v5025_v57  ;;  %vm2167_vm5 = vcmp.eq.s32.totalorder %v6325_v39, 0 }
 0x3c4   : >> { %2180 = vrot.lane.b32.xlu0 %v2179_v20, %s8018_s13  ;;  %2159 = vrot.lane.b32.xlu1 %v2179_v20, %s8023_s14  ;;  %4998 = vst [vmem:[%s7109_s28 + $0x38] sm:$0xff] %v1959_v16  ;;  %v5052_v0 = vld [vmem:[%s7285_s20 + $0x18] sm:$0xff]  ;;  %s7345_s28 = smov [#allocation15]  ;;  %vm2184_vm6 = vcmp.eq.s32.totalorder %v6325_v39, 63  ;;  %vm2171_vm7 = vcmp.eq.s32.totalorder %v6325_v39, 1 }
 0x3c5   : >> { %2099 = vst [vmem:[%s7147_s30] sm:$0xff] %v2098_v18  ;;  %v5056_v2 = vld [vmem:[%s7297_s3 + $0x20] sm:$0xff]  ;;  %v5060_v5 = vld [vmem:[%s7309_s0 + $0x28] sm:$0xff]  ;;  %v5064_v6 = vld [vmem:[%s7321_s24 + $0x30] sm:$0xff] }
 0x3c6   : >> { %5028 = vst [vmem:[%s7147_s30 + $0x8] sm:$0xff] %v2106_v21  ;;  %v5068_v3 = vld [vmem:[%s7333_s26 + $0x38] sm:$0xff] }
 0x3c7   : >> { %5030 = vst [vmem:[%s7147_s30 + $0x10] sm:$0xff] %v2114_v24 }
 0x3c8   : >> { %5032 = vst [vmem:[%s7147_s30 + $0x18] sm:$0xff] %v2122_v26 }
 0x3c9   : >> { %5034 = vst [vmem:[%s7147_s30 + $0x20] sm:$0xff] %v2130_v53 }
 0x3ca   : >> { %5036 = vst [vmem:[%s7147_s30 + $0x28] sm:$0xff] %v2138_v28 }
 0x3cb   : >> { %v7241_v37 = vld [vmem:[%s7225_s16] sm:$0xff]  ;;  %5038 = vst [vmem:[%s7147_s30 + $0x30] sm:$0xff] %v2146_v30  ;;  %v7253_v44 = vld [vmem:[%s7234_s2 + $0x8] sm:$0xff]  ;;  %v7278_v63 = vld [vmem:[%s7269_s19 + $0x10] sm:$0xff] }
 0x3cc   : >> { %2163 = vrot.lane.b32.xlu2 %v7241_v37, %s8023_s14  ;;  %2212 = vrot.lane.b32.xlu0 %v5044_v40, %s8018_s13  ;;  %5040 = vst [vmem:[%s7147_s30 + $0x38] sm:$0xff] %v2154_v41  ;;  %v7293_v1 = vld [vmem:[%s7287_s21 + $0x18] sm:$0xff]  ;;  %s7357_s30 = smov [#allocation15] }
 0x3cd   : >> { %2195 = vrot.lane.b32.xlu1 %v7253_v44, %s8023_s14  ;;  %2035 = vst [vmem:[%s7217_s15] sm:$0xff] %v2034_v45  ;;  %v7305_v4 = vld [vmem:[%s7299_s22 + $0x20] sm:$0xff]  ;;  %v7317_v60 = vld [vmem:[%s7311_s23 + $0x28] sm:$0xff] }
 0x3ce   : >> { %5014 = vst [vmem:[%s7217_s15 + $0x8] sm:$0xff] %v2041_v48  ;;  %v7329_v7 = vld [vmem:[%s7323_s25 + $0x30] sm:$0xff]  ;;  %v7341_v8 = vld [vmem:[%s7335_s27 + $0x38] sm:$0xff] }
 0x3cf   : >> { %5016 = vst [vmem:[%s7217_s15 + $0x10] sm:$0xff] %v2048_v50 }
 0x3d0   : >> { %5018 = vst [vmem:[%s7217_s15 + $0x18] sm:$0xff] %v2055_v54 }
 0x3d1   : >> { %5020 = vst [vmem:[%s7217_s15 + $0x20] sm:$0xff] %v2062_v56 }
 0x3d2   : >> { %5022 = vst [vmem:[%s7217_s15 + $0x28] sm:$0xff] %v2069_v58 }
 0x3d3   : >> { %5024 = vst [vmem:[%s7217_s15 + $0x30] sm:$0xff] %v2076_v59  ;;  %v2449_v9 = vld [vmem:[%s7345_s28] sm:$0xff]  ;;  %v5086_v10 = vld [vmem:[%s7357_s30 + $0x8] sm:$0xff]  ;;  %v5087_v14 = vld [vmem:[%s7371_s9 + $0x10] sm:$0xff] }
 0x3d4   : >> { %2191 = vrot.lane.b32.xlu2 %v5044_v40, %s8023_s14  ;;  %2244 = vrot.lane.b32.xlu0 %v5048_v61, %s8018_s13  ;;  %5026 = vst [vmem:[%s7217_s15 + $0x38] sm:$0xff] %v2083_v62  ;;  %s7369_s15 = smov [#allocation14]  ;;  %v5091_v17 = vld [vmem:[%s7385_s7 + $0x18] sm:$0xff] }
 0x3d5   : >> { %2227 = vrot.lane.b32.xlu1 %v7278_v63, %s8023_s14  ;;  %v5095_v19 = vld [vmem:[%s7401_s5 + $0x20] sm:$0xff]  ;;  %v5099_v22 = vld [vmem:[%s7413_s11 + $0x28] sm:$0xff] }
 0x3db   : >> { %v7353_v11 = vld [vmem:[%s7347_s29] sm:$0xff]  ;;  %v7365_v12 = vld [vmem:[%s7359_s1 + $0x8] sm:$0xff]  ;;  %v7374_v13 = vld [vmem:[%s7369_s15 + $0x18] sm:$0xff] }
 0x3dc   : >> { %2223 = vrot.lane.b32.xlu2 %v5048_v61, %s8023_s14  ;;  %2276 = vrot.lane.b32.xlu0 %v5052_v0, %s8018_s13  ;;  %v7391_v16 = vld [vmem:[%s7383_s8 + $0x20] sm:$0xff]  ;;  %v7404_v18 = vld [vmem:[%s7399_s6 + $0x28] sm:$0xff]  ;;  %s7423_s6 = smov [#allocation14]  ;;  %s7425_s8 = smov [#allocation15] }
 0x3dd   : >> { %2259 = vrot.lane.b32.xlu1 %v7293_v1, %s8023_s14  ;;  %v7416_v21 = vld [vmem:[%s7411_s10 + $0x30] sm:$0xff]  ;;  %8036 = sst [smem:[#allocation29_spill]] %s7423_s6  ;;  %v7428_v24 = vld [vmem:[%s7423_s6 + $0x38] sm:$0xff]  ;;  %s8037_s6 = smov 1  }
 0x3de   : >> { %v5103_v25 = vld [vmem:[%s7425_s8 + $0x30] sm:$0xff] }
 0x3e4   : >> { %2255 = vrot.lane.b32.xlu2 %v5052_v0, %s8023_s14  ;;  %2308 = vrot.lane.b32.xlu0 %v5056_v2, %s8018_s13 }
 0x3e5   : >> { %2291 = vrot.lane.b32.xlu1 %v7305_v4, %s8023_s14 }
 0x3ec   : >> { %2287 = vrot.lane.b32.xlu2 %v5056_v2, %s8023_s14  ;;  %2340 = vrot.lane.b32.xlu0 %v5060_v5, %s8018_s13 }
 0x3ed   : >> { %2323 = vrot.lane.b32.xlu1 %v7317_v60, %s8023_s14 }
 0x3f4   : >> { %2319 = vrot.lane.b32.xlu2 %v5060_v5, %s8023_s14  ;;  %2372 = vrot.lane.b32.xlu0 %v5064_v6, %s8018_s13 }
 0x3f5   : >> { %2355 = vrot.lane.b32.xlu1 %v7329_v7, %s8023_s14 }
 0x3fc   : >> { %2351 = vrot.lane.b32.xlu2 %v5064_v6, %s8023_s14  ;;  %2404 = vrot.lane.b32.xlu0 %v5068_v3, %s8018_s13 }
 0x3fd   : >> { %2387 = vrot.lane.b32.xlu1 %v7341_v8, %s8023_s14 }
 0x404   : >> { %2383 = vrot.lane.b32.xlu2 %v5068_v3, %s8023_s14  ;;  %2450 = vrot.lane.b32.xlu0 %v2449_v9, %s8018_s13 }
 0x405   : >> { %2433 = vrot.lane.b32.xlu1 %v7353_v11, %s8023_s14 }
 0x40c   : >> { %2429 = vrot.lane.b32.xlu2 %v2449_v9, %s8023_s14  ;;  %2482 = vrot.lane.b32.xlu0 %v5086_v10, %s8018_s13  ;;  %s7381_s13 = smov [#allocation14] }
 0x40d   : >> { %2465 = vrot.lane.b32.xlu1 %v7365_v12, %s8023_s14  ;;  %v7388_v15 = vld [vmem:[%s7381_s13 + $0x10] sm:$0xff] }
 0x414   : >> { %2461 = vrot.lane.b32.xlu2 %v5086_v10, %s8023_s14  ;;  %2529 = vrot.lane.b32.xlu0 %v7374_v13, %s8023_s14 }
 0x415   : >> { %2493 = vrot.lane.b32.xlu1 %v5087_v14, %s8023_s14 }
 0x41c   : >> { %2497 = vrot.lane.b32.xlu2 %v7388_v15, %s8023_s14  ;;  %2561 = vrot.lane.b32.xlu0 %v7391_v16, %s8023_s14 }
 0x41d   : >> { %2525 = vrot.lane.b32.xlu1 %v5091_v17, %s8023_s14 }
 0x424   : >> { %2514 = vrot.lane.b32.xlu2 %v5087_v14, %s8035_s4  ;;  %2593 = vrot.lane.b32.xlu0 %v7404_v18, %s8023_s14 }
 0x425   : >> { %2557 = vrot.lane.b32.xlu1 %v5095_v19, %s8023_s14 }
 0x426   : >> { %v2164_v20 = vpop.permute.xlu2 %2163 }
 0x427   : >> { %v2168_v53 = vsel %vm2167_vm5, %v7241_v37, %v2164_v20 }
 0x42c   : >> { %2546 = vrot.lane.b32.xlu2 %v5091_v17, %s8035_s4  ;;  %2625 = vrot.lane.b32.xlu0 %v7416_v21, %s8023_s14 }
 0x42d   : >> { %2589 = vrot.lane.b32.xlu1 %v5099_v22, %s8023_s14 }
 0x42e   : >> { %v2192_v23 = vpop.permute.xlu2 %2191 }
 0x434   : >> { %2578 = vrot.lane.b32.xlu2 %v5095_v19, %s8035_s4  ;;  %2657 = vrot.lane.b32.xlu0 %v7428_v24, %s8023_s14 }
 0x435   : >> { %2621 = vrot.lane.b32.xlu1 %v5103_v25, %s8023_s14  ;;  %s7447_s14 = smov [#allocation15] }
 0x436   : >> { %v2224_v26 = vpop.permute.xlu2 %2223  ;;  %v2181_v52 = vpop.permute.xlu0 %2180  ;;  %v5110_v31 = vld [vmem:[%s7447_s14 + $0x38] sm:$0xff] }
 0x437   : >> { %v2185_v27 = vsel %vm2184_vm6, %v7241_v37, %v2181_v52  ;;  %v2160_v28 = vpop.permute.xlu1 %2159 }
 0x438   : >> { %2411 = vst [vmem:[%s7174_s12] sm:$0xff] %v2185_v27  ;;  %v2172_v29 = vsel %vm2171_vm7, %v2160_v28, %v2168_v53 }
 0x439   : >> { %v2178_v30 = vsel %vm4317_vm0, %v2172_v29, 0.0 }
 0x43a   : >> { %2410 = vst [vmem:[%s7225_s16] sm:$0xff] %v2178_v30 }
 0x43c   : >> { %2610 = vrot.lane.b32.xlu2 %v5099_v22, %s8035_s4  ;;  %2674 = vrot.lane.b32.xlu0 %v5110_v31, %s8035_s4 }
 0x43d   : >> { %2653 = vrot.lane.b32.xlu1 %v5110_v31, %s8037_s6  ;;  %s7579_s6 = smov [#allocation12] }
 0x43e   : >> { %v2256_v32 = vpop.permute.xlu2 %2255  ;;  %v2213_v33 = vpop.permute.xlu0 %2212 }
 0x43f   : >> { %v2217_v34 = vsel %vm2184_vm6, %v7253_v44, %v2213_v33  ;;  %v2196_v35 = vpop.permute.xlu1 %2195 }
 0x440   : >> { %5070 = vst [vmem:[%s7227_s17 + $0x8] sm:$0xff] %v2217_v34  ;;  %v2200_v36 = vsel %vm2167_vm5, %v7253_v44, %v2196_v35 }
 0x441   : >> { %v2204_v37 = vsel %vm2171_vm7, %v2192_v23, %v2200_v36 }
 0x442   : >> { %v2210_v40 = vsel %vm4317_vm0, %v2204_v37, 0.0 }
 0x443   : >> { %5069 = vst [vmem:[%s7234_s2 + $0x8] sm:$0xff] %v2210_v40 }
 0x444   : >> { %2642 = vrot.lane.b32.xlu2 %v5103_v25, %s8035_s4  ;;  %s7545_s4 = smov [#allocation13] }
 0x446   : >> { %v2288_v41 = vpop.permute.xlu2 %2287  ;;  %v2245_v42 = vpop.permute.xlu0 %2244 }
 0x447   : >> { %v2249_v43 = vsel %vm2184_vm6, %v7278_v63, %v2245_v42  ;;  %v2228_v45 = vpop.permute.xlu1 %2227 }
 0x448   : >> { %5072 = vst [vmem:[%s7265_s18 + $0x10] sm:$0xff] %v2249_v43  ;;  %v2232_v44 = vsel %vm2167_vm5, %v7278_v63, %v2228_v45 }
 0x449   : >> { %v2236_v46 = vsel %vm2171_vm7, %v2224_v26, %v2232_v44 }
 0x44a   : >> { %v2242_v47 = vsel %vm4317_vm0, %v2236_v46, 0.0 }
 0x44b   : >> { %5071 = vst [vmem:[%s7269_s19 + $0x10] sm:$0xff] %v2242_v47 }
 0x44e   : >> { %v2320_v48 = vpop.permute.xlu2 %2319  ;;  %v2277_v49 = vpop.permute.xlu0 %2276 }
 0x44f   : >> { %v2281_v50 = vsel %vm2184_vm6, %v7293_v1, %v2277_v49  ;;  %v2260_v51 = vpop.permute.xlu1 %2259 }
 0x450   : >> { %5074 = vst [vmem:[%s7285_s20 + $0x18] sm:$0xff] %v2281_v50  ;;  %v2264_v54 = vsel %vm2167_vm5, %v7293_v1, %v2260_v51 }
 0x451   : >> { %v2268_v55 = vsel %vm2171_vm7, %v2256_v32, %v2264_v54 }
 0x452   : >> { %v2274_v56 = vsel %vm4317_vm0, %v2268_v55, 0.0 }
 0x453   : >> { %5073 = vst [vmem:[%s7287_s21 + $0x18] sm:$0xff] %v2274_v56 }
 0x456   : >> { %v2352_v57 = vpop.permute.xlu2 %2351  ;;  %v2309_v58 = vpop.permute.xlu0 %2308 }
 0x457   : >> { %v2313_v59 = vsel %vm2184_vm6, %v7305_v4, %v2309_v58  ;;  %v2292_v61 = vpop.permute.xlu1 %2291 }
 0x458   : >> { %5076 = vst [vmem:[%s7297_s3 + $0x20] sm:$0xff] %v2313_v59  ;;  %v2296_v62 = vsel %vm2167_vm5, %v7305_v4, %v2292_v61 }
 0x459   : >> { %v2300_v63 = vsel %vm2171_vm7, %v2288_v41, %v2296_v62 }
 0x45a   : >> { %v2306_v0 = vsel %vm4317_vm0, %v2300_v63, 0.0 }
 0x45b   : >> { %5075 = vst [vmem:[%s7299_s22 + $0x20] sm:$0xff] %v2306_v0 }
 0x45e   : >> { %v2384_v1 = vpop.permute.xlu2 %2383  ;;  %v2341_v2 = vpop.permute.xlu0 %2340 }
 0x45f   : >> { %v2345_v5 = vsel %vm2184_vm6, %v7317_v60, %v2341_v2  ;;  %v2324_v6 = vpop.permute.xlu1 %2323 }
 0x460   : >> { %5078 = vst [vmem:[%s7309_s0 + $0x28] sm:$0xff] %v2345_v5  ;;  %v2328_v4 = vsel %vm2167_vm5, %v7317_v60, %v2324_v6 }
 0x461   : >> { %v2332_v3 = vsel %vm2171_vm7, %v2320_v48, %v2328_v4 }
 0x462   : >> { %v2338_v9 = vsel %vm4317_vm0, %v2332_v3, 0.0 }
 0x463   : >> { %5077 = vst [vmem:[%s7311_s23 + $0x28] sm:$0xff] %v2338_v9 }
 0x466   : >> { %v7517_v10 = vpop.permute.xlu2 %2429  ;;  %v2373_v14 = vpop.permute.xlu0 %2372 }
 0x467   : >> { %v2377_v17 = vsel %vm2184_vm6, %v7329_v7, %v2373_v14  ;;  %v2356_v19 = vpop.permute.xlu1 %2355 }
 0x468   : >> { %5080 = vst [vmem:[%s7321_s24 + $0x30] sm:$0xff] %v2377_v17  ;;  %v2360_v60 = vsel %vm2167_vm5, %v7329_v7, %v2356_v19 }
 0x469   : >> { %v2364_v20 = vsel %vm2171_vm7, %v2352_v57, %v2360_v60 }
 0x46a   : >> { %v2370_v22 = vsel %vm4317_vm0, %v2364_v20, 0.0 }
 0x46b   : >> { %5079 = vst [vmem:[%s7323_s25 + $0x30] sm:$0xff] %v2370_v22 }
 0x46e   : >> { %v7531_v23 = vpop.permute.xlu2 %2461  ;;  %v2405_v25 = vpop.permute.xlu0 %2404 }
 0x46f   : >> { %v2409_v26 = vsel %vm2184_vm6, %v7341_v8, %v2405_v25  ;;  %v2388_v52 = vpop.permute.xlu1 %2387 }
 0x470   : >> { %5082 = vst [vmem:[%s7333_s26 + $0x38] sm:$0xff] %v2409_v26  ;;  %v2392_v7 = vsel %vm2167_vm5, %v7341_v8, %v2388_v52 }
 0x471   : >> { %v2396_v53 = vsel %vm2171_vm7, %v2384_v1, %v2392_v7 }
 0x472   : >> { %v2402_v27 = vsel %vm4317_vm0, %v2396_v53, 0.0 }
 0x473   : >> { %5081 = vst [vmem:[%s7335_s27 + $0x38] sm:$0xff] %v2402_v27 }
 0x476   : >> { %v7547_v28 = vpop.permute.xlu2 %2497  ;;  %v2451_v8 = vpop.permute.xlu0 %2450 }
 0x477   : >> { %v2862_v29 = vld [vmem:[%s7545_s4] ss:$0 sm:$0xff]  ;;  %v5172_v31 = vld [vmem:[%s7545_s4 + $0x7] ss:$0 sm:$0xff]  ;;  %v2455_v32 = vsel %vm2184_vm6, %v7353_v11, %v2451_v8  ;;  %v2434_v33 = vpop.permute.xlu1 %2433  ;;  %v5173_v35 = vld [vmem:[%s7545_s4 + $0x7] sm:$0xfe] }
 0x478   : >> { %v5171_v30 = vld [vmem:[%s7545_s4 - $0x1] sm:$0xfe]  ;;  %v5174_v36 = vld [vmem:[%s7545_s4 + $0xf] ss:$0 sm:$0xff]  ;;  %v5176_v37 = vld [vmem:[%s7545_s4 + $0xf] sm:$0xfe]  ;;  %2681 = vst [vmem:[%s7345_s28] sm:$0xff] %v2455_v32  ;;  %v2880_v40 = vsel %vm2704_vm12, %v5172_v31, %v5173_v35  ;;  %v2438_v53 = vsel %vm2167_vm5, %v7353_v11, %v2434_v33 }
 0x479   : >> { %v2869_v34 = vsel %vm2704_vm12, %v2862_v29, %v5171_v30  ;;  %v2891_v41 = vsel %vm2704_vm12, %v5174_v36, %v5176_v37  ;;  %v5177_v42 = vld [vmem:[%s7545_s4 + $0x17] ss:$0 sm:$0xff]  ;;  %v5179_v43 = vld [vmem:[%s7545_s4 + $0x17] sm:$0xfe]  ;;  %v5180_v45 = vld [vmem:[%s7545_s4 + $0x1f] ss:$0 sm:$0xff]  ;;  %v2442_v33 = vsel %vm2171_vm7, %v7517_v10, %v2438_v53 }
 0x47a   : >> { %2872 = vst [vmem:[%s7545_s4] sm:$0xff] %v2869_v34  ;;  %v2902_v44 = vsel %vm2704_vm12, %v5177_v42, %v5179_v43  ;;  %v5182_v46 = vld [vmem:[%s7545_s4 + $0x1f] sm:$0xfe]  ;;  %v5183_v47 = vld [vmem:[%s7545_s4 + $0x27] ss:$0 sm:$0xff]  ;;  %v5185_v49 = vld [vmem:[%s7545_s4 + $0x27] sm:$0xfe] }
 0x47b   : >> { %5175 = vst [vmem:[%s7545_s4 + $0x8] sm:$0xff] %v2880_v40  ;;  %v2913_v48 = vsel %vm2704_vm12, %v5180_v45, %v5182_v46  ;;  %v5186_v50 = vld [vmem:[%s7545_s4 + $0x2f] ss:$0 sm:$0xff]  ;;  %v2924_v51 = vsel %vm2704_vm12, %v5183_v47, %v5185_v49  ;;  %v5188_v54 = vld [vmem:[%s7545_s4 + $0x2f] sm:$0xfe]  ;;  %v2502_v40 = vsel %vm2167_vm5, %v7388_v15, %v7547_v28  ;;  %v2448_v42 = vsel %vm4317_vm0, %v2442_v33, 0.0 }
 0x47c   : >> { %5178 = vst [vmem:[%s7545_s4 + $0x10] sm:$0xff] %v2891_v41  ;;  %v5189_v55 = vld [vmem:[%s7545_s4 + $0x37] ss:$0 sm:$0xff]  ;;  %v2935_v56 = vsel %vm2704_vm12, %v5186_v50, %v5188_v54  ;;  %v5191_v57 = vld [vmem:[%s7545_s4 + $0x37] sm:$0xfe] }
 0x47d   : >> { %5181 = vst [vmem:[%s7545_s4 + $0x18] sm:$0xff] %v2902_v44  ;;  %v7591_v58 = vld [vmem:[%s7545_s4 + $0x3f] ss:$0 sm:$0xff]  ;;  %v2946_v59 = vsel %vm2704_vm12, %v5189_v55, %v5191_v57  ;;  %v2698_v61 = vld [vmem:[%s7579_s6] ss:$0 sm:$0xff] }
 0x47e   : >> { %5184 = vst [vmem:[%s7545_s4 + $0x20] sm:$0xff] %v2913_v48  ;;  %v5125_v62 = vld [vmem:[%s7579_s6 - $0x1] sm:$0xfe]  ;;  %v2515_v63 = vpop.permute.xlu2 %2514  ;;  %v2483_v0 = vpop.permute.xlu0 %2482  ;;  %v5126_v2 = vld [vmem:[%s7579_s6 + $0x7] ss:$0 sm:$0xff] }
 0x47f   : >> { %5187 = vst [vmem:[%s7545_s4 + $0x28] sm:$0xff] %v2924_v51  ;;  %v2705_v1 = vsel %vm2704_vm12, %v2698_v61, %v5125_v62  ;;  %v5127_v5 = vld [vmem:[%s7579_s6 + $0x7] sm:$0xfe]  ;;  %v2466_v6 = vpop.permute.xlu1 %2465  ;;  %v5128_v3 = vld [vmem:[%s7579_s6 + $0xf] ss:$0 sm:$0xff]  ;;  %v2487_v35 = vsel %vm2184_vm6, %v7365_v12, %v2483_v0  ;;  %v2519_v43 = vsel %vm2184_vm6, %v7388_v15, %v2515_v63 }
 0x480   : >> { %5190 = vst [vmem:[%s7545_s4 + $0x30] sm:$0xff] %v2935_v56  ;;  %v2716_v4 = vsel %vm2704_vm12, %v5126_v2, %v5127_v5  ;;  %v5130_v9 = vld [vmem:[%s7579_s6 + $0xf] sm:$0xfe]  ;;  %v5131_v17 = vld [vmem:[%s7579_s6 + $0x17] ss:$0 sm:$0xff]  ;;  %v2470_v30 = vsel %vm2167_vm5, %v7365_v12, %v2466_v6 }
 0x481   : >> { %5193 = vst [vmem:[%s7545_s4 + $0x38] sm:$0xff] %v2946_v59  ;;  %v2727_v14 = vsel %vm2704_vm12, %v5128_v3, %v5130_v9  ;;  %v5133_v19 = vld [vmem:[%s7579_s6 + $0x17] sm:$0xfe]  ;;  %v5134_v60 = vld [vmem:[%s7579_s6 + $0x1f] ss:$0 sm:$0xff]  ;;  %v2474_v41 = vsel %vm2171_vm7, %v7531_v23, %v2470_v30 }
 0x482   : >> { %2708 = vst [vmem:[%s7579_s6] sm:$0xff] %v2705_v1  ;;  %v2738_v20 = vsel %vm2704_vm12, %v5131_v17, %v5133_v19  ;;  %v5136_v22 = vld [vmem:[%s7579_s6 + $0x1f] sm:$0xfe]  ;;  %v5137_v25 = vld [vmem:[%s7579_s6 + $0x27] ss:$0 sm:$0xff]  ;;  %v5139_v52 = vld [vmem:[%s7579_s6 + $0x27] sm:$0xfe] }
 0x483   : >> { %5129 = vst [vmem:[%s7579_s6 + $0x8] sm:$0xff] %v2716_v4  ;;  %v2749_v26 = vsel %vm2704_vm12, %v5134_v60, %v5136_v22  ;;  %v5140_v7 = vld [vmem:[%s7579_s6 + $0x2f] ss:$0 sm:$0xff]  ;;  %v2760_v27 = vsel %vm2704_vm12, %v5137_v25, %v5139_v52  ;;  %v5142_v8 = vld [vmem:[%s7579_s6 + $0x2f] sm:$0xfe]  ;;  %v2480_v23 = vsel %vm4317_vm0, %v2474_v41, 0.0 }
 0x484   : >> { %5132 = vst [vmem:[%s7579_s6 + $0x10] sm:$0xff] %v2727_v14  ;;  %v5143_v29 = vld [vmem:[%s7579_s6 + $0x37] ss:$0 sm:$0xff]  ;;  %v2771_v31 = vsel %vm2704_vm12, %v5140_v7, %v5142_v8  ;;  %v5145_v32 = vld [vmem:[%s7579_s6 + $0x37] sm:$0xfe] }
 0x485   : >> { %5135 = vst [vmem:[%s7579_s6 + $0x18] sm:$0xff] %v2738_v20  ;;  %v7640_v34 = vld [vmem:[%s7579_s6 + $0x3f] ss:$0 sm:$0xff]  ;;  %v2782_v11 = vsel %vm2704_vm12, %v5143_v29, %v5145_v32 }
 0x486   : >> { %5138 = vst [vmem:[%s7579_s6 + $0x20] sm:$0xff] %v2749_v26  ;;  %v2547_v36 = vpop.permute.xlu2 %2546  ;;  %v2530_v37 = vpop.permute.xlu0 %2529 }
 0x487   : >> { %5141 = vst [vmem:[%s7579_s6 + $0x28] sm:$0xff] %v2760_v27  ;;  %v2494_v10 = vpop.permute.xlu1 %2493  ;;  %v2551_v28 = vsel %vm2184_vm6, %v7374_v13, %v2547_v36  ;;  %v2534_v15 = vsel %vm2167_vm5, %v7374_v13, %v2530_v37 }
 0x488   : >> { %5144 = vst [vmem:[%s7579_s6 + $0x30] sm:$0xff] %v2771_v31  ;;  %v2506_v12 = vsel %vm2171_vm7, %v2494_v10, %v2502_v40 }
 0x489   : >> { %5147 = vst [vmem:[%s7579_s6 + $0x38] sm:$0xff] %v2782_v11  ;;  %v2512_v45 = vsel %vm4317_vm0, %v2506_v12, 0.0 }
 0x48a   : >> { %5112 = vst [vmem:[%s7357_s30 + $0x8] sm:$0xff] %v2487_v35 }
 0x48b   : >> { %5114 = vst [vmem:[%s7371_s9 + $0x10] sm:$0xff] %v2519_v43  ;;  %s8038_s9 = sld [smem:[#allocation27_spill]] }
 0x48c   : >> { %5116 = vst [vmem:[%s7385_s7 + $0x18] sm:$0xff] %v2551_v28  ;;  %s8039_s7 = sld [smem:[#allocation28_spill]] }
 0x48d   : >> { %2680 = vst [vmem:[%s7347_s29] sm:$0xff] %v2448_v42 }
 0x48e   : >> { %5111 = vst [vmem:[%s7359_s1 + $0x8] sm:$0xff] %v2480_v23  ;;  %v2579_v44 = vpop.permute.xlu2 %2578  ;;  %v2562_v46 = vpop.permute.xlu0 %2561 }
 0x48f   : >> { %5113 = vst [vmem:[%s7381_s13 + $0x10] sm:$0xff] %v2512_v45  ;;  %v2583_v47 = vsel %vm2184_vm6, %v7391_v16, %v2579_v44  ;;  %v2526_v48 = vpop.permute.xlu1 %2525  ;;  %v2566_v13 = vsel %vm2167_vm5, %v7391_v16, %v2562_v46 }
 0x490   : >> { %5118 = vst [vmem:[%s7401_s5 + $0x20] sm:$0xff] %v2583_v47  ;;  %v2538_v49 = vsel %vm2171_vm7, %v2526_v48, %v2534_v15  ;;  %s8040_s5 = sld [smem:[#allocation29_spill]] }
 0x491   : >> { %v2544_v50 = vsel %vm4317_vm0, %v2538_v49, 0.0 }
 0x492   : >> { %5115 = vst [vmem:[%s7369_s15 + $0x18] sm:$0xff] %v2544_v50 }
 0x496   : >> { %v2611_v51 = vpop.permute.xlu2 %2610  ;;  %v2594_v54 = vpop.permute.xlu0 %2593 }
 0x497   : >> { %v2615_v55 = vsel %vm2184_vm6, %v7404_v18, %v2611_v51  ;;  %v2558_v56 = vpop.permute.xlu1 %2557  ;;  %v2598_v16 = vsel %vm2167_vm5, %v7404_v18, %v2594_v54 }
 0x498   : >> { %5120 = vst [vmem:[%s7413_s11 + $0x28] sm:$0xff] %v2615_v55  ;;  %v2570_v57 = vsel %vm2171_vm7, %v2558_v56, %v2566_v13  ;;  %s8041_s11 = sld [smem:[#allocation26_spill]] }
 0x499   : >> { %v2576_v59 = vsel %vm4317_vm0, %v2570_v57, 0.0 }
 0x49a   : >> { %5117 = vst [vmem:[%s8038_s9 + $0x20] sm:$0xff] %v2576_v59 }
 0x49e   : >> { %v2643_v61 = vpop.permute.xlu2 %2642  ;;  %v2626_v62 = vpop.permute.xlu0 %2625  ;;  %s870_s11 = sadd.s32 1, %s8041_s11  }
 0x49f   : >> { %v2647_v63 = vsel %vm2184_vm6, %v7416_v21, %v2643_v61  ;;  %v2590_v0 = vpop.permute.xlu1 %2589  ;;  %v2630_v18 = vsel %vm2167_vm5, %v7416_v21, %v2626_v62  ;;  %p867_p9 = scmp.ge.s32.totalorder %s870_s11, 127  }
 0x4a0   : >> { %5122 = vst [vmem:[%s7425_s8 + $0x30] sm:$0xff] %v2647_v63  ;;  %v2602_v1 = vsel %vm2171_vm7, %v2590_v0, %v2598_v16  ;;  %s7736_s8 = smov [#allocation15]  ;;  %s551_s13 = smov (%p867_p9), [#allocation12]  ;;  %v636_v39 = vmov (%p867_p9), %v6325_v39  ;;  %v639_v38 = vmov (%p867_p9), %v6323_v38 }
 0x4a1   : >> { %v2608_v2 = vsel %vm4317_vm0, %v2602_v1, 0.0  ;;  %v695_v39 = vmov (%p867_p9), %v6325_v39  ;;  %v698_v38 = vmov (%p867_p9), %v6323_v38  ;;  %s7881_s16 = smov (%p867_p9), [#allocation14]  ;;  %s7911_s17 = smov (%p867_p9), [#allocation15] }
 0x4a2   : >> { %5119 = vst [vmem:[%s8039_s7 + $0x28] sm:$0xff] %v2608_v2  ;;  %v7850_v39 = vmov (%p867_p9), %v6325_v39  ;;  %v550_v38 = vmov (%p867_p9), %v6323_v38 }
 0x4a3   : > { %vm562_vm12 = vcmp.eq.s32.totalorder (%p867_p9), %v550_v38, %v7850_v39 }
 0x4a6   : >> { %v2658_v5 = vpop.permute.xlu0 %2657 }
 0x4a7   : >> { %v2622_v6 = vpop.permute.xlu1 %2621  ;;  %v2662_v14 = vsel %vm2167_vm5, %v7428_v24, %v2658_v5 }
 0x4a8   : >> { %v2634_v4 = vsel %vm2171_vm7, %v2622_v6, %v2630_v18 }
 0x4a9   : >> { %v2640_v3 = vsel %vm4317_vm0, %v2634_v4, 0.0 }
 0x4aa   : >> { %5121 = vst [vmem:[%s7411_s10 + $0x30] sm:$0xff] %v2640_v3  ;;  %s7762_s10 = smov [#allocation14] }
 0x4ae   : >> { %v2675_v9 = vpop.permute.xlu0 %2674 }
 0x4af   : >> { %v2679_v17 = vsel %vm2184_vm6, %v7428_v24, %v2675_v9  ;;  %v2654_v19 = vpop.permute.xlu1 %2653 }
 0x4b0   : >> { %5124 = vst [vmem:[%s7447_s14 + $0x38] sm:$0xff] %v2679_v17  ;;  %v2666_v21 = vsel %vm2171_vm7, %v2654_v19, %v2662_v14  ;;  %s7844_s14 = smov (%p867_p9), [#allocation13] }
 0x4b1   : >> { %v2672_v60 = vsel %vm4317_vm0, %v2666_v21, 0.0 }
 0x4b2   : >> { %5123 = vst [vmem:[%s8040_s5 + $0x38] sm:$0xff] %v2672_v60 }
 0x4b7   : >> { %v2950_v24 = vld [vmem:[%s7736_s8] ss:$0 sm:$0xff]  ;;  %v5195_v20 = vld [vmem:[%s7736_s8 + $0x39] sm:$0x7f]  ;;  %v5196_v22 = vld [vmem:[%s7736_s8 + $0x38] ss:$0 sm:$0xff] }
 0x4b8   : >> { %5194 = vst [vmem:[%s7545_s4 + $0x1] sm:$0x1] %v2950_v24  ;;  %v2959_v25 = vsel %vm2794_vm13, %v7591_v58, %v5195_v20  ;;  %v5198_v26 = vld [vmem:[%s7736_s8 + $0x31] sm:$0x7f]  ;;  %v5199_v52 = vld [vmem:[%s7736_s8 + $0x30] ss:$0 sm:$0xff] }
 0x4b9   : >> { %5197 = vst [vmem:[%s7736_s8 + $0x38] sm:$0xff] %v2959_v25  ;;  %v2968_v7 = vsel %vm2794_vm13, %v5196_v22, %v5198_v26  ;;  %v5201_v53 = vld [vmem:[%s7736_s8 + $0x29] sm:$0x7f]  ;;  %v5202_v27 = vld [vmem:[%s7736_s8 + $0x28] ss:$0 sm:$0xff] }
 0x4ba   : >> { %5200 = vst [vmem:[%s7736_s8 + $0x30] sm:$0xff] %v2968_v7  ;;  %v2977_v8 = vsel %vm2794_vm13, %v5199_v52, %v5201_v53  ;;  %v5204_v58 = vld [vmem:[%s7736_s8 + $0x21] sm:$0x7f]  ;;  %v5205_v29 = vld [vmem:[%s7736_s8 + $0x20] ss:$0 sm:$0xff] }
 0x4bb   : >> { %5203 = vst [vmem:[%s7736_s8 + $0x28] sm:$0xff] %v2977_v8  ;;  %v2986_v30 = vsel %vm2794_vm13, %v5202_v27, %v5204_v58  ;;  %v5207_v31 = vld [vmem:[%s7736_s8 + $0x19] sm:$0x7f]  ;;  %v5208_v32 = vld [vmem:[%s7736_s8 + $0x18] ss:$0 sm:$0xff] }
 0x4bc   : >> { %5206 = vst [vmem:[%s7736_s8 + $0x20] sm:$0xff] %v2986_v30  ;;  %v2995_v11 = vsel %vm2794_vm13, %v5205_v29, %v5207_v31  ;;  %v5210_v33 = vld [vmem:[%s7736_s8 + $0x11] sm:$0x7f]  ;;  %v5211_v35 = vld [vmem:[%s7736_s8 + $0x10] ss:$0 sm:$0xff] }
 0x4bd   : >> { %5209 = vst [vmem:[%s7736_s8 + $0x18] sm:$0xff] %v2995_v11  ;;  %v3004_v36 = vsel %vm2794_vm13, %v5208_v32, %v5210_v33  ;;  %v5213_v37 = vld [vmem:[%s7736_s8 + $0x9] sm:$0x7f]  ;;  %v5214_v40 = vld [vmem:[%s7736_s8 + $0x8] ss:$0 sm:$0xff]  ;;  %v569_v33 = vadd.s32 (%p867_p9), 8, %v550_v38 }
 0x4be   : >> { %5212 = vst [vmem:[%s7736_s8 + $0x10] sm:$0xff] %v3004_v36  ;;  %v3013_v41 = vsel %vm2794_vm13, %v5211_v35, %v5213_v37  ;;  %v5216_v10 = vld [vmem:[%s7736_s8 + $0x1] sm:$0x7f]  ;;  %v2786_v12 = vld [vmem:[%s7762_s10] ss:$0 sm:$0xff] }
 0x4bf   : >> { %5215 = vst [vmem:[%s7736_s8 + $0x8] sm:$0xff] %v3013_v41  ;;  %v3021_v42 = vsel %vm2794_vm13, %v5214_v40, %v5216_v10  ;;  %v5149_v43 = vld [vmem:[%s7762_s10 + $0x39] sm:$0x7f]  ;;  %v5150_v23 = vld [vmem:[%s7762_s10 + $0x38] ss:$0 sm:$0xff]  ;;  %v646_v58 = vld [vmem:[%s7844_s14] sm:$0xff] (%p867_p9) }
 0x4c0   : >> { %3023 = vst [vmem:[%s7736_s8] sm:$0xff] %v3021_v42  ;;  %v2795_v28 = vsel %vm2794_vm13, %v7640_v34, %v5149_v43  ;;  %v5152_v45 = vld [vmem:[%s7762_s10 + $0x31] sm:$0x7f]  ;;  %v5153_v44 = vld [vmem:[%s7762_s10 + $0x30] ss:$0 sm:$0xff]  ;;  %v5155_v46 = vld [vmem:[%s7762_s10 + $0x29] sm:$0x7f] }
 0x4c1   : >> { %5148 = vst [vmem:[%s7579_s6 + $0x1] sm:$0x1] %v2786_v12  ;;  %v2804_v15 = vsel %vm2794_vm13, %v5150_v23, %v5152_v45  ;;  %v2813_v47 = vsel %vm2794_vm13, %v5153_v44, %v5155_v46  ;;  %v5156_v48 = vld [vmem:[%s7762_s10 + $0x28] ss:$0 sm:$0xff]  ;;  %v5158_v49 = vld [vmem:[%s7762_s10 + $0x21] sm:$0x7f] }
 0x4c2   : >> { %5151 = vst [vmem:[%s7762_s10 + $0x38] sm:$0xff] %v2795_v28  ;;  %v2822_v34 = vsel %vm2794_vm13, %v5156_v48, %v5158_v49  ;;  %v5159_v50 = vld [vmem:[%s7762_s10 + $0x20] ss:$0 sm:$0xff]  ;;  %v5161_v51 = vld [vmem:[%s7762_s10 + $0x19] sm:$0x7f]  ;;  %v5386_v32 = vld [vmem:[%s7844_s14 + $0x8] sm:$0xff] (%p867_p9) }
 0x4c3   : >> { %5154 = vst [vmem:[%s7762_s10 + $0x30] sm:$0xff] %v2804_v15  ;;  %v2831_v54 = vsel %vm2794_vm13, %v5159_v50, %v5161_v51  ;;  %v5162_v13 = vld [vmem:[%s7762_s10 + $0x18] ss:$0 sm:$0xff]  ;;  %v5164_v55 = vld [vmem:[%s7762_s10 + $0x11] sm:$0x7f]  ;;  %v647_v11 = vsel (%p867_p9), %vm4317_vm0, %v646_v58, 0.0 }
 0x4c4   : >> { %5157 = vst [vmem:[%s7762_s10 + $0x28] sm:$0xff] %v2813_v47  ;;  %v2840_v56 = vsel %vm2794_vm13, %v5162_v13, %v5164_v55  ;;  %v5165_v57 = vld [vmem:[%s7762_s10 + $0x10] ss:$0 sm:$0xff]  ;;  %v5167_v59 = vld [vmem:[%s7762_s10 + $0x9] sm:$0x7f]  ;;  %v653_v40 = vsel (%p867_p9), %vm4317_vm0, %v5386_v32, 0.0  ;;  %v7862_v10 = vmul.f32 (%p867_p9), %v647_v11, %v647_v11 }
 0x4c5   : >> { %5160 = vst [vmem:[%s7762_s10 + $0x20] sm:$0xff] %v2822_v34  ;;  %v2849_v61 = vsel %vm2794_vm13, %v5165_v57, %v5167_v59  ;;  %v5168_v62 = vld [vmem:[%s7762_s10 + $0x8] ss:$0 sm:$0xff]  ;;  %v5170_v16 = vld [vmem:[%s7762_s10 + $0x1] sm:$0x7f]  ;;  %869 = sbr.rel (!%p867_p9) target bundleno = 397 (0x18d), region = 918  ;;  %v654_v44 = vmul.f32 (%p867_p9), %v653_v40, %v653_v40 }
 0x4c6   : >> { %5163 = vst [vmem:[%s7762_s10 + $0x18] sm:$0xff] %v2831_v54  ;;  %v2857_v63 = vsel %vm2794_vm13, %v5168_v62, %v5170_v16  ;;  %v5387_v37 = vld [vmem:[%s7844_s14 + $0x10] sm:$0xff] (%p867_p9)  ;;  %v5388_v12 = vld [vmem:[%s7844_s14 + $0x18] sm:$0xff] (%p867_p9)  ;;  %vm570_vm13 = vcmp.eq.s32.totalorder (%p867_p9), %v569_v33, %v7850_v39  ;;  %v579_v23 = vadd.s32 (%p867_p9), 16, %v550_v38  ;;  %v589_v28 = vadd.s32 (%p867_p9), 24, %v550_v38  ;;  %v5389_v46 = vld [vmem:[%s7844_s14 + $0x20] sm:$0xff] (%p867_p9) }
 0x4c7   : >> { %5166 = vst [vmem:[%s7762_s10 + $0x10] sm:$0xff] %v2840_v56  ;;  %v659_v43 = vsel (%p867_p9), %vm4317_vm0, %v5387_v37, 0.0  ;;  %v599_v47 = vadd.s32 (%p867_p9), 32, %v550_v38  ;;  %v665_v48 = vsel (%p867_p9), %vm4317_vm0, %v5388_v12, 0.0  ;;  %v5390_v51 = vld [vmem:[%s7844_s14 + $0x28] sm:$0xff] (%p867_p9)  ;;  %v671_v55 = vsel (%p867_p9), %vm4317_vm0, %v5389_v46, 0.0 }
 0x4c8   : >> { %5169 = vst [vmem:[%s7762_s10 + $0x8] sm:$0xff] %v2849_v61  ;;  %v557_v0 = vld [vmem:[%s551_s13] sm:$0xff] (%p867_p9)  ;;  %v5379_v1 = vld [vmem:[%s551_s13 + $0x8] sm:$0xff] (%p867_p9)  ;;  %v5380_v2 = vld [vmem:[%s551_s13 + $0x10] sm:$0xff] (%p867_p9)  ;;  %vm580_vm8 = vcmp.eq.s32.totalorder (%p867_p9), %v579_v23, %v7850_v39  ;;  %vm590_vm9 = vcmp.eq.s32.totalorder (%p867_p9), %v589_v28, %v7850_v39  ;;  %v660_v50 = vmul.f32 (%p867_p9), %v659_v43, %v659_v43  ;;  %v609_v57 = vadd.s32 (%p867_p9), 40, %v550_v38 }
 0x4c9   : >> { %2859 = vst [vmem:[%s7762_s10] sm:$0xff] %v2857_v63  ;;  %s8042_s10 = sld [smem:[#allocation25_spill]] (%p867_p9)  ;;  %v558_v5 = vsel (%p867_p9), %vm4317_vm0, %v557_v0, 0.0  ;;  %v566_v18 = vsel (%p867_p9), %vm4317_vm0, %v5379_v1, 0.0  ;;  %v576_v6 = vsel (%p867_p9), %vm4317_vm0, %v5380_v2, 0.0  ;;  %v5381_v4 = vld [vmem:[%s551_s13 + $0x18] sm:$0xff] (%p867_p9)  ;;  %v5382_v3 = vld [vmem:[%s551_s13 + $0x20] sm:$0xff] (%p867_p9)  ;;  %vm600_vm10 = vcmp.eq.s32.totalorder (%p867_p9), %v599_v47, %v7850_v39 }
 0x4ca   : > { %v559_v9 = vmul.f32 %v558_v5, %v558_v5  ;;  %v567_v14 = vmul.f32 %v566_v18, %v566_v18  ;;  %v577_v17 = vmul.f32 %v576_v6, %v576_v6  ;;  %v586_v19 = vsel %vm4317_vm0, %v5381_v4, 0.0  ;;  %v5383_v21 = vld [vmem:[%s551_s13 + $0x28] sm:$0xff]  ;;  %v5384_v22 = vld [vmem:[%s551_s13 + $0x30] sm:$0xff]  ;;  %v5385_v7 = vld [vmem:[%s551_s13 + $0x38] sm:$0xff] }
 0x4cb   : > { %v596_v60 = vsel %vm4317_vm0, %v5382_v3, 0.0  ;;  %v587_v20 = vmul.f32 %v586_v19, %v586_v19  ;;  %v606_v25 = vsel %vm4317_vm0, %v5383_v21, 0.0  ;;  %v616_v53 = vsel %vm4317_vm0, %v5384_v22, 0.0  ;;  %v5391_v62 = vld [vmem:[%s7844_s14 + $0x30] sm:$0xff]  ;;  %v5392_v6 = vld [vmem:[%s7844_s14 + $0x38] sm:$0xff] }
 0x4cc   : > { %v573_v24 = vadd.f32 %v567_v14, %v559_v9  ;;  %v597_v52 = vmul.f32 %v596_v60, %v596_v60  ;;  %v607_v8 = vmul.f32 %v606_v25, %v606_v25  ;;  %v626_v29 = vsel %vm4317_vm0, %v5385_v7, 0.0 }
 0x4cd   : > { %v617_v31 = vmul.f32 %v616_v53, %v616_v53  ;;  %v627_v36 = vmul.f32 %v626_v29, %v626_v29  ;;  %v563_v42 = vsel %vm562_vm12, 0.0, %v559_v9  ;;  %v571_v15 = vsel %vm570_vm13, 0.0, %v567_v14 }
 0x4ce   : > { %v583_v26 = vadd.f32 %v577_v17, %v573_v24  ;;  %v572_v49 = vadd.f32 %v571_v15, %v563_v42  ;;  %v581_v54 = vsel %vm580_vm8, 0.0, %v577_v17  ;;  %v591_v13 = vsel %vm590_vm9, 0.0, %v587_v20 }
 0x4cf   : > { %s3618_s12 = sadd.s32 1, %s8042_s10   ;;  %v666_v61 = vmul.f32 %v665_v48, %v665_v48  ;;  %v601_v16 = vsel %vm600_vm10, 0.0, %v597_v52  ;;  %v619_v63 = vadd.s32 48, %v550_v38  ;;  %v677_v0 = vsel %vm4317_vm0, %v5390_v51, 0.0 }
 0x4d0   : > { %v593_v27 = vadd.f32 %v587_v20, %v583_v26  ;;  %v582_v56 = vadd.f32 %v581_v54, %v572_v49  ;;  %vm610_vm11 = vcmp.eq.s32.totalorder %v609_v57, %v7850_v39  ;;  %v629_v2 = vadd.s32 56, %v550_v38  ;;  %v705_v19 = vld [vmem:[%s7881_s16] sm:$0xff]  ;;  %v5393_v25 = vld [vmem:[%s7881_s16 + $0x8] sm:$0xff]  ;;  %v5395_v32 = vld [vmem:[%s7881_s16 + $0x18] sm:$0xff]  ;;  %p863_p10 = scmp.ge.s32.totalorder %s3618_s12, 15  ;;  %s8043_s10 = smov %s3618_s12 }
 0x4d1   : > { %v672_v18 = vmul.f32 %v671_v55, %v671_v55  ;;  %v611_v4 = vsel %vm610_vm11, 0.0, %v607_v8  ;;  %vm620_vm14 = vcmp.eq.s32.totalorder %v619_v63, %v7850_v39  ;;  %v683_v3 = vsel %vm4317_vm0, %v5391_v62, 0.0  ;;  %v5396_v37 = vld [vmem:[%s7881_s16 + $0x20] sm:$0xff]  ;;  %v5397_v43 = vld [vmem:[%s7881_s16 + $0x28] sm:$0xff]  ;;  %v5398_v15 = vld [vmem:[%s7881_s16 + $0x30] sm:$0xff] }
 0x4d2   : > { %v603_v30 = vadd.f32 %v597_v52, %v593_v27  ;;  %v592_v1 = vadd.f32 %v591_v13, %v582_v56  ;;  %vm630_vm15 = vcmp.eq.s32.totalorder %v629_v2, %v7850_v39  ;;  %v678_v17 = vmul.f32 %v677_v0, %v677_v0  ;;  %v5399_v49 = vld [vmem:[%s7881_s16 + $0x38] sm:$0xff]  ;;  %v764_v13 = vld [vmem:[%s7911_s17] sm:$0xff] }
 0x4d3   : > { %v621_v21 = vsel %vm620_vm14, 0.0, %v617_v31  ;;  %v689_v60 = vsel %vm4317_vm0, %v5392_v6, 0.0  ;;  %v684_v22 = vmul.f32 %v683_v3, %v683_v3  ;;  %v631_v26 = vsel %vm630_vm15, 0.0, %v627_v36 }
 0x4d4   : > { %v613_v35 = vadd.f32 %v607_v8, %v603_v30  ;;  %v602_v9 = vadd.f32 %v601_v16, %v592_v1  ;;  %v706_v52 = vsel %vm4317_vm0, %v705_v19, 0.0  ;;  %v690_v27 = vmul.f32 %v689_v60, %v689_v60  ;;  %v5394_v8 = vld [vmem:[%s7881_s16 + $0x10] sm:$0xff]  ;;  %v5403_v19 = vld [vmem:[%s7911_s17 + $0x20] sm:$0xff] }
 0x4d5   : > { %v712_v58 = vsel %vm4317_vm0, %v5393_v25, 0.0  ;;  %v718_v11 = vsel %vm4317_vm0, %v5394_v8, 0.0  ;;  %v724_v40 = vsel %vm4317_vm0, %v5395_v32, 0.0  ;;  %v730_v23 = vsel %vm4317_vm0, %v5396_v37, 0.0  ;;  %v5401_v1 = vld [vmem:[%s7911_s17 + $0x10] sm:$0xff] }
 0x4d6   : > { %v623_v41 = vadd.f32 %v617_v31, %v613_v35  ;;  %v612_v24 = vadd.f32 %v611_v4, %v602_v9  ;;  %v707_v31 = vmul.f32 %v706_v52, %v706_v52  ;;  %v719_v42 = vmul.f32 %v718_v11, %v718_v11  ;;  %v5402_v4 = vld [vmem:[%s7911_s17 + $0x18] sm:$0xff] }
 0x4d7   : > { %v725_v46 = vmul.f32 %v724_v40, %v724_v40  ;;  %v748_v55 = vsel %vm4317_vm0, %v5399_v49, 0.0  ;;  %v765_v62 = vsel %vm4317_vm0, %v764_v13, 0.0  ;;  %v785_v3 = vsel %vm4317_vm0, %v5401_v1, 0.0 }
 0x4d8   : > { %v633_v45 = vadd.f32 %v627_v36, %v623_v41  ;;  %v622_v7 = vadd.f32 %v621_v21, %v612_v24  ;;  %v713_v36 = vmul.f32 %v712_v58, %v712_v58  ;;  %v749_v0 = vmul.f32 %v748_v55, %v748_v55 }
 0x4d9   : > { %v766_v6 = vmul.f32 %v765_v62, %v765_v62  ;;  %v795_v21 = vsel %vm4317_vm0, %v5402_v4, 0.0  ;;  %v805_v25 = vsel %vm4317_vm0, %v5403_v19, 0.0  ;;  %v757_v38 = vmov %v6323_v38 }
 0x4da   : > { %v650_v34 = vadd.f32 %v7862_v10, %v633_v45  ;;  %v632_v29 = vadd.f32 %v631_v26, %v622_v7  ;;  %v796_v7 = vmul.f32 %v795_v21, %v795_v21  ;;  %v754_v39 = vmov %v6325_v39 }
 0x4db   : > { %v778_v11 = vadd.s32 8, %v757_v38  ;;  %vm769_vm1 = vcmp.eq.s32.totalorder %v757_v38, %v754_v39  ;;  %v788_v40 = vadd.s32 16, %v757_v38  ;;  %v838_v55 = vadd.s32 56, %v757_v38 }
 0x4dc   : > { %v656_v59 = vadd.f32 %v654_v44, %v650_v34  ;;  %v649_v33 = vadd.f32 %v7862_v10, %v632_v29  ;;  %v736_v10 = vsel %vm4317_vm0, %v5397_v43, 0.0  ;;  %v742_v34 = vsel %vm4317_vm0, %v5398_v15, 0.0 }
 0x4dd   : > { %v737_v54 = vmul.f32 %v736_v10, %v736_v10  ;;  %v806_v29 = vmul.f32 %v805_v25, %v805_v25  ;;  %vm779_vm2 = vcmp.eq.s32.totalorder %v778_v11, %v754_v39  ;;  %v798_v43 = vadd.s32 24, %v757_v38 }
 0x4de   : > { %v662_v5 = vadd.f32 %v660_v50, %v656_v59  ;;  %v655_v41 = vadd.f32 %v654_v44, %v649_v33  ;;  %v731_v44 = vmul.f32 %v730_v23, %v730_v23  ;;  %v743_v59 = vmul.f32 %v742_v34, %v742_v34 }
 0x4df   : > { %vm789_vm3 = vcmp.eq.s32.totalorder %v788_v40, %v754_v39  ;;  %v808_v15 = vadd.s32 32, %v757_v38  ;;  %vm799_vm4 = vcmp.eq.s32.totalorder %v798_v43, %v754_v39  ;;  %vm839_vm12 = vcmp.eq.s32.totalorder %v838_v55, %v754_v39 }
 0x4e0   : > { %v668_v14 = vadd.f32 %v666_v61, %v662_v5  ;;  %v661_v28 = vadd.f32 %v660_v50, %v655_v41 }
 0x4e1   : > { %vm809_vm5 = vcmp.eq.s32.totalorder %v808_v15, %v754_v39 }
 0x4e2   : > { %v674_v20 = vadd.f32 %v672_v18, %v668_v14  ;;  %v667_v47 = vadd.f32 %v666_v61, %v661_v28  ;;  %v5400_v61 = vld [vmem:[%s7911_s17 + $0x8] sm:$0xff] }
 0x4e3   : > { %v775_v2 = vsel %vm4317_vm0, %v5400_v61, 0.0 }
 0x4e4   : > { %v680_v53 = vadd.f32 %v678_v17, %v674_v20  ;;  %v673_v51 = vadd.f32 %v672_v18, %v667_v47  ;;  %v786_v20 = vmul.f32 %v785_v3, %v785_v3 }
 0x4e6   : > { %v686_v30 = vadd.f32 %v684_v22, %v680_v53  ;;  %v679_v56 = vadd.f32 %v678_v17, %v673_v51  ;;  %v776_v17 = vmul.f32 %v775_v2, %v775_v2  ;;  %v5405_v53 = vld [vmem:[%s7911_s17 + $0x30] sm:$0xff]  ;;  %v790_v34 = vsel %vm789_vm3, 0.0, %v786_v20 }
 0x4e8   : > { %v692_v35 = vadd.f32 %v690_v27, %v686_v30  ;;  %v685_v16 = vadd.f32 %v684_v22, %v679_v56  ;;  %v5404_v22 = vld [vmem:[%s7911_s17 + $0x28] sm:$0xff]  ;;  %v5406_v30 = vld [vmem:[%s7911_s17 + $0x38] sm:$0xff]  ;;  %v780_v47 = vsel %vm779_vm2, 0.0, %v776_v17  ;;  %v810_v56 = vsel %vm809_vm5, 0.0, %v806_v29 }
 0x4ea   : > { %v709_v12 = vadd.f32 %v707_v31, %v692_v35  ;;  %v691_v5 = vadd.f32 %v690_v27, %v685_v16  ;;  %v815_v27 = vsel %vm4317_vm0, %v5404_v22, 0.0 }
 0x4eb   : > { %v816_v35 = vmul.f32 %v815_v27, %v815_v27 }
 0x4ec   : > { %v715_v45 = vadd.f32 %v713_v36, %v709_v12  ;;  %v708_v9 = vadd.f32 %v707_v31, %v691_v5  ;;  %v825_v31 = vsel %vm4317_vm0, %v5405_v53, 0.0 }
 0x4ed   : > { %v826_v12 = vmul.f32 %v825_v31, %v825_v31 }
 0x4ee   : > { %v721_v48 = vadd.f32 %v719_v42, %v715_v45  ;;  %v714_v60 = vadd.f32 %v713_v36, %v708_v9  ;;  %v835_v36 = vsel %vm4317_vm0, %v5406_v30, 0.0  ;;  %v770_v45 = vsel %vm769_vm1, 0.0, %v766_v6 }
 0x4ef   : > { %v836_v28 = vmul.f32 %v835_v36, %v835_v36 }
 0x4f0   : > { %v727_v50 = vadd.f32 %v725_v46, %v721_v48  ;;  %v720_v26 = vadd.f32 %v719_v42, %v714_v60 }
 0x4f2   : > { %v733_v57 = vadd.f32 %v731_v44, %v727_v50  ;;  %v726_v8 = vadd.f32 %v725_v46, %v720_v26  ;;  %v828_v50 = vadd.s32 48, %v757_v38 }
 0x4f4   : > { %v739_v63 = vadd.f32 %v737_v54, %v733_v57  ;;  %v732_v32 = vadd.f32 %v731_v44, %v726_v8  ;;  %v818_v44 = vadd.s32 40, %v757_v38  ;;  %vm829_vm7 = vcmp.eq.s32.totalorder %v828_v50, %v754_v39 }
 0x4f5   : > { %v830_v62 = vsel %vm829_vm7, 0.0, %v826_v12 }
 0x4f6   : > { %v745_v18 = vadd.f32 %v743_v59, %v739_v63  ;;  %v738_v37 = vadd.f32 %v737_v54, %v732_v32  ;;  %v800_v54 = vsel %vm799_vm4, 0.0, %v796_v7  ;;  %vm819_vm6 = vcmp.eq.s32.totalorder %v818_v44, %v754_v39 }
 0x4f7   : > { %v840_v63 = vsel %vm839_vm12, 0.0, %v836_v28 }
 0x4f8   : > { %v751_v14 = vadd.f32 %v749_v0, %v745_v18  ;;  %v744_v42 = vadd.f32 %v743_v59, %v738_v37  ;;  %v820_v59 = vsel %vm819_vm6, 0.0, %v816_v35 }
 0x4fa   : > { %v772_v24 = vadd.f32 %v766_v6, %v751_v14  ;;  %v750_v46 = vadd.f32 %v749_v0, %v744_v42 }
 0x4fc   : > { %v782_v52 = vadd.f32 %v776_v17, %v772_v24  ;;  %v771_v48 = vadd.f32 %v770_v45, %v750_v46 }
 0x4fe   : > { %v792_v58 = vadd.f32 %v786_v20, %v782_v52  ;;  %v781_v51 = vadd.f32 %v780_v47, %v771_v48 }
 0x500   : > { %v802_v33 = vadd.f32 %v796_v7, %v792_v58  ;;  %v791_v13 = vadd.f32 %v790_v34, %v781_v51 }
 0x502   : > { %v812_v41 = vadd.f32 %v806_v29, %v802_v33  ;;  %v801_v57 = vadd.f32 %v800_v54, %v791_v13 }
 0x504   : > { %v822_v23 = vadd.f32 %v816_v35, %v812_v41  ;;  %v811_v61 = vadd.f32 %v810_v56, %v801_v57 }
 0x506   : > { %v832_v10 = vadd.f32 %v826_v12, %v822_v23  ;;  %v821_v16 = vadd.f32 %v820_v59, %v811_v61 }
 0x508   : > { %v842_v49 = vadd.f32 %v836_v28, %v832_v10  ;;  %v831_v0 = vadd.f32 %v830_v62, %v821_v16 }
 0x50a   : > { %843 = vadd.xlane.f32.xlu0 %v842_v49  ;;  %v841_v1 = vadd.f32 %v840_v63, %v831_v0 }
 0x512   : > { %851 = vadd.xlane.f32.xlu0 %v841_v1 }
 0x57d   : > { %v844_v2 = vpop.xlane.xlu0 %843 }
 0x57e   : > { %v845_v5 = vrot.slane %v844_v2, 4 }
 0x580   : > { %v846_v18 = vadd.f32 %v845_v5, %v844_v2 }
 0x582   : > { %v847_v6 = vrot.slane %v846_v18, 2 }
 0x584   : > { %v848_v14 = vadd.f32 %v847_v6, %v846_v18 }
 0x585   : > { %v852_v4 = vpop.xlane.xlu0 %851 }
 0x586   : > { %v853_v3 = vrot.slane %v852_v4, 4  ;;  %v849_v21 = vrot.slane %v848_v14, 1 }
 0x588   : > { %v854_v9 = vadd.f32 %v853_v3, %v852_v4  ;;  %v850_v20 = vadd.f32 %v849_v21, %v848_v14 }
 0x58a   : > { %v855_v17 = vrot.slane %v854_v9, 2 }
 0x58c   : > { %v856_v19 = vadd.f32 %v855_v17, %v854_v9 }
 0x58e   : > { %v857_v60 = vrot.slane %v856_v19, 1 }
 0x590   : > { %v858_v24 = vadd.f32 %v857_v60, %v856_v19 }
 0x592   : > { %5447 = vpush %v858_v24 }
 0x593   : > { %5449 = vpush %v850_v20 }
 0x5c3   : > { %s5448_s2 = spop %5447 }
 0x5c4   : > { %s5450_s18 = spop %5449 }
 0x5c5   : > { %s861_s19 = smul.f32 1e-10, %s5450_s18 }
 0x5c7   : > { %p862_p11 = scmp.le.f32.partialorder %s5448_s2, %s861_s19 }
 0x5c9   : > { %p864_p12 = por %p863_p10, %p862_p11 }
 0x5cb   :  { %3620 = sbr.rel (!%p864_p12) target bundleno = 396 (0x18c), region = 929 }
 0x5d0 PF:  { %s7950_s20 = smov [#allocation12]  ;;  %v3625_v39 = vmov %v6325_v39  ;;  %v3628_v38 = vmov %v6323_v38  ;;  %s7963_s21 = smov [#allocation15] }
 0x5d1   :  { %v7955_v39 = vmov %v6325_v39  ;;  %v3690_v38 = vmov %v6323_v38  ;;  %v3629_v22 = vld [vmem:[%s7950_s20] sm:$0xff]  ;;  %vm3632_vm13 = vcmp.eq.s32.totalorder %v3628_v38, %v3625_v39  ;;  %v5407_v25 = vld [vmem:[%s7950_s20 + $0x8] sm:$0xff]  ;;  %v3637_v26 = vadd.s32 8, %v3628_v38  ;;  %v5408_v27 = vld [vmem:[%s7950_s20 + $0x10] sm:$0xff]  ;;  %s3622_s3 = smov [#allocation4]  ;;  %s3684_s22 = smov [#allocation6] }
 0x5d2   :  { %v3643_v52 = vadd.s32 16, %v3628_v38  ;;  %v3649_v7 = vadd.s32 24, %v3628_v38  ;;  %v3633_v53 = vsel %vm3632_vm13, %v3629_v22, 0.0  ;;  %v3655_v8 = vadd.s32 32, %v3628_v38  ;;  %v5409_v29 = vld [vmem:[%s7950_s20 + $0x18] sm:$0xff]  ;;  %v5410_v32 = vld [vmem:[%s7950_s20 + $0x20] sm:$0xff] }
 0x5d3   :  { %v3661_v58 = vadd.s32 40, %v3628_v38  ;;  %vm3694_vm0 = vcmp.eq.s32.totalorder %v3690_v38, %v7955_v39  ;;  %vm3638_vm8 = vcmp.eq.s32.totalorder %v3637_v26, %v3625_v39  ;;  %v3667_v30 = vadd.s32 48, %v3628_v38  ;;  %v3691_v33 = vld [vmem:[%s7963_s21] sm:$0xff]  ;;  %v5411_v36 = vld [vmem:[%s7950_s20 + $0x28] sm:$0xff]  ;;  %v5412_v42 = vld [vmem:[%s7950_s20 + $0x30] sm:$0xff]  ;;  %s8044_s24 = sld [smem:[#allocation30_spill]] }
 0x5d4   :  { %vm3644_vm9 = vcmp.eq.s32.totalorder %v3643_v52, %v3625_v39  ;;  %vm3650_vm10 = vcmp.eq.s32.totalorder %v3649_v7, %v3625_v39  ;;  %v3639_v31 = vsel %vm3638_vm8, %v5407_v25, %v3633_v53  ;;  %vm3656_vm11 = vcmp.eq.s32.totalorder %v3655_v8, %v3625_v39  ;;  %v5414_v40 = vld [vmem:[%s7963_s21 + $0x8] sm:$0xff]  ;;  %v5415_v43 = vld [vmem:[%s7963_s21 + $0x10] sm:$0xff]  ;;  %v5413_v46 = vld [vmem:[%s7950_s20 + $0x38] sm:$0xff]  ;;  %s8045_s27 = sld [smem:[#allocation31_spill]]  ;;  %s6206_s15 = smov [#allocation8]  }
 0x5d5   :  { %vm3662_vm14 = vcmp.eq.s32.totalorder %v3661_v58, %v3625_v39  ;;  %v3673_v11 = vadd.s32 56, %v3628_v38  ;;  %v3645_v35 = vsel %vm3644_vm9, %v5408_v27, %v3639_v31  ;;  %vm3668_vm15 = vcmp.eq.s32.totalorder %v3667_v30, %v3625_v39  ;;  %v5416_v15 = vld [vmem:[%s7963_s21 + $0x18] sm:$0xff]  ;;  %v5417_v49 = vld [vmem:[%s7963_s21 + $0x20] sm:$0xff]  ;;  %v5418_v50 = vld [vmem:[%s7963_s21 + $0x28] sm:$0xff]  ;;  %s8046_s30 = sld [smem:[#allocation32_spill]] }
 0x5d6   :  { %v3695_v37 = vsel %vm3694_vm0, %v3691_v33, 0.0  ;;  %v3699_v41 = vadd.s32 8, %v3690_v38  ;;  %v3651_v12 = vsel %vm3650_vm10, %v5409_v29, %v3645_v35  ;;  %v3705_v23 = vadd.s32 16, %v3690_v38  ;;  %v5419_v55 = vld [vmem:[%s7963_s21 + $0x30] sm:$0xff]  ;;  %v5420_v62 = vld [vmem:[%s7963_s21 + $0x38] sm:$0xff] }
 0x5d7   :  { %vm3674_vm1 = vcmp.eq.s32.totalorder %v3673_v11, %v3625_v39  ;;  %v3711_v28 = vadd.s32 24, %v3690_v38  ;;  %v3657_v45 = vsel %vm3656_vm11, %v5410_v32, %v3651_v12  ;;  %v3717_v10 = vadd.s32 32, %v3690_v38 }
 0x5d8   :  { %vm3700_vm2 = vcmp.eq.s32.totalorder %v3699_v41, %v7955_v39  ;;  %v3723_v47 = vadd.s32 40, %v3690_v38  ;;  %v3663_v48 = vsel %vm3662_vm14, %v5411_v36, %v3657_v45  ;;  %vm3706_vm3 = vcmp.eq.s32.totalorder %v3705_v23, %v7955_v39 }
 0x5d9   :  { %v3701_v44 = vsel %vm3700_vm2, %v5414_v40, %v3695_v37  ;;  %vm3712_vm4 = vcmp.eq.s32.totalorder %v3711_v28, %v7955_v39  ;;  %v3669_v34 = vsel %vm3668_vm15, %v5412_v42, %v3663_v48  ;;  %vm3718_vm5 = vcmp.eq.s32.totalorder %v3717_v10, %v7955_v39 }
 0x5da   :  { %v3707_v51 = vsel %vm3706_vm3, %v5415_v43, %v3701_v44  ;;  %vm3724_vm6 = vcmp.eq.s32.totalorder %v3723_v47, %v7955_v39  ;;  %v3675_v54 = vsel %vm3674_vm1, %v5413_v46, %v3669_v34  ;;  %v3729_v56 = vadd.s32 48, %v3690_v38 }
 0x5db   :  { %v3713_v13 = vsel %vm3712_vm4, %v5416_v15, %v3707_v51  ;;  %v3735_v57 = vadd.s32 56, %v3690_v38  ;;  %v3676_v59 = vrot.slane %v3675_v54, 4  ;;  %s6202_s1 = smov %s8046_s30  }
 0x5dc   :  { %v3719_v61 = vsel %vm3718_vm5, %v5417_v49, %v3713_v13  ;;  %vm3730_vm7 = vcmp.eq.s32.totalorder %v3729_v56, %v7955_v39 }
 0x5dd   :  { %v3725_v16 = vsel %vm3724_vm6, %v5418_v50, %v3719_v61  ;;  %vm3736_vm12 = vcmp.eq.s32.totalorder %v3735_v57, %v7955_v39  ;;  %v3677_v63 = vadd.f32 %v3676_v59, %v3675_v54 }
 0x5de   :  { %v3731_v0 = vsel %vm3730_vm7, %v5419_v55, %v3725_v16 }
 0x5df   :  { %v3737_v1 = vsel %vm3736_vm12, %v5420_v62, %v3731_v0  ;;  %v3678_v2 = vrot.slane %v3677_v63, 2 }
 0x5e0   :  { %v3738_v5 = vrot.slane %v3737_v1, 4 }
 0x5e1   :  { %v3679_v18 = vadd.f32 %v3678_v2, %v3677_v63 }
 0x5e2   :  { %v3739_v6 = vadd.f32 %v3738_v5, %v3737_v1 }
 0x5e3   :  { %v3680_v4 = vrot.slane %v3679_v18, 1 }
 0x5e4   :  { %v3740_v3 = vrot.slane %v3739_v6, 2 }
 0x5e5   :  { %v3681_v9 = vadd.f32 %v3680_v4, %v3679_v18 }
 0x5e6   :  { %v3741_v38 = vadd.f32 %v3740_v3, %v3739_v6 }
 0x5e7   :  { %3682 = vst [vmem:[%s3622_s3] sm:$0x1] %v3681_v9 }
 0x5e8   :  { %v3742_v14 = vrot.slane %v3741_v38, 1 }
 0x5ea   :  { %v3743_v17 = vadd.f32 %v3742_v14, %v3741_v38 }
 0x5ec   :  { %3744 = vst [vmem:[%s3684_s22] sm:$0x1] %v3743_v17 }
 0x5ee   :  { %v3747_v19 = vld [vmem:[#allocation4] sm:$0x1] }
 0x5ef   :  { %3750 = vst [vmem:[#allocation5] sm:$0x1] %v3747_v19 }
 0x5f3   :  { %v3753_v39 = vld [vmem:[#allocation6] sm:$0x1] }
 0x5f4   :  { %3756 = vst [vmem:[#allocation7] sm:$0x1] %v3753_v39 }
 0x5f6   :  { %v3813_v21 = vld [vmem:[#allocation5] sm:$0x1] }
 0x5f7   :  { %3814 = vst [vmem:[%s8044_s24] sm:$0x1] %v3813_v21 }
 0x5fb   :  { %v3871_v60 = vld [vmem:[#allocation7] sm:$0x1] }
 0x5fc   :  { %3872 = vst [vmem:[%s8045_s27] sm:$0x1] %v3871_v60 }
 0x5fd LB: > { %v3916_v24 = vld [vmem:[%s6208_s15] sm:$0xff]  ;;  %s3918_s15 = scalar_lea.vmem %s6208_s15, 8   ;;  %s6208_s15 = sphi %s6206_s15, %s3918_s15   ;;  %s6204_s1 = sphi %s6202_s1, %s3919_s1  }
 0x5fe   : > { %3917 = vst [vmem:[%s6204_s1] sm:$0xff] %v3916_v24  ;;  %s3919_s1 = scalar_lea.vmem %s6204_s1, 8   ;;  %p3913_p13 = scmp.gt.s32.totalorder %s3918_s15, [#allocation8 + $0x38] }
 0x5ff   :  { %s8047_s9 = sld [smem:[#allocation33_spill]] (%p3913_p13)  ;;  %s6214_s5 = smov (%p3913_p13), [#allocation9]  }
 0x600   :  { %3915 = sbr.rel (!%p3913_p13) target bundleno = 1533 (0x5fd), region = 995 }
 0x605   :  { %s6210_s7 = smov %s8047_s9  }
 0x606 LB: > { %v3972_v20 = vld [vmem:[%s6216_s5] sm:$0xff]  ;;  %s3974_s5 = scalar_lea.vmem %s6216_s5, 8   ;;  %s6216_s5 = sphi %s6214_s5, %s3974_s5   ;;  %s6212_s7 = sphi %s6210_s7, %s3975_s7  }
 0x607   : > { %3973 = vst [vmem:[%s6212_s7] sm:$0xff] %v3972_v20  ;;  %s3975_s7 = scalar_lea.vmem %s6212_s7, 8   ;;  %p3969_p0 = scmp.gt.s32.totalorder %s3974_s5, [#allocation9 + $0x38] }
 0x608   :  { %s8048_s11 = sld [smem:[#allocation34_spill]] (%p3969_p0)  ;;  %s6222_s13 = smov (%p3969_p0), [#allocation10]  }
 0x609   :  { %3971 = sbr.rel (!%p3969_p0) target bundleno = 1542 (0x606), region = 1017 }
 0x60e   :  { %s6218_s12 = smov %s8048_s11  }
 0x60f LB: > { %v4028_v22 = vld [vmem:[%s6224_s13] sm:$0xff]  ;;  %s4030_s13 = scalar_lea.vmem %s6224_s13, 8   ;;  %s6224_s13 = sphi %s6222_s13, %s4030_s13   ;;  %s6220_s12 = sphi %s6218_s12, %s4031_s12  }
 0x610   : > { %4029 = vst [vmem:[%s6220_s12] sm:$0xff] %v4028_v22  ;;  %s4031_s12 = scalar_lea.vmem %s6220_s12, 8   ;;  %p4025_p1 = scmp.gt.s32.totalorder %s4030_s13, [#allocation10 + $0x38] }
 0x611   :  { %s8049_s17 = sld [smem:[#allocation35_spill]] (%p4025_p1)  ;;  %s6230_s18 = smov (%p4025_p1), [#allocation11]  }
 0x612   :  { %4027 = sbr.rel (!%p4025_p1) target bundleno = 1551 (0x60f), region = 1039 }
 0x617   :  { %s6226_s2 = smov %s8049_s17  }
 0x618 LB: > { %v4084_v25 = vld [vmem:[%s6232_s18] sm:$0xff]  ;;  %s4086_s18 = scalar_lea.vmem %s6232_s18, 8   ;;  %s6232_s18 = sphi %s6230_s18, %s4086_s18   ;;  %s6228_s2 = sphi %s6226_s2, %s4087_s2  }
 0x619   : > { %4085 = vst [vmem:[%s6228_s2] sm:$0xff] %v4084_v25  ;;  %s4087_s2 = scalar_lea.vmem %s6228_s2, 8   ;;  %p4081_p2 = scmp.gt.s32.totalorder %s4086_s18, [#allocation11 + $0x38] }
 0x61b   :  { %4083 = sbr.rel (!%p4081_p2) target bundleno = 1560 (0x618), region = 1061 }

// kernel: fid_forward.2
= control target key start
LH: loop header
LB: loop body
LE: loop exit
PB: predicated region body
PF: predicated region fallthrough
CT: control target
= control target key end

     0   :  { %s946_s12 = smov 0   ;;  %s948_s13 = smov 0   ;;  %s1055_s0 = inlined_call_operand.vmem [shape: f32[2,32,128], index: 0, kind: input, shape index: {}]   ;;  %s1056_s1 = inlined_call_operand.vmem [shape: f32[2,1,128], index: 1, kind: output, shape index: {0}]   ;;  %s1057_s2 = inlined_call_operand.vmem [shape: f32[2,128,128], index: 2, kind: output, shape index: {1}]   ;;  %s1058_s3 = inlined_call_operand.vmem [shape: f32[2,1,128], index: 3, kind: output, shape index: {2}]  }
   0x1   :  { %s950_s14 = smov 0  }
   0x2 LB: > { %s26_s15 = sadd.s32 1, %s919_s13  ;;  %p829_p0 = scmp.ge.s32.totalorder %s923_s14, 1  ;;  %s923_s14 = sphi %s950_s14, %s14_s14   ;;  %s919_s13 = sphi %s948_s13, %s1060_s13   ;;  %s915_s12 = sphi %s946_s12, %s1059_s12  }
   0x3   : > { %p28_p1 = scmp.ge.s32.totalorder %s26_s15, 2  ;;  %p161_p2 = scmp.lt.s32.totalorder %s923_s14, 3 }
   0x5   : > { %s1062_s15 = smov (%p28_p1, %s26_s15), 0  ;;  %p162_p3 = pnand %p829_p0, %p161_p2 }
   0x6   : > { %p196_p4 = scmp.lt.s32.totalorder (!%p162_p3), %s915_s12, 1 }
   0x7   : > { %165 = sbr.rel (%p162_p3) target bundleno = 471 (0x1d7), region = 24 }
   0xc   : > { %s1064_s12 = smov (!%p196_p4, %s915_s12), 1  ;;  %v925_v0 = vmov 0.0   ;;  %vm318_vm0 = vcmask 261120   ;;  %vm551_vm1 = vcmask 1040384   ;;  %vm502_vm2 = vcmask 7168  }
   0xd   : > { %s869_s16 = sshll.u32 %s1064_s12, 5  ;;  %s971_s19 = scalar_lea.vmem %s1056_s1, %s1064_s12 }
   0xe   : > { %s203_s22 = scalar_lea.vmem %s1055_s0, %s869_s16  ;;  %220 = vst [vmem:[%s971_s19] sm:$0x1] %v925_v0  ;;  %s981_s25 = scalar_lea.vmem %s1058_s3, %s1064_s12 }
   0xf   : > { %v238_v1 = vld [vmem:[%s203_s22] sm:$0xff]  ;;  %v241_v2 = vld [vmem:[%s203_s22 + $0x18] sm:$0xff]  ;;  %237 = vst [vmem:[%s981_s25] sm:$0x1] %v925_v0  ;;  %v240_v3 = vld [vmem:[%s203_s22 + $0x10] sm:$0xff]  ;;  %s870_s26 = sshll.u32 %s1064_s12, 7 }
  0x10   : > { %286 = vxpose.xlu0.b32.start [1/4] (short) %v238_v1, 128  ;;  %v255_v4 = vmul.f32 %v238_v1, %v238_v1  ;;  %v239_v5 = vld [vmem:[%s203_s22 + $0x8] sm:$0xff]  ;;  %379 = vmatpush.msra.mxu0 %v241_v2  ;;  %v257_v7 = vmul.f32 %v240_v3, %v240_v3  ;;  %v258_v9 = vmul.f32 %v241_v2, %v241_v2  ;;  %s1028_s29 = scalar_lea.vmem %s1057_s2, %s870_s26 }
  0x11   : > { %v256_v6 = vmul.f32 %v239_v5, %v239_v5  ;;  %v243_v8 = vadd.f32 %v239_v5, %v238_v1  ;;  %871 = vmatpush.msra.mxu2 %v241_v2 }
  0x12   : > { %380 = vmatpush.msra.mxu0 %v240_v3 }
  0x13   : > { %v244_v10 = vadd.f32 %v243_v8, %v240_v3  ;;  %v259_v11 = vadd.f32 %v256_v6, %v255_v4  ;;  %872 = vmatpush.msra.mxu2 %v240_v3 }
  0x14   : > { %381 = vmatpush.msra.mxu0 %v239_v5 }
  0x15   : > { %v245_v12 = vadd.f32 %v244_v10, %v241_v2  ;;  %v260_v13 = vadd.f32 %v259_v11, %v257_v7  ;;  %873 = vmatpush.msra.mxu2 %v239_v5  ;;  %v242_v24 = vld [vmem:[%s971_s19] sm:$0x1] }
  0x16   : > { %382 = vmatpush.msra.mxu0 %v238_v1  ;;  %v254_v27 = vld [vmem:[%s981_s25] sm:$0x1] }
  0x17   : > { %v246_v14 = vrot.slane %v245_v12, 4  ;;  %v261_v15 = vadd.f32 %v260_v13, %v258_v9  ;;  %874 = vmatpush.msra.mxu2 %v238_v1 }
  0x18   : > { %287 = vxpose.xlu0.b32.cont [2/4] (short) %v239_v5, 128 }
  0x19   : > { %v247_v16 = vadd.f32 %v246_v14, %v245_v12  ;;  %v262_v17 = vrot.slane %v261_v15, 4 }
  0x1b   : > { %v248_v18 = vrot.slane %v247_v16, 2  ;;  %v263_v19 = vadd.f32 %v262_v17, %v261_v15 }
  0x1d   : > { %v249_v20 = vadd.f32 %v248_v18, %v247_v16  ;;  %v264_v21 = vrot.slane %v263_v19, 2 }
  0x1f   : > { %v250_v22 = vrot.slane %v249_v20, 1  ;;  %v265_v23 = vadd.f32 %v264_v21, %v263_v19 }
  0x20   : > { %288 = vxpose.xlu0.b32.cont [3/4] (short) %v240_v3, 128 }
  0x21   : > { %v251_v25 = vadd.f32 %v250_v22, %v249_v20  ;;  %v266_v26 = vrot.slane %v265_v23, 1 }
  0x23   : > { %v252_v28 = vadd.f32 %v251_v25, %v242_v24  ;;  %v267_v29 = vadd.f32 %v266_v26, %v265_v23 }
  0x25   : > { %253 = vst [vmem:[%s971_s19] sm:$0x1] %v252_v28  ;;  %v268_v30 = vadd.f32 %v267_v29, %v254_v27 }
  0x27   : > { %269 = vst [vmem:[%s981_s25] sm:$0x1] %v268_v30 }
  0x28   : > { %289 = vxpose.xlu0.b32.end [4/4] (short) %v241_v2, 128 }
  0x2c   : > { %v467_v31 = vld [vmem:[%s971_s19] sm:$0x1] }
  0x2d   : > { %v468_v32 = vmul.f32 0.03125, %v467_v31 }
  0x2e   : > { %v700_v34 = vld [vmem:[%s981_s25] sm:$0x1] }
  0x2f   : > { %470 = vxpose.xlu1.b32.start.end [1/1] (short) %v468_v32, 128  ;;  %469 = vst [vmem:[%s971_s19] sm:$0x1] %v468_v32  ;;  %v701_v33 = vmul.f32 32.0, %v468_v32  ;;  %850 = vmatpush.msk.msra.mxu1 %vm551_vm1, %v468_v32 }
  0x30   : > { %875 = vmatpush.msk.msra.mxu3 %vm551_vm1, %v468_v32 }
  0x31   : > { %v702_v35 = vmul.f32 %v701_v33, %v468_v32 }
  0x33   : > { %v703_v36 = vsub.f32 %v700_v34, %v702_v35 }
  0x35   : > { %v704_v37 = vmul.f32 0.032258064, %v703_v36 }
  0x37   : > { %705 = vst [vmem:[%s981_s25] sm:$0x1] %v704_v37 }
  0xb4   : > { %v302_v38 = vpop.trf.xlu0 }
  0xb5   : > { %834 = vmatmul.msk.f32.vlgmr.msra.gmra.mxu0 %vm318_vm0, %v302_v38 }
  0xbc   : > { %v303_v39 = vpop.trf.xlu0 }
  0xbd   : > { %835 = vmatmul.msk.f32.gmra.mxu0 %vm318_vm0, %v303_v39 }
  0xc4   : > { %v304_v40 = vpop.trf.xlu0 }
  0xc5   : > { %836 = vmatmul.msk.f32.gmra.mxu0 %vm318_vm0, %v304_v40 }
  0xcc   : > { %v305_v41 = vpop.trf.xlu0 }
  0xcd   : > { %837 = vmatmul.msk.f32.gmra.mxu0 %vm318_vm0, %v305_v41 }
  0xd3   : > { %v486_v42 = vpop.trf.xlu1 }
  0xd4   : > { %851 = vmatmul.msk.f32.vlgmr.msra.gmra.mxu1 %vm502_vm2, %v486_v42  ;;  %v306_v43 = vpop.trf.xlu0 }
  0xd5   : > { %838 = vmatmul.msk.f32.gmra.mxu0 %vm318_vm0, %v306_v43 }
  0xdb   : > { %v487_v44 = vpop.trf.xlu1 }
  0xdc   : > { %852 = vmatmul.msk.f32.gmra.mxu1 %vm502_vm2, %v487_v44  ;;  %v307_v45 = vpop.trf.xlu0 }
  0xdd   : > { %839 = vmatmul.msk.f32.gmra.mxu0 %vm318_vm0, %v307_v45 }
  0xe3   : > { %v488_v46 = vpop.trf.xlu1 }
  0xe4   : > { %853 = vmatmul.msk.f32.gmra.mxu1 %vm502_vm2, %v488_v46  ;;  %v308_v47 = vpop.trf.xlu0 }
  0xe5   : > { %840 = vmatmul.msk.f32.gmra.mxu0 %vm318_vm0, %v308_v47 }
  0xeb   : > { %v489_v48 = vpop.trf.xlu1 }
  0xec   : > { %854 = vmatmul.msk.f32.gmra.mxu1 %vm502_vm2, %v489_v48  ;;  %v309_v49 = vpop.trf.xlu0 }
  0xed   : > { %841 = vmatmul.msk.f32.gmra.mxu0 %vm318_vm0, %v309_v49 }
  0xf3   : > { %v490_v50 = vpop.trf.xlu1 }
  0xf4   : > { %855 = vmatmul.msk.f32.gmra.mxu1 %vm502_vm2, %v490_v50  ;;  %v310_v51 = vpop.trf.xlu0 }
  0xf5   : > { %842 = vmatmul.msk.f32.vlgmr.msra.gmra.mxu2 %vm318_vm0, %v310_v51 }
  0xfb   : > { %v491_v52 = vpop.trf.xlu1 }
  0xfc   : > { %856 = vmatmul.msk.f32.gmra.mxu1 %vm502_vm2, %v491_v52  ;;  %v311_v53 = vpop.trf.xlu0 }
  0xfd   : > { %843 = vmatmul.msk.f32.gmra.mxu2 %vm318_vm0, %v311_v53 }
 0x103   : > { %v492_v54 = vpop.trf.xlu1 }
 0x104   : > { %857 = vmatmul.msk.f32.gmra.mxu1 %vm502_vm2, %v492_v54  ;;  %v312_v55 = vpop.trf.xlu0 }
 0x105   : > { %844 = vmatmul.msk.f32.gmra.mxu2 %vm318_vm0, %v312_v55 }
 0x10b   : > { %v493_v56 = vpop.trf.xlu1 }
 0x10c   : > { %858 = vmatmul.msk.f32.gmra.mxu1 %vm502_vm2, %v493_v56  ;;  %v313_v57 = vpop.trf.xlu0 }
 0x10d   : > { %845 = vmatmul.msk.f32.gmra.mxu2 %vm318_vm0, %v313_v57 }
 0x113   : > { %v494_v58 = vpop.trf.xlu1 }
 0x114   : > { %859 = vmatmul.msk.f32.gmra.mxu1 %vm502_vm2, %v494_v58  ;;  %v314_v59 = vpop.trf.xlu0 }
 0x115   : > { %846 = vmatmul.msk.f32.gmra.mxu2 %vm318_vm0, %v314_v59 }
 0x11b   : > { %v495_v60 = vpop.trf.xlu1 }
 0x11c   : > { %860 = vmatmul.msk.f32.vlgmr.msra.gmra.mxu3 %vm502_vm2, %v495_v60  ;;  %v315_v61 = vpop.trf.xlu0 }
 0x11d   : > { %847 = vmatmul.msk.f32.gmra.mxu2 %vm318_vm0, %v315_v61 }
 0x123   : > { %v496_v62 = vpop.trf.xlu1 }
 0x124   : > { %861 = vmatmul.msk.f32.gmra.mxu3 %vm502_vm2, %v496_v62  ;;  %v316_v63 = vpop.trf.xlu0 }
 0x125   : > { %848 = vmatmul.msk.f32.gmra.mxu2 %vm318_vm0, %v316_v63 }
 0x12b   : > { %v497_v0 = vpop.trf.xlu1 }
 0x12c   : > { %862 = vmatmul.msk.f32.gmra.mxu3 %vm502_vm2, %v497_v0  ;;  %v317_v1 = vpop.trf.xlu0 }
 0x12d   : > { %849 = vmatmul.msk.f32.gmra.mxu2 %vm318_vm0, %v317_v1 }
 0x132   : > { %v384_v4 = vpop.f32.mrf.mxu0 }
 0x133   : > { %v498_v2 = vpop.trf.xlu1 }
 0x134   : > { %863 = vmatmul.msk.f32.gmra.mxu3 %vm502_vm2, %v498_v2 }
 0x13a   : > { %v387_v6 = vpop.f32.mrf.mxu0 }
 0x13b   : > { %v499_v3 = vpop.trf.xlu1 }
 0x13c   : > { %864 = vmatmul.msk.f32.gmra.mxu3 %vm502_vm2, %v499_v3 }
 0x142   : > { %v390_v10 = vpop.f32.mrf.mxu0 }
 0x143   : > { %v500_v5 = vpop.trf.xlu1 }
 0x144   : > { %865 = vmatmul.msk.f32.gmra.mxu3 %vm502_vm2, %v500_v5 }
 0x14a   : > { %v393_v16 = vpop.f32.mrf.mxu0 }
 0x14b   : > { %v501_v7 = vpop.trf.xlu1 }
 0x14c   : > { %866 = vmatmul.msk.f32.gmra.mxu3 %vm502_vm2, %v501_v7 }
 0x151   : > { %v572_v8 = vpop.f32.mrf.mxu1 }
 0x152   : > { %v636_v9 = vmul.f32 32.0, %v572_v8  ;;  %v396_v22 = vpop.f32.mrf.mxu0 }
 0x154   : > { %v652_v11 = vsub.f32 %v384_v4, %v636_v9 }
 0x156   : > { %v668_v12 = vmul.f32 0.032258064, %v652_v11 }
 0x158   : > { %684 = vst [vmem:[%s1028_s29] sm:$0xff] %v668_v12 }
 0x159   : > { %v575_v13 = vpop.f32.mrf.mxu1 }
 0x15a   : > { %v637_v14 = vmul.f32 32.0, %v575_v13  ;;  %v399_v27 = vpop.f32.mrf.mxu0 }
 0x15c   : > { %v653_v15 = vsub.f32 %v387_v6, %v637_v14 }
 0x15e   : > { %v669_v17 = vmul.f32 0.032258064, %v653_v15 }
 0x160   : > { %685 = vst [vmem:[%s1028_s29 + $0x8] sm:$0xff] %v669_v17 }
 0x161   : > { %v578_v18 = vpop.f32.mrf.mxu1 }
 0x162   : > { %v638_v19 = vmul.f32 32.0, %v578_v18  ;;  %v402_v34 = vpop.f32.mrf.mxu0 }
 0x164   : > { %v654_v20 = vsub.f32 %v390_v10, %v638_v19 }
 0x166   : > { %v670_v21 = vmul.f32 0.032258064, %v654_v20 }
 0x168   : > { %686 = vst [vmem:[%s1028_s29 + $0x10] sm:$0xff] %v670_v21 }
 0x169   : > { %v581_v23 = vpop.f32.mrf.mxu1 }
 0x16a   : > { %v639_v24 = vmul.f32 32.0, %v581_v23  ;;  %v405_v40 = vpop.f32.mrf.mxu0 }
 0x16c   : > { %v655_v25 = vsub.f32 %v393_v16, %v639_v24 }
 0x16e   : > { %v671_v26 = vmul.f32 0.032258064, %v655_v25 }
 0x170   : > { %687 = vst [vmem:[%s1028_s29 + $0x18] sm:$0xff] %v671_v26 }
 0x171   : > { %v584_v28 = vpop.f32.mrf.mxu1 }
 0x172   : > { %v640_v29 = vmul.f32 32.0, %v584_v28 }
 0x174   : > { %v656_v30 = vsub.f32 %v396_v22, %v640_v29 }
 0x176   : > { %v672_v31 = vmul.f32 0.032258064, %v656_v30 }
 0x178   : > { %688 = vst [vmem:[%s1028_s29 + $0x20] sm:$0xff] %v672_v31  ;;  %v408_v42 = vpop.f32.mrf.mxu2 }
 0x179   : > { %v587_v32 = vpop.f32.mrf.mxu1 }
 0x17a   : > { %v641_v33 = vmul.f32 32.0, %v587_v32 }
 0x17c   : > { %v657_v35 = vsub.f32 %v399_v27, %v641_v33 }
 0x17e   : > { %v673_v36 = vmul.f32 0.032258064, %v657_v35 }
 0x180   : > { %689 = vst [vmem:[%s1028_s29 + $0x28] sm:$0xff] %v673_v36  ;;  %v411_v47 = vpop.f32.mrf.mxu2 }
 0x181   : > { %v590_v37 = vpop.f32.mrf.mxu1 }
 0x182   : > { %v642_v38 = vmul.f32 32.0, %v590_v37 }
 0x184   : > { %v658_v39 = vsub.f32 %v402_v34, %v642_v38 }
 0x186   : > { %v674_v41 = vmul.f32 0.032258064, %v658_v39 }
 0x188   : > { %690 = vst [vmem:[%s1028_s29 + $0x30] sm:$0xff] %v674_v41  ;;  %v414_v52 = vpop.f32.mrf.mxu2 }
 0x189   : > { %v593_v43 = vpop.f32.mrf.mxu1 }
 0x18a   : > { %v643_v44 = vmul.f32 32.0, %v593_v43 }
 0x18c   : > { %v659_v45 = vsub.f32 %v405_v40, %v643_v44 }
 0x18e   : > { %v675_v46 = vmul.f32 0.032258064, %v659_v45 }
 0x190   : > { %691 = vst [vmem:[%s1028_s29 + $0x38] sm:$0xff] %v675_v46  ;;  %v417_v56 = vpop.f32.mrf.mxu2 }
 0x191   : > { %v596_v48 = vpop.f32.mrf.mxu1 }
 0x192   : > { %v644_v49 = vmul.f32 32.0, %v596_v48 }
 0x194   : > { %v660_v50 = vsub.f32 %v408_v42, %v644_v49 }
 0x196   : > { %v676_v51 = vmul.f32 0.032258064, %v660_v50 }
 0x198   : > { %692 = vst [vmem:[%s1028_s29 + $0x40] sm:$0xff] %v676_v51  ;;  %v420_v62 = vpop.f32.mrf.mxu2 }
 0x19f   : > { %v599_v53 = vpop.f32.mrf.mxu3 }
 0x1a0   : > { %v645_v54 = vmul.f32 32.0, %v599_v53  ;;  %v423_v3 = vpop.f32.mrf.mxu2 }
 0x1a2   : > { %v661_v55 = vsub.f32 %v411_v47, %v645_v54 }
 0x1a4   : > { %v677_v57 = vmul.f32 0.032258064, %v661_v55 }
 0x1a6   : > { %693 = vst [vmem:[%s1028_s29 + $0x48] sm:$0xff] %v677_v57 }
 0x1a7   : > { %v602_v58 = vpop.f32.mrf.mxu3 }
 0x1a8   : > { %v646_v59 = vmul.f32 32.0, %v602_v58  ;;  %v426_v10 = vpop.f32.mrf.mxu2 }
 0x1aa   : > { %v662_v60 = vsub.f32 %v414_v52, %v646_v59 }
 0x1ac   : > { %v678_v61 = vmul.f32 0.032258064, %v662_v60 }
 0x1ae   : > { %694 = vst [vmem:[%s1028_s29 + $0x50] sm:$0xff] %v678_v61 }
 0x1af   : > { %v605_v63 = vpop.f32.mrf.mxu3 }
 0x1b0   : > { %v647_v0 = vmul.f32 32.0, %v605_v63  ;;  %v429_v16 = vpop.f32.mrf.mxu2 }
 0x1b2   : > { %v663_v1 = vsub.f32 %v417_v56, %v647_v0 }
 0x1b4   : > { %v679_v2 = vmul.f32 0.032258064, %v663_v1 }
 0x1b6   : > { %695 = vst [vmem:[%s1028_s29 + $0x58] sm:$0xff] %v679_v2 }
 0x1b7   : > { %v608_v4 = vpop.f32.mrf.mxu3 }
 0x1b8   : > { %v648_v5 = vmul.f32 32.0, %v608_v4 }
 0x1ba   : > { %v664_v6 = vsub.f32 %v420_v62, %v648_v5 }
 0x1bc   : > { %v680_v7 = vmul.f32 0.032258064, %v664_v6 }
 0x1be   : > { %696 = vst [vmem:[%s1028_s29 + $0x60] sm:$0xff] %v680_v7 }
 0x1bf   : > { %v611_v8 = vpop.f32.mrf.mxu3 }
 0x1c0   : > { %v649_v9 = vmul.f32 32.0, %v611_v8 }
 0x1c2   : > { %v665_v11 = vsub.f32 %v423_v3, %v649_v9 }
 0x1c4   : > { %v681_v12 = vmul.f32 0.032258064, %v665_v11 }
 0x1c6   : > { %697 = vst [vmem:[%s1028_s29 + $0x68] sm:$0xff] %v681_v12 }
 0x1c7   : > { %v614_v13 = vpop.f32.mrf.mxu3 }
 0x1c8   : > { %v650_v14 = vmul.f32 32.0, %v614_v13 }
 0x1ca   : > { %v666_v15 = vsub.f32 %v426_v10, %v650_v14 }
 0x1cc   : > { %v682_v17 = vmul.f32 0.032258064, %v666_v15 }
 0x1ce   : > { %698 = vst [vmem:[%s1028_s29 + $0x70] sm:$0xff] %v682_v17 }
 0x1cf   : > { %v617_v18 = vpop.f32.mrf.mxu3 }
 0x1d0   : > { %v651_v19 = vmul.f32 32.0, %v617_v18 }
 0x1d2   : > { %v667_v20 = vsub.f32 %v429_v16, %v651_v19 }
 0x1d4   : > { %v683_v21 = vmul.f32 0.032258064, %v667_v20 }
 0x1d6   : > { %699 = vst [vmem:[%s1028_s29 + $0x78] sm:$0xff] %v683_v21 }
 0x1d7 PF: > { %s14_s14 = sadd.s32 1, %s923_s14   ;;  %s1059_s12 = smov %s919_s13 }
 0x1d8   : > { %p11_p5 = scmp.ge.s32.totalorder %s14_s14, 4   ;;  %s1060_s13 = smov %s1062_s15 }
 0x1da   :  { %13 = sbr.rel (!%p11_p5) target bundleno = 2 (0x2), region = 86 }

// kernel: fid_forward.3
= control target key start
LH: loop header
LB: loop body
LE: loop exit
PB: predicated region body
PF: predicated region fallthrough
CT: control target
= control target key end

     0   :  { %s652_s1 = inlined_call_operand.vmem [shape: f32[1,128], index: 1, kind: input, shape index: {}, may-alias: {1,3}]   ;;  %s653_s0 = inlined_call_operand.vmem [shape: f32[128,128], index: 0, kind: input, shape index: {}, may-alias: {0,2}]   ;;  %s654_s4 = inlined_call_operand.vmem [shape: f32[128,128], index: 4, kind: input, shape index: {}]   ;;  %s655_s3 = inlined_call_operand.vmem [shape: f32[1,128], index: 3, kind: input, shape index: {}, may-alias: {1,3}]   ;;  %s656_s2 = inlined_call_operand.vmem [shape: f32[128,128], index: 2, kind: input, shape index: {}, may-alias: {0,2}]   ;;  %s657_s5 = inlined_call_operand.vmem [shape: f32[128,128], index: 5, kind: output, shape index: {}]  }
   0x1   :  { %v24_v0 = vld [vmem:[%s652_s1] sm:$0x1]  ;;  %v39_v15 = vld [vmem:[%s653_s0 + $0x8] sm:$0xff]  ;;  %v40_v17 = vld [vmem:[%s653_s0 + $0x10] sm:$0xff] }
   0x2   :  { %v25_v1 = vmax.f32 %v24_v0, 0.0  ;;  %v38_v12 = vld [vmem:[%s653_s0] sm:$0xff]  ;;  %v41_v19 = vld [vmem:[%s653_s0 + $0x18] sm:$0xff]  ;;  %v43_v23 = vld [vmem:[%s653_s0 + $0x28] sm:$0xff] }
   0x3   :  { %v42_v21 = vld [vmem:[%s653_s0 + $0x20] sm:$0xff]  ;;  %v44_v25 = vld [vmem:[%s653_s0 + $0x30] sm:$0xff]  ;;  %v45_v27 = vld [vmem:[%s653_s0 + $0x38] sm:$0xff] }
   0x4   :  { %384 = vrsqrt.f32 %v25_v1  ;;  %vm33_vm0 = vcmp.eq.f32.partialorder %v25_v1, inf  ;;  %v36_v8 = vand.u32 2147483648, %v25_v1  ;;  %vm35_vm1 = vcmp.eq.f32.partialorder %v25_v1, 0.0  ;;  %v46_v29 = vld [vmem:[%s653_s0 + $0x40] sm:$0xff]  ;;  %v47_v31 = vld [vmem:[%s653_s0 + $0x48] sm:$0xff]  ;;  %v48_v33 = vld [vmem:[%s653_s0 + $0x50] sm:$0xff] }
   0x5   :  { %v49_v35 = vld [vmem:[%s653_s0 + $0x58] sm:$0xff]  ;;  %v87_v38 = vld [vmem:[%s654_s4 + $0x70] sm:$0xff]  ;;  %v50_v39 = vld [vmem:[%s653_s0 + $0x60] sm:$0xff] }
   0x6   :  { %v88_v37 = vld [vmem:[%s654_s4 + $0x78] sm:$0xff]  ;;  %v86_v40 = vld [vmem:[%s654_s4 + $0x68] sm:$0xff]  ;;  %v85_v42 = vld [vmem:[%s654_s4 + $0x60] sm:$0xff] }
   0x7   :  { %121 = vmatpush.msra.mxu0 %v88_v37  ;;  %352 = vmatpush.msra.mxu2 %v88_v37  ;;  %v84_v43 = vld [vmem:[%s654_s4 + $0x58] sm:$0xff]  ;;  %v83_v44 = vld [vmem:[%s654_s4 + $0x50] sm:$0xff]  ;;  %v51_v45 = vld [vmem:[%s653_s0 + $0x68] sm:$0xff] }
   0x8   :  { %v82_v46 = vld [vmem:[%s654_s4 + $0x48] sm:$0xff]  ;;  %v81_v48 = vld [vmem:[%s654_s4 + $0x40] sm:$0xff]  ;;  %v80_v49 = vld [vmem:[%s654_s4 + $0x38] sm:$0xff] }
   0x9   :  { %122 = vmatpush.msra.mxu0 %v87_v38  ;;  %353 = vmatpush.msra.mxu2 %v87_v38  ;;  %v79_v50 = vld [vmem:[%s654_s4 + $0x30] sm:$0xff]  ;;  %v78_v52 = vld [vmem:[%s654_s4 + $0x28] sm:$0xff]  ;;  %v77_v54 = vld [vmem:[%s654_s4 + $0x20] sm:$0xff] }
   0xa   :  { %v385_v2 = vpop.eup %384  ;;  %v52_v51 = vld [vmem:[%s653_s0 + $0x70] sm:$0xff]  ;;  %v76_v55 = vld [vmem:[%s654_s4 + $0x18] sm:$0xff]  ;;  %v74_v58 = vld [vmem:[%s654_s4 + $0x8] sm:$0xff] }
   0xb   :  { %v27_v3 = vmul.f32 %v385_v2, %v25_v1  ;;  %123 = vmatpush.msra.mxu0 %v86_v40  ;;  %354 = vmatpush.msra.mxu2 %v86_v40  ;;  %v75_v56 = vld [vmem:[%s654_s4 + $0x10] sm:$0xff]  ;;  %v53_v57 = vld [vmem:[%s653_s0 + $0x78] sm:$0xff]  ;;  %v73_v60 = vld [vmem:[%s654_s4] sm:$0xff] }
   0xc   :  { %v222_v38 = vld [vmem:[%s656_s2 + $0x30] sm:$0xff] }
   0xd   :  { %v28_v4 = vmul.f32 %v385_v2, %v27_v3  ;;  %124 = vmatpush.msra.mxu0 %v85_v42  ;;  %355 = vmatpush.msra.mxu2 %v85_v42  ;;  %v220_v42 = vld [vmem:[%s656_s2 + $0x20] sm:$0xff] }
   0xf   :  { %v29_v5 = vmul.f32 0.5, %v28_v4  ;;  %125 = vmatpush.msra.mxu0 %v84_v43  ;;  %356 = vmatpush.msra.mxu2 %v84_v43 }
  0x11   :  { %v30_v6 = vsub.f32 1.5, %v29_v5  ;;  %126 = vmatpush.msra.mxu0 %v83_v44  ;;  %357 = vmatpush.msra.mxu2 %v83_v44 }
  0x13   :  { %v31_v7 = vmul.f32 %v385_v2, %v30_v6  ;;  %127 = vmatpush.msra.mxu0 %v82_v46  ;;  %358 = vmatpush.msra.mxu2 %v82_v46  ;;  %v202_v2 = vld [vmem:[%s655_s3] sm:$0x1] }
  0x14   :  { %v203_v3 = vmax.f32 %v202_v2, 0.0 }
  0x15   :  { %v32_v9 = vmul.f32 %v31_v7, %v25_v1  ;;  %128 = vmatpush.msra.mxu0 %v81_v48  ;;  %359 = vmatpush.msra.mxu2 %v81_v48 }
  0x16   :  { %386 = vrsqrt.f32 %v203_v3  ;;  %vm211_vm2 = vcmp.eq.f32.partialorder %v203_v3, inf  ;;  %vm213_vm3 = vcmp.eq.f32.partialorder %v203_v3, 0.0 }
  0x17   :  { %v34_v10 = vsel %vm33_vm0, %v25_v1, %v32_v9  ;;  %129 = vmatpush.msra.mxu0 %v80_v49  ;;  %360 = vmatpush.msra.mxu2 %v80_v49 }
  0x18   :  { %v37_v11 = vsel %vm35_vm1, %v36_v8, %v34_v10 }
  0x19   :  { %v424_v13 = vperm.slane %v37_v11, 0  ;;  %130 = vmatpush.msra.mxu0 %v79_v50  ;;  %361 = vmatpush.msra.mxu2 %v79_v50  ;;  %v217_v50 = vld [vmem:[%s656_s2 + $0x8] sm:$0xff] }
  0x1b   :  { %v57_v14 = vmul.f32 %v424_v13, %v38_v12  ;;  %v58_v16 = vmul.f32 %v424_v13, %v39_v15  ;;  %v59_v18 = vmul.f32 %v424_v13, %v40_v17  ;;  %v60_v20 = vmul.f32 %v424_v13, %v41_v19  ;;  %131 = vmatpush.msra.mxu0 %v78_v52 }
  0x1c   :  { %v61_v22 = vmul.f32 %v424_v13, %v42_v21  ;;  %v62_v24 = vmul.f32 %v424_v13, %v43_v23  ;;  %v63_v26 = vmul.f32 %v424_v13, %v44_v25  ;;  %v64_v28 = vmul.f32 %v424_v13, %v45_v27  ;;  %362 = vmatpush.msra.mxu2 %v78_v52  ;;  %v387_v5 = vpop.eup %386  ;;  %v229_v23 = vld [vmem:[%s656_s2 + $0x68] sm:$0xff]  ;;  %v227_v27 = vld [vmem:[%s656_s2 + $0x58] sm:$0xff]  ;;  %v216_v52 = vld [vmem:[%s656_s2] sm:$0xff] }
  0x1d   :  { %89 = vxpose.xlu0.b32.start [1/16] %v57_v14, 128  ;;  %v65_v30 = vmul.f32 %v424_v13, %v46_v29  ;;  %v66_v32 = vmul.f32 %v424_v13, %v47_v31  ;;  %v67_v34 = vmul.f32 %v424_v13, %v48_v33  ;;  %v68_v36 = vmul.f32 %v424_v13, %v49_v35  ;;  %v226_v29 = vld [vmem:[%s656_s2 + $0x50] sm:$0xff]  ;;  %v224_v33 = vld [vmem:[%s656_s2 + $0x40] sm:$0xff] }
  0x1e   :  { %v69_v41 = vmul.f32 %v424_v13, %v50_v39  ;;  %v70_v47 = vmul.f32 %v424_v13, %v51_v45  ;;  %v71_v53 = vmul.f32 %v424_v13, %v52_v51  ;;  %132 = vmatpush.msra.mxu0 %v77_v54  ;;  %363 = vmatpush.msra.mxu2 %v77_v54  ;;  %v214_v14 = vand.u32 2147483648, %v203_v3  ;;  %v219_v45 = vld [vmem:[%s656_s2 + $0x18] sm:$0xff] }
  0x1f   :  { %v72_v59 = vmul.f32 %v424_v13, %v53_v57  ;;  %v205_v6 = vmul.f32 %v387_v5, %v203_v3 }
  0x20   :  { %133 = vmatpush.msra.mxu0 %v76_v55  ;;  %364 = vmatpush.msra.mxu2 %v76_v55 }
  0x21   :  { %v206_v8 = vmul.f32 %v387_v5, %v205_v6 }
  0x22   :  { %134 = vmatpush.msra.mxu0 %v75_v56  ;;  %365 = vmatpush.msra.mxu2 %v75_v56 }
  0x23   :  { %v207_v9 = vmul.f32 0.5, %v206_v8 }
  0x24   :  { %135 = vmatpush.msra.mxu0 %v74_v58  ;;  %366 = vmatpush.msra.mxu2 %v74_v58 }
  0x25   :  { %90 = vxpose.xlu0.b32.cont [2/16] %v58_v16, 128  ;;  %v208_v10 = vsub.f32 1.5, %v207_v9 }
  0x26   :  { %136 = vmatpush.msra.mxu0 %v73_v60  ;;  %367 = vmatpush.msra.mxu2 %v73_v60 }
  0x27   :  { %v209_v11 = vmul.f32 %v387_v5, %v208_v10 }
  0x29   :  { %v210_v13 = vmul.f32 %v209_v11, %v203_v3 }
  0x2b   :  { %v212_v15 = vsel %vm211_vm2, %v203_v3, %v210_v13 }
  0x2c   :  { %v215_v16 = vsel %vm213_vm3, %v214_v14, %v212_v15 }
  0x2d   :  { %91 = vxpose.xlu0.b32.cont [3/16] %v59_v18, 128  ;;  %v538_v17 = vperm.slane %v215_v16, 0  ;;  %v231_v18 = vld [vmem:[%s656_s2 + $0x78] sm:$0xff] }
  0x2f   :  { %v250_v19 = vmul.f32 %v538_v17, %v231_v18  ;;  %v248_v25 = vmul.f32 %v538_v17, %v229_v23  ;;  %v245_v31 = vmul.f32 %v538_v17, %v226_v29  ;;  %v243_v35 = vmul.f32 %v538_v17, %v224_v33 }
  0x30   :  { %v241_v40 = vmul.f32 %v538_v17, %v222_v38  ;;  %v239_v44 = vmul.f32 %v538_v17, %v220_v42  ;;  %v238_v46 = vmul.f32 %v538_v17, %v219_v45  ;;  %v236_v51 = vmul.f32 %v538_v17, %v217_v50 }
  0x31   :  { %267 = vmatpush.msra.mxu1 %v250_v19  ;;  %368 = vmatpush.msra.mxu3 %v250_v19 }
  0x35   :  { %92 = vxpose.xlu0.b32.cont [4/16] %v60_v20, 128  ;;  %v230_v20 = vld [vmem:[%s656_s2 + $0x70] sm:$0xff] }
  0x3d   :  { %93 = vxpose.xlu0.b32.cont [5/16] %v61_v22, 128  ;;  %v249_v22 = vmul.f32 %v538_v17, %v230_v20 }
  0x3f   :  { %268 = vmatpush.msra.mxu1 %v249_v22  ;;  %369 = vmatpush.msra.mxu3 %v249_v22 }
  0x41   :  { %269 = vmatpush.msra.mxu1 %v248_v25  ;;  %370 = vmatpush.msra.mxu3 %v248_v25 }
  0x45   :  { %94 = vxpose.xlu0.b32.cont [6/16] %v62_v24, 128  ;;  %v228_v24 = vld [vmem:[%s656_s2 + $0x60] sm:$0xff] }
  0x4d   :  { %95 = vxpose.xlu0.b32.cont [7/16] %v63_v26, 128  ;;  %v247_v26 = vmul.f32 %v538_v17, %v228_v24 }
  0x4f   :  { %270 = vmatpush.msra.mxu1 %v247_v26  ;;  %371 = vmatpush.msra.mxu3 %v247_v26 }
  0x55   :  { %96 = vxpose.xlu0.b32.cont [8/16] %v64_v28, 128  ;;  %v246_v28 = vmul.f32 %v538_v17, %v227_v27 }
  0x57   :  { %271 = vmatpush.msra.mxu1 %v246_v28  ;;  %372 = vmatpush.msra.mxu3 %v246_v28 }
  0x59   :  { %272 = vmatpush.msra.mxu1 %v245_v31  ;;  %373 = vmatpush.msra.mxu3 %v245_v31 }
  0x5d   :  { %97 = vxpose.xlu0.b32.cont [9/16] %v65_v30, 128 }
  0x65   :  { %98 = vxpose.xlu0.b32.cont [10/16] %v66_v32, 128  ;;  %v225_v32 = vld [vmem:[%s656_s2 + $0x48] sm:$0xff] }
  0x6d   :  { %99 = vxpose.xlu0.b32.cont [11/16] %v67_v34, 128  ;;  %v244_v34 = vmul.f32 %v538_v17, %v225_v32 }
  0x6f   :  { %273 = vmatpush.msra.mxu1 %v244_v34  ;;  %374 = vmatpush.msra.mxu3 %v244_v34 }
  0x71   :  { %274 = vmatpush.msra.mxu1 %v243_v35  ;;  %375 = vmatpush.msra.mxu3 %v243_v35 }
  0x75   :  { %100 = vxpose.xlu0.b32.cont [12/16] %v68_v36, 128  ;;  %v223_v36 = vld [vmem:[%s656_s2 + $0x38] sm:$0xff] }
  0x76   :  { %v242_v37 = vmul.f32 %v538_v17, %v223_v36 }
  0x78   :  { %275 = vmatpush.msra.mxu1 %v242_v37  ;;  %376 = vmatpush.msra.mxu3 %v242_v37 }
  0x7a   :  { %276 = vmatpush.msra.mxu1 %v241_v40  ;;  %377 = vmatpush.msra.mxu3 %v241_v40 }
  0x7d   :  { %101 = vxpose.xlu0.b32.cont [13/16] %v69_v41, 128  ;;  %v221_v41 = vld [vmem:[%s656_s2 + $0x28] sm:$0xff] }
  0x7e   :  { %v240_v43 = vmul.f32 %v538_v17, %v221_v41 }
  0x80   :  { %277 = vmatpush.msra.mxu1 %v240_v43  ;;  %378 = vmatpush.msra.mxu3 %v240_v43 }
  0x82   :  { %278 = vmatpush.msra.mxu1 %v239_v44  ;;  %379 = vmatpush.msra.mxu3 %v239_v44 }
  0x84   :  { %279 = vmatpush.msra.mxu1 %v238_v46  ;;  %380 = vmatpush.msra.mxu3 %v238_v46 }
  0x85   :  { %102 = vxpose.xlu0.b32.cont [14/16] %v70_v47, 128  ;;  %v218_v47 = vld [vmem:[%s656_s2 + $0x10] sm:$0xff] }
  0x86   :  { %v237_v49 = vmul.f32 %v538_v17, %v218_v47 }
  0x88   :  { %280 = vmatpush.msra.mxu1 %v237_v49  ;;  %381 = vmatpush.msra.mxu3 %v237_v49 }
  0x8a   :  { %281 = vmatpush.msra.mxu1 %v236_v51  ;;  %382 = vmatpush.msra.mxu3 %v236_v51 }
  0x8d   :  { %103 = vxpose.xlu0.b32.cont [15/16] %v71_v53, 128  ;;  %v235_v53 = vmul.f32 %v538_v17, %v216_v52 }
  0x8f   :  { %282 = vmatpush.msra.mxu1 %v235_v53  ;;  %383 = vmatpush.msra.mxu3 %v235_v53 }
  0x95   :  { %104 = vxpose.xlu0.b32.end [16/16] %v72_v59, 128 }
  0xc1   :  { %v105_v61 = vpop.trf.xlu0 }
  0xc2   :  { %137 = vmatmul.f32.vlgmr.msra.gmra.mxu0 %v105_v61 }
  0xc9   :  { %v106_v62 = vpop.trf.xlu0 }
  0xca   :  { %140 = vmatmul.f32.gmra.mxu0 %v106_v62 }
  0xd1   :  { %v107_v63 = vpop.trf.xlu0 }
  0xd2   :  { %143 = vmatmul.f32.gmra.mxu0 %v107_v63 }
  0xd9   :  { %v108_v0 = vpop.trf.xlu0 }
  0xda   :  { %146 = vmatmul.f32.gmra.mxu0 %v108_v0 }
  0xe1   :  { %v109_v1 = vpop.trf.xlu0 }
  0xe2   :  { %149 = vmatmul.f32.gmra.mxu0 %v109_v1 }
  0xe9   :  { %v110_v4 = vpop.trf.xlu0 }
  0xea   :  { %152 = vmatmul.f32.gmra.mxu0 %v110_v4 }
  0xf1   :  { %v111_v7 = vpop.trf.xlu0 }
  0xf2   :  { %155 = vmatmul.f32.gmra.mxu0 %v111_v7 }
  0xf9   :  { %v112_v12 = vpop.trf.xlu0 }
  0xfa   :  { %158 = vmatmul.f32.gmra.mxu0 %v112_v12 }
 0x101   :  { %v113_v21 = vpop.trf.xlu0 }
 0x102   :  { %161 = vmatmul.f32.vlgmr.msra.gmra.mxu2 %v113_v21 }
 0x109   :  { %v114_v30 = vpop.trf.xlu0 }
 0x10a   :  { %164 = vmatmul.f32.gmra.mxu2 %v114_v30 }
 0x111   :  { %v115_v39 = vpop.trf.xlu0 }
 0x112   :  { %167 = vmatmul.f32.gmra.mxu2 %v115_v39 }
 0x119   :  { %v116_v48 = vpop.trf.xlu0 }
 0x11a   :  { %170 = vmatmul.f32.gmra.mxu2 %v116_v48 }
 0x121   :  { %v117_v54 = vpop.trf.xlu0 }
 0x122   :  { %173 = vmatmul.f32.gmra.mxu2 %v117_v54 }
 0x129   :  { %v118_v55 = vpop.trf.xlu0 }
 0x12a   :  { %176 = vmatmul.f32.gmra.mxu2 %v118_v55 }
 0x131   :  { %v119_v56 = vpop.trf.xlu0 }
 0x132   :  { %179 = vmatmul.f32.gmra.mxu2 %v119_v56 }
 0x139   :  { %v120_v57 = vpop.trf.xlu0 }
 0x13a   :  { %182 = vmatmul.f32.gmra.mxu2 %v120_v57 }
 0x13f   :  { %v138_v58 = vpop.f32.mrf.mxu0 }
 0x140   :  { %283 = vmatmul.f32.vlgmr.msra.gmra.mxu1 %v138_v58 }
 0x147   :  { %v141_v59 = vpop.f32.mrf.mxu0 }
 0x148   :  { %286 = vmatmul.f32.gmra.mxu1 %v141_v59 }
 0x14f   :  { %v144_v60 = vpop.f32.mrf.mxu0 }
 0x150   :  { %289 = vmatmul.f32.gmra.mxu1 %v144_v60 }
 0x157   :  { %v147_v61 = vpop.f32.mrf.mxu0 }
 0x158   :  { %292 = vmatmul.f32.gmra.mxu1 %v147_v61 }
 0x15f   :  { %v150_v62 = vpop.f32.mrf.mxu0 }
 0x160   :  { %295 = vmatmul.f32.gmra.mxu1 %v150_v62 }
 0x167   :  { %v153_v63 = vpop.f32.mrf.mxu0 }
 0x168   :  { %298 = vmatmul.f32.gmra.mxu1 %v153_v63 }
 0x16f   :  { %v156_v0 = vpop.f32.mrf.mxu0 }
 0x170   :  { %301 = vmatmul.f32.gmra.mxu1 %v156_v0 }
 0x177   :  { %v159_v1 = vpop.f32.mrf.mxu0 }
 0x178   :  { %304 = vmatmul.f32.gmra.mxu1 %v159_v1 }
 0x185   :  { %v162_v2 = vpop.f32.mrf.mxu2 }
 0x186   :  { %307 = vmatmul.f32.vlgmr.msra.gmra.mxu3 %v162_v2 }
 0x18d   :  { %v165_v3 = vpop.f32.mrf.mxu2 }
 0x18e   :  { %310 = vmatmul.f32.gmra.mxu3 %v165_v3 }
 0x195   :  { %v168_v4 = vpop.f32.mrf.mxu2 }
 0x196   :  { %313 = vmatmul.f32.gmra.mxu3 %v168_v4 }
 0x19d   :  { %v171_v5 = vpop.f32.mrf.mxu2 }
 0x19e   :  { %316 = vmatmul.f32.gmra.mxu3 %v171_v5 }
 0x1a5   :  { %v174_v6 = vpop.f32.mrf.mxu2 }
 0x1a6   :  { %319 = vmatmul.f32.gmra.mxu3 %v174_v6 }
 0x1ad   :  { %v177_v7 = vpop.f32.mrf.mxu2 }
 0x1ae   :  { %322 = vmatmul.f32.gmra.mxu3 %v177_v7 }
 0x1b5   :  { %v180_v8 = vpop.f32.mrf.mxu2 }
 0x1b6   :  { %325 = vmatmul.f32.gmra.mxu3 %v180_v8 }
 0x1bd   :  { %v183_v9 = vpop.f32.mrf.mxu2  ;;  %v284_v10 = vpop.f32.mrf.mxu1 }
 0x1be   :  { %332 = vst [vmem:[%s657_s5] sm:$0xff] %v284_v10  ;;  %328 = vmatmul.f32.gmra.mxu3 %v183_v9 }
 0x1c5   :  { %v287_v11 = vpop.f32.mrf.mxu1 }
 0x1c6   :  { %333 = vst [vmem:[%s657_s5 + $0x8] sm:$0xff] %v287_v11 }
 0x1cd   :  { %v290_v12 = vpop.f32.mrf.mxu1 }
 0x1ce   :  { %334 = vst [vmem:[%s657_s5 + $0x10] sm:$0xff] %v290_v12 }
 0x1d5   :  { %v293_v13 = vpop.f32.mrf.mxu1 }
 0x1d6   :  { %335 = vst [vmem:[%s657_s5 + $0x18] sm:$0xff] %v293_v13 }
 0x1dd   :  { %v296_v14 = vpop.f32.mrf.mxu1 }
 0x1de   :  { %336 = vst [vmem:[%s657_s5 + $0x20] sm:$0xff] %v296_v14 }
 0x1e5   :  { %v299_v15 = vpop.f32.mrf.mxu1 }
 0x1e6   :  { %337 = vst [vmem:[%s657_s5 + $0x28] sm:$0xff] %v299_v15 }
 0x1ed   :  { %v302_v16 = vpop.f32.mrf.mxu1 }
 0x1ee   :  { %338 = vst [vmem:[%s657_s5 + $0x30] sm:$0xff] %v302_v16 }
 0x1f5   :  { %v305_v17 = vpop.f32.mrf.mxu1 }
 0x1f6   :  { %339 = vst [vmem:[%s657_s5 + $0x38] sm:$0xff] %v305_v17 }
 0x209   :  { %v308_v18 = vpop.f32.mrf.mxu3 }
 0x20a   :  { %340 = vst [vmem:[%s657_s5 + $0x40] sm:$0xff] %v308_v18 }
 0x211   :  { %v311_v19 = vpop.f32.mrf.mxu3 }
 0x212   :  { %341 = vst [vmem:[%s657_s5 + $0x48] sm:$0xff] %v311_v19 }
 0x219   :  { %v314_v20 = vpop.f32.mrf.mxu3 }
 0x21a   :  { %342 = vst [vmem:[%s657_s5 + $0x50] sm:$0xff] %v314_v20 }
 0x221   :  { %v317_v21 = vpop.f32.mrf.mxu3 }
 0x222   :  { %343 = vst [vmem:[%s657_s5 + $0x58] sm:$0xff] %v317_v21 }
 0x229   :  { %v320_v22 = vpop.f32.mrf.mxu3 }
 0x22a   :  { %344 = vst [vmem:[%s657_s5 + $0x60] sm:$0xff] %v320_v22 }
 0x231   :  { %v323_v23 = vpop.f32.mrf.mxu3 }
 0x232   :  { %345 = vst [vmem:[%s657_s5 + $0x68] sm:$0xff] %v323_v23 }
 0x239   :  { %v326_v24 = vpop.f32.mrf.mxu3 }
 0x23a   :  { %346 = vst [vmem:[%s657_s5 + $0x70] sm:$0xff] %v326_v24 }
 0x241   :  { %v329_v25 = vpop.f32.mrf.mxu3 }
 0x242   :  { %347 = vst [vmem:[%s657_s5 + $0x78] sm:$0xff] %v329_v25 }

// kernel: custom-call.3
= control target key start
LH: loop header
LB: loop body
LE: loop exit
PB: predicated region body
PF: predicated region fallthrough
CT: control target
= control target key end

     0   :  { %s7490_s0 = inlined_call_operand.vmem [shape: f32[64,64], index: 0, kind: input, shape index: {}]   ;;  %s7491_s1 = inlined_call_operand.vmem [shape: f32[64,64], index: 1, kind: input, shape index: {}]   ;;  %s7492_s2 = inlined_call_operand.vmem [shape: f32[64,64], index: 2, kind: input, shape index: {}]   ;;  %s7493_s3 = inlined_call_operand.vmem [shape: f32[64,64], index: 3, kind: input, shape index: {}]   ;;  %s7494_s4 = inlined_call_operand.vmem [shape: f32[64], index: 4, kind: output, shape index: {0}]   ;;  %s7495_s5 = inlined_call_operand.vmem [shape: f32[64], index: 5, kind: output, shape index: {1}]   ;;  %s7496_s6 = inlined_call_operand.hbm [shape: f32[64,64], index: 6, kind: output, shape index: {2}]   ;;  %s7497_s7 = inlined_call_operand.hbm [shape: f32[64,64], index: 7, kind: output, shape index: {3}]   ;;  %s7498_s8 = inlined_call_operand.hbm [shape: f32[64,64], index: 8, kind: output, shape index: {4}]   ;;  %s7499_s9 = inlined_call_operand.hbm [shape: f32[64,64], index: 9, kind: output, shape index: {5}]  }
   0x1   :  { %7507 = sst [smem:[#allocation36_spill]] %s7494_s4 }
   0x2   :  { %7508 = sst [smem:[#allocation37_spill]] %s7495_s5 }
   0x3   :  { %7509 = sst [smem:[#allocation38_spill]] %s7496_s6 }
   0x4   :  { %7510 = sst [smem:[#allocation39_spill]] %s7497_s7 }
   0x5   :  { %7511 = sst [smem:[#allocation40_spill]] %s7498_s8 }
   0x6   :  { %7512 = sst [smem:[#allocation41_spill]] %s7499_s9 }
   0x7   :  { %11 = vsyncpa [#allocation9], 0 }
   0x8   :  { %12 = vsyncpa [#allocation11], 0 }
   0x9   :  { %13 = vsyncpa [#allocation14], 0  ;;  %s23_s11 = scalar_lea.vmem %s7490_s0, 56 }
   0xa   :  { %p4045_p0 = scmp.gt.s32.totalorder %s7490_s0, %s23_s11 }
   0xb   :  { %s5642_s14 = smov (!%p4045_p0), [#allocation0]   ;;  %s5646_s17 = smov (!%p4045_p0), %s7490_s0  }
   0xc   :  { %4046 = sbr.rel (%p4045_p0) target bundleno = 25 (0x19), region = 719 }
  0x11 LB: > { %v57_v0 = vld [vmem:[%s5648_s17] sm:$0xff]  ;;  %s59_s17 = scalar_lea.vmem %s5648_s17, 8   ;;  %s5648_s17 = sphi %s5646_s17, %s59_s17   ;;  %s5644_s14 = sphi %s5642_s14, %s60_s14  }
  0x12   : > { %58 = vst [vmem:[%s5644_s14] sm:$0xff] %v57_v0  ;;  %s60_s14 = scalar_lea.vmem %s5644_s14, 8   ;;  %p54_p1 = scmp.gt.s32.totalorder %s59_s17, %s23_s11 }
  0x14   :  { %56 = sbr.rel (!%p54_p1) target bundleno = 17 (0x11), region = 725 }
  0x19 PF:  { %s79_s20 = scalar_lea.vmem %s7491_s1, 56 }
  0x1a   :  { %p4065_p2 = scmp.gt.s32.totalorder %s7491_s1, %s79_s20 }
  0x1b   :  { %s5650_s0 = smov (!%p4065_p2), [#allocation1]   ;;  %s5654_s25 = smov (!%p4065_p2), %s7491_s1  }
  0x1c   :  { %4066 = sbr.rel (%p4065_p2) target bundleno = 41 (0x29), region = 741 }
  0x21 LB: > { %v113_v1 = vld [vmem:[%s5656_s25] sm:$0xff]  ;;  %s115_s25 = scalar_lea.vmem %s5656_s25, 8   ;;  %s5656_s25 = sphi %s5654_s25, %s115_s25   ;;  %s5652_s0 = sphi %s5650_s0, %s116_s0  }
  0x22   : > { %114 = vst [vmem:[%s5652_s0] sm:$0xff] %v113_v1  ;;  %s116_s0 = scalar_lea.vmem %s5652_s0, 8   ;;  %p110_p3 = scmp.gt.s32.totalorder %s115_s25, %s79_s20 }
  0x24   :  { %112 = sbr.rel (!%p110_p3) target bundleno = 33 (0x21), region = 747 }
  0x29 PF:  { %s135_s28 = scalar_lea.vmem %s7492_s2, 56 }
  0x2a   :  { %p4085_p4 = scmp.gt.s32.totalorder %s7492_s2, %s135_s28 }
  0x2b   :  { %s5658_s1 = smov (!%p4085_p4), [#allocation2]   ;;  %s5662_s12 = smov (!%p4085_p4), %s7492_s2  }
  0x2c   :  { %4086 = sbr.rel (%p4085_p4) target bundleno = 57 (0x39), region = 763 }
  0x31 LB: > { %v169_v2 = vld [vmem:[%s5664_s12] sm:$0xff]  ;;  %s171_s12 = scalar_lea.vmem %s5664_s12, 8   ;;  %s5664_s12 = sphi %s5662_s12, %s171_s12   ;;  %s5660_s1 = sphi %s5658_s1, %s172_s1  }
  0x32   : > { %170 = vst [vmem:[%s5660_s1] sm:$0xff] %v169_v2  ;;  %s172_s1 = scalar_lea.vmem %s5660_s1, 8   ;;  %p166_p5 = scmp.gt.s32.totalorder %s171_s12, %s135_s28 }
  0x34   :  { %168 = sbr.rel (!%p166_p5) target bundleno = 49 (0x31), region = 769 }
  0x39 PF:  { %s191_s15 = scalar_lea.vmem %s7493_s3, 56 }
  0x3a   :  { %p4105_p6 = scmp.gt.s32.totalorder %s7493_s3, %s191_s15 }
  0x3b   :  { %s5666_s2 = smov (!%p4105_p6), [#allocation3]   ;;  %s5670_s20 = smov (!%p4105_p6), %s7493_s3  }
  0x3c   :  { %4106 = sbr.rel (%p4105_p6) target bundleno = 73 (0x49), region = 785 }
  0x41 LB: > { %v225_v3 = vld [vmem:[%s5672_s20] sm:$0xff]  ;;  %s227_s20 = scalar_lea.vmem %s5672_s20, 8   ;;  %s5672_s20 = sphi %s5670_s20, %s227_s20   ;;  %s5668_s2 = sphi %s5666_s2, %s228_s2  }
  0x42   : > { %226 = vst [vmem:[%s5668_s2] sm:$0xff] %v225_v3  ;;  %s228_s2 = scalar_lea.vmem %s5668_s2, 8   ;;  %p222_p7 = scmp.gt.s32.totalorder %s227_s20, %s191_s15 }
  0x44   :  { %224 = sbr.rel (!%p222_p7) target bundleno = 65 (0x41), region = 791 }
  0x49 PF:  { %s238_s21 = smov [#allocation15]  ;;  %v239_v4 = vld [vmem:[#allocation0] sm:$0xff]  ;;  %v243_v5 = vld [vmem:[#allocation0 + $0x8] sm:$0xff]  ;;  %v247_v6 = vld [vmem:[#allocation0 + $0x10] sm:$0xff]  ;;  %s269_s3 = smov [#allocation16]  ;;  %v5682_v36 = vmov 0.0   ;;  %v423_v37 = vlaneseq }
  0x4a   :  { %240 = vst [vmem:[%s238_s21] sm:$0xff] %v239_v4  ;;  %v251_v7 = vld [vmem:[#allocation0 + $0x18] sm:$0xff]  ;;  %v255_v8 = vld [vmem:[#allocation0 + $0x20] sm:$0xff]  ;;  %v259_v9 = vld [vmem:[#allocation0 + $0x28] sm:$0xff]  ;;  %s300_s22 = smov [#allocation17]  ;;  %s331_s0 = smov [#allocation18] }
  0x4b   :  { %4470 = vst [vmem:[%s238_s21 + $0x8] sm:$0xff] %v243_v5  ;;  %v263_v10 = vld [vmem:[#allocation0 + $0x30] sm:$0xff]  ;;  %v267_v11 = vld [vmem:[#allocation0 + $0x38] sm:$0xff]  ;;  %v270_v12 = vld [vmem:[#allocation1] sm:$0xff]  ;;  %v5775_v38 = vshrl.u32 %v423_v37, 7  ;;  %v5777_v39 = vand.u32 127, %v423_v37 }
  0x4c   :  { %4471 = vst [vmem:[%s238_s21 + $0x10] sm:$0xff] %v247_v6  ;;  %v274_v13 = vld [vmem:[#allocation1 + $0x8] sm:$0xff]  ;;  %v278_v14 = vld [vmem:[#allocation1 + $0x10] sm:$0xff]  ;;  %v282_v15 = vld [vmem:[#allocation1 + $0x18] sm:$0xff]  ;;  %s5780_s23 = smov [#allocation8]  ;;  %s5797_s24 = smov [#allocation13] }
  0x4d   :  { %4472 = vst [vmem:[%s238_s21 + $0x18] sm:$0xff] %v251_v7  ;;  %v286_v16 = vld [vmem:[#allocation1 + $0x20] sm:$0xff]  ;;  %v290_v17 = vld [vmem:[#allocation1 + $0x28] sm:$0xff]  ;;  %v294_v18 = vld [vmem:[#allocation1 + $0x30] sm:$0xff]  ;;  %v428_v38 = vmov %v5775_v38  ;;  %v425_v39 = vmov %v5777_v39  ;;  %s4123_s25 = smov [#allocation15]  ;;  %s5837_s26 = smov [#allocation16] }
  0x4e   :  { %4473 = vst [vmem:[%s238_s21 + $0x20] sm:$0xff] %v255_v8  ;;  %v298_v19 = vld [vmem:[#allocation1 + $0x38] sm:$0xff]  ;;  %v301_v20 = vld [vmem:[#allocation2] sm:$0xff]  ;;  %v305_v21 = vld [vmem:[#allocation2 + $0x8] sm:$0xff]  ;;  %v438_v40 = vadd.s32 8, %v428_v38  ;;  %v445_v41 = vadd.s32 16, %v428_v38  ;;  %vm432_vm0 = vcmp.eq.s32.totalorder %v428_v38, %v425_v39 }
  0x4f   :  { %4474 = vst [vmem:[%s238_s21 + $0x28] sm:$0xff] %v259_v9  ;;  %v309_v22 = vld [vmem:[#allocation2 + $0x10] sm:$0xff]  ;;  %v313_v23 = vld [vmem:[#allocation2 + $0x18] sm:$0xff]  ;;  %v317_v24 = vld [vmem:[#allocation2 + $0x20] sm:$0xff]  ;;  %v452_v42 = vadd.s32 24, %v428_v38  ;;  %v459_v44 = vadd.s32 32, %v428_v38 }
  0x50   :  { %4475 = vst [vmem:[%s238_s21 + $0x30] sm:$0xff] %v263_v10  ;;  %v321_v25 = vld [vmem:[#allocation2 + $0x28] sm:$0xff]  ;;  %v325_v26 = vld [vmem:[#allocation2 + $0x30] sm:$0xff]  ;;  %v329_v27 = vld [vmem:[#allocation2 + $0x38] sm:$0xff]  ;;  %vm439_vm1 = vcmp.eq.s32.totalorder %v438_v40, %v425_v39  ;;  %v466_v46 = vadd.s32 40, %v428_v38  ;;  %vm446_vm2 = vcmp.eq.s32.totalorder %v445_v41, %v425_v39  ;;  %v473_v48 = vadd.s32 48, %v428_v38 }
  0x51   :  { %4476 = vst [vmem:[%s238_s21 + $0x38] sm:$0xff] %v267_v11  ;;  %v332_v28 = vld [vmem:[#allocation3] sm:$0xff]  ;;  %v336_v29 = vld [vmem:[#allocation3 + $0x8] sm:$0xff]  ;;  %v340_v30 = vld [vmem:[#allocation3 + $0x10] sm:$0xff]  ;;  %vm453_vm3 = vcmp.eq.s32.totalorder %v452_v42, %v425_v39  ;;  %v480_v51 = vadd.s32 56, %v428_v38  ;;  %v490_v38 = vmov %v5775_v38  ;;  %vm460_vm4 = vcmp.eq.s32.totalorder %v459_v44, %v425_v39  ;;  %s5874_s27 = smov [#allocation17] }
  0x52   :  { %271 = vst [vmem:[%s269_s3] sm:$0xff] %v270_v12  ;;  %v344_v31 = vld [vmem:[#allocation3 + $0x18] sm:$0xff]  ;;  %v348_v32 = vld [vmem:[#allocation3 + $0x20] sm:$0xff]  ;;  %v352_v33 = vld [vmem:[#allocation3 + $0x28] sm:$0xff]  ;;  %vm467_vm5 = vcmp.eq.s32.totalorder %v466_v46, %v425_v39  ;;  %v487_v39 = vmov %v5777_v39  ;;  %vm474_vm6 = vcmp.eq.s32.totalorder %v473_v48, %v425_v39  ;;  %v500_v58 = vadd.s32 8, %v490_v38  ;;  %s5904_s28 = smov [#allocation18] }
  0x53   :  { %4477 = vst [vmem:[%s269_s3 + $0x8] sm:$0xff] %v274_v13  ;;  %v356_v34 = vld [vmem:[#allocation3 + $0x30] sm:$0xff]  ;;  %v360_v35 = vld [vmem:[#allocation3 + $0x38] sm:$0xff]  ;;  %v507_v59 = vadd.s32 16, %v490_v38  ;;  %vm481_vm7 = vcmp.eq.s32.totalorder %v480_v51, %v425_v39  ;;  %v514_v62 = vadd.s32 24, %v490_v38  ;;  %v521_v0 = vadd.s32 32, %v490_v38 }
  0x54   :  { %4478 = vst [vmem:[%s269_s3 + $0x10] sm:$0xff] %v278_v14  ;;  %vm494_vm8 = vcmp.eq.s32.totalorder %v490_v38, %v487_v39  ;;  %v528_v2 = vadd.s32 40, %v490_v38  ;;  %vm501_vm9 = vcmp.eq.s32.totalorder %v500_v58, %v487_v39  ;;  %v535_v4 = vadd.s32 48, %v490_v38 }
  0x55   :  { %4479 = vst [vmem:[%s269_s3 + $0x18] sm:$0xff] %v282_v15  ;;  %vm508_vm10 = vcmp.eq.s32.totalorder %v507_v59, %v487_v39  ;;  %vm515_vm11 = vcmp.eq.s32.totalorder %v514_v62, %v487_v39  ;;  %v542_v5 = vadd.s32 56, %v490_v38  ;;  %vm522_vm12 = vcmp.eq.s32.totalorder %v521_v0, %v487_v39 }
  0x56   :  { %4480 = vst [vmem:[%s269_s3 + $0x20] sm:$0xff] %v286_v16  ;;  %vm529_vm13 = vcmp.eq.s32.totalorder %v528_v2, %v487_v39  ;;  %vm536_vm14 = vcmp.eq.s32.totalorder %v535_v4, %v487_v39  ;;  %v4202_v38 = vmov %v5775_v38 }
  0x57   :  { %4481 = vst [vmem:[%s269_s3 + $0x28] sm:$0xff] %v290_v17  ;;  %vm543_vm15 = vcmp.eq.s32.totalorder %v542_v5, %v487_v39  ;;  %v4261_v38 = vmov %v5775_v38 }
  0x58   :  { %4482 = vst [vmem:[%s269_s3 + $0x30] sm:$0xff] %v294_v18  ;;  %v4531_v40 = vld [vmem:[%s4123_s25 + $0x30] sm:$0xff]  ;;  %v4532_v44 = vld [vmem:[%s4123_s25 + $0x38] sm:$0xff]  ;;  %v4122_v38 = vmov %v5775_v38 }
  0x59   :  { %4483 = vst [vmem:[%s269_s3 + $0x38] sm:$0xff] %v298_v19  ;;  %v4147_v0 = vadd.s32 16, %v4122_v38 }
  0x5a   :  { %302 = vst [vmem:[%s300_s22] sm:$0xff] %v301_v20 }
  0x5b   :  { %4484 = vst [vmem:[%s300_s22 + $0x8] sm:$0xff] %v305_v21 }
  0x5c   :  { %4485 = vst [vmem:[%s300_s22 + $0x10] sm:$0xff] %v309_v22  ;;  %v4129_v22 = vld [vmem:[%s4123_s25] sm:$0xff] }
  0x5d   :  { %4486 = vst [vmem:[%s300_s22 + $0x18] sm:$0xff] %v313_v23  ;;  %v4526_v23 = vld [vmem:[%s4123_s25 + $0x8] sm:$0xff] }
  0x5e   :  { %4487 = vst [vmem:[%s300_s22 + $0x20] sm:$0xff] %v317_v24  ;;  %v4527_v24 = vld [vmem:[%s4123_s25 + $0x10] sm:$0xff] }
  0x5f   :  { %4488 = vst [vmem:[%s300_s22 + $0x28] sm:$0xff] %v321_v25 }
  0x60   :  { %4489 = vst [vmem:[%s300_s22 + $0x30] sm:$0xff] %v325_v26  ;;  %v4209_v48 = vld [vmem:[%s5837_s26] sm:$0xff] }
  0x61   :  { %4490 = vst [vmem:[%s300_s22 + $0x38] sm:$0xff] %v329_v27  ;;  %v4536_v4 = vld [vmem:[%s5837_s26 + $0x20] sm:$0xff] }
  0x62   :  { %333 = vst [vmem:[%s331_s0] sm:$0xff] %v332_v28  ;;  %v4528_v28 = vld [vmem:[%s4123_s25 + $0x18] sm:$0xff] }
  0x63   :  { %4491 = vst [vmem:[%s331_s0 + $0x8] sm:$0xff] %v336_v29  ;;  %v4529_v29 = vld [vmem:[%s4123_s25 + $0x20] sm:$0xff] }
  0x64   :  { %4492 = vst [vmem:[%s331_s0 + $0x10] sm:$0xff] %v340_v30 }
  0x65   :  { %4493 = vst [vmem:[%s331_s0 + $0x18] sm:$0xff] %v344_v31 }
  0x66   :  { %4494 = vst [vmem:[%s331_s0 + $0x20] sm:$0xff] %v348_v32 }
  0x67   :  { %4495 = vst [vmem:[%s331_s0 + $0x28] sm:$0xff] %v352_v33 }
  0x68   :  { %4496 = vst [vmem:[%s331_s0 + $0x30] sm:$0xff] %v356_v34  ;;  %v4530_v34 = vld [vmem:[%s4123_s25 + $0x28] sm:$0xff] }
  0x69   :  { %4497 = vst [vmem:[%s331_s0 + $0x38] sm:$0xff] %v360_v35 }
  0x6a   :  { %362 = vst [vmem:[#allocation8] sm:$0xff] %v5682_v36 }
  0x6b   :  { %364 = vst [vmem:[#allocation8 + $0x8] sm:$0xff] %v5682_v36 }
  0x6c   :  { %366 = vst [vmem:[#allocation8 + $0x10] sm:$0xff] %v5682_v36 }
  0x6d   :  { %368 = vst [vmem:[#allocation8 + $0x18] sm:$0xff] %v5682_v36 }
  0x6e   :  { %370 = vst [vmem:[#allocation8 + $0x20] sm:$0xff] %v5682_v36 }
  0x6f   :  { %372 = vst [vmem:[#allocation8 + $0x28] sm:$0xff] %v5682_v36 }
  0x70   :  { %374 = vst [vmem:[#allocation8 + $0x30] sm:$0xff] %v5682_v36 }
  0x71   :  { %376 = vst [vmem:[#allocation8 + $0x38] sm:$0xff] %v5682_v36 }
  0x72   :  { %377 = vst [vmem:[#allocation10] sm:$0xff] %v5682_v36 }
  0x73   :  { %379 = vst [vmem:[#allocation10 + $0x8] sm:$0xff] %v5682_v36 }
  0x74   :  { %381 = vst [vmem:[#allocation10 + $0x10] sm:$0xff] %v5682_v36 }
  0x75   :  { %383 = vst [vmem:[#allocation10 + $0x18] sm:$0xff] %v5682_v36 }
  0x76   :  { %385 = vst [vmem:[#allocation10 + $0x20] sm:$0xff] %v5682_v36 }
  0x77   :  { %387 = vst [vmem:[#allocation10 + $0x28] sm:$0xff] %v5682_v36 }
  0x78   :  { %389 = vst [vmem:[#allocation10 + $0x30] sm:$0xff] %v5682_v36  ;;  %v429_v43 = vld [vmem:[%s5780_s23] sm:$0xff]  ;;  %v4498_v45 = vld [vmem:[%s5780_s23 + $0x8] sm:$0xff]  ;;  %v4500_v47 = vld [vmem:[%s5780_s23 + $0x10] sm:$0xff] }
  0x79   :  { %391 = vst [vmem:[#allocation10 + $0x38] sm:$0xff] %v5682_v36  ;;  %v433_v49 = vsel %vm432_vm0, 1.0, %v429_v43  ;;  %v4502_v50 = vld [vmem:[%s5780_s23 + $0x18] sm:$0xff]  ;;  %v440_v52 = vsel %vm439_vm1, 1.0, %v4498_v45  ;;  %v4504_v53 = vld [vmem:[%s5780_s23 + $0x20] sm:$0xff]  ;;  %v447_v54 = vsel %vm446_vm2, 1.0, %v4500_v47 }
  0x7a   :  { %392 = vst [vmem:[#allocation12] sm:$0xff] %v5682_v36  ;;  %v4506_v55 = vld [vmem:[%s5780_s23 + $0x28] sm:$0xff]  ;;  %v454_v56 = vsel %vm453_vm3, 1.0, %v4502_v50  ;;  %v4508_v57 = vld [vmem:[%s5780_s23 + $0x30] sm:$0xff]  ;;  %v461_v60 = vsel %vm460_vm4, 1.0, %v4504_v53  ;;  %v4510_v61 = vld [vmem:[%s5780_s23 + $0x38] sm:$0xff] }
  0x7b   :  { %394 = vst [vmem:[#allocation12 + $0x8] sm:$0xff] %v5682_v36  ;;  %v468_v63 = vsel %vm467_vm5, 1.0, %v4506_v55  ;;  %v475_v1 = vsel %vm474_vm6, 1.0, %v4508_v57  ;;  %v482_v3 = vsel %vm481_vm7, 1.0, %v4510_v61  ;;  %vm4127_vm0 = vcmp.lt.s32.totalorder %v5777_v39, 64  ;;  %v4534_v57 = vld [vmem:[%s5837_s26 + $0x10] sm:$0xff] }
  0x7c   :  { %396 = vst [vmem:[#allocation12 + $0x10] sm:$0xff] %v5682_v36  ;;  %v4199_v39 = vmov %v5777_v39  ;;  %v4130_v25 = vsel %vm4127_vm0, %v4129_v22, 0.0  ;;  %v4136_v26 = vsel %vm4127_vm0, %v4526_v23, 0.0  ;;  %v4145_v27 = vsel %vm4127_vm0, %v4527_v24, 0.0  ;;  %v4535_v61 = vld [vmem:[%s5837_s26 + $0x18] sm:$0xff] }
  0x7d   :  { %398 = vst [vmem:[#allocation12 + $0x18] sm:$0xff] %v5682_v36  ;;  %v4258_v39 = vmov %v5777_v39  ;;  %v4131_v30 = vmul.f32 %v4130_v25, %v4130_v25  ;;  %v4137_v31 = vmul.f32 %v4136_v26, %v4136_v26  ;;  %v4146_v32 = vmul.f32 %v4145_v27, %v4145_v27  ;;  %v4539_v27 = vld [vmem:[%s5837_s26 + $0x38] sm:$0xff] }
  0x7e   :  { %400 = vst [vmem:[#allocation12 + $0x20] sm:$0xff] %v5682_v36  ;;  %v4154_v33 = vsel %vm4127_vm0, %v4528_v28, 0.0  ;;  %v4163_v35 = vsel %vm4127_vm0, %v4529_v29, 0.0  ;;  %v4172_v41 = vsel %vm4127_vm0, %v4530_v34, 0.0  ;;  %v4181_v45 = vsel %vm4127_vm0, %v4531_v40, 0.0 }
  0x7f   :  { %402 = vst [vmem:[#allocation12 + $0x28] sm:$0xff] %v5682_v36  ;;  %v4155_v37 = vmul.f32 %v4154_v33, %v4154_v33  ;;  %v4164_v43 = vmul.f32 %v4163_v35, %v4163_v35  ;;  %v4173_v47 = vmul.f32 %v4172_v41, %v4172_v41  ;;  %v5843_v39 = vmov %v5777_v39  ;;  %v4268_v33 = vld [vmem:[%s5874_s27] sm:$0xff]  ;;  %v4540_v41 = vld [vmem:[%s5874_s27 + $0x8] sm:$0xff] }
  0x80   :  { %404 = vst [vmem:[#allocation12 + $0x30] sm:$0xff] %v5682_v36  ;;  %v4182_v51 = vmul.f32 %v4181_v45, %v4181_v45  ;;  %v4210_v53 = vsel %vm4127_vm0, %v4209_v48, 0.0  ;;  %vm4132_vm1 = vcmp.eq.s32.totalorder %v4122_v38, %v5843_v39  ;;  %vm4148_vm3 = vcmp.eq.s32.totalorder %v4147_v0, %v5843_v39 }
  0x81   :  { %406 = vst [vmem:[#allocation12 + $0x38] sm:$0xff] %v5682_v36  ;;  %v4133_v62 = vsel %vm4132_vm1, 0.0, %v4131_v30  ;;  %v4192_v24 = vadd.s32 56, %v4122_v38  ;;  %v4252_v35 = vsel %vm4127_vm0, %v4539_v27, 0.0  ;;  %v4275_v48 = vsel %vm4127_vm0, %v4540_v41, 0.0 }
  0x82   :  { %407 = vst [vmem:[#allocation13] sm:$0xff] %v5682_v36 }
  0x83   :  { %409 = vst [vmem:[#allocation13 + $0x8] sm:$0xff] %v5682_v36 }
  0x84   :  { %411 = vst [vmem:[#allocation13 + $0x10] sm:$0xff] %v5682_v36 }
  0x85   :  { %413 = vst [vmem:[#allocation13 + $0x18] sm:$0xff] %v5682_v36 }
  0x86   :  { %415 = vst [vmem:[#allocation13 + $0x20] sm:$0xff] %v5682_v36 }
  0x87   :  { %417 = vst [vmem:[#allocation13 + $0x28] sm:$0xff] %v5682_v36 }
  0x88   :  { %419 = vst [vmem:[#allocation13 + $0x30] sm:$0xff] %v5682_v36 }
  0x89   :  { %421 = vst [vmem:[#allocation13 + $0x38] sm:$0xff] %v5682_v36  ;;  %v4142_v36 = vadd.f32 %v4137_v31, %v4131_v30 }
  0x8a   :  { %434 = vst [vmem:[%s5780_s23] sm:$0xff] %v433_v49  ;;  %v4190_v49 = vsel %vm4127_vm0, %v4532_v44, 0.0 }
  0x8b   :  { %4499 = vst [vmem:[%s5780_s23 + $0x8] sm:$0xff] %v440_v52  ;;  %v4151_v42 = vadd.f32 %v4146_v32, %v4142_v36  ;;  %v4533_v52 = vld [vmem:[%s5837_s26 + $0x8] sm:$0xff] }
  0x8c   :  { %4501 = vst [vmem:[%s5780_s23 + $0x10] sm:$0xff] %v447_v54  ;;  %v4138_v54 = vadd.s32 8, %v4122_v38  ;;  %v4216_v58 = vsel %vm4127_vm0, %v4533_v52, 0.0  ;;  %v4542_v52 = vld [vmem:[%s5874_s27 + $0x18] sm:$0xff] }
  0x8d   :  { %4503 = vst [vmem:[%s5780_s23 + $0x18] sm:$0xff] %v454_v56  ;;  %v4160_v46 = vadd.f32 %v4155_v37, %v4151_v42  ;;  %v4191_v56 = vmul.f32 %v4190_v49, %v4190_v49 }
  0x8e   :  { %4505 = vst [vmem:[%s5780_s23 + $0x20] sm:$0xff] %v461_v60  ;;  %v5855_v60 = vmul.f32 %v4210_v53, %v4210_v53  ;;  %vm4139_vm2 = vcmp.eq.s32.totalorder %v4138_v54, %v5843_v39 }
  0x8f   :  { %4507 = vst [vmem:[%s5780_s23 + $0x28] sm:$0xff] %v468_v63  ;;  %v4169_v50 = vadd.f32 %v4164_v43, %v4160_v46  ;;  %v4222_v63 = vsel %vm4127_vm0, %v4534_v57, 0.0  ;;  %v4140_v5 = vsel %vm4139_vm2, 0.0, %v4137_v31  ;;  %v4253_v46 = vmul.f32 %v4252_v35, %v4252_v35  ;;  %v4543_v57 = vld [vmem:[%s5874_s27 + $0x20] sm:$0xff] }
  0x90   :  { %4509 = vst [vmem:[%s5780_s23 + $0x30] sm:$0xff] %v475_v1  ;;  %v491_v6 = vld [vmem:[%s5797_s24] sm:$0xff]  ;;  %v4512_v7 = vld [vmem:[%s5797_s24 + $0x8] sm:$0xff]  ;;  %v4514_v8 = vld [vmem:[%s5797_s24 + $0x10] sm:$0xff]  ;;  %v4156_v1 = vadd.s32 24, %v4122_v38  ;;  %v4293_v0 = vsel %vm4127_vm0, %v4543_v57, 0.0 }
  0x91   :  { %4511 = vst [vmem:[%s5780_s23 + $0x38] sm:$0xff] %v482_v3  ;;  %v495_v9 = vsel %vm494_vm8, 1.0, %v491_v6  ;;  %v502_v10 = vsel %vm501_vm9, 1.0, %v4512_v7  ;;  %v509_v11 = vsel %vm508_vm10, 1.0, %v4514_v8  ;;  %v4516_v12 = vld [vmem:[%s5797_s24 + $0x18] sm:$0xff]  ;;  %v4518_v13 = vld [vmem:[%s5797_s24 + $0x20] sm:$0xff]  ;;  %v4178_v55 = vadd.f32 %v4173_v47, %v4169_v50 }
  0x92   :  { %496 = vst [vmem:[%s5797_s24] sm:$0xff] %v495_v9  ;;  %v516_v14 = vsel %vm515_vm11, 1.0, %v4516_v12  ;;  %v4520_v15 = vld [vmem:[%s5797_s24 + $0x28] sm:$0xff]  ;;  %v4522_v16 = vld [vmem:[%s5797_s24 + $0x30] sm:$0xff]  ;;  %v523_v17 = vsel %vm522_vm12, 1.0, %v4518_v13  ;;  %v4524_v18 = vld [vmem:[%s5797_s24 + $0x38] sm:$0xff]  ;;  %v4217_v3 = vmul.f32 %v4216_v58, %v4216_v58  ;;  %v4165_v6 = vadd.s32 32, %v4122_v38 }
  0x93   :  { %4513 = vst [vmem:[%s5797_s24 + $0x8] sm:$0xff] %v502_v10  ;;  %v530_v19 = vsel %vm529_vm13, 1.0, %v4520_v15  ;;  %v537_v20 = vsel %vm536_vm14, 1.0, %v4522_v16  ;;  %v544_v21 = vsel %vm543_vm15, 1.0, %v4524_v18  ;;  %v4187_v59 = vadd.f32 %v4182_v51, %v4178_v55 }
  0x94   :  { %4515 = vst [vmem:[%s5797_s24 + $0x10] sm:$0xff] %v509_v11  ;;  %v4228_v7 = vsel %vm4127_vm0, %v4535_v61, 0.0  ;;  %v4141_v8 = vadd.f32 %v4140_v5, %v4133_v62  ;;  %vm4157_vm4 = vcmp.eq.s32.totalorder %v4156_v1, %v5843_v39  ;;  %v4223_v10 = vmul.f32 %v4222_v63, %v4222_v63  ;;  %v4537_v11 = vld [vmem:[%s5837_s26 + $0x28] sm:$0xff]  ;;  %v4545_v5 = vld [vmem:[%s5874_s27 + $0x30] sm:$0xff] }
  0x95   :  { %4517 = vst [vmem:[%s5797_s24 + $0x18] sm:$0xff] %v516_v14  ;;  %v4196_v2 = vadd.f32 %v4191_v56, %v4187_v59  ;;  %v4149_v12 = vsel %vm4148_vm3, 0.0, %v4146_v32  ;;  %v4158_v13 = vsel %vm4157_vm4, 0.0, %v4155_v37  ;;  %v4234_v14 = vsel %vm4127_vm0, %v4536_v4, 0.0  ;;  %v4544_v63 = vld [vmem:[%s5874_s27 + $0x28] sm:$0xff] }
  0x96   :  { %4519 = vst [vmem:[%s5797_s24 + $0x20] sm:$0xff] %v523_v17  ;;  %v4150_v15 = vadd.f32 %v4149_v12, %v4141_v8  ;;  %vm4166_vm5 = vcmp.eq.s32.totalorder %v4165_v6, %v5843_v39  ;;  %v4174_v16 = vadd.s32 40, %v4122_v38  ;;  %v4229_v18 = vmul.f32 %v4228_v7, %v4228_v7  ;;  %v4546_v8 = vld [vmem:[%s5874_s27 + $0x38] sm:$0xff] }
  0x97   :  { %4521 = vst [vmem:[%s5797_s24 + $0x28] sm:$0xff] %v530_v19  ;;  %v4213_v9 = vadd.f32 %v5855_v60, %v4196_v2  ;;  %v4538_v19 = vld [vmem:[%s5837_s26 + $0x30] sm:$0xff]  ;;  %v4240_v22 = vsel %vm4127_vm0, %v4537_v11, 0.0  ;;  %v4235_v26 = vmul.f32 %v4234_v14, %v4234_v14  ;;  %vm4193_vm8 = vcmp.eq.s32.totalorder %v4192_v24, %v5843_v39 }
  0x98   :  { %4523 = vst [vmem:[%s5797_s24 + $0x30] sm:$0xff] %v537_v20  ;;  %v4167_v20 = vsel %vm4166_vm5, 0.0, %v4164_v43  ;;  %v4159_v23 = vadd.f32 %v4158_v13, %v4150_v15  ;;  %vm4175_vm6 = vcmp.eq.s32.totalorder %v4174_v16, %v5843_v39  ;;  %v4246_v29 = vsel %vm4127_vm0, %v4538_v19, 0.0  ;;  %v4327_v13 = vld [vmem:[%s5904_s28] sm:$0xff] }
  0x99   :  { %4525 = vst [vmem:[%s5797_s24 + $0x38] sm:$0xff] %v544_v21  ;;  %v4219_v17 = vadd.f32 %v4217_v3, %v4213_v9  ;;  %v4183_v21 = vadd.s32 48, %v4122_v38  ;;  %v4176_v28 = vsel %vm4175_vm6, 0.0, %v4173_v47  ;;  %v4241_v32 = vmul.f32 %v4240_v22, %v4240_v22  ;;  %v4541_v47 = vld [vmem:[%s5874_s27 + $0x10] sm:$0xff] }
  0x9a   :  { %v4168_v30 = vadd.f32 %v4167_v20, %v4159_v23  ;;  %v4247_v40 = vmul.f32 %v4246_v29, %v4246_v29  ;;  %v4194_v42 = vsel %vm4193_vm8, 0.0, %v4191_v56  ;;  %v4269_v43 = vsel %vm4127_vm0, %v4268_v33, 0.0  ;;  %v4548_v23 = vld [vmem:[%s5904_s28 + $0x10] sm:$0xff]  ;;  %v4550_v33 = vld [vmem:[%s5904_s28 + $0x20] sm:$0xff] }
  0x9b   :  { %v4225_v25 = vadd.f32 %v4223_v10, %v4219_v17  ;;  %vm4184_vm7 = vcmp.eq.s32.totalorder %v4183_v21, %v5843_v39  ;;  %v4281_v53 = vsel %vm4127_vm0, %v4541_v47, 0.0  ;;  %v4276_v56 = vmul.f32 %v4275_v48, %v4275_v48 }
  0x9c   :  { %v4185_v34 = vsel %vm4184_vm7, 0.0, %v4182_v51  ;;  %v4177_v36 = vadd.f32 %v4176_v28, %v4168_v30  ;;  %v4270_v51 = vmul.f32 %v4269_v43, %v4269_v43  ;;  %v4287_v58 = vsel %vm4127_vm0, %v4542_v52, 0.0  ;;  %v4549_v28 = vld [vmem:[%s5904_s28 + $0x18] sm:$0xff] }
  0x9d   :  { %v4231_v31 = vadd.f32 %v4229_v18, %v4225_v25  ;;  %v4282_v62 = vmul.f32 %v4281_v53, %v4281_v53  ;;  %v4288_v4 = vmul.f32 %v4287_v58, %v4287_v58  ;;  %v4305_v9 = vsel %vm4127_vm0, %v4545_v5, 0.0 }
  0x9e   :  { %v4186_v44 = vadd.f32 %v4185_v34, %v4177_v36  ;;  %v4311_v14 = vsel %vm4127_vm0, %v4546_v8, 0.0  ;;  %v4306_v17 = vmul.f32 %v4305_v9, %v4305_v9  ;;  %v4328_v19 = vsel %vm4127_vm0, %v4327_v13, 0.0 }
  0x9f   :  { %v4237_v37 = vadd.f32 %v4235_v26, %v4231_v31  ;;  %v4312_v22 = vmul.f32 %v4311_v14, %v4311_v14  ;;  %v4329_v27 = vmul.f32 %v4328_v19, %v4328_v19  ;;  %v4345_v29 = vsel %vm4127_vm0, %v4548_v23, 0.0 }
  0xa0   :  { %v4195_v49 = vadd.f32 %v4194_v42, %v4186_v44  ;;  %v4354_v34 = vsel %vm4127_vm0, %v4549_v28, 0.0  ;;  %v4363_v41 = vsel %vm4127_vm0, %v4550_v33, 0.0  ;;  %v4320_v38 = vmov %v5775_v38 }
  0xa1   :  { %v4243_v45 = vadd.f32 %v4241_v32, %v4237_v37  ;;  %v4346_v37 = vmul.f32 %v4345_v29, %v4345_v29  ;;  %v4355_v44 = vmul.f32 %v4354_v34, %v4354_v34  ;;  %v4317_v39 = vmov %v5777_v39 }
  0xa2   :  { %v4212_v54 = vadd.f32 %v5855_v60, %v4195_v49  ;;  %v4299_v60 = vsel %vm4127_vm0, %v4544_v63, 0.0  ;;  %v4364_v49 = vmul.f32 %v4363_v41, %v4363_v41  ;;  %v4338_v53 = vadd.s32 8, %v4320_v38 }
  0xa3   :  { %v4249_v50 = vadd.f32 %v4247_v40, %v4243_v45  ;;  %v4300_v12 = vmul.f32 %v4299_v60, %v4299_v60  ;;  %v4552_v45 = vld [vmem:[%s5904_s28 + $0x30] sm:$0xff]  ;;  %vm4330_vm9 = vcmp.eq.s32.totalorder %v4320_v38, %v4317_v39  ;;  %v4347_v58 = vadd.s32 16, %v4320_v38 }
  0xa4   :  { %v4218_v59 = vadd.f32 %v4217_v3, %v4212_v54  ;;  %v4294_v3 = vmul.f32 %v4293_v0, %v4293_v0  ;;  %vm4339_vm10 = vcmp.eq.s32.totalorder %v4338_v53, %v4317_v39  ;;  %v4356_v63 = vadd.s32 24, %v4320_v38 }
  0xa5   :  { %v4255_v55 = vadd.f32 %v4253_v46, %v4249_v50  ;;  %v4553_v50 = vld [vmem:[%s5904_s28 + $0x38] sm:$0xff]  ;;  %vm4348_vm11 = vcmp.eq.s32.totalorder %v4347_v58, %v4317_v39  ;;  %v4365_v5 = vadd.s32 32, %v4320_v38  ;;  %v4392_v14 = vadd.s32 56, %v4320_v38 }
  0xa6   :  { %v4224_v1 = vadd.f32 %v4223_v10, %v4218_v59  ;;  %vm4357_vm12 = vcmp.eq.s32.totalorder %v4356_v63, %v4317_v39  ;;  %v4349_v9 = vsel %vm4348_vm11, 0.0, %v4346_v37 }
  0xa7   :  { %v4272_v61 = vadd.f32 %v4270_v51, %v4255_v55  ;;  %vm4366_vm13 = vcmp.eq.s32.totalorder %v4365_v5, %v4317_v39  ;;  %vm4393_vm1 = vcmp.eq.s32.totalorder %v4392_v14, %v4317_v39 }
  0xa8   :  { %v4230_v6 = vadd.f32 %v4229_v18, %v4224_v1  ;;  %v4547_v18 = vld [vmem:[%s5904_s28 + $0x8] sm:$0xff] }
  0xa9   :  { %v4278_v2 = vadd.f32 %v4276_v56, %v4272_v61  ;;  %v4336_v24 = vsel %vm4127_vm0, %v4547_v18, 0.0 }
  0xaa   :  { %v4236_v11 = vadd.f32 %v4235_v26, %v4230_v6 }
  0xab   :  { %v4284_v7 = vadd.f32 %v4282_v62, %v4278_v2  ;;  %v4331_v2 = vsel %vm4330_vm9, 0.0, %v4329_v27 }
  0xac   :  { %v4242_v15 = vadd.f32 %v4241_v32, %v4236_v11  ;;  %v4337_v32 = vmul.f32 %v4336_v24, %v4336_v24 }
  0xad   :  { %v4290_v10 = vadd.f32 %v4288_v4, %v4284_v7 }
  0xae   :  { %v4248_v20 = vadd.f32 %v4247_v40, %v4242_v15  ;;  %v4551_v40 = vld [vmem:[%s5904_s28 + $0x28] sm:$0xff]  ;;  %v4340_v6 = vsel %vm4339_vm10, 0.0, %v4337_v32  ;;  %v4367_v15 = vsel %vm4366_vm13, 0.0, %v4364_v49 }
  0xaf   :  { %v4296_v16 = vadd.f32 %v4294_v3, %v4290_v10  ;;  %v4383_v10 = vadd.s32 48, %v4320_v38 }
  0xb0   :  { %v4254_v25 = vadd.f32 %v4253_v46, %v4248_v20  ;;  %v4372_v46 = vsel %vm4127_vm0, %v4551_v40, 0.0 }
  0xb1   :  { %v4302_v21 = vadd.f32 %v4300_v12, %v4296_v16  ;;  %v4373_v55 = vmul.f32 %v4372_v46, %v4372_v46  ;;  %vm4384_vm15 = vcmp.eq.s32.totalorder %v4383_v10, %v4317_v39 }
  0xb2   :  { %v4271_v30 = vadd.f32 %v4270_v51, %v4254_v25  ;;  %v4381_v51 = vsel %vm4127_vm0, %v4552_v45, 0.0 }
  0xb3   :  { %v4308_v26 = vadd.f32 %v4306_v17, %v4302_v21  ;;  %v4382_v61 = vmul.f32 %v4381_v51, %v4381_v51 }
  0xb4   :  { %v4277_v35 = vadd.f32 %v4276_v56, %v4271_v30  ;;  %v4390_v56 = vsel %vm4127_vm0, %v4553_v50, 0.0 }
  0xb5   :  { %v4314_v31 = vadd.f32 %v4312_v22, %v4308_v26  ;;  %v4391_v1 = vmul.f32 %v4390_v56, %v4390_v56  ;;  %v4385_v19 = vsel %vm4384_vm15, 0.0, %v4382_v61 }
  0xb6   :  { %v4283_v42 = vadd.f32 %v4282_v62, %v4277_v35 }
  0xb7   :  { %v4333_v36 = vadd.f32 %v4329_v27, %v4314_v31  ;;  %v4394_v21 = vsel %vm4393_vm1, 0.0, %v4391_v1 }
  0xb8   :  { %v4289_v47 = vadd.f32 %v4288_v4, %v4283_v42 }
  0xb9   :  { %v4342_v43 = vadd.f32 %v4337_v32, %v4333_v36 }
  0xba   :  { %v4295_v52 = vadd.f32 %v4294_v3, %v4289_v47  ;;  %v4374_v3 = vadd.s32 40, %v4320_v38 }
  0xbb   :  { %v4351_v48 = vadd.f32 %v4346_v37, %v4342_v43 }
  0xbc   :  { %v4301_v57 = vadd.f32 %v4300_v12, %v4295_v52  ;;  %v4358_v12 = vsel %vm4357_vm12, 0.0, %v4355_v44  ;;  %vm4375_vm14 = vcmp.eq.s32.totalorder %v4374_v3, %v4317_v39 }
  0xbd   :  { %v4360_v54 = vadd.f32 %v4355_v44, %v4351_v48 }
  0xbe   :  { %v4307_v62 = vadd.f32 %v4306_v17, %v4301_v57  ;;  %v4376_v17 = vsel %vm4375_vm14, 0.0, %v4373_v55 }
  0xbf   :  { %v4369_v59 = vadd.f32 %v4364_v49, %v4360_v54 }
  0xc0   :  { %v4313_v4 = vadd.f32 %v4312_v22, %v4307_v62 }
  0xc1   :  { %v4378_v0 = vadd.f32 %v4373_v55, %v4369_v59 }
  0xc2   :  { %v4332_v7 = vadd.f32 %v4331_v2, %v4313_v4 }
  0xc3   :  { %v4387_v60 = vadd.f32 %v4382_v61, %v4378_v0 }
  0xc4   :  { %v4341_v11 = vadd.f32 %v4340_v6, %v4332_v7 }
  0xc5   :  { %v4396_v8 = vadd.f32 %v4391_v1, %v4387_v60 }
  0xc6   :  { %v4350_v13 = vadd.f32 %v4349_v9, %v4341_v11 }
  0xc7   :  { %4397 = vadd.xlane.f32.xlu0 %v4396_v8 }
  0xc8   :  { %v4359_v16 = vadd.f32 %v4358_v12, %v4350_v13 }
  0xca   :  { %v4368_v18 = vadd.f32 %v4367_v15, %v4359_v16 }
  0xcc   :  { %v4377_v20 = vadd.f32 %v4376_v17, %v4368_v18 }
  0xce   :  { %v4386_v22 = vadd.f32 %v4385_v19, %v4377_v20 }
  0xd0   :  { %v4395_v23 = vadd.f32 %v4394_v21, %v4386_v22 }
  0xd2   :  { %4405 = vadd.xlane.f32.xlu0 %v4395_v23 }
 0x13a   :  { %v4398_v24 = vpop.xlane.xlu0 %4397 }
 0x13b   :  { %v4399_v25 = vrot.slane %v4398_v24, 4 }
 0x13d   :  { %v4400_v26 = vadd.f32 %v4399_v25, %v4398_v24 }
 0x13f   :  { %v4401_v27 = vrot.slane %v4400_v26, 2 }
 0x141   :  { %v4402_v31 = vadd.f32 %v4401_v27, %v4400_v26 }
 0x143   :  { %v4403_v34 = vrot.slane %v4402_v31, 1 }
 0x145   :  { %v4406_v28 = vpop.xlane.xlu0 %4405  ;;  %v4404_v37 = vadd.f32 %v4403_v34, %v4402_v31 }
 0x146   :  { %v4407_v29 = vrot.slane %v4406_v28, 4 }
 0x148   :  { %v4408_v30 = vadd.f32 %v4407_v29, %v4406_v28 }
 0x14a   :  { %v4409_v32 = vrot.slane %v4408_v30, 2 }
 0x14c   :  { %v4410_v33 = vadd.f32 %v4409_v32, %v4408_v30 }
 0x14e   :  { %v4411_v35 = vrot.slane %v4410_v33, 1 }
 0x150   :  { %v4412_v36 = vadd.f32 %v4411_v35, %v4410_v33 }
 0x152   :  { %5157 = vpush %v4412_v36 }
 0x153   :  { %5159 = vpush %v4404_v37 }
 0x183   :  { %s5158_s29 = spop %5157 }
 0x184   :  { %s5160_s30 = spop %5159 }
 0x185   :  { %s4415_s1 = smul.f32 1e-10, %s5160_s30 }
 0x187   :  { %p4416_p8 = scmp.le.f32.partialorder %s5158_s29, %s4415_s1 }
 0x188   :  { %s5937_s10 = smov (!%p4416_p8), 0  }
 0x189   :  { %4419 = sbr.rel (%p4416_p8) target bundleno = 1490 (0x5d2), region = 807 }
 0x18e LB: > { %7513 = sst [smem:[#allocation31_spill]] %s5676_s10  ;;  %s5942_s11 = smov 0   ;;  %s5676_s10 = sphi %s5937_s10, %s7525_s10  }
 0x18f LB: >> { %7514 = sst [smem:[#allocation32_spill]] %s5680_s11  ;;  %s5680_s11 = sphi %s5942_s11, %s873_s11  }
 0x190   : >> { %s5947_s12 = smov [#allocation15]  ;;  %v878_v39 = vmov %v5777_v39  ;;  %v881_v38 = vmov %v5775_v38  ;;  %s5960_s13 = smov [#allocation16] }
 0x191   : >> { %v5952_v39 = vmov %v5777_v39  ;;  %v943_v38 = vmov %v5775_v38  ;;  %v882_v40 = vld [vmem:[%s5947_s12] sm:$0xff]  ;;  %vm885_vm2 = vcmp.eq.s32.totalorder %v881_v38, %v878_v39  ;;  %v4554_v41 = vld [vmem:[%s5947_s12 + $0x8] sm:$0xff]  ;;  %v890_v42 = vadd.s32 8, %v881_v38  ;;  %v4555_v46 = vld [vmem:[%s5947_s12 + $0x10] sm:$0xff]  ;;  %s5974_s14 = smov [#allocation18]  ;;  %s875_s15 = smov [#allocation19] }
 0x192   : >> { %v896_v43 = vadd.s32 16, %v881_v38  ;;  %v902_v44 = vadd.s32 24, %v881_v38  ;;  %v886_v45 = vsel %vm885_vm2, %v882_v40, 0.0  ;;  %v908_v47 = vadd.s32 32, %v881_v38  ;;  %v4556_v49 = vld [vmem:[%s5947_s12 + $0x18] sm:$0xff]  ;;  %v4557_v52 = vld [vmem:[%s5947_s12 + $0x20] sm:$0xff] }
 0x193   : >> { %v914_v48 = vadd.s32 40, %v881_v38  ;;  %vm947_vm3 = vcmp.eq.s32.totalorder %v943_v38, %v5952_v39  ;;  %vm891_vm4 = vcmp.eq.s32.totalorder %v890_v42, %v878_v39  ;;  %v920_v50 = vadd.s32 48, %v881_v38  ;;  %v944_v54 = vld [vmem:[%s5960_s13] sm:$0xff]  ;;  %v4558_v56 = vld [vmem:[%s5947_s12 + $0x28] sm:$0xff]  ;;  %v4559_v62 = vld [vmem:[%s5947_s12 + $0x30] sm:$0xff]  ;;  %s937_s16 = smov [#allocation20] }
 0x194   : >> { %vm897_vm5 = vcmp.eq.s32.totalorder %v896_v43, %v878_v39  ;;  %vm903_vm6 = vcmp.eq.s32.totalorder %v902_v44, %v878_v39  ;;  %v892_v51 = vsel %vm891_vm4, %v4554_v41, %v886_v45  ;;  %vm909_vm7 = vcmp.eq.s32.totalorder %v908_v47, %v878_v39  ;;  %v4561_v58 = vld [vmem:[%s5960_s13 + $0x8] sm:$0xff]  ;;  %v4562_v63 = vld [vmem:[%s5960_s13 + $0x10] sm:$0xff]  ;;  %v4560_v4 = vld [vmem:[%s5947_s12 + $0x38] sm:$0xff]  ;;  %s1064_s17 = smov [#allocation20]  ;;  %s999_s2 = smov [#allocation21] }
 0x195   : >> { %vm915_vm8 = vcmp.eq.s32.totalorder %v914_v48, %v878_v39  ;;  %v926_v53 = vadd.s32 56, %v881_v38  ;;  %v898_v55 = vsel %vm897_vm5, %v4555_v46, %v892_v51  ;;  %vm921_vm9 = vcmp.eq.s32.totalorder %v920_v50, %v878_v39  ;;  %v4563_v5 = vld [vmem:[%s5960_s13 + $0x18] sm:$0xff]  ;;  %v4564_v8 = vld [vmem:[%s5960_s13 + $0x20] sm:$0xff]  ;;  %v4565_v10 = vld [vmem:[%s5960_s13 + $0x28] sm:$0xff]  ;;  %s1062_s18 = smov [#allocation19]  ;;  %s1066_s19 = smov [#allocation21] }
 0x196   : >> { %v948_v57 = vsel %vm947_vm3, %v944_v54, 0.0  ;;  %v952_v59 = vadd.s32 8, %v943_v38  ;;  %v904_v61 = vsel %vm903_vm6, %v4556_v49, %v898_v55  ;;  %v958_v0 = vadd.s32 16, %v943_v38  ;;  %v4566_v14 = vld [vmem:[%s5960_s13 + $0x30] sm:$0xff]  ;;  %v1006_v17 = vld [vmem:[%s5974_s14] sm:$0xff]  ;;  %v4567_v20 = vld [vmem:[%s5960_s13 + $0x38] sm:$0xff] }
 0x197   : >> { %vm927_vm10 = vcmp.eq.s32.totalorder %v926_v53, %v878_v39  ;;  %v964_v1 = vadd.s32 24, %v943_v38  ;;  %v910_v2 = vsel %vm909_vm7, %v4557_v52, %v904_v61  ;;  %v970_v60 = vadd.s32 32, %v943_v38  ;;  %v4568_v25 = vld [vmem:[%s5974_s14 + $0x8] sm:$0xff]  ;;  %v4569_v28 = vld [vmem:[%s5974_s14 + $0x10] sm:$0xff]  ;;  %v4570_v34 = vld [vmem:[%s5974_s14 + $0x18] sm:$0xff]  ;;  %s1141_s20 = smov [#allocation22] }
 0x198   : >> { %vm953_vm11 = vcmp.eq.s32.totalorder %v952_v59, %v5952_v39  ;;  %v976_v6 = vadd.s32 40, %v943_v38  ;;  %v916_v7 = vsel %vm915_vm8, %v4558_v56, %v910_v2  ;;  %vm959_vm12 = vcmp.eq.s32.totalorder %v958_v0, %v5952_v39  ;;  %v4571_v37 = vld [vmem:[%s5974_s14 + $0x20] sm:$0xff]  ;;  %v4572_v43 = vld [vmem:[%s5974_s14 + $0x28] sm:$0xff]  ;;  %v4573_v45 = vld [vmem:[%s5974_s14 + $0x30] sm:$0xff]  ;;  %s1143_s21 = smov [#allocation23]  ;;  %s1060_s3 = smov [#allocation24] }
 0x199   : >> { %v954_v3 = vsel %vm953_vm11, %v4561_v58, %v948_v57  ;;  %vm965_vm13 = vcmp.eq.s32.totalorder %v964_v1, %v5952_v39  ;;  %v922_v9 = vsel %vm921_vm9, %v4559_v62, %v916_v7  ;;  %vm971_vm14 = vcmp.eq.s32.totalorder %v970_v60, %v5952_v39  ;;  %v4574_v51 = vld [vmem:[%s5974_s14 + $0x38] sm:$0xff]  ;;  %s1061_s22 = smov [#allocation25]  ;;  %s1145_s3 = smov %s1060_s3 }
 0x19a   : >> { %v960_v11 = vsel %vm959_vm12, %v4562_v63, %v954_v3  ;;  %vm977_vm15 = vcmp.eq.s32.totalorder %v976_v6, %v5952_v39  ;;  %v928_v12 = vsel %vm927_vm10, %v4560_v4, %v922_v9  ;;  %v982_v15 = vadd.s32 48, %v943_v38  ;;  %s1147_s22 = smov %s1061_s22  ;;  %s1180_s0 = smov [#allocation24] }
 0x19b   : >> { %v966_v13 = vsel %vm965_vm13, %v4563_v5, %v960_v11  ;;  %v988_v16 = vadd.s32 56, %v943_v38  ;;  %v929_v18 = vrot.slane %v928_v12, 4  ;;  %v1002_v39 = vmov %v5777_v39  ;;  %s1149_s23 = smov [#allocation24]  ;;  %s1164_s24 = smov [#allocation24] }
 0x19c   : >> { %v972_v19 = vsel %vm971_vm14, %v4564_v8, %v966_v13  ;;  %v1005_v38 = vmov %v5775_v38  ;;  %vm983_vm1 = vcmp.eq.s32.totalorder %v982_v15, %v5952_v39  ;;  %s1212_s25 = smov [#allocation24]  ;;  %s1196_s26 = smov [#allocation24] }
 0x19d   : >> { %v978_v21 = vsel %vm977_vm15, %v4565_v10, %v972_v19  ;;  %vm989_vm2 = vcmp.eq.s32.totalorder %v988_v16, %v5952_v39  ;;  %vm1009_vm3 = vcmp.eq.s32.totalorder %v1005_v38, %v1002_v39  ;;  %v930_v22 = vadd.f32 %v929_v18, %v928_v12  ;;  %s1228_s27 = smov [#allocation24]  ;;  %s1244_s28 = smov [#allocation24] }
 0x19e   : >> { %v984_v23 = vsel %vm983_vm1, %v4566_v14, %v978_v21  ;;  %v1010_v24 = vsel %vm1009_vm3, %v1006_v17, 0.0  ;;  %v1014_v26 = vadd.s32 8, %v1005_v38  ;;  %v1020_v29 = vadd.s32 16, %v1005_v38  ;;  %s1307_s29 = smov [#allocation25]  ;;  %s1291_s30 = smov [#allocation25] }
 0x19f   : >> { %v990_v27 = vsel %vm989_vm2, %v4567_v20, %v984_v23  ;;  %v1026_v30 = vadd.s32 24, %v1005_v38  ;;  %v1032_v31 = vadd.s32 32, %v1005_v38  ;;  %v931_v32 = vrot.slane %v930_v22, 2  ;;  %s1355_s1 = smov [#allocation25]  ;;  %s1276_s12 = smov [#allocation25] }
 0x1a0   : >> { %v991_v33 = vrot.slane %v990_v27, 4  ;;  %vm1015_vm4 = vcmp.eq.s32.totalorder %v1014_v26, %v1002_v39  ;;  %v1038_v35 = vadd.s32 40, %v1005_v38  ;;  %vm1021_vm5 = vcmp.eq.s32.totalorder %v1020_v29, %v1002_v39  ;;  %s1323_s13 = smov [#allocation25]  ;;  %s1260_s14 = smov [#allocation24] }
 0x1a1   : >> { %v1016_v36 = vsel %vm1015_vm4, %v4568_v25, %v1010_v24  ;;  %vm1027_vm6 = vcmp.eq.s32.totalorder %v1026_v30, %v1002_v39  ;;  %vm1033_vm7 = vcmp.eq.s32.totalorder %v1032_v31, %v1002_v39  ;;  %v932_v40 = vadd.f32 %v931_v32, %v930_v22  ;;  %s6823_s5 = smov [#allocation18]  ;;  %s6835_s4 = smov [#allocation17] }
 0x1a2   : >> { %v992_v41 = vadd.f32 %v991_v33, %v990_v27  ;;  %v1022_v42 = vsel %vm1021_vm5, %v4569_v28, %v1016_v36  ;;  %vm1039_vm8 = vcmp.eq.s32.totalorder %v1038_v35, %v1002_v39  ;;  %v1044_v46 = vadd.s32 48, %v1005_v38  ;;  %7515 = sst [smem:[#allocation33_spill]] %s6835_s4  ;;  %s6837_s9 = smov [#allocation18] }
 0x1a3   : >> { %v1028_v44 = vsel %vm1027_vm6, %v4570_v34, %v1022_v42  ;;  %v1050_v47 = vadd.s32 56, %v1005_v38  ;;  %v933_v48 = vrot.slane %v932_v40, 1  ;;  %v1187_v38 = vmov %v5775_v38  ;;  %s6851_s8 = smov [#allocation17]  ;;  %s6853_s6 = smov [#allocation18] }
 0x1a4   : >> { %v993_v49 = vrot.slane %v992_v41, 2  ;;  %v1034_v50 = vsel %vm1033_vm7, %v4571_v37, %v1028_v44  ;;  %vm1045_vm9 = vcmp.eq.s32.totalorder %v1044_v46, %v1002_v39  ;;  %v1171_v38 = vmov %v5775_v38  ;;  %7516 = sst [smem:[#allocation34_spill]] %s6851_s8  ;;  %s7517_s7 = smov 127  }
 0x1a5   : >> { %v1040_v52 = vsel %vm1039_vm8, %v4572_v43, %v1034_v50  ;;  %vm1051_vm10 = vcmp.eq.s32.totalorder %v1050_v47, %v1002_v39  ;;  %v934_v53 = vadd.f32 %v933_v48, %v932_v40  ;;  %v1184_v39 = vmov %v5777_v39  ;;  %s6863_s10 = smov [#allocation17]  ;;  %s6865_s11 = smov [#allocation18] }
 0x1a6   : >> { %v994_v54 = vadd.f32 %v993_v49, %v992_v41  ;;  %v1046_v55 = vsel %vm1045_vm9, %v4573_v45, %v1040_v52  ;;  %v1153_v39 = vmov %v5777_v39 }
 0x1a7   : >> { %v1052_v56 = vsel %vm1051_vm10, %v4574_v51, %v1046_v55  ;;  %935 = vst [vmem:[%s875_s15] sm:$0x1] %v934_v53  ;;  %v1168_v39 = vmov %v5777_v39  ;;  %s1339_s15 = smov [#allocation25] }
 0x1a8   : >> { %v995_v57 = vrot.slane %v994_v54, 1  ;;  %v1053_v58 = vrot.slane %v1052_v56, 4 }
 0x1aa   : >> { %v996_v59 = vadd.f32 %v995_v57, %v994_v54  ;;  %v1054_v61 = vadd.f32 %v1053_v58, %v1052_v56 }
 0x1ac   : >> { %997 = vst [vmem:[%s937_s16] sm:$0x1] %v996_v59  ;;  %v1055_v62 = vrot.slane %v1054_v61, 2  ;;  %s1371_s16 = smov [#allocation25] }
 0x1ae   : >> { %v1056_v63 = vadd.f32 %v1055_v62, %v1054_v61  ;;  %v1063_v8 = vld [vmem:[%s1062_s18] sm:$0xff]  ;;  %s1177_s18 = smov [#allocation26] }
 0x1af   : >> { %v1117_v32 = vand.u32 2147483647, %v1063_v8 }
 0x1b0   : >> { %v1057_v0 = vrot.slane %v1056_v63, 1 }
 0x1b2   : >> { %v1058_v1 = vadd.f32 %v1057_v0, %v1056_v63  ;;  %v1188_v0 = vadd.s32 16, %v1187_v38  ;;  %v1156_v38 = vmov %v5775_v38 }
 0x1b3   : >> { %v5999_v2 = vld [vmem:[%s1064_s17] sm:$0xff]  ;;  %s1387_s17 = smov [#allocation25] }
 0x1b4   : >> { %1059 = vst [vmem:[%s999_s2] sm:$0x1] %v1058_v1  ;;  %v1069_v4 = vmul.f32 2.0, %v5999_v2  ;;  %v1118_v42 = vand.u32 2147483647, %v5999_v2  ;;  %v1172_v1 = vadd.s32 8, %v1171_v38  ;;  %v1219_v38 = vmov %v5775_v38  ;;  %s1162_s2 = smov [#allocation26] }
 0x1b5   : >> { %v1203_v38 = vmov %v5775_v38 }
 0x1b6   : >> { %5412 = vrcp.f32 %v1069_v4  ;;  %v1081_v6 = vand.u32 2147483648, %v1069_v4  ;;  %vm1075_vm11 = vweird.f32 %v1069_v4  ;;  %v1079_v3 = vand.u32 2147483647, %v1069_v4 }
 0x1b8   : >> { %v1082_v10 = vor.u32 1.1754944e-38, %v1081_v6  ;;  %vm1080_vm14 = vcmp.eq.f32.partialorder %v1079_v3, 8.507059e+37 }
 0x1bb   : >> { %v1067_v9 = vld [vmem:[%s1066_s19] sm:$0xff]  ;;  %s1193_s19 = smov [#allocation26] }
 0x1bc   : >> { %v5413_v5 = vpop.eup %5412  ;;  %v1068_v12 = vsub.f32 %v1067_v9, %v1063_v8  ;;  %v1119_v33 = vand.u32 2147483647, %v1067_v9 }
 0x1bd   : >> { %v1071_v60 = vmul.f32 %v5413_v5, %v1069_v4  ;;  %vm1076_vm12 = vweird.f32 %v5413_v5 }
 0x1be   : >> { %vm1077_vm13 = vmor %vm1075_vm11, %vm1076_vm12  ;;  %v1120_v35 = vmin.f32 %v1117_v32, %v1119_v33  ;;  %vm1189_vm11 = vcmp.eq.s32.totalorder %v1188_v0, %v1184_v39  ;;  %vm1158_vm12 = vcmp.eq.s32.totalorder %v1156_v38, %v1153_v39  ;;  %v1235_v38 = vmov %v5775_v38 }
 0x1bf   : >> { %v1072_v7 = vsub.f32 1.0, %v1071_v60  ;;  %v1204_v60 = vadd.s32 24, %v1203_v38 }
 0x1c0   : >> { %v1121_v43 = vmul.f32 1.1920929e-08, %v1120_v35 }
 0x1c1   : >> { %v1073_v11 = vmul.f32 %v5413_v5, %v1072_v7 }
 0x1c2   : >> { %vm1122_vm7 = vcmp.le.f32.partialorder %v1118_v42, %v1121_v43 }
 0x1c3   : >> { %v1074_v13 = vadd.f32 %v5413_v5, %v1073_v11 }
 0x1c5   : >> { %v1078_v14 = vsel %vm1077_vm13, %v5413_v5, %v1074_v13  ;;  %vm1173_vm13 = vcmp.eq.s32.totalorder %v1172_v1, %v1168_v39  ;;  %v1216_v39 = vmov %v5777_v39  ;;  %v1220_v5 = vadd.s32 32, %v1219_v38 }
 0x1c6   : >> { %v1083_v15 = vsel %vm1080_vm14, %v1082_v10, %v1078_v14  ;;  %v1200_v39 = vmov %v5777_v39 }
 0x1c7   : >> { %v1084_v16 = vmul.f32 %v1083_v15, %v1068_v12  ;;  %v1232_v39 = vmov %v5777_v39  ;;  %vm1221_vm14 = vcmp.eq.s32.totalorder %v1220_v5, %v1216_v39 }
 0x1c9   : >> { %v1086_v17 = vmul.f32 %v1084_v16, %v1084_v16  ;;  %vm1085_vm2 = vcmp.ge.f32.partialorder %v1084_v16, 0.0 }
 0x1cb   : >> { %v1087_v18 = vadd.f32 1.0, %v1086_v17 }
 0x1cd   : >> { %5414 = vrsqrt.f32 %v1087_v18  ;;  %vm1095_vm15 = vcmp.eq.f32.partialorder %v1087_v18, inf  ;;  %v1098_v25 = vand.u32 2147483648, %v1087_v18  ;;  %vm1097_vm1 = vcmp.eq.f32.partialorder %v1087_v18, 0.0 }
 0x1d3   : >> { %v5415_v19 = vpop.eup %5414 }
 0x1d4   : >> { %v1089_v20 = vmul.f32 %v5415_v19, %v1087_v18 }
 0x1d6   : >> { %v1090_v21 = vmul.f32 %v5415_v19, %v1089_v20 }
 0x1d8   : >> { %v1091_v22 = vmul.f32 0.5, %v1090_v21 }
 0x1da   : >> { %v1092_v23 = vsub.f32 1.5, %v1091_v22 }
 0x1dc   : >> { %v1093_v24 = vmul.f32 %v5415_v19, %v1092_v23 }
 0x1de   : >> { %v1094_v26 = vmul.f32 %v1093_v24, %v1087_v18 }
 0x1e0   : >> { %v1096_v27 = vsel %vm1095_vm15, %v1087_v18, %v1094_v26  ;;  %vm1205_vm15 = vcmp.eq.s32.totalorder %v1204_v60, %v1200_v39 }
 0x1e1   : >> { %v1099_v28 = vsel %vm1097_vm1, %v1098_v25, %v1096_v27 }
 0x1e2   : >> { %v1100_v29 = vxor.u32 2147483648, %v1099_v28 }
 0x1e4   : >> { %v1101_v30 = vsel %vm1085_vm2, %v1099_v28, %v1100_v29 }
 0x1e5   : >> { %v1102_v31 = vadd.f32 %v1101_v30, %v1084_v16 }
 0x1e7   : >> { %5416 = vrcp.f32 %v1102_v31  ;;  %v1114_v37 = vand.u32 2147483648, %v1102_v31  ;;  %vm1108_vm3 = vweird.f32 %v1102_v31  ;;  %v1112_v41 = vand.u32 2147483647, %v1102_v31 }
 0x1e9   : >> { %v1115_v45 = vor.u32 1.1754944e-38, %v1114_v37  ;;  %vm1113_vm6 = vcmp.eq.f32.partialorder %v1112_v41, 8.507059e+37 }
 0x1ed   : >> { %v5417_v34 = vpop.eup %5416 }
 0x1ee   : >> { %v1104_v36 = vmul.f32 %v5417_v34, %v1102_v31  ;;  %vm1109_vm4 = vweird.f32 %v5417_v34 }
 0x1ef   : >> { %vm1110_vm5 = vmor %vm1108_vm3, %vm1109_vm4 }
 0x1f0   : >> { %v1105_v40 = vsub.f32 1.0, %v1104_v36 }
 0x1f2   : >> { %v1106_v44 = vmul.f32 %v5417_v34, %v1105_v40 }
 0x1f4   : >> { %v1107_v46 = vadd.f32 %v5417_v34, %v1106_v44 }
 0x1f6   : >> { %v1111_v47 = vsel %vm1110_vm5, %v5417_v34, %v1107_v46 }
 0x1f7   : >> { %v1116_v48 = vsel %vm1113_vm6, %v1115_v45, %v1111_v47 }
 0x1f8   : >> { %v1123_v49 = vsel %vm1122_vm7, 0.0, %v1116_v48 }
 0x1f9   : >> { %v1124_v50 = vmul.f32 %v1123_v49, %v1123_v49  ;;  %v1137_v51 = vmul.f32 %v1123_v49, %v5999_v2 }
 0x1fb   : >> { %v1125_v52 = vadd.f32 1.0, %v1124_v50  ;;  %v1138_v53 = vsub.f32 %v1063_v8, %v1137_v51  ;;  %v1140_v54 = vadd.f32 %v1137_v51, %v1067_v9  ;;  %v1236_v8 = vadd.s32 40, %v1235_v38 }
 0x1fc   : >> { %v1251_v38 = vmov %v5775_v38 }
 0x1fd   : >> { %5418 = vrsqrt.f32 %v1125_v52  ;;  %1142 = vst [vmem:[%s1141_s20] sm:$0xff] %v1138_v53  ;;  %vm1132_vm8 = vweird.f32 %v1125_v52  ;;  %vm1237_vm1 = vcmp.eq.s32.totalorder %v1236_v8, %v1232_v39  ;;  %v1314_v38 = vmov %v5775_v38  ;;  %s1209_s20 = smov [#allocation26] }
 0x1fe   : >> { %1144 = vst [vmem:[%s1143_s21] sm:$0xff] %v1140_v54  ;;  %v1298_v38 = vmov %v5775_v38  ;;  %v1252_v16 = vadd.s32 48, %v1251_v38  ;;  %v1315_v17 = vadd.s32 16, %v1314_v38  ;;  %v1248_v39 = vmov %v5777_v39  ;;  %s1225_s21 = smov [#allocation26] }
 0x1ff   : >> { %v1311_v39 = vmov %v5777_v39  ;;  %v1299_v18 = vadd.s32 8, %v1298_v38  ;;  %v1362_v38 = vmov %v5775_v38 }
 0x200   : >> { %v1295_v39 = vmov %v5777_v39  ;;  %vm1253_vm2 = vcmp.eq.s32.totalorder %v1252_v16, %v1248_v39  ;;  %vm1316_vm3 = vcmp.eq.s32.totalorder %v1315_v17, %v1311_v39  ;;  %v1330_v38 = vmov %v5775_v38 }
 0x201   : >> { %vm1300_vm4 = vcmp.eq.s32.totalorder %v1299_v18, %v1295_v39  ;;  %v1363_v25 = vadd.s32 40, %v1362_v38  ;;  %v1359_v39 = vmov %v5777_v39  ;;  %v1283_v38 = vmov %v5775_v38 }
 0x202   : >> { %v1280_v39 = vmov %v5777_v39  ;;  %v1331_v26 = vadd.s32 24, %v1330_v38 }
 0x203   : >> { %v5419_v55 = vpop.eup %5418  ;;  %v1327_v39 = vmov %v5777_v39  ;;  %vm1364_vm5 = vcmp.eq.s32.totalorder %v1363_v25, %v1359_v39  ;;  %vm1285_vm6 = vcmp.eq.s32.totalorder %v1283_v38, %v1280_v39  ;;  %v1267_v38 = vmov %v5775_v38 }
 0x204   : >> { %v1127_v56 = vmul.f32 %v5419_v55, %v1125_v52  ;;  %vm1133_vm9 = vweird.f32 %v5419_v55  ;;  %vm1332_vm7 = vcmp.eq.s32.totalorder %v1331_v26, %v1327_v39  ;;  %v1346_v38 = vmov %v5775_v38 }
 0x205   : >> { %vm1134_vm10 = vmor %vm1132_vm8, %vm1133_vm9  ;;  %v1378_v38 = vmov %v5775_v38  ;;  %v1268_v33 = vadd.s32 56, %v1267_v38  ;;  %v1347_v34 = vadd.s32 32, %v1346_v38  ;;  %v1264_v39 = vmov %v5777_v39 }
 0x206   : >> { %v1128_v57 = vmul.f32 %v5419_v55, %v1127_v56  ;;  %v1343_v39 = vmov %v5777_v39  ;;  %v1379_v35 = vadd.s32 48, %v1378_v38  ;;  %v1394_v38 = vmov %v5775_v38 }
 0x207   : >> { %v1375_v39 = vmov %v5777_v39  ;;  %vm1269_vm8 = vcmp.eq.s32.totalorder %v1268_v33, %v1264_v39  ;;  %vm1348_vm9 = vcmp.eq.s32.totalorder %v1347_v34, %v1343_v39  ;;  %v1395_v44 = vadd.s32 56, %v1394_v38 }
 0x208   : >> { %v1129_v58 = vmul.f32 0.5, %v1128_v57 }
 0x20a   : >> { %v1130_v59 = vsub.f32 1.5, %v1129_v58 }
 0x20c   : >> { %v1131_v61 = vmul.f32 %v5419_v55, %v1130_v59 }
 0x20e   : >> { %v1135_v62 = vsel %vm1134_vm10, %v5419_v55, %v1131_v61  ;;  %vm1380_vm10 = vcmp.eq.s32.totalorder %v1379_v35, %v1375_v39  ;;  %v1391_v39 = vmov %v5777_v39 }
 0x20f   : >> { %1146 = vst [vmem:[%s1145_s3] sm:$0xff] %v1135_v62  ;;  %v1136_v63 = vmul.f32 %v1135_v62, %v1123_v49  ;;  %s1241_s3 = smov [#allocation26] }
 0x211   : >> { %1148 = vst [vmem:[%s1147_s22] sm:$0xff] %v1136_v63  ;;  %s1257_s22 = smov [#allocation26] }
 0x216   : >> { %v1181_v2 = vld [vmem:[%s1180_s0] ss:$0 sm:$0xff]  ;;  %s1289_s0 = smov [#allocation27] }
 0x217   : >> { %v1150_v4 = vld [vmem:[%s1149_s23] ss:$0 sm:$0xff]  ;;  %v1190_v6 = vsel %vm1189_vm11, %v1181_v2, 0.0  ;;  %vm1396_vm11 = vcmp.eq.s32.totalorder %v1395_v44, %v1391_v39  ;;  %s1304_s23 = smov [#allocation27]  ;;  %v1967_v39 = vmov %v5777_v39 }
 0x218   : >> { %v1159_v7 = vsel %vm1158_vm12, %v1150_v4, 0.0  ;;  %v1165_v3 = vld [vmem:[%s1164_s24] ss:$0 sm:$0xff]  ;;  %1191 = vadd.xlane.f32.xlu2 %v1190_v6  ;;  %s1320_s24 = smov [#allocation27]  ;;  %vm2707_vm12 = vcmp.eq.s32.totalorder %v5775_v38, 0 }
 0x219   : >> { %1160 = vadd.xlane.f32.xlu0 %v1159_v7  ;;  %v1174_v9 = vsel %vm1173_vm13, %v1165_v3, 0.0  ;;  %v1213_v11 = vld [vmem:[%s1212_s25] ss:$0 sm:$0xff]  ;;  %s1336_s25 = smov [#allocation27]  ;;  %vm2797_vm13 = vcmp.eq.s32.totalorder %v5775_v38, 7  ;;  %v1970_v38 = vmov %v5775_v38 }
 0x21a   : >> { %1175 = vadd.xlane.f32.xlu1 %v1174_v9  ;;  %v1197_v10 = vld [vmem:[%s1196_s26] ss:$0 sm:$0xff]  ;;  %v1222_v13 = vsel %vm1221_vm14, %v1213_v11, 0.0  ;;  %s1273_s26 = smov [#allocation26]  ;;  %vm1974_vm14 = vcmp.eq.s32.totalorder %v1970_v38, %v1967_v39 }
 0x21b   : >> { %v1229_v12 = vld [vmem:[%s1228_s27] ss:$0 sm:$0xff]  ;;  %v1206_v14 = vsel %vm1205_vm15, %v1197_v10, 0.0  ;;  %s1352_s27 = smov [#allocation27] }
 0x21c   : >> { %v1238_v15 = vsel %vm1237_vm1, %v1229_v12, 0.0  ;;  %v1245_v19 = vld [vmem:[%s1244_s28] ss:$0 sm:$0xff]  ;;  %s1368_s28 = smov [#allocation27] }
 0x21d   : >> { %v1308_v20 = vld [vmem:[%s1307_s29] ss:$0 sm:$0xff]  ;;  %v1254_v22 = vsel %vm1253_vm2, %v1245_v19, 0.0  ;;  %s1384_s29 = smov [#allocation27] }
 0x21e   : >> { %v1292_v21 = vld [vmem:[%s1291_s30] ss:$0 sm:$0xff]  ;;  %v1317_v23 = vsel %vm1316_vm3, %v1308_v20, 0.0  ;;  %s1400_s30 = smov [#allocation27] }
 0x21f   : >> { %v1301_v24 = vsel %vm1300_vm4, %v1292_v21, 0.0  ;;  %v1356_v27 = vld [vmem:[%s1355_s1] ss:$0 sm:$0xff]  ;;  %s1403_s1 = smov [#allocation26] }
 0x220   : >> { %1223 = vadd.xlane.f32.xlu2 %v1222_v13  ;;  %v1277_v28 = vld [vmem:[%s1276_s12] ss:$0 sm:$0xff]  ;;  %v1365_v30 = vsel %vm1364_vm5, %v1356_v27, 0.0  ;;  %s6036_s12 = smov [#allocation15] }
 0x221   : >> { %1207 = vadd.xlane.f32.xlu0 %v1206_v14  ;;  %v1324_v29 = vld [vmem:[%s1323_s13] ss:$0 sm:$0xff]  ;;  %v1286_v31 = vsel %vm1285_vm6, %v1277_v28, 0.0  ;;  %s6038_s13 = smov [#allocation16] }
 0x222   : >> { %1239 = vadd.xlane.f32.xlu1 %v1238_v15  ;;  %v1333_v32 = vsel %vm1332_vm7, %v1324_v29, 0.0  ;;  %v1261_v36 = vld [vmem:[%s1260_s14] ss:$0 sm:$0xff]  ;;  %s6040_s14 = smov [#allocation17] }
 0x223   : >> { %v1340_v37 = vld [vmem:[%s1339_s15] ss:$0 sm:$0xff]  ;;  %v1270_v41 = vsel %vm1269_vm8, %v1261_v36, 0.0  ;;  %s6042_s15 = smov [#allocation18] }
 0x224   : >> { %v1372_v40 = vld [vmem:[%s1371_s16] ss:$0 sm:$0xff]  ;;  %v1349_v42 = vsel %vm1348_vm9, %v1340_v37, 0.0  ;;  %s3027_s16 = smov [#allocation26] }
 0x225   : >> { %v1381_v43 = vsel %vm1380_vm10, %v1372_v40, 0.0  ;;  %v1388_v45 = vld [vmem:[%s1387_s17] ss:$0 sm:$0xff]  ;;  %s6046_s17 = smov [#allocation8] }
 0x226   : >> { %v1397_v46 = vsel %vm1396_vm11, %v1388_v45, 0.0  ;;  %v1411_v0 = vld [vmem:[%s6036_s12] sm:$0xff] }
 0x227   : >> { %v1412_v1 = vld [vmem:[%s6038_s13] sm:$0xff] }
 0x228   : >> { %1318 = vadd.xlane.f32.xlu2 %v1317_v23  ;;  %v1413_v2 = vld [vmem:[%s6040_s14] sm:$0xff] }
 0x229   : >> { %1255 = vadd.xlane.f32.xlu0 %v1254_v22  ;;  %v1414_v4 = vld [vmem:[%s6042_s15] sm:$0xff] }
 0x22a   : >> { %1302 = vadd.xlane.f32.xlu1 %v1301_v24  ;;  %v3035_v60 = vld [vmem:[%s6046_s17] sm:$0xff] }
 0x230   : >> { %1366 = vadd.xlane.f32.xlu2 %v1365_v30 }
 0x231   : >> { %1287 = vadd.xlane.f32.xlu0 %v1286_v31 }
 0x232   : >> { %1334 = vadd.xlane.f32.xlu1 %v1333_v32 }
 0x238   : >> { %1271 = vadd.xlane.f32.xlu2 %v1270_v41 }
 0x239   : >> { %1350 = vadd.xlane.f32.xlu0 %v1349_v42 }
 0x23a   : >> { %1382 = vadd.xlane.f32.xlu1 %v1381_v43 }
 0x241   : >> { %1398 = vadd.xlane.f32.xlu0 %v1397_v46 }
 0x28b   : >> { %v1192_v47 = vpop.xlane.xlu2 %1191 }
 0x28c   : >> { %v1161_v48 = vpop.xlane.xlu0 %1160 }
 0x28d   : >> { %1163 = vst [vmem:[%s1162_s2] sm:$0xff] %v1161_v48  ;;  %v1176_v49 = vpop.xlane.xlu1 %1175  ;;  %s6048_s2 = smov [#allocation10] }
 0x28e   : >> { %4575 = vst [vmem:[%s1177_s18 + $0x8] sm:$0xff] %v1176_v49  ;;  %s1405_s18 = smov [#allocation27]  ;;  %v3036_v6 = vld [vmem:[%s6048_s2] sm:$0xff] }
 0x28f   : >> { %4576 = vst [vmem:[%s1193_s19 + $0x10] sm:$0xff] %v1192_v47  ;;  %s6052_s19 = smov [#allocation12] }
 0x290   : >> { %v3037_v16 = vld [vmem:[%s6052_s19] sm:$0xff] }
 0x293   : >> { %v1224_v50 = vpop.xlane.xlu2 %1223 }
 0x294   : >> { %v1208_v51 = vpop.xlane.xlu0 %1207 }
 0x295   : >> { %4577 = vst [vmem:[%s1209_s20 + $0x18] sm:$0xff] %v1208_v51  ;;  %v1240_v52 = vpop.xlane.xlu1 %1239  ;;  %s3029_s20 = smov [#allocation27] }
 0x296   : >> { %4578 = vst [vmem:[%s1225_s21 + $0x20] sm:$0xff] %v1224_v50  ;;  %s6056_s21 = smov [#allocation13] }
 0x297   : >> { %4579 = vst [vmem:[%s1241_s3 + $0x28] sm:$0xff] %v1240_v52  ;;  %v3038_v20 = vld [vmem:[%s6056_s21] sm:$0xff]  ;;  %s1431_s3 = smov [#allocation26] }
 0x29b   : >> { %v1319_v54 = vpop.xlane.xlu2 %1318 }
 0x29c   : >> { %v1256_v53 = vpop.xlane.xlu0 %1255 }
 0x29d   : >> { %4580 = vst [vmem:[%s1257_s22 + $0x30] sm:$0xff] %v1256_v53  ;;  %v1303_v55 = vpop.xlane.xlu1 %1302  ;;  %s6064_s22 = smov [#allocation15] }
 0x2a3   : >> { %v1367_v56 = vpop.xlane.xlu2 %1366 }
 0x2a4   : >> { %v1288_v57 = vpop.xlane.xlu0 %1287 }
 0x2a5   : >> { %1290 = vst [vmem:[%s1289_s0] sm:$0xff] %v1288_v57  ;;  %v1335_v58 = vpop.xlane.xlu1 %1334  ;;  %s1434_s0 = smov [#allocation27] }
 0x2a6   : >> { %4582 = vst [vmem:[%s1304_s23 + $0x8] sm:$0xff] %v1303_v55  ;;  %s6067_s23 = smov [#allocation16] }
 0x2a7   : >> { %4583 = vst [vmem:[%s1320_s24 + $0x10] sm:$0xff] %v1319_v54  ;;  %s6070_s24 = smov [#allocation17] }
 0x2a8   : >> { %4584 = vst [vmem:[%s1336_s25 + $0x18] sm:$0xff] %v1335_v58  ;;  %s6073_s25 = smov [#allocation18] }
 0x2ab   : >> { %v1272_v59 = vpop.xlane.xlu2 %1271 }
 0x2ac   : >> { %v1351_v61 = vpop.xlane.xlu0 %1350  ;;  %4581 = vst [vmem:[%s1273_s26 + $0x38] sm:$0xff] %v1272_v59  ;;  %s3055_s26 = smov [#allocation26] }
 0x2ad   : >> { %v1383_v62 = vpop.xlane.xlu1 %1382  ;;  %4585 = vst [vmem:[%s1352_s27 + $0x20] sm:$0xff] %v1351_v61  ;;  %s3058_s27 = smov [#allocation27] }
 0x2ae   : >> { %4586 = vst [vmem:[%s1368_s28 + $0x28] sm:$0xff] %v1367_v56  ;;  %s6077_s28 = smov [#allocation8] }
 0x2af   : >> { %4587 = vst [vmem:[%s1384_s29 + $0x30] sm:$0xff] %v1383_v62  ;;  %s6080_s29 = smov [#allocation10] }
 0x2b3   : >> { %v1404_v5 = vld [vmem:[%s1403_s1] sm:$0xff]  ;;  %v4589_v35 = vld [vmem:[%s1431_s3 + $0x8] sm:$0xff]  ;;  %s6086_s1 = smov [#allocation13]  ;;  %s6118_s3 = smov [#allocation13] }
 0x2b4   : >> { %v1399_v63 = vpop.xlane.xlu0 %1398  ;;  %v3028_v7 = vld [vmem:[%s3027_s16] sm:$0xff]  ;;  %v1415_v3 = vmul.f32 %v1411_v0, %v1404_v5  ;;  %v1418_v8 = vmul.f32 %v1412_v1, %v1404_v5  ;;  %v1422_v9 = vmul.f32 %v1413_v2, %v1404_v5  ;;  %v1425_v11 = vmul.f32 %v1414_v4, %v1404_v5  ;;  %v4947_v49 = vld [vmem:[%s3055_s26 + $0x8] sm:$0xff]  ;;  %s6102_s16 = smov [#allocation17]  ;;  %s6137_s26 = smov [#allocation18] }
 0x2b5   : >> { %4588 = vst [vmem:[%s1400_s30 + $0x38] sm:$0xff] %v1399_v63  ;;  %v3039_v17 = vmul.f32 %v3035_v60, %v3028_v7  ;;  %v3042_v18 = vmul.f32 %v3036_v6, %v3028_v7  ;;  %v3046_v29 = vmul.f32 %v3037_v16, %v3028_v7  ;;  %v3049_v30 = vmul.f32 %v3038_v20, %v3028_v7  ;;  %s6083_s30 = smov [#allocation12] }
 0x2bc   : >> { %v1406_v10 = vld [vmem:[%s1405_s18] sm:$0xff]  ;;  %v4590_v36 = vld [vmem:[%s1434_s0 + $0x8] sm:$0xff]  ;;  %s3092_s18 = smov [#allocation27]  ;;  %s6128_s0 = smov [#allocation15] }
 0x2bd   : >> { %v1416_v12 = vmul.f32 %v1413_v2, %v1406_v10  ;;  %v1419_v13 = vmul.f32 %v1414_v4, %v1406_v10  ;;  %v1421_v14 = vmul.f32 %v1411_v0, %v1406_v10  ;;  %v1424_v15 = vmul.f32 %v1412_v1, %v1406_v10  ;;  %v3030_v19 = vld [vmem:[%s3029_s20] sm:$0xff]  ;;  %v4948_v52 = vld [vmem:[%s3058_s27 + $0x8] sm:$0xff]  ;;  %s6112_s20 = smov [#allocation10]  ;;  %s3123_s27 = smov [#allocation26] }
 0x2be   : >> { %v3040_v25 = vmul.f32 %v3037_v16, %v3030_v19  ;;  %v3043_v26 = vmul.f32 %v3038_v20, %v3030_v19  ;;  %v3045_v27 = vmul.f32 %v3035_v60, %v3030_v19  ;;  %v3048_v28 = vmul.f32 %v3036_v6, %v3030_v19 }
 0x2bf   : >> { %v1417_v21 = vsub.f32 %v1415_v3, %v1416_v12  ;;  %v1420_v22 = vsub.f32 %v1418_v8, %v1419_v13  ;;  %v1423_v23 = vadd.f32 %v1422_v9, %v1421_v14  ;;  %v1426_v24 = vadd.f32 %v1425_v11, %v1424_v15 }
 0x2c0   : >> { %v3041_v31 = vsub.f32 %v3039_v17, %v3040_v25  ;;  %v3044_v32 = vsub.f32 %v3042_v18, %v3043_v26  ;;  %v3047_v33 = vadd.f32 %v3046_v29, %v3045_v27  ;;  %v3050_v34 = vadd.f32 %v3049_v30, %v3048_v28 }
 0x2c1   : >> { %1427 = vst [vmem:[%s6036_s12] sm:$0xff] %v1417_v21  ;;  %s1465_s12 = smov [#allocation26] }
 0x2c2   : >> { %1428 = vst [vmem:[%s6038_s13] sm:$0xff] %v1420_v22  ;;  %s6096_s13 = smov [#allocation15]  ;;  %v4599_v9 = vld [vmem:[%s1465_s12 + $0x10] sm:$0xff]  ;;  %s6150_s12 = smov [#allocation13] }
 0x2c3   : >> { %1429 = vst [vmem:[%s6040_s14] sm:$0xff] %v1423_v23  ;;  %s1468_s14 = smov [#allocation27] }
 0x2c4   : >> { %1430 = vst [vmem:[%s6042_s15] sm:$0xff] %v1426_v24  ;;  %s6099_s15 = smov [#allocation16]  ;;  %v4600_v11 = vld [vmem:[%s1468_s14 + $0x10] sm:$0xff]  ;;  %s6160_s14 = smov [#allocation15] }
 0x2c5   : >> { %3051 = vst [vmem:[%s6046_s17] sm:$0xff] %v3041_v31  ;;  %s6105_s17 = smov [#allocation18]  ;;  %v4958_v24 = vld [vmem:[%s3092_s18 + $0x10] sm:$0xff]  ;;  %s3157_s18 = smov [#allocation26] }
 0x2c6   : >> { %3052 = vst [vmem:[%s6048_s2] sm:$0xff] %v3044_v32  ;;  %s3089_s2 = smov [#allocation26] }
 0x2c7   : >> { %3053 = vst [vmem:[%s6052_s19] sm:$0xff] %v3047_v33  ;;  %s6109_s19 = smov [#allocation8]  ;;  %v4957_v21 = vld [vmem:[%s3089_s2 + $0x10] sm:$0xff]  ;;  %s6169_s2 = smov [#allocation18] }
 0x2c8   : >> { %v4591_v37 = vld [vmem:[%s6064_s22 + $0x8] sm:$0xff]  ;;  %3054 = vst [vmem:[%s6056_s21] sm:$0xff] %v3050_v34  ;;  %s6115_s21 = smov [#allocation12] }
 0x2c9   : >> { %v4592_v40 = vld [vmem:[%s6067_s23 + $0x8] sm:$0xff]  ;;  %v1449_v41 = vmul.f32 %v4591_v37, %v4589_v35  ;;  %v1455_v42 = vmul.f32 %v4591_v37, %v4590_v36 }
 0x2ca   : >> { %v4593_v43 = vld [vmem:[%s6070_s24 + $0x8] sm:$0xff]  ;;  %v1452_v44 = vmul.f32 %v4592_v40, %v4589_v35  ;;  %v1458_v45 = vmul.f32 %v4592_v40, %v4590_v36 }
 0x2cb   : >> { %v4594_v46 = vld [vmem:[%s6073_s25 + $0x8] sm:$0xff]  ;;  %v1450_v47 = vmul.f32 %v4593_v43, %v4590_v36  ;;  %v1456_v48 = vmul.f32 %v4593_v43, %v4589_v35 }
 0x2cc   : >> { %v1453_v50 = vmul.f32 %v4594_v46, %v4590_v36  ;;  %v1459_v51 = vmul.f32 %v4594_v46, %v4589_v35  ;;  %v4949_v53 = vld [vmem:[%s6077_s28 + $0x8] sm:$0xff] }
 0x2cd   : >> { %v1451_v54 = vsub.f32 %v1449_v41, %v1450_v47  ;;  %v1457_v55 = vadd.f32 %v1456_v48, %v1455_v42  ;;  %v4950_v56 = vld [vmem:[%s6080_s29 + $0x8] sm:$0xff]  ;;  %v3073_v57 = vmul.f32 %v4949_v53, %v4947_v49  ;;  %v3079_v58 = vmul.f32 %v4949_v53, %v4948_v52 }
 0x2ce   : >> { %v1454_v59 = vsub.f32 %v1452_v44, %v1453_v50  ;;  %v1460_v61 = vadd.f32 %v1459_v51, %v1458_v45  ;;  %v4951_v62 = vld [vmem:[%s6083_s30 + $0x8] sm:$0xff]  ;;  %v3076_v63 = vmul.f32 %v4950_v56, %v4947_v49  ;;  %v3082_v0 = vmul.f32 %v4950_v56, %v4948_v52 }
 0x2cf   : >> { %4595 = vst [vmem:[%s6064_s22 + $0x8] sm:$0xff] %v1451_v54  ;;  %v4952_v1 = vld [vmem:[%s6086_s1 + $0x8] sm:$0xff]  ;;  %v3074_v2 = vmul.f32 %v4951_v62, %v4948_v52  ;;  %v3080_v4 = vmul.f32 %v4951_v62, %v4947_v49  ;;  %s1499_s22 = smov [#allocation26] }
 0x2d0   : >> { %4596 = vst [vmem:[%s6067_s23 + $0x8] sm:$0xff] %v1454_v59  ;;  %v3077_v5 = vmul.f32 %v4952_v1, %v4948_v52  ;;  %v3083_v60 = vmul.f32 %v4952_v1, %v4947_v49  ;;  %s1502_s23 = smov [#allocation27]  ;;  %v4609_v47 = vld [vmem:[%s1499_s22 + $0x18] sm:$0xff]  ;;  %s6182_s22 = smov [#allocation13] }
 0x2d1   : >> { %4597 = vst [vmem:[%s6070_s24 + $0x8] sm:$0xff] %v1457_v55  ;;  %v3075_v6 = vsub.f32 %v3073_v57, %v3074_v2  ;;  %v3081_v7 = vadd.f32 %v3080_v4, %v3079_v58  ;;  %s6131_s24 = smov [#allocation16]  ;;  %v4610_v48 = vld [vmem:[%s1502_s23 + $0x18] sm:$0xff]  ;;  %s6192_s23 = smov [#allocation15] }
 0x2d2   : >> { %4598 = vst [vmem:[%s6073_s25 + $0x8] sm:$0xff] %v1460_v61  ;;  %v3078_v3 = vsub.f32 %v3076_v63, %v3077_v5  ;;  %v3084_v8 = vadd.f32 %v3083_v60, %v3082_v0  ;;  %s6134_s25 = smov [#allocation17]  ;;  %v4967_v59 = vld [vmem:[%s3123_s27 + $0x18] sm:$0xff]  ;;  %s6201_s27 = smov [#allocation18] }
 0x2d3   : >> { %4953 = vst [vmem:[%s6077_s28 + $0x8] sm:$0xff] %v3075_v6  ;;  %s3126_s28 = smov [#allocation27] }
 0x2d4   : >> { %4954 = vst [vmem:[%s6080_s29 + $0x8] sm:$0xff] %v3078_v3  ;;  %s6141_s29 = smov [#allocation8]  ;;  %v4968_v63 = vld [vmem:[%s3126_s28 + $0x18] sm:$0xff]  ;;  %s3191_s28 = smov [#allocation26] }
 0x2d5   : >> { %4955 = vst [vmem:[%s6083_s30 + $0x8] sm:$0xff] %v3081_v7  ;;  %s6144_s30 = smov [#allocation10] }
 0x2d6   : >> { %v4601_v10 = vld [vmem:[%s6096_s13 + $0x10] sm:$0xff]  ;;  %4956 = vst [vmem:[%s6086_s1 + $0x8] sm:$0xff] %v3084_v8  ;;  %s6147_s1 = smov [#allocation12] }
 0x2d7   : >> { %v4602_v12 = vld [vmem:[%s6099_s15 + $0x10] sm:$0xff]  ;;  %v1483_v13 = vmul.f32 %v4601_v10, %v4599_v9  ;;  %v1489_v14 = vmul.f32 %v4601_v10, %v4600_v11 }
 0x2d8   : >> { %v4603_v15 = vld [vmem:[%s6102_s16 + $0x10] sm:$0xff]  ;;  %v1486_v16 = vmul.f32 %v4602_v12, %v4599_v9  ;;  %v1492_v17 = vmul.f32 %v4602_v12, %v4600_v11 }
 0x2d9   : >> { %v4604_v18 = vld [vmem:[%s6105_s17 + $0x10] sm:$0xff]  ;;  %v1484_v19 = vmul.f32 %v4603_v15, %v4600_v11  ;;  %v1490_v20 = vmul.f32 %v4603_v15, %v4599_v9 }
 0x2da   : >> { %v1487_v22 = vmul.f32 %v4604_v18, %v4600_v11  ;;  %v1493_v23 = vmul.f32 %v4604_v18, %v4599_v9  ;;  %v4959_v25 = vld [vmem:[%s6109_s19 + $0x10] sm:$0xff] }
 0x2db   : >> { %v1485_v26 = vsub.f32 %v1483_v13, %v1484_v19  ;;  %v1491_v27 = vadd.f32 %v1490_v20, %v1489_v14  ;;  %v4960_v28 = vld [vmem:[%s6112_s20 + $0x10] sm:$0xff]  ;;  %v3107_v29 = vmul.f32 %v4959_v25, %v4957_v21  ;;  %v3113_v30 = vmul.f32 %v4959_v25, %v4958_v24 }
 0x2dc   : >> { %v1488_v31 = vsub.f32 %v1486_v16, %v1487_v22  ;;  %v1494_v32 = vadd.f32 %v1493_v23, %v1492_v17  ;;  %v4961_v33 = vld [vmem:[%s6115_s21 + $0x10] sm:$0xff]  ;;  %v3110_v34 = vmul.f32 %v4960_v28, %v4957_v21  ;;  %v3116_v35 = vmul.f32 %v4960_v28, %v4958_v24 }
 0x2dd   : >> { %4605 = vst [vmem:[%s6096_s13 + $0x10] sm:$0xff] %v1485_v26  ;;  %v4962_v36 = vld [vmem:[%s6118_s3 + $0x10] sm:$0xff]  ;;  %v3108_v37 = vmul.f32 %v4961_v33, %v4958_v24  ;;  %v3114_v40 = vmul.f32 %v4961_v33, %v4957_v21  ;;  %s1533_s13 = smov [#allocation26] }
 0x2de   : >> { %4606 = vst [vmem:[%s6099_s15 + $0x10] sm:$0xff] %v1488_v31  ;;  %v3111_v41 = vmul.f32 %v4962_v36, %v4958_v24  ;;  %v3117_v42 = vmul.f32 %v4962_v36, %v4957_v21  ;;  %s1536_s15 = smov [#allocation27]  ;;  %v4619_v19 = vld [vmem:[%s1533_s13 + $0x20] sm:$0xff]  ;;  %s6214_s13 = smov [#allocation13] }
 0x2df   : >> { %4607 = vst [vmem:[%s6102_s16 + $0x10] sm:$0xff] %v1491_v27  ;;  %v3109_v43 = vsub.f32 %v3107_v29, %v3108_v37  ;;  %v3115_v44 = vadd.f32 %v3114_v40, %v3113_v30  ;;  %s6163_s16 = smov [#allocation16]  ;;  %v4620_v20 = vld [vmem:[%s1536_s15 + $0x20] sm:$0xff]  ;;  %s6224_s15 = smov [#allocation15] }
 0x2e0   : >> { %4608 = vst [vmem:[%s6105_s17 + $0x10] sm:$0xff] %v1494_v32  ;;  %v3112_v45 = vsub.f32 %v3110_v34, %v3111_v41  ;;  %v3118_v46 = vadd.f32 %v3117_v42, %v3116_v35  ;;  %s6166_s17 = smov [#allocation17]  ;;  %v4977_v31 = vld [vmem:[%s3157_s18 + $0x20] sm:$0xff]  ;;  %s6233_s18 = smov [#allocation18] }
 0x2e1   : >> { %4963 = vst [vmem:[%s6109_s19 + $0x10] sm:$0xff] %v3109_v43  ;;  %s3160_s19 = smov [#allocation27] }
 0x2e2   : >> { %4964 = vst [vmem:[%s6112_s20 + $0x10] sm:$0xff] %v3112_v45  ;;  %s6173_s20 = smov [#allocation8]  ;;  %v4978_v34 = vld [vmem:[%s3160_s19 + $0x20] sm:$0xff]  ;;  %s3225_s19 = smov [#allocation26] }
 0x2e3   : >> { %4965 = vst [vmem:[%s6115_s21 + $0x10] sm:$0xff] %v3115_v44  ;;  %s6176_s21 = smov [#allocation10] }
 0x2e4   : >> { %v4611_v49 = vld [vmem:[%s6128_s0 + $0x18] sm:$0xff]  ;;  %4966 = vst [vmem:[%s6118_s3 + $0x10] sm:$0xff] %v3118_v46  ;;  %s6179_s3 = smov [#allocation12] }
 0x2e5   : >> { %v4612_v50 = vld [vmem:[%s6131_s24 + $0x18] sm:$0xff]  ;;  %v1517_v51 = vmul.f32 %v4611_v49, %v4609_v47  ;;  %v1523_v52 = vmul.f32 %v4611_v49, %v4610_v48 }
 0x2e6   : >> { %v4613_v53 = vld [vmem:[%s6134_s25 + $0x18] sm:$0xff]  ;;  %v1520_v54 = vmul.f32 %v4612_v50, %v4609_v47  ;;  %v1526_v55 = vmul.f32 %v4612_v50, %v4610_v48 }
 0x2e7   : >> { %v4614_v56 = vld [vmem:[%s6137_s26 + $0x18] sm:$0xff]  ;;  %v1518_v57 = vmul.f32 %v4613_v53, %v4610_v48  ;;  %v1524_v58 = vmul.f32 %v4613_v53, %v4609_v47 }
 0x2e8   : >> { %v1521_v61 = vmul.f32 %v4614_v56, %v4610_v48  ;;  %v1527_v62 = vmul.f32 %v4614_v56, %v4609_v47  ;;  %v4969_v0 = vld [vmem:[%s6141_s29 + $0x18] sm:$0xff] }
 0x2e9   : >> { %v1519_v1 = vsub.f32 %v1517_v51, %v1518_v57  ;;  %v1525_v2 = vadd.f32 %v1524_v58, %v1523_v52  ;;  %v4970_v4 = vld [vmem:[%s6144_s30 + $0x18] sm:$0xff]  ;;  %v3141_v5 = vmul.f32 %v4969_v0, %v4967_v59  ;;  %v3147_v60 = vmul.f32 %v4969_v0, %v4968_v63 }
 0x2ea   : >> { %v1522_v6 = vsub.f32 %v1520_v54, %v1521_v61  ;;  %v1528_v7 = vadd.f32 %v1527_v62, %v1526_v55  ;;  %v4971_v3 = vld [vmem:[%s6147_s1 + $0x18] sm:$0xff]  ;;  %v3144_v8 = vmul.f32 %v4970_v4, %v4967_v59  ;;  %v3150_v9 = vmul.f32 %v4970_v4, %v4968_v63 }
 0x2eb   : >> { %4615 = vst [vmem:[%s6128_s0 + $0x18] sm:$0xff] %v1519_v1  ;;  %v4972_v11 = vld [vmem:[%s6150_s12 + $0x18] sm:$0xff]  ;;  %v3142_v10 = vmul.f32 %v4971_v3, %v4968_v63  ;;  %v3148_v12 = vmul.f32 %v4971_v3, %v4967_v59  ;;  %s1567_s0 = smov [#allocation26] }
 0x2ec   : >> { %4616 = vst [vmem:[%s6131_s24 + $0x18] sm:$0xff] %v1522_v6  ;;  %v3145_v13 = vmul.f32 %v4972_v11, %v4968_v63  ;;  %v3151_v14 = vmul.f32 %v4972_v11, %v4967_v59  ;;  %s1570_s24 = smov [#allocation27]  ;;  %v4629_v57 = vld [vmem:[%s1567_s0 + $0x28] sm:$0xff]  ;;  %s6246_s0 = smov [#allocation13] }
 0x2ed   : >> { %4617 = vst [vmem:[%s6134_s25 + $0x18] sm:$0xff] %v1525_v2  ;;  %v3143_v15 = vsub.f32 %v3141_v5, %v3142_v10  ;;  %v3149_v16 = vadd.f32 %v3148_v12, %v3147_v60  ;;  %s6195_s25 = smov [#allocation16]  ;;  %v4630_v58 = vld [vmem:[%s1570_s24 + $0x28] sm:$0xff]  ;;  %s6256_s24 = smov [#allocation15] }
 0x2ee   : >> { %4618 = vst [vmem:[%s6137_s26 + $0x18] sm:$0xff] %v1528_v7  ;;  %v3146_v17 = vsub.f32 %v3144_v8, %v3145_v13  ;;  %v3152_v18 = vadd.f32 %v3151_v14, %v3150_v9  ;;  %s6198_s26 = smov [#allocation17]  ;;  %v4987_v6 = vld [vmem:[%s3191_s28 + $0x28] sm:$0xff]  ;;  %s6265_s28 = smov [#allocation18] }
 0x2ef   : >> { %4973 = vst [vmem:[%s6141_s29 + $0x18] sm:$0xff] %v3143_v15  ;;  %s3194_s29 = smov [#allocation27] }
 0x2f0   : >> { %4974 = vst [vmem:[%s6144_s30 + $0x18] sm:$0xff] %v3146_v17  ;;  %s6205_s30 = smov [#allocation8]  ;;  %v4988_v8 = vld [vmem:[%s3194_s29 + $0x28] sm:$0xff]  ;;  %s3259_s29 = smov [#allocation26] }
 0x2f1   : >> { %4975 = vst [vmem:[%s6147_s1 + $0x18] sm:$0xff] %v3149_v16  ;;  %s6208_s1 = smov [#allocation10] }
 0x2f2   : >> { %v4621_v21 = vld [vmem:[%s6160_s14 + $0x20] sm:$0xff]  ;;  %4976 = vst [vmem:[%s6150_s12 + $0x18] sm:$0xff] %v3152_v18  ;;  %s6211_s12 = smov [#allocation12] }
 0x2f3   : >> { %v4622_v22 = vld [vmem:[%s6163_s16 + $0x20] sm:$0xff]  ;;  %v1551_v23 = vmul.f32 %v4621_v21, %v4619_v19  ;;  %v1557_v24 = vmul.f32 %v4621_v21, %v4620_v20 }
 0x2f4   : >> { %v4623_v25 = vld [vmem:[%s6166_s17 + $0x20] sm:$0xff]  ;;  %v1554_v26 = vmul.f32 %v4622_v22, %v4619_v19  ;;  %v1560_v27 = vmul.f32 %v4622_v22, %v4620_v20 }
 0x2f5   : >> { %v4624_v28 = vld [vmem:[%s6169_s2 + $0x20] sm:$0xff]  ;;  %v1552_v29 = vmul.f32 %v4623_v25, %v4620_v20  ;;  %v1558_v30 = vmul.f32 %v4623_v25, %v4619_v19 }
 0x2f6   : >> { %v1555_v32 = vmul.f32 %v4624_v28, %v4620_v20  ;;  %v1561_v33 = vmul.f32 %v4624_v28, %v4619_v19  ;;  %v4979_v35 = vld [vmem:[%s6173_s20 + $0x20] sm:$0xff] }
 0x2f7   : >> { %v1553_v36 = vsub.f32 %v1551_v23, %v1552_v29  ;;  %v1559_v37 = vadd.f32 %v1558_v30, %v1557_v24  ;;  %v4980_v40 = vld [vmem:[%s6176_s21 + $0x20] sm:$0xff]  ;;  %v3175_v41 = vmul.f32 %v4979_v35, %v4977_v31  ;;  %v3181_v42 = vmul.f32 %v4979_v35, %v4978_v34 }
 0x2f8   : >> { %v1556_v43 = vsub.f32 %v1554_v26, %v1555_v32  ;;  %v1562_v44 = vadd.f32 %v1561_v33, %v1560_v27  ;;  %v4981_v45 = vld [vmem:[%s6179_s3 + $0x20] sm:$0xff]  ;;  %v3178_v46 = vmul.f32 %v4980_v40, %v4977_v31  ;;  %v3184_v47 = vmul.f32 %v4980_v40, %v4978_v34 }
 0x2f9   : >> { %4625 = vst [vmem:[%s6160_s14 + $0x20] sm:$0xff] %v1553_v36  ;;  %v4982_v48 = vld [vmem:[%s6182_s22 + $0x20] sm:$0xff]  ;;  %v3176_v49 = vmul.f32 %v4981_v45, %v4978_v34  ;;  %v3182_v50 = vmul.f32 %v4981_v45, %v4977_v31  ;;  %s1601_s14 = smov [#allocation26] }
 0x2fa   : >> { %4626 = vst [vmem:[%s6163_s16 + $0x20] sm:$0xff] %v1556_v43  ;;  %v3179_v51 = vmul.f32 %v4982_v48, %v4978_v34  ;;  %v3185_v52 = vmul.f32 %v4982_v48, %v4977_v31  ;;  %s1604_s16 = smov [#allocation27]  ;;  %v4639_v29 = vld [vmem:[%s1601_s14 + $0x30] sm:$0xff]  ;;  %s6278_s14 = smov [#allocation13] }
 0x2fb   : >> { %4627 = vst [vmem:[%s6166_s17 + $0x20] sm:$0xff] %v1559_v37  ;;  %v3177_v53 = vsub.f32 %v3175_v41, %v3176_v49  ;;  %v3183_v54 = vadd.f32 %v3182_v50, %v3181_v42  ;;  %s6227_s17 = smov [#allocation16]  ;;  %v4640_v30 = vld [vmem:[%s1604_s16 + $0x30] sm:$0xff]  ;;  %s6316_s16 = smov [#allocation12] }
 0x2fc   : >> { %4628 = vst [vmem:[%s6169_s2 + $0x20] sm:$0xff] %v1562_v44  ;;  %v3180_v55 = vsub.f32 %v3178_v46, %v3179_v51  ;;  %v3186_v56 = vadd.f32 %v3185_v52, %v3184_v47  ;;  %s6230_s2 = smov [#allocation17]  ;;  %v4997_v43 = vld [vmem:[%s3225_s19 + $0x30] sm:$0xff]  ;;  %s6390_s19 = smov [#allocation13] }
 0x2fd   : >> { %4983 = vst [vmem:[%s6173_s20 + $0x20] sm:$0xff] %v3177_v53  ;;  %s3228_s20 = smov [#allocation27] }
 0x2fe   : >> { %4984 = vst [vmem:[%s6176_s21 + $0x20] sm:$0xff] %v3180_v55  ;;  %s6237_s21 = smov [#allocation8]  ;;  %v4998_v46 = vld [vmem:[%s3228_s20 + $0x30] sm:$0xff]  ;;  %s6414_s20 = smov [#allocation15] }
 0x2ff   : >> { %4985 = vst [vmem:[%s6179_s3 + $0x20] sm:$0xff] %v3183_v54  ;;  %s6240_s3 = smov [#allocation10] }
 0x300   : >> { %v4631_v59 = vld [vmem:[%s6192_s23 + $0x28] sm:$0xff]  ;;  %4986 = vst [vmem:[%s6182_s22 + $0x20] sm:$0xff] %v3186_v56  ;;  %s6243_s22 = smov [#allocation12] }
 0x301   : >> { %v4632_v61 = vld [vmem:[%s6195_s25 + $0x28] sm:$0xff]  ;;  %v1585_v62 = vmul.f32 %v4631_v59, %v4629_v57  ;;  %v1591_v63 = vmul.f32 %v4631_v59, %v4630_v58 }
 0x302   : >> { %v4633_v0 = vld [vmem:[%s6198_s26 + $0x28] sm:$0xff]  ;;  %v1588_v1 = vmul.f32 %v4632_v61, %v4629_v57  ;;  %v1594_v2 = vmul.f32 %v4632_v61, %v4630_v58 }
 0x303   : >> { %v4634_v4 = vld [vmem:[%s6201_s27 + $0x28] sm:$0xff]  ;;  %v1586_v5 = vmul.f32 %v4633_v0, %v4630_v58  ;;  %v1592_v60 = vmul.f32 %v4633_v0, %v4629_v57 }
 0x304   : >> { %v1589_v7 = vmul.f32 %v4634_v4, %v4630_v58  ;;  %v1595_v3 = vmul.f32 %v4634_v4, %v4629_v57  ;;  %v4989_v9 = vld [vmem:[%s6205_s30 + $0x28] sm:$0xff] }
 0x305   : >> { %v1587_v11 = vsub.f32 %v1585_v62, %v1586_v5  ;;  %v1593_v10 = vadd.f32 %v1592_v60, %v1591_v63  ;;  %v4990_v12 = vld [vmem:[%s6208_s1 + $0x28] sm:$0xff]  ;;  %v3209_v13 = vmul.f32 %v4989_v9, %v4987_v6  ;;  %v3215_v14 = vmul.f32 %v4989_v9, %v4988_v8 }
 0x306   : >> { %v1590_v15 = vsub.f32 %v1588_v1, %v1589_v7  ;;  %v1596_v16 = vadd.f32 %v1595_v3, %v1594_v2  ;;  %v4991_v17 = vld [vmem:[%s6211_s12 + $0x28] sm:$0xff]  ;;  %v3212_v18 = vmul.f32 %v4990_v12, %v4987_v6  ;;  %v3218_v19 = vmul.f32 %v4990_v12, %v4988_v8 }
 0x307   : >> { %4635 = vst [vmem:[%s6192_s23 + $0x28] sm:$0xff] %v1587_v11  ;;  %v4992_v20 = vld [vmem:[%s6214_s13 + $0x28] sm:$0xff]  ;;  %v3210_v21 = vmul.f32 %v4991_v17, %v4988_v8  ;;  %v3216_v22 = vmul.f32 %v4991_v17, %v4987_v6  ;;  %s1635_s23 = smov [#allocation26] }
 0x308   : >> { %4636 = vst [vmem:[%s6195_s25 + $0x28] sm:$0xff] %v1590_v15  ;;  %v3213_v23 = vmul.f32 %v4992_v20, %v4988_v8  ;;  %v3219_v24 = vmul.f32 %v4992_v20, %v4987_v6  ;;  %s1638_s25 = smov [#allocation27]  ;;  %v4649_v5 = vld [vmem:[%s1635_s23 + $0x38] sm:$0xff]  ;;  %s1699_s23 = smov [#allocation16] }
 0x309   : >> { %4637 = vst [vmem:[%s6198_s26 + $0x28] sm:$0xff] %v1593_v10  ;;  %v3211_v25 = vsub.f32 %v3209_v13, %v3210_v21  ;;  %v3217_v26 = vadd.f32 %v3216_v22, %v3215_v14  ;;  %s6259_s26 = smov [#allocation16]  ;;  %v4650_v60 = vld [vmem:[%s1638_s25 + $0x38] sm:$0xff]  ;;  %s1703_s25 = smov [#allocation18] }
 0x30a   : >> { %4638 = vst [vmem:[%s6201_s27 + $0x28] sm:$0xff] %v1596_v16  ;;  %v3214_v27 = vsub.f32 %v3212_v18, %v3213_v23  ;;  %v3220_v28 = vadd.f32 %v3219_v24, %v3218_v19  ;;  %s6262_s27 = smov [#allocation17]  ;;  %v5007_v15 = vld [vmem:[%s3259_s29 + $0x38] sm:$0xff]  ;;  %s1731_s29 = smov [#allocation18] }
 0x30b   : >> { %4993 = vst [vmem:[%s6205_s30 + $0x28] sm:$0xff] %v3211_v25  ;;  %s3262_s30 = smov [#allocation27] }
 0x30c   : >> { %4994 = vst [vmem:[%s6208_s1 + $0x28] sm:$0xff] %v3214_v27  ;;  %s6269_s1 = smov [#allocation8]  ;;  %v5008_v18 = vld [vmem:[%s3262_s30 + $0x38] sm:$0xff]  ;;  %s1753_s30 = smov [#allocation15] }
 0x30d   : >> { %4995 = vst [vmem:[%s6211_s12 + $0x28] sm:$0xff] %v3217_v26  ;;  %s6272_s12 = smov [#allocation10] }
 0x30e   : >> { %v4641_v31 = vld [vmem:[%s6224_s15 + $0x30] sm:$0xff]  ;;  %4996 = vst [vmem:[%s6214_s13 + $0x28] sm:$0xff] %v3220_v28  ;;  %s6275_s13 = smov [#allocation12] }
 0x30f   : >> { %v4642_v32 = vld [vmem:[%s6227_s17 + $0x30] sm:$0xff]  ;;  %v1619_v33 = vmul.f32 %v4641_v31, %v4639_v29  ;;  %v1625_v34 = vmul.f32 %v4641_v31, %v4640_v30 }
 0x310   : >> { %v4643_v35 = vld [vmem:[%s6230_s2 + $0x30] sm:$0xff]  ;;  %v1622_v36 = vmul.f32 %v4642_v32, %v4639_v29  ;;  %v1628_v37 = vmul.f32 %v4642_v32, %v4640_v30 }
 0x311   : >> { %v4644_v40 = vld [vmem:[%s6233_s18 + $0x30] sm:$0xff]  ;;  %v1620_v41 = vmul.f32 %v4643_v35, %v4640_v30  ;;  %v1626_v42 = vmul.f32 %v4643_v35, %v4639_v29 }
 0x312   : >> { %v1623_v44 = vmul.f32 %v4644_v40, %v4640_v30  ;;  %v1629_v45 = vmul.f32 %v4644_v40, %v4639_v29  ;;  %v4999_v47 = vld [vmem:[%s6237_s21 + $0x30] sm:$0xff] }
 0x313   : >> { %v1621_v48 = vsub.f32 %v1619_v33, %v1620_v41  ;;  %v1627_v49 = vadd.f32 %v1626_v42, %v1625_v34  ;;  %v5000_v50 = vld [vmem:[%s6240_s3 + $0x30] sm:$0xff]  ;;  %v3243_v51 = vmul.f32 %v4999_v47, %v4997_v43  ;;  %v3249_v52 = vmul.f32 %v4999_v47, %v4998_v46 }
 0x314   : >> { %v1624_v53 = vsub.f32 %v1622_v36, %v1623_v44  ;;  %v1630_v54 = vadd.f32 %v1629_v45, %v1628_v37  ;;  %v5001_v55 = vld [vmem:[%s6243_s22 + $0x30] sm:$0xff]  ;;  %v3246_v56 = vmul.f32 %v5000_v50, %v4997_v43  ;;  %v3252_v57 = vmul.f32 %v5000_v50, %v4998_v46 }
 0x315   : >> { %4645 = vst [vmem:[%s6224_s15 + $0x30] sm:$0xff] %v1621_v48  ;;  %v5002_v58 = vld [vmem:[%s6246_s0 + $0x30] sm:$0xff]  ;;  %v3244_v59 = vmul.f32 %v5001_v55, %v4998_v46  ;;  %v3250_v61 = vmul.f32 %v5001_v55, %v4997_v43  ;;  %s6292_s15 = smov [#allocation8] }
 0x316   : >> { %4646 = vst [vmem:[%s6227_s17 + $0x30] sm:$0xff] %v1624_v53  ;;  %v3247_v62 = vmul.f32 %v5002_v58, %v4998_v46  ;;  %v3253_v63 = vmul.f32 %v5002_v58, %v4997_v43  ;;  %s6359_s17 = smov [#allocation10] }
 0x317   : >> { %4647 = vst [vmem:[%s6230_s2 + $0x30] sm:$0xff] %v1627_v49  ;;  %v3245_v0 = vsub.f32 %v3243_v51, %v3244_v59  ;;  %v3251_v1 = vadd.f32 %v3250_v61, %v3249_v52  ;;  %s6376_s2 = smov [#allocation24] }
 0x318   : >> { %4648 = vst [vmem:[%s6233_s18 + $0x30] sm:$0xff] %v1630_v54  ;;  %v3248_v2 = vsub.f32 %v3246_v56, %v3247_v62  ;;  %v3254_v4 = vadd.f32 %v3253_v63, %v3252_v57  ;;  %s6383_s18 = smov [#allocation25] }
 0x319   : >> { %5003 = vst [vmem:[%s6237_s21 + $0x30] sm:$0xff] %v3245_v0  ;;  %s6421_s21 = smov [#allocation16] }
 0x31a   : >> { %5004 = vst [vmem:[%s6240_s3 + $0x30] sm:$0xff] %v3248_v2  ;;  %s6427_s3 = smov [#allocation17] }
 0x31b   : >> { %5005 = vst [vmem:[%s6243_s22 + $0x30] sm:$0xff] %v3251_v1  ;;  %s6429_s22 = smov [#allocation18] }
 0x31c   : >> { %v4651_v6 = vld [vmem:[%s6256_s24 + $0x38] sm:$0xff]  ;;  %5006 = vst [vmem:[%s6246_s0 + $0x30] sm:$0xff] %v3254_v4  ;;  %s1697_s0 = smov [#allocation15] }
 0x31d   : >> { %v4652_v7 = vld [vmem:[%s6259_s26 + $0x38] sm:$0xff]  ;;  %v1653_v3 = vmul.f32 %v4651_v6, %v4649_v5  ;;  %v1659_v8 = vmul.f32 %v4651_v6, %v4650_v60 }
 0x31e   : >> { %v4653_v9 = vld [vmem:[%s6262_s27 + $0x38] sm:$0xff]  ;;  %v1656_v11 = vmul.f32 %v4652_v7, %v4649_v5  ;;  %v1662_v10 = vmul.f32 %v4652_v7, %v4650_v60 }
 0x31f   : >> { %v4654_v12 = vld [vmem:[%s6265_s28 + $0x38] sm:$0xff]  ;;  %v1654_v13 = vmul.f32 %v4653_v9, %v4650_v60  ;;  %v1660_v14 = vmul.f32 %v4653_v9, %v4649_v5 }
 0x320   : >> { %v1657_v16 = vmul.f32 %v4654_v12, %v4650_v60  ;;  %v1663_v17 = vmul.f32 %v4654_v12, %v4649_v5  ;;  %v5009_v19 = vld [vmem:[%s6269_s1 + $0x38] sm:$0xff] }
 0x321   : >> { %v1655_v20 = vsub.f32 %v1653_v3, %v1654_v13  ;;  %v1661_v21 = vadd.f32 %v1660_v14, %v1659_v8  ;;  %v5010_v22 = vld [vmem:[%s6272_s12 + $0x38] sm:$0xff]  ;;  %v3277_v23 = vmul.f32 %v5009_v19, %v5007_v15  ;;  %v3283_v24 = vmul.f32 %v5009_v19, %v5008_v18 }
 0x322   : >> { %v1658_v25 = vsub.f32 %v1656_v11, %v1657_v16  ;;  %v1664_v26 = vadd.f32 %v1663_v17, %v1662_v10  ;;  %v5011_v27 = vld [vmem:[%s6275_s13 + $0x38] sm:$0xff]  ;;  %v3280_v28 = vmul.f32 %v5010_v22, %v5007_v15  ;;  %v3286_v29 = vmul.f32 %v5010_v22, %v5008_v18 }
 0x323   : >> { %4657 = vst [vmem:[%s6262_s27 + $0x38] sm:$0xff] %v1661_v21  ;;  %v5012_v30 = vld [vmem:[%s6278_s14 + $0x38] sm:$0xff]  ;;  %v3278_v31 = vmul.f32 %v5011_v27, %v5008_v18  ;;  %v3284_v32 = vmul.f32 %v5011_v27, %v5007_v15  ;;  %s1727_s27 = smov [#allocation16] }
 0x324   : >> { %v3281_v33 = vmul.f32 %v5012_v30, %v5008_v18  ;;  %v3287_v34 = vmul.f32 %v5012_v30, %v5007_v15  ;;  %4655 = vst [vmem:[%s6256_s24 + $0x38] sm:$0xff] %v1655_v20  ;;  %s1701_s24 = smov [#allocation17] }
 0x325   : >> { %v3279_v35 = vsub.f32 %v3277_v23, %v3278_v31  ;;  %v3285_v36 = vadd.f32 %v3284_v32, %v3283_v24  ;;  %4656 = vst [vmem:[%s6259_s26 + $0x38] sm:$0xff] %v1658_v25  ;;  %s1725_s26 = smov [#allocation15] }
 0x326   : >> { %v3282_v37 = vsub.f32 %v3280_v28, %v3281_v33  ;;  %v3288_v40 = vadd.f32 %v3287_v34, %v3286_v29  ;;  %4658 = vst [vmem:[%s6265_s28 + $0x38] sm:$0xff] %v1664_v26  ;;  %s1729_s28 = smov [#allocation17] }
 0x327   : >> { %5013 = vst [vmem:[%s6269_s1 + $0x38] sm:$0xff] %v3279_v35  ;;  %s1755_s1 = smov [#allocation16] }
 0x328   : >> { %5014 = vst [vmem:[%s6272_s12 + $0x38] sm:$0xff] %v3282_v37  ;;  %s1757_s12 = smov [#allocation17] }
 0x329   : >> { %5015 = vst [vmem:[%s6275_s13 + $0x38] sm:$0xff] %v3285_v36  ;;  %s1759_s13 = smov [#allocation18] }
 0x32a   : >> { %5016 = vst [vmem:[%s6278_s14 + $0x38] sm:$0xff] %v3288_v40  ;;  %s1781_s14 = smov [#allocation15] }
 0x32e   : >> { %v3295_v41 = vld [vmem:[%s6292_s15] ss:$0 sm:$0xff]  ;;  %v5018_v43 = vld [vmem:[%s6292_s15 + $0x7] ss:$0 sm:$0xff]  ;;  %v5019_v45 = vld [vmem:[%s6292_s15 + $0x7] sm:$0xfe] }
 0x32f   : >> { %v5017_v42 = vld [vmem:[%s6292_s15 - $0x1] sm:$0xfe]  ;;  %v5020_v46 = vld [vmem:[%s6292_s15 + $0xf] ss:$0 sm:$0xff]  ;;  %v5022_v47 = vld [vmem:[%s6292_s15 + $0xf] sm:$0xfe]  ;;  %v3313_v48 = vsel %vm2707_vm12, %v5018_v43, %v5019_v45 }
 0x330   : >> { %v3302_v44 = vsel %vm2707_vm12, %v3295_v41, %v5017_v42  ;;  %v3324_v49 = vsel %vm2707_vm12, %v5020_v46, %v5022_v47  ;;  %v5023_v50 = vld [vmem:[%s6292_s15 + $0x17] ss:$0 sm:$0xff]  ;;  %v5025_v51 = vld [vmem:[%s6292_s15 + $0x17] sm:$0xfe]  ;;  %v5026_v52 = vld [vmem:[%s6292_s15 + $0x1f] ss:$0 sm:$0xff] }
 0x331   : >> { %3305 = vst [vmem:[%s6292_s15] sm:$0xff] %v3302_v44  ;;  %v3335_v53 = vsel %vm2707_vm12, %v5023_v50, %v5025_v51  ;;  %v5028_v54 = vld [vmem:[%s6292_s15 + $0x1f] sm:$0xfe]  ;;  %v5029_v55 = vld [vmem:[%s6292_s15 + $0x27] ss:$0 sm:$0xff]  ;;  %v5031_v57 = vld [vmem:[%s6292_s15 + $0x27] sm:$0xfe] }
 0x332   : >> { %5021 = vst [vmem:[%s6292_s15 + $0x8] sm:$0xff] %v3313_v48  ;;  %v3346_v56 = vsel %vm2707_vm12, %v5026_v52, %v5028_v54  ;;  %v5032_v58 = vld [vmem:[%s6292_s15 + $0x2f] ss:$0 sm:$0xff]  ;;  %v3357_v59 = vsel %vm2707_vm12, %v5029_v55, %v5031_v57  ;;  %v5034_v61 = vld [vmem:[%s6292_s15 + $0x2f] sm:$0xfe]  ;;  %v1677_v57 = vld [vmem:[%s6414_s20] sm:$0xff] }
 0x333   : >> { %5024 = vst [vmem:[%s6292_s15 + $0x10] sm:$0xff] %v3324_v49  ;;  %v5035_v62 = vld [vmem:[%s6292_s15 + $0x37] ss:$0 sm:$0xff]  ;;  %v3368_v63 = vsel %vm2707_vm12, %v5032_v58, %v5034_v61  ;;  %v5037_v0 = vld [vmem:[%s6292_s15 + $0x37] sm:$0xfe] }
 0x334   : >> { %5027 = vst [vmem:[%s6292_s15 + $0x18] sm:$0xff] %v3335_v53  ;;  %v5038_v1 = vld [vmem:[%s6292_s15 + $0x3f] ss:$0 sm:$0xff]  ;;  %v3379_v2 = vsel %vm2707_vm12, %v5035_v62, %v5037_v0  ;;  %v3383_v4 = vld [vmem:[%s6316_s16] ss:$0 sm:$0xff] }
 0x335   : >> { %5030 = vst [vmem:[%s6292_s15 + $0x20] sm:$0xff] %v3346_v56  ;;  %v5041_v5 = vld [vmem:[%s6316_s16 + $0x39] sm:$0x7f]  ;;  %v5042_v6 = vld [vmem:[%s6316_s16 + $0x38] ss:$0 sm:$0xff]  ;;  %v1678_v62 = vld [vmem:[%s6421_s21] sm:$0xff] }
 0x336   : >> { %5033 = vst [vmem:[%s6292_s15 + $0x28] sm:$0xff] %v3357_v59  ;;  %v3392_v60 = vsel %vm2797_vm13, %v5038_v1, %v5041_v5  ;;  %v5044_v7 = vld [vmem:[%s6316_s16 + $0x31] sm:$0x7f]  ;;  %v5045_v8 = vld [vmem:[%s6316_s16 + $0x30] ss:$0 sm:$0xff] }
 0x337   : >> { %5036 = vst [vmem:[%s6292_s15 + $0x30] sm:$0xff] %v3368_v63  ;;  %v3401_v3 = vsel %vm2797_vm13, %v5042_v6, %v5044_v7  ;;  %v5047_v9 = vld [vmem:[%s6316_s16 + $0x29] sm:$0x7f]  ;;  %v5048_v10 = vld [vmem:[%s6316_s16 + $0x28] ss:$0 sm:$0xff]  ;;  %v1680_v6 = vld [vmem:[%s6429_s22] sm:$0xff] }
 0x338   : >> { %5039 = vst [vmem:[%s6292_s15 + $0x38] sm:$0xff] %v3379_v2  ;;  %v3410_v11 = vsel %vm2797_vm13, %v5045_v8, %v5047_v9  ;;  %v5050_v12 = vld [vmem:[%s6316_s16 + $0x21] sm:$0x7f]  ;;  %v5051_v14 = vld [vmem:[%s6316_s16 + $0x20] ss:$0 sm:$0xff] }
 0x339   : >> { %5040 = vst [vmem:[%s6292_s15 + $0x1] sm:$0x1] %v3383_v4  ;;  %v3419_v13 = vsel %vm2797_vm13, %v5048_v10, %v5050_v12  ;;  %v5053_v15 = vld [vmem:[%s6316_s16 + $0x19] sm:$0x7f]  ;;  %v5054_v17 = vld [vmem:[%s6316_s16 + $0x18] ss:$0 sm:$0xff] }
 0x33a   : >> { %5043 = vst [vmem:[%s6316_s16 + $0x38] sm:$0xff] %v3392_v60  ;;  %v3428_v16 = vsel %vm2797_vm13, %v5051_v14, %v5053_v15  ;;  %v5056_v18 = vld [vmem:[%s6316_s16 + $0x11] sm:$0x7f]  ;;  %v5057_v20 = vld [vmem:[%s6316_s16 + $0x10] ss:$0 sm:$0xff]  ;;  %v1679_v2 = vld [vmem:[%s6427_s3] sm:$0xff] }
 0x33b   : >> { %5046 = vst [vmem:[%s6316_s16 + $0x30] sm:$0xff] %v3401_v3  ;;  %v3437_v19 = vsel %vm2797_vm13, %v5054_v17, %v5056_v18  ;;  %v5059_v21 = vld [vmem:[%s6316_s16 + $0x9] sm:$0x7f]  ;;  %v5060_v23 = vld [vmem:[%s6316_s16 + $0x8] ss:$0 sm:$0xff]  ;;  %s1783_s15 = smov [#allocation16] }
 0x33c   : >> { %5049 = vst [vmem:[%s6316_s16 + $0x28] sm:$0xff] %v3410_v11  ;;  %v3446_v22 = vsel %vm2797_vm13, %v5057_v20, %v5059_v21  ;;  %v5062_v24 = vld [vmem:[%s6316_s16 + $0x1] sm:$0x7f]  ;;  %v3459_v26 = vld [vmem:[%s6359_s17] ss:$0 sm:$0xff] }
 0x33d   : >> { %5052 = vst [vmem:[%s6316_s16 + $0x20] sm:$0xff] %v3419_v13  ;;  %v3454_v25 = vsel %vm2797_vm13, %v5060_v23, %v5062_v24  ;;  %v5063_v27 = vld [vmem:[%s6359_s17 - $0x1] sm:$0xfe]  ;;  %v5064_v29 = vld [vmem:[%s6359_s17 + $0x7] ss:$0 sm:$0xff] }
 0x33e   : >> { %5055 = vst [vmem:[%s6316_s16 + $0x18] sm:$0xff] %v3428_v16  ;;  %v3466_v28 = vsel %vm2707_vm12, %v3459_v26, %v5063_v27  ;;  %v5065_v30 = vld [vmem:[%s6359_s17 + $0x7] sm:$0xfe]  ;;  %v5066_v32 = vld [vmem:[%s6359_s17 + $0xf] ss:$0 sm:$0xff] }
 0x33f   : >> { %5058 = vst [vmem:[%s6316_s16 + $0x10] sm:$0xff] %v3437_v19  ;;  %v3477_v31 = vsel %vm2707_vm12, %v5064_v29, %v5065_v30  ;;  %v5068_v33 = vld [vmem:[%s6359_s17 + $0xf] sm:$0xfe]  ;;  %v5069_v35 = vld [vmem:[%s6359_s17 + $0x17] ss:$0 sm:$0xff] }
 0x340   : >> { %5061 = vst [vmem:[%s6316_s16 + $0x8] sm:$0xff] %v3446_v22  ;;  %v3488_v34 = vsel %vm2707_vm12, %v5066_v32, %v5068_v33  ;;  %v5071_v36 = vld [vmem:[%s6359_s17 + $0x17] sm:$0xfe]  ;;  %v5072_v37 = vld [vmem:[%s6359_s17 + $0x1f] ss:$0 sm:$0xff] }
 0x341   : >> { %3456 = vst [vmem:[%s6316_s16] sm:$0xff] %v3454_v25  ;;  %v3499_v40 = vsel %vm2707_vm12, %v5069_v35, %v5071_v36  ;;  %v5074_v41 = vld [vmem:[%s6359_s17 + $0x1f] sm:$0xfe]  ;;  %v5075_v42 = vld [vmem:[%s6359_s17 + $0x27] ss:$0 sm:$0xff]  ;;  %v5077_v43 = vld [vmem:[%s6359_s17 + $0x27] sm:$0xfe] }
 0x342   : >> { %3469 = vst [vmem:[%s6359_s17] sm:$0xff] %v3466_v28  ;;  %v3510_v44 = vsel %vm2707_vm12, %v5072_v37, %v5074_v41  ;;  %v5078_v45 = vld [vmem:[%s6359_s17 + $0x2f] ss:$0 sm:$0xff]  ;;  %v5080_v46 = vld [vmem:[%s6359_s17 + $0x2f] sm:$0xfe]  ;;  %v3521_v47 = vsel %vm2707_vm12, %v5075_v42, %v5077_v43  ;;  %v5081_v48 = vld [vmem:[%s6359_s17 + $0x37] ss:$0 sm:$0xff] }
 0x343   : >> { %5067 = vst [vmem:[%s6359_s17 + $0x8] sm:$0xff] %v3477_v31  ;;  %v5083_v49 = vld [vmem:[%s6359_s17 + $0x37] sm:$0xfe]  ;;  %v3532_v50 = vsel %vm2707_vm12, %v5078_v45, %v5080_v46  ;;  %v5084_v51 = vld [vmem:[%s6359_s17 + $0x3f] ss:$0 sm:$0xff]  ;;  %s1785_s16 = smov [#allocation17] }
 0x344   : >> { %5070 = vst [vmem:[%s6359_s17 + $0x10] sm:$0xff] %v3488_v34  ;;  %v6432_v52 = vld [vmem:[%s6376_s2] ss:$0 sm:$0xff]  ;;  %v3543_v54 = vsel %vm2707_vm12, %v5081_v48, %v5083_v49  ;;  %v5087_v55 = vld [vmem:[%s6390_s19 + $0x39] sm:$0x7f]  ;;  %s1809_s2 = smov [#allocation15] }
 0x345   : >> { %5073 = vst [vmem:[%s6359_s17 + $0x18] sm:$0xff] %v3499_v40  ;;  %v6435_v53 = vld [vmem:[%s6383_s18] ss:$0 sm:$0xff]  ;;  %v5088_v56 = vld [vmem:[%s6390_s19 + $0x38] ss:$0 sm:$0xff]  ;;  %v3556_v63 = vsel %vm2797_vm13, %v5084_v51, %v5087_v55  ;;  %v1681_v12 = vmul.f32 %v1677_v57, %v6432_v52  ;;  %v1685_v18 = vmul.f32 %v1678_v62, %v6432_v52  ;;  %v1687_v21 = vmul.f32 %v1679_v2, %v6432_v52  ;;  %s1811_s18 = smov [#allocation16] }
 0x346   : >> { %5076 = vst [vmem:[%s6359_s17 + $0x20] sm:$0xff] %v3510_v44  ;;  %v3547_v58 = vld [vmem:[%s6390_s19] ss:$0 sm:$0xff]  ;;  %v5090_v59 = vld [vmem:[%s6390_s19 + $0x31] sm:$0x7f]  ;;  %v1682_v13 = vmul.f32 %v1678_v62, %v6435_v53  ;;  %v1684_v17 = vmul.f32 %v1677_v57, %v6435_v53  ;;  %v1688_v22 = vmul.f32 %v1680_v6, %v6435_v53  ;;  %v1690_v24 = vmul.f32 %v1679_v2, %v6435_v53 }
 0x347   : >> { %5079 = vst [vmem:[%s6359_s17 + $0x28] sm:$0xff] %v3521_v47  ;;  %v5091_v61 = vld [vmem:[%s6390_s19 + $0x30] ss:$0 sm:$0xff]  ;;  %v5093_v0 = vld [vmem:[%s6390_s19 + $0x29] sm:$0x7f]  ;;  %v3565_v4 = vsel %vm2797_vm13, %v5088_v56, %v5090_v59  ;;  %v1691_v25 = vmul.f32 %v1680_v6, %v6432_v52 }
 0x348   : >> { %5082 = vst [vmem:[%s6359_s17 + $0x30] sm:$0xff] %v3532_v50  ;;  %v5094_v1 = vld [vmem:[%s6390_s19 + $0x28] ss:$0 sm:$0xff]  ;;  %v5096_v5 = vld [vmem:[%s6390_s19 + $0x21] sm:$0x7f]  ;;  %v3574_v7 = vsel %vm2797_vm13, %v5091_v61, %v5093_v0  ;;  %v1683_v27 = vsub.f32 %v1681_v12, %v1682_v13  ;;  %v1686_v28 = vadd.f32 %v1685_v18, %v1684_v17  ;;  %v1689_v29 = vsub.f32 %v1687_v21, %v1688_v22 }
 0x349   : >> { %5085 = vst [vmem:[%s6359_s17 + $0x38] sm:$0xff] %v3543_v54  ;;  %v5097_v60 = vld [vmem:[%s6390_s19 + $0x20] ss:$0 sm:$0xff]  ;;  %v5099_v3 = vld [vmem:[%s6390_s19 + $0x19] sm:$0x7f]  ;;  %v3583_v9 = vsel %vm2797_vm13, %v5094_v1, %v5096_v5  ;;  %v1692_v30 = vadd.f32 %v1691_v25, %v1690_v24 }
 0x34a   : >> { %5086 = vst [vmem:[%s6359_s17 + $0x1] sm:$0x1] %v3547_v58  ;;  %v5100_v8 = vld [vmem:[%s6390_s19 + $0x18] ss:$0 sm:$0xff]  ;;  %v5102_v11 = vld [vmem:[%s6390_s19 + $0x11] sm:$0x7f]  ;;  %v3592_v14 = vsel %vm2797_vm13, %v5097_v60, %v5099_v3 }
 0x34b   : >> { %5089 = vst [vmem:[%s6390_s19 + $0x38] sm:$0xff] %v3556_v63  ;;  %v5103_v10 = vld [vmem:[%s6390_s19 + $0x10] ss:$0 sm:$0xff]  ;;  %v5105_v15 = vld [vmem:[%s6390_s19 + $0x9] sm:$0x7f]  ;;  %v3601_v19 = vsel %vm2797_vm13, %v5100_v8, %v5102_v11  ;;  %s1787_s17 = smov [#allocation18] }
 0x34c   : >> { %5092 = vst [vmem:[%s6390_s19 + $0x30] sm:$0xff] %v3565_v4  ;;  %v5106_v16 = vld [vmem:[%s6390_s19 + $0x8] ss:$0 sm:$0xff]  ;;  %v5108_v20 = vld [vmem:[%s6390_s19 + $0x1] sm:$0x7f]  ;;  %v3610_v23 = vsel %vm2797_vm13, %v5103_v10, %v5105_v15 }
 0x34d   : >> { %5095 = vst [vmem:[%s6390_s19 + $0x28] sm:$0xff] %v3574_v7  ;;  %v3618_v26 = vsel %vm2797_vm13, %v5106_v16, %v5108_v20 }
 0x34e   : >> { %5098 = vst [vmem:[%s6390_s19 + $0x20] sm:$0xff] %v3583_v9 }
 0x34f   : >> { %5101 = vst [vmem:[%s6390_s19 + $0x18] sm:$0xff] %v3592_v14 }
 0x350   : >> { %5104 = vst [vmem:[%s6390_s19 + $0x10] sm:$0xff] %v3601_v19 }
 0x351   : >> { %5107 = vst [vmem:[%s6390_s19 + $0x8] sm:$0xff] %v3610_v23 }
 0x352   : >> { %3620 = vst [vmem:[%s6390_s19] sm:$0xff] %v3618_v26  ;;  %s1813_s19 = smov [#allocation17] }
 0x353   : >> { %1693 = vst [vmem:[%s6414_s20] sm:$0xff] %v1683_v27  ;;  %s1815_s20 = smov [#allocation18] }
 0x354   : >> { %1694 = vst [vmem:[%s6421_s21] sm:$0xff] %v1686_v28  ;;  %s1837_s21 = smov [#allocation15] }
 0x355   : >> { %1695 = vst [vmem:[%s6427_s3] sm:$0xff] %v1689_v29  ;;  %s1839_s3 = smov [#allocation16] }
 0x356   : >> { %1696 = vst [vmem:[%s6429_s22] sm:$0xff] %v1692_v30  ;;  %s1841_s22 = smov [#allocation17] }
 0x35a   : >> { %v4659_v31 = vld [vmem:[%s1697_s0 + $0x8] sm:$0xff] }
 0x35b   : >> { %v4660_v32 = vld [vmem:[%s1699_s23 + $0x8] sm:$0xff]  ;;  %v1709_v33 = vmul.f32 %v4659_v31, %v6432_v52  ;;  %v1712_v34 = vmul.f32 %v4659_v31, %v6435_v53 }
 0x35c   : >> { %v1710_v35 = vmul.f32 %v4660_v32, %v6435_v53  ;;  %v1713_v36 = vmul.f32 %v4660_v32, %v6432_v52  ;;  %v4661_v37 = vld [vmem:[%s1701_s24 + $0x8] sm:$0xff] }
 0x35d   : >> { %v4662_v40 = vld [vmem:[%s1703_s25 + $0x8] sm:$0xff]  ;;  %v1715_v41 = vmul.f32 %v4661_v37, %v6432_v52  ;;  %v1718_v42 = vmul.f32 %v4661_v37, %v6435_v53 }
 0x35e   : >> { %v1711_v43 = vsub.f32 %v1709_v33, %v1710_v35  ;;  %v1714_v44 = vadd.f32 %v1713_v36, %v1712_v34  ;;  %v1716_v45 = vmul.f32 %v4662_v40, %v6435_v53  ;;  %v1719_v46 = vmul.f32 %v4662_v40, %v6432_v52 }
 0x360   : >> { %4663 = vst [vmem:[%s1697_s0 + $0x8] sm:$0xff] %v1711_v43  ;;  %v1717_v47 = vsub.f32 %v1715_v41, %v1716_v45  ;;  %v1720_v48 = vadd.f32 %v1719_v46, %v1718_v42  ;;  %s1843_s0 = smov [#allocation18] }
 0x361   : >> { %4664 = vst [vmem:[%s1699_s23 + $0x8] sm:$0xff] %v1714_v44  ;;  %s1865_s23 = smov [#allocation15] }
 0x362   : >> { %4665 = vst [vmem:[%s1701_s24 + $0x8] sm:$0xff] %v1717_v47  ;;  %s1867_s24 = smov [#allocation16] }
 0x363   : >> { %4666 = vst [vmem:[%s1703_s25 + $0x8] sm:$0xff] %v1720_v48  ;;  %s1869_s25 = smov [#allocation17] }
 0x367   : >> { %v4667_v49 = vld [vmem:[%s1725_s26 + $0x10] sm:$0xff] }
 0x368   : >> { %v4668_v50 = vld [vmem:[%s1727_s27 + $0x10] sm:$0xff]  ;;  %v1737_v51 = vmul.f32 %v4667_v49, %v6432_v52  ;;  %v1740_v54 = vmul.f32 %v4667_v49, %v6435_v53 }
 0x369   : >> { %v1738_v55 = vmul.f32 %v4668_v50, %v6435_v53  ;;  %v1741_v56 = vmul.f32 %v4668_v50, %v6432_v52  ;;  %v4669_v57 = vld [vmem:[%s1729_s28 + $0x10] sm:$0xff] }
 0x36a   : >> { %v4670_v58 = vld [vmem:[%s1731_s29 + $0x10] sm:$0xff]  ;;  %v1743_v59 = vmul.f32 %v4669_v57, %v6432_v52  ;;  %v1746_v61 = vmul.f32 %v4669_v57, %v6435_v53 }
 0x36b   : >> { %v1739_v62 = vsub.f32 %v1737_v51, %v1738_v55  ;;  %v1742_v63 = vadd.f32 %v1741_v56, %v1740_v54  ;;  %v1744_v0 = vmul.f32 %v4670_v58, %v6435_v53  ;;  %v1747_v1 = vmul.f32 %v4670_v58, %v6432_v52 }
 0x36d   : >> { %4671 = vst [vmem:[%s1725_s26 + $0x10] sm:$0xff] %v1739_v62  ;;  %v1745_v2 = vsub.f32 %v1743_v59, %v1744_v0  ;;  %v1748_v4 = vadd.f32 %v1747_v1, %v1746_v61  ;;  %s1871_s26 = smov [#allocation18] }
 0x36e   : >> { %4672 = vst [vmem:[%s1727_s27 + $0x10] sm:$0xff] %v1742_v63  ;;  %s6559_s27 = smov [#allocation16] }
 0x36f   : >> { %4673 = vst [vmem:[%s1729_s28 + $0x10] sm:$0xff] %v1745_v2  ;;  %s6561_s28 = smov [#allocation15] }
 0x370   : >> { %4674 = vst [vmem:[%s1731_s29 + $0x10] sm:$0xff] %v1748_v4  ;;  %s1894_s29 = smov [#allocation22] }
 0x374   : >> { %v4675_v5 = vld [vmem:[%s1753_s30 + $0x18] sm:$0xff] }
 0x375   : >> { %v4676_v60 = vld [vmem:[%s1755_s1 + $0x18] sm:$0xff]  ;;  %v1765_v6 = vmul.f32 %v4675_v5, %v6432_v52  ;;  %v1768_v7 = vmul.f32 %v4675_v5, %v6435_v53 }
 0x376   : >> { %v1766_v3 = vmul.f32 %v4676_v60, %v6435_v53  ;;  %v1769_v8 = vmul.f32 %v4676_v60, %v6432_v52  ;;  %v4677_v9 = vld [vmem:[%s1757_s12 + $0x18] sm:$0xff] }
 0x377   : >> { %v4678_v11 = vld [vmem:[%s1759_s13 + $0x18] sm:$0xff]  ;;  %v1771_v10 = vmul.f32 %v4677_v9, %v6432_v52  ;;  %v1774_v12 = vmul.f32 %v4677_v9, %v6435_v53 }
 0x378   : >> { %v1767_v13 = vsub.f32 %v1765_v6, %v1766_v3  ;;  %v1770_v14 = vadd.f32 %v1769_v8, %v1768_v7  ;;  %v1772_v15 = vmul.f32 %v4678_v11, %v6435_v53  ;;  %v1775_v16 = vmul.f32 %v4678_v11, %v6432_v52 }
 0x37a   : >> { %4679 = vst [vmem:[%s1753_s30 + $0x18] sm:$0xff] %v1767_v13  ;;  %v1773_v17 = vsub.f32 %v1771_v10, %v1772_v15  ;;  %v1776_v18 = vadd.f32 %v1775_v16, %v1774_v12  ;;  %s6599_s30 = smov [#allocation18] }
 0x37b   : >> { %4680 = vst [vmem:[%s1755_s1 + $0x18] sm:$0xff] %v1770_v14  ;;  %s2089_s1 = smov [#allocation23] }
 0x37c   : >> { %4681 = vst [vmem:[%s1757_s12 + $0x18] sm:$0xff] %v1773_v17  ;;  %s6626_s12 = smov [#allocation16] }
 0x37d   : >> { %4682 = vst [vmem:[%s1759_s13 + $0x18] sm:$0xff] %v1776_v18  ;;  %s7500_s13 = smov 127  }
 0x381   : >> { %v4683_v19 = vld [vmem:[%s1781_s14 + $0x20] sm:$0xff] }
 0x382   : >> { %v4684_v20 = vld [vmem:[%s1783_s15 + $0x20] sm:$0xff]  ;;  %v1793_v21 = vmul.f32 %v4683_v19, %v6432_v52  ;;  %v1796_v22 = vmul.f32 %v4683_v19, %v6435_v53 }
 0x383   : >> { %v1794_v23 = vmul.f32 %v4684_v20, %v6435_v53  ;;  %v1797_v24 = vmul.f32 %v4684_v20, %v6432_v52  ;;  %v4685_v25 = vld [vmem:[%s1785_s16 + $0x20] sm:$0xff] }
 0x384   : >> { %v4686_v26 = vld [vmem:[%s1787_s17 + $0x20] sm:$0xff]  ;;  %v1799_v27 = vmul.f32 %v4685_v25, %v6432_v52  ;;  %v1802_v28 = vmul.f32 %v4685_v25, %v6435_v53  ;;  %v1994_v25 = vadd.s32 24, %v1970_v38 }
 0x385   : >> { %v1795_v29 = vsub.f32 %v1793_v21, %v1794_v23  ;;  %v1798_v30 = vadd.f32 %v1797_v24, %v1796_v22  ;;  %v1800_v31 = vmul.f32 %v4686_v26, %v6435_v53  ;;  %v1803_v32 = vmul.f32 %v4686_v26, %v6432_v52 }
 0x386   : >> { %v1980_v23 = vadd.s32 8, %v1970_v38  ;;  %v1987_v24 = vadd.s32 16, %v1970_v38  ;;  %v2001_v26 = vadd.s32 32, %v1970_v38  ;;  %v1900_v38 = vmov %v5775_v38 }
 0x387   : >> { %4687 = vst [vmem:[%s1781_s14 + $0x20] sm:$0xff] %v1795_v29  ;;  %v1801_v33 = vsub.f32 %v1799_v27, %v1800_v31  ;;  %v1804_v34 = vadd.f32 %v1803_v32, %v1802_v28  ;;  %vm1995_vm2 = vcmp.eq.s32.totalorder %v1994_v25, %v1967_v39  ;;  %v2022_v27 = vadd.s32 56, %v1970_v38  ;;  %s7505_s14 = smov 1  }
 0x388   : >> { %4688 = vst [vmem:[%s1783_s15 + $0x20] sm:$0xff] %v1798_v30  ;;  %vm1981_vm15 = vcmp.eq.s32.totalorder %v1980_v23, %v1967_v39  ;;  %vm1988_vm1 = vcmp.eq.s32.totalorder %v1987_v24, %v1967_v39  ;;  %v6564_v39 = vmov %v5777_v39  ;;  %v1912_v28 = vadd.s32 8, %v1900_v38  ;;  %s6669_s15 = smov [#allocation17] }
 0x389   : >> { %4689 = vst [vmem:[%s1785_s16 + $0x20] sm:$0xff] %v1801_v33  ;;  %vm2002_vm3 = vcmp.eq.s32.totalorder %v2001_v26, %v1967_v39  ;;  %vm2023_vm6 = vcmp.eq.s32.totalorder %v2022_v27, %v1967_v39  ;;  %vm1905_vm7 = vcmp.eq.s32.totalorder %v1900_v38, %v6564_v39  ;;  %s6677_s16 = smov [#allocation15] }
 0x38a   : >> { %4690 = vst [vmem:[%s1787_s17 + $0x20] sm:$0xff] %v1804_v34  ;;  %vm1913_vm8 = vcmp.eq.s32.totalorder %v1912_v28, %v6564_v39  ;;  %s6679_s17 = smov [#allocation16] }
 0x38e   : >> { %v4691_v35 = vld [vmem:[%s1809_s2 + $0x28] sm:$0xff] }
 0x38f   : >> { %v4692_v36 = vld [vmem:[%s1811_s18 + $0x28] sm:$0xff]  ;;  %v1821_v37 = vmul.f32 %v4691_v35, %v6432_v52  ;;  %v1824_v40 = vmul.f32 %v4691_v35, %v6435_v53 }
 0x390   : >> { %v1822_v41 = vmul.f32 %v4692_v36, %v6435_v53  ;;  %v1825_v42 = vmul.f32 %v4692_v36, %v6432_v52  ;;  %v4693_v43 = vld [vmem:[%s1813_s19 + $0x28] sm:$0xff] }
 0x391   : >> { %v4694_v44 = vld [vmem:[%s1815_s20 + $0x28] sm:$0xff]  ;;  %v1827_v45 = vmul.f32 %v4693_v43, %v6432_v52  ;;  %v1830_v46 = vmul.f32 %v4693_v43, %v6435_v53  ;;  %v1928_v43 = vadd.s32 24, %v1900_v38 }
 0x392   : >> { %v1823_v47 = vsub.f32 %v1821_v37, %v1822_v41  ;;  %v1826_v48 = vadd.f32 %v1825_v42, %v1824_v40  ;;  %v1828_v49 = vmul.f32 %v4694_v44, %v6435_v53  ;;  %v1831_v50 = vmul.f32 %v4694_v44, %v6432_v52 }
 0x393   : >> { %v1920_v40 = vadd.s32 16, %v1900_v38  ;;  %vm1929_vm10 = vcmp.eq.s32.totalorder %v1928_v43, %v6564_v39 }
 0x394   : >> { %4695 = vst [vmem:[%s1809_s2 + $0x28] sm:$0xff] %v1823_v47  ;;  %v1829_v51 = vsub.f32 %v1827_v45, %v1828_v49  ;;  %v1832_v54 = vadd.f32 %v1831_v50, %v1830_v46  ;;  %v1901_v46 = vld [vmem:[%s1894_s29] ss:$0 sm:$0xff]  ;;  %v1936_v47 = vadd.s32 32, %v1900_v38  ;;  %v1944_v50 = vadd.s32 40, %v1900_v38  ;;  %s6686_s2 = smov [#allocation15] }
 0x395   : >> { %4696 = vst [vmem:[%s1811_s18 + $0x28] sm:$0xff] %v1826_v48  ;;  %vm1921_vm9 = vcmp.eq.s32.totalorder %v1920_v40, %v6564_v39  ;;  %s6717_s18 = smov [#allocation16]  ;;  %s6799_s29 = smov [#allocation17] }
 0x396   : >> { %4697 = vst [vmem:[%s1813_s19 + $0x28] sm:$0xff] %v1829_v51  ;;  %vm1937_vm11 = vcmp.eq.s32.totalorder %v1936_v47, %v6564_v39  ;;  %s6721_s19 = smov [#allocation15] }
 0x397   : >> { %4698 = vst [vmem:[%s1815_s20 + $0x28] sm:$0xff] %v1832_v54  ;;  %s6737_s20 = smov [#allocation16] }
 0x39b   : >> { %v4699_v55 = vld [vmem:[%s1837_s21 + $0x30] sm:$0xff] }
 0x39c   : >> { %v4700_v56 = vld [vmem:[%s1839_s3 + $0x30] sm:$0xff]  ;;  %v1849_v57 = vmul.f32 %v4699_v55, %v6432_v52  ;;  %v1852_v58 = vmul.f32 %v4699_v55, %v6435_v53  ;;  %v1952_v55 = vadd.s32 48, %v1900_v38 }
 0x39d   : >> { %v1850_v59 = vmul.f32 %v4700_v56, %v6435_v53  ;;  %v1853_v61 = vmul.f32 %v4700_v56, %v6432_v52  ;;  %v4701_v62 = vld [vmem:[%s1841_s22 + $0x30] sm:$0xff] }
 0x39e   : >> { %v4702_v63 = vld [vmem:[%s1843_s0 + $0x30] sm:$0xff]  ;;  %v1855_v0 = vmul.f32 %v4701_v62, %v6432_v52  ;;  %v1858_v1 = vmul.f32 %v4701_v62, %v6435_v53 }
 0x39f   : >> { %v1851_v2 = vsub.f32 %v1849_v57, %v1850_v59  ;;  %v1854_v4 = vadd.f32 %v1853_v61, %v1852_v58  ;;  %v1856_v5 = vmul.f32 %v4702_v63, %v6435_v53  ;;  %v1859_v60 = vmul.f32 %v4702_v63, %v6432_v52 }
 0x3a0   : >> { %v1960_v58 = vadd.s32 56, %v1900_v38 }
 0x3a1   : >> { %4703 = vst [vmem:[%s1837_s21 + $0x30] sm:$0xff] %v1851_v2  ;;  %v1857_v6 = vsub.f32 %v1855_v0, %v1856_v5  ;;  %v1860_v7 = vadd.f32 %v1859_v60, %v1858_v1  ;;  %s6739_s21 = smov [#allocation15] }
 0x3a2   : >> { %4704 = vst [vmem:[%s1839_s3 + $0x30] sm:$0xff] %v1854_v4  ;;  %s6749_s3 = smov [#allocation16] }
 0x3a3   : >> { %4705 = vst [vmem:[%s1841_s22 + $0x30] sm:$0xff] %v1857_v6  ;;  %s6751_s22 = smov [#allocation15] }
 0x3a4   : >> { %4706 = vst [vmem:[%s1843_s0 + $0x30] sm:$0xff] %v1860_v7  ;;  %s6761_s0 = smov [#allocation16] }
 0x3a8   : >> { %v4707_v3 = vld [vmem:[%s1865_s23 + $0x38] sm:$0xff] }
 0x3a9   : >> { %v4708_v8 = vld [vmem:[%s1867_s24 + $0x38] sm:$0xff]  ;;  %v1880_v9 = vmul.f32 %v4707_v3, %v6435_v53  ;;  %v1877_v11 = vmul.f32 %v4707_v3, %v6432_v52 }
 0x3aa   : >> { %v1878_v10 = vmul.f32 %v4708_v8, %v6435_v53  ;;  %v1881_v12 = vmul.f32 %v4708_v8, %v6432_v52  ;;  %v4709_v13 = vld [vmem:[%s1869_s25 + $0x38] sm:$0xff]  ;;  %v6618_v8 = vld [vmem:[%s2089_s1] ss:$0 sm:$0xff]  ;;  %s6811_s1 = smov [#allocation17] }
 0x3ab   : >> { %v4710_v14 = vld [vmem:[%s1871_s26 + $0x38] sm:$0xff]  ;;  %v1886_v15 = vmul.f32 %v4709_v13, %v6435_v53  ;;  %v1883_v16 = vmul.f32 %v4709_v13, %v6432_v52 }
 0x3ac   : >> { %v1882_v17 = vadd.f32 %v1881_v12, %v1880_v9  ;;  %v1879_v18 = vsub.f32 %v1877_v11, %v1878_v10  ;;  %v1887_v19 = vmul.f32 %v4710_v14, %v6432_v52  ;;  %v1884_v20 = vmul.f32 %v4710_v14, %v6435_v53 }
 0x3ad   : >> { %v2008_v52 = vadd.s32 40, %v1970_v38  ;;  %v2015_v53 = vadd.s32 48, %v1970_v38  ;;  %v2095_v38 = vmov %v5775_v38 }
 0x3ae   : >> { %4712 = vst [vmem:[%s1867_s24 + $0x38] sm:$0xff] %v1882_v17  ;;  %v1888_v21 = vadd.f32 %v1887_v19, %v1886_v15  ;;  %v1885_v22 = vsub.f32 %v1883_v16, %v1884_v20  ;;  %v2107_v0 = vadd.s32 8, %v2095_v38  ;;  %v2115_v4 = vadd.s32 16, %v2095_v38  ;;  %s6773_s24 = smov [#allocation16] }
 0x3af   : >> { %4711 = vst [vmem:[%s1865_s23 + $0x38] sm:$0xff] %v1879_v18  ;;  %vm2009_vm4 = vcmp.eq.s32.totalorder %v2008_v52, %v1967_v39  ;;  %vm2016_vm5 = vcmp.eq.s32.totalorder %v2015_v53, %v1967_v39  ;;  %v2123_v6 = vadd.s32 24, %v2095_v38  ;;  %v2131_v9 = vadd.s32 32, %v2095_v38  ;;  %s6763_s23 = smov [#allocation15] }
 0x3b0   : >> { %4714 = vst [vmem:[%s1871_s26 + $0x38] sm:$0xff] %v1888_v21  ;;  %v2139_v12 = vadd.s32 40, %v2095_v38  ;;  %v2147_v15 = vadd.s32 48, %v2095_v38  ;;  %v2155_v23 = vadd.s32 56, %v2095_v38  ;;  %s6785_s26 = smov [#allocation16] }
 0x3b1   : >> { %4713 = vst [vmem:[%s1869_s25 + $0x38] sm:$0xff] %v1885_v22  ;;  %s6775_s25 = smov [#allocation15] }
 0x3b5   : >> { %v1971_v29 = vld [vmem:[%s6559_s27] sm:$0xff]  ;;  %v4729_v30 = vld [vmem:[%s6559_s27 + $0x8] sm:$0xff]  ;;  %v4731_v31 = vld [vmem:[%s6559_s27 + $0x10] sm:$0xff] }
 0x3b6   : >> { %v1975_v32 = vsel %vm1974_vm14, 0.0, %v1971_v29  ;;  %v1982_v33 = vsel %vm1981_vm15, 0.0, %v4729_v30  ;;  %v1989_v34 = vsel %vm1988_vm1, 0.0, %v4731_v31  ;;  %v4733_v35 = vld [vmem:[%s6559_s27 + $0x18] sm:$0xff]  ;;  %v4735_v36 = vld [vmem:[%s6559_s27 + $0x20] sm:$0xff]  ;;  %v4737_v37 = vld [vmem:[%s6559_s27 + $0x28] sm:$0xff]  ;;  %vm1945_vm14 = vcmp.eq.s32.totalorder %v1944_v50, %v6564_v39 }
 0x3b7   : >> { %1976 = vst [vmem:[%s6559_s27] sm:$0xff] %v1975_v32  ;;  %v1996_v41 = vsel %vm1995_vm2, 0.0, %v4733_v35  ;;  %v4739_v42 = vld [vmem:[%s6559_s27 + $0x30] sm:$0xff]  ;;  %v2003_v44 = vsel %vm2002_vm3, 0.0, %v4735_v36  ;;  %v4741_v45 = vld [vmem:[%s6559_s27 + $0x38] sm:$0xff]  ;;  %v2010_v48 = vsel %vm2009_vm4, 0.0, %v4737_v37  ;;  %v1902_v49 = vld [vmem:[%s6561_s28] sm:$0xff]  ;;  %v6602_v39 = vmov %v5777_v39 }
 0x3b8   : >> { %4730 = vst [vmem:[%s6559_s27 + $0x8] sm:$0xff] %v1982_v33  ;;  %v2017_v51 = vsel %vm2016_vm5, 0.0, %v4739_v42  ;;  %v4715_v54 = vld [vmem:[%s6561_s28 + $0x8] sm:$0xff]  ;;  %v2024_v56 = vsel %vm2023_vm6, 0.0, %v4741_v45  ;;  %v4717_v57 = vld [vmem:[%s6561_s28 + $0x10] sm:$0xff]  ;;  %v4719_v59 = vld [vmem:[%s6561_s28 + $0x18] sm:$0xff]  ;;  %v1906_v61 = vsel %vm1905_vm7, %v1901_v46, %v1902_v49  ;;  %vm1953_vm15 = vcmp.eq.s32.totalorder %v1952_v55, %v6564_v39 }
 0x3b9   : >> { %4732 = vst [vmem:[%s6559_s27 + $0x10] sm:$0xff] %v1989_v34  ;;  %v4721_v62 = vld [vmem:[%s6561_s28 + $0x20] sm:$0xff]  ;;  %v1914_v63 = vsel %vm1913_vm8, %v1901_v46, %v4715_v54  ;;  %v4723_v1 = vld [vmem:[%s6561_s28 + $0x28] sm:$0xff]  ;;  %v1922_v2 = vsel %vm1921_vm9, %v1901_v46, %v4717_v57  ;;  %v4725_v5 = vld [vmem:[%s6561_s28 + $0x30] sm:$0xff]  ;;  %v1930_v60 = vsel %vm1929_vm10, %v1901_v46, %v4719_v59  ;;  %vm1961_vm1 = vcmp.eq.s32.totalorder %v1960_v58, %v6564_v39 }
 0x3ba   : >> { %4734 = vst [vmem:[%s6559_s27 + $0x18] sm:$0xff] %v1996_v41  ;;  %v4727_v7 = vld [vmem:[%s6561_s28 + $0x38] sm:$0xff]  ;;  %v1938_v3 = vsel %vm1937_vm11, %v1901_v46, %v4721_v62  ;;  %vm2100_vm2 = vcmp.eq.s32.totalorder %v2095_v38, %v6602_v39  ;;  %v1946_v11 = vsel %vm1945_vm14, %v1901_v46, %v4723_v1  ;;  %v2097_v10 = vld [vmem:[%s6599_s30] sm:$0xff]  ;;  %vm2108_vm3 = vcmp.eq.s32.totalorder %v2107_v0, %v6602_v39  ;;  %v4757_v14 = vld [vmem:[%s6599_s30 + $0x8] sm:$0xff] }
 0x3bb   : >> { %4736 = vst [vmem:[%s6559_s27 + $0x20] sm:$0xff] %v2003_v44  ;;  %v1954_v13 = vsel %vm1953_vm15, %v1901_v46, %v4725_v5  ;;  %vm2116_vm4 = vcmp.eq.s32.totalorder %v2115_v4, %v6602_v39  ;;  %v1962_v16 = vsel %vm1961_vm1, %v1901_v46, %v4727_v7  ;;  %v4759_v17 = vld [vmem:[%s6599_s30 + $0x10] sm:$0xff]  ;;  %vm2124_vm5 = vcmp.eq.s32.totalorder %v2123_v6, %v6602_v39  ;;  %v4761_v19 = vld [vmem:[%s6599_s30 + $0x18] sm:$0xff]  ;;  %v4763_v22 = vld [vmem:[%s6599_s30 + $0x20] sm:$0xff] }
 0x3bc   : >> { %4738 = vst [vmem:[%s6559_s27 + $0x28] sm:$0xff] %v2010_v48  ;;  %v2101_v18 = vsel %vm2100_vm2, %v6618_v8, %v2097_v10  ;;  %vm2132_vm6 = vcmp.eq.s32.totalorder %v2131_v9, %v6602_v39  ;;  %v2109_v21 = vsel %vm2108_vm3, %v6618_v8, %v4757_v14  ;;  %v2032_v38 = vmov %v5775_v38  ;;  %v4765_v25 = vld [vmem:[%s6599_s30 + $0x28] sm:$0xff]  ;;  %v4767_v52 = vld [vmem:[%s6599_s30 + $0x30] sm:$0xff]  ;;  %v4769_v31 = vld [vmem:[%s6599_s30 + $0x38] sm:$0xff] }
 0x3bd   : >> { %4740 = vst [vmem:[%s6559_s27 + $0x30] sm:$0xff] %v2017_v51  ;;  %vm2140_vm7 = vcmp.eq.s32.totalorder %v2139_v12, %v6602_v39  ;;  %v2117_v24 = vsel %vm2116_vm4, %v6618_v8, %v4759_v17  ;;  %vm2148_vm8 = vcmp.eq.s32.totalorder %v2147_v15, %v6602_v39  ;;  %v2125_v26 = vsel %vm2124_vm5, %v6618_v8, %v4761_v19  ;;  %v2033_v33 = vld [vmem:[%s6669_s15] sm:$0xff]  ;;  %v4743_v35 = vld [vmem:[%s6669_s15 + $0x8] sm:$0xff]  ;;  %v4745_v42 = vld [vmem:[%s6669_s15 + $0x10] sm:$0xff] }
 0x3be   : >> { %4742 = vst [vmem:[%s6559_s27 + $0x38] sm:$0xff] %v2024_v56  ;;  %v2133_v53 = vsel %vm2132_vm6, %v6618_v8, %v4763_v22  ;;  %v2029_v39 = vmov %v5777_v39  ;;  %v2042_v27 = vadd.s32 8, %v2032_v38  ;;  %v2141_v28 = vsel %vm2140_vm7, %v6618_v8, %v4765_v25  ;;  %v4747_v46 = vld [vmem:[%s6669_s15 + $0x18] sm:$0xff]  ;;  %v4749_v49 = vld [vmem:[%s6669_s15 + $0x20] sm:$0xff]  ;;  %v4751_v51 = vld [vmem:[%s6669_s15 + $0x28] sm:$0xff]  ;;  %s6787_s27 = smov [#allocation15] }
 0x3bf   : >> { %1907 = vst [vmem:[%s6561_s28] sm:$0xff] %v1906_v61  ;;  %v2049_v29 = vadd.s32 16, %v2032_v38  ;;  %vm2156_vm9 = vcmp.eq.s32.totalorder %v2155_v23, %v6602_v39  ;;  %v2149_v30 = vsel %vm2148_vm8, %v6618_v8, %v4767_v52  ;;  %v2056_v32 = vadd.s32 24, %v2032_v38  ;;  %v4753_v55 = vld [vmem:[%s6669_s15 + $0x30] sm:$0xff]  ;;  %v4755_v57 = vld [vmem:[%s6669_s15 + $0x38] sm:$0xff] }
 0x3c0   : >> { %4716 = vst [vmem:[%s6561_s28 + $0x8] sm:$0xff] %v1914_v63  ;;  %vm2036_vm10 = vcmp.eq.s32.totalorder %v2032_v38, %v2029_v39  ;;  %v2063_v34 = vadd.s32 32, %v2032_v38  ;;  %vm2043_vm11 = vcmp.eq.s32.totalorder %v2042_v27, %v2029_v39  ;;  %v2070_v36 = vadd.s32 40, %v2032_v38 }
 0x3c1   : >> { %4718 = vst [vmem:[%s6561_s28 + $0x10] sm:$0xff] %v1922_v2  ;;  %v2157_v41 = vsel %vm2156_vm9, %v6618_v8, %v4769_v31  ;;  %vm2050_vm14 = vcmp.eq.s32.totalorder %v2049_v29, %v2029_v39  ;;  %v2077_v43 = vadd.s32 48, %v2032_v38  ;;  %v2037_v45 = vsel %vm2036_vm10, 0.0, %v2033_v33 }
 0x3c2   : >> { %4720 = vst [vmem:[%s6561_s28 + $0x18] sm:$0xff] %v1930_v60  ;;  %vm2057_vm15 = vcmp.eq.s32.totalorder %v2056_v32, %v2029_v39  ;;  %v2084_v47 = vadd.s32 56, %v2032_v38  ;;  %v2044_v48 = vsel %vm2043_vm11, 0.0, %v4743_v35  ;;  %vm2064_vm1 = vcmp.eq.s32.totalorder %v2063_v34, %v2029_v39 }
 0x3c3   : >> { %4722 = vst [vmem:[%s6561_s28 + $0x20] sm:$0xff] %v1938_v3  ;;  %v2051_v50 = vsel %vm2050_vm14, 0.0, %v4745_v42  ;;  %vm2071_vm2 = vcmp.eq.s32.totalorder %v2070_v36, %v2029_v39  ;;  %v2058_v54 = vsel %vm2057_vm15, 0.0, %v4747_v46  ;;  %vm2078_vm3 = vcmp.eq.s32.totalorder %v2077_v43, %v2029_v39 }
 0x3c4   : >> { %4724 = vst [vmem:[%s6561_s28 + $0x28] sm:$0xff] %v1946_v11  ;;  %v2065_v56 = vsel %vm2064_vm1, 0.0, %v4749_v49  ;;  %vm2085_vm4 = vcmp.eq.s32.totalorder %v2084_v47, %v2029_v39  ;;  %v2072_v58 = vsel %vm2071_vm2, 0.0, %v4751_v51  ;;  %v2079_v59 = vsel %vm2078_vm3, 0.0, %v4753_v55 }
 0x3c5   : >> { %v2182_v20 = vld [vmem:[%s6626_s12] sm:$0xff]  ;;  %4726 = vst [vmem:[%s6561_s28 + $0x30] sm:$0xff] %v1954_v13  ;;  %v4774_v40 = vld [vmem:[%s6679_s17 + $0x8] sm:$0xff]  ;;  %v4778_v61 = vld [vmem:[%s6717_s18 + $0x10] sm:$0xff]  ;;  %v2086_v62 = vsel %vm2085_vm4, 0.0, %v4755_v57  ;;  %vm2170_vm5 = vcmp.eq.s32.totalorder %v5777_v39, 0 }
 0x3c6   : >> { %2183 = vrot.lane.b32.xlu0 %v2182_v20, %s7500_s13  ;;  %2162 = vrot.lane.b32.xlu1 %v2182_v20, %s7505_s14  ;;  %4728 = vst [vmem:[%s6561_s28 + $0x38] sm:$0xff] %v1962_v16  ;;  %v4782_v0 = vld [vmem:[%s6737_s20 + $0x18] sm:$0xff]  ;;  %s6797_s28 = smov [#allocation18]  ;;  %vm2187_vm6 = vcmp.eq.s32.totalorder %v5777_v39, 63  ;;  %vm2174_vm7 = vcmp.eq.s32.totalorder %v5777_v39, 1 }
 0x3c7   : >> { %2102 = vst [vmem:[%s6599_s30] sm:$0xff] %v2101_v18  ;;  %v4786_v2 = vld [vmem:[%s6749_s3 + $0x20] sm:$0xff]  ;;  %v4790_v5 = vld [vmem:[%s6761_s0 + $0x28] sm:$0xff]  ;;  %v4794_v6 = vld [vmem:[%s6773_s24 + $0x30] sm:$0xff] }
 0x3c8   : >> { %4758 = vst [vmem:[%s6599_s30 + $0x8] sm:$0xff] %v2109_v21  ;;  %v4798_v3 = vld [vmem:[%s6785_s26 + $0x38] sm:$0xff] }
 0x3c9   : >> { %4760 = vst [vmem:[%s6599_s30 + $0x10] sm:$0xff] %v2117_v24 }
 0x3ca   : >> { %4762 = vst [vmem:[%s6599_s30 + $0x18] sm:$0xff] %v2125_v26 }
 0x3cb   : >> { %4764 = vst [vmem:[%s6599_s30 + $0x20] sm:$0xff] %v2133_v53 }
 0x3cc   : >> { %4766 = vst [vmem:[%s6599_s30 + $0x28] sm:$0xff] %v2141_v28 }
 0x3cd   : >> { %v6693_v37 = vld [vmem:[%s6677_s16] sm:$0xff]  ;;  %4768 = vst [vmem:[%s6599_s30 + $0x30] sm:$0xff] %v2149_v30  ;;  %v6705_v44 = vld [vmem:[%s6686_s2 + $0x8] sm:$0xff]  ;;  %v6730_v63 = vld [vmem:[%s6721_s19 + $0x10] sm:$0xff] }
 0x3ce   : >> { %2166 = vrot.lane.b32.xlu2 %v6693_v37, %s7505_s14  ;;  %2215 = vrot.lane.b32.xlu0 %v4774_v40, %s7500_s13  ;;  %4770 = vst [vmem:[%s6599_s30 + $0x38] sm:$0xff] %v2157_v41  ;;  %v6745_v1 = vld [vmem:[%s6739_s21 + $0x18] sm:$0xff]  ;;  %s6809_s30 = smov [#allocation18] }
 0x3cf   : >> { %2198 = vrot.lane.b32.xlu1 %v6705_v44, %s7505_s14  ;;  %2038 = vst [vmem:[%s6669_s15] sm:$0xff] %v2037_v45  ;;  %v6757_v4 = vld [vmem:[%s6751_s22 + $0x20] sm:$0xff]  ;;  %v6769_v60 = vld [vmem:[%s6763_s23 + $0x28] sm:$0xff] }
 0x3d0   : >> { %4744 = vst [vmem:[%s6669_s15 + $0x8] sm:$0xff] %v2044_v48  ;;  %v6781_v7 = vld [vmem:[%s6775_s25 + $0x30] sm:$0xff]  ;;  %v6793_v8 = vld [vmem:[%s6787_s27 + $0x38] sm:$0xff] }
 0x3d1   : >> { %4746 = vst [vmem:[%s6669_s15 + $0x10] sm:$0xff] %v2051_v50 }
 0x3d2   : >> { %4748 = vst [vmem:[%s6669_s15 + $0x18] sm:$0xff] %v2058_v54 }
 0x3d3   : >> { %4750 = vst [vmem:[%s6669_s15 + $0x20] sm:$0xff] %v2065_v56 }
 0x3d4   : >> { %4752 = vst [vmem:[%s6669_s15 + $0x28] sm:$0xff] %v2072_v58 }
 0x3d5   : >> { %4754 = vst [vmem:[%s6669_s15 + $0x30] sm:$0xff] %v2079_v59  ;;  %v2452_v9 = vld [vmem:[%s6797_s28] sm:$0xff]  ;;  %v4816_v10 = vld [vmem:[%s6809_s30 + $0x8] sm:$0xff]  ;;  %v4817_v14 = vld [vmem:[%s6823_s5 + $0x10] sm:$0xff] }
 0x3d6   : >> { %2194 = vrot.lane.b32.xlu2 %v4774_v40, %s7505_s14  ;;  %2247 = vrot.lane.b32.xlu0 %v4778_v61, %s7500_s13  ;;  %4756 = vst [vmem:[%s6669_s15 + $0x38] sm:$0xff] %v2086_v62  ;;  %s6821_s15 = smov [#allocation17]  ;;  %v4821_v17 = vld [vmem:[%s6837_s9 + $0x18] sm:$0xff] }
 0x3d7   : >> { %2230 = vrot.lane.b32.xlu1 %v6730_v63, %s7505_s14  ;;  %v4825_v19 = vld [vmem:[%s6853_s6 + $0x20] sm:$0xff]  ;;  %v4829_v22 = vld [vmem:[%s6865_s11 + $0x28] sm:$0xff] }
 0x3dd   : >> { %v6805_v11 = vld [vmem:[%s6799_s29] sm:$0xff]  ;;  %v6817_v12 = vld [vmem:[%s6811_s1 + $0x8] sm:$0xff]  ;;  %v6826_v13 = vld [vmem:[%s6821_s15 + $0x18] sm:$0xff] }
 0x3de   : >> { %2226 = vrot.lane.b32.xlu2 %v4778_v61, %s7505_s14  ;;  %2279 = vrot.lane.b32.xlu0 %v4782_v0, %s7500_s13  ;;  %v6843_v16 = vld [vmem:[%s6835_s4 + $0x20] sm:$0xff]  ;;  %v6856_v18 = vld [vmem:[%s6851_s8 + $0x28] sm:$0xff]  ;;  %s6875_s8 = smov [#allocation17]  ;;  %s6877_s4 = smov [#allocation18] }
 0x3df   : >> { %2262 = vrot.lane.b32.xlu1 %v6745_v1, %s7505_s14  ;;  %v6868_v21 = vld [vmem:[%s6863_s10 + $0x30] sm:$0xff]  ;;  %7518 = sst [smem:[#allocation35_spill]] %s6875_s8  ;;  %v6880_v24 = vld [vmem:[%s6875_s8 + $0x38] sm:$0xff]  ;;  %s7519_s8 = smov 1  }
 0x3e0   : >> { %v4833_v25 = vld [vmem:[%s6877_s4 + $0x30] sm:$0xff] }
 0x3e6   : >> { %2258 = vrot.lane.b32.xlu2 %v4782_v0, %s7505_s14  ;;  %2311 = vrot.lane.b32.xlu0 %v4786_v2, %s7500_s13 }
 0x3e7   : >> { %2294 = vrot.lane.b32.xlu1 %v6757_v4, %s7505_s14 }
 0x3ee   : >> { %2290 = vrot.lane.b32.xlu2 %v4786_v2, %s7505_s14  ;;  %2343 = vrot.lane.b32.xlu0 %v4790_v5, %s7500_s13 }
 0x3ef   : >> { %2326 = vrot.lane.b32.xlu1 %v6769_v60, %s7505_s14 }
 0x3f6   : >> { %2322 = vrot.lane.b32.xlu2 %v4790_v5, %s7505_s14  ;;  %2375 = vrot.lane.b32.xlu0 %v4794_v6, %s7500_s13 }
 0x3f7   : >> { %2358 = vrot.lane.b32.xlu1 %v6781_v7, %s7505_s14 }
 0x3fe   : >> { %2354 = vrot.lane.b32.xlu2 %v4794_v6, %s7505_s14  ;;  %2407 = vrot.lane.b32.xlu0 %v4798_v3, %s7500_s13 }
 0x3ff   : >> { %2390 = vrot.lane.b32.xlu1 %v6793_v8, %s7505_s14 }
 0x406   : >> { %2386 = vrot.lane.b32.xlu2 %v4798_v3, %s7505_s14  ;;  %2453 = vrot.lane.b32.xlu0 %v2452_v9, %s7500_s13 }
 0x407   : >> { %2436 = vrot.lane.b32.xlu1 %v6805_v11, %s7505_s14 }
 0x40e   : >> { %2432 = vrot.lane.b32.xlu2 %v2452_v9, %s7505_s14  ;;  %2485 = vrot.lane.b32.xlu0 %v4816_v10, %s7500_s13  ;;  %s6833_s13 = smov [#allocation17] }
 0x40f   : >> { %2468 = vrot.lane.b32.xlu1 %v6817_v12, %s7505_s14  ;;  %v6840_v15 = vld [vmem:[%s6833_s13 + $0x10] sm:$0xff] }
 0x416   : >> { %2464 = vrot.lane.b32.xlu2 %v4816_v10, %s7505_s14  ;;  %2532 = vrot.lane.b32.xlu0 %v6826_v13, %s7505_s14 }
 0x417   : >> { %2496 = vrot.lane.b32.xlu1 %v4817_v14, %s7505_s14 }
 0x41e   : >> { %2500 = vrot.lane.b32.xlu2 %v6840_v15, %s7505_s14  ;;  %2564 = vrot.lane.b32.xlu0 %v6843_v16, %s7505_s14 }
 0x41f   : >> { %2528 = vrot.lane.b32.xlu1 %v4821_v17, %s7505_s14 }
 0x426   : >> { %2517 = vrot.lane.b32.xlu2 %v4817_v14, %s7517_s7  ;;  %2596 = vrot.lane.b32.xlu0 %v6856_v18, %s7505_s14 }
 0x427   : >> { %2560 = vrot.lane.b32.xlu1 %v4825_v19, %s7505_s14 }
 0x428   : >> { %v2167_v20 = vpop.permute.xlu2 %2166 }
 0x429   : >> { %v2171_v53 = vsel %vm2170_vm5, %v6693_v37, %v2167_v20 }
 0x42e   : >> { %2549 = vrot.lane.b32.xlu2 %v4821_v17, %s7517_s7  ;;  %2628 = vrot.lane.b32.xlu0 %v6868_v21, %s7505_s14 }
 0x42f   : >> { %2592 = vrot.lane.b32.xlu1 %v4829_v22, %s7505_s14 }
 0x430   : >> { %v2195_v23 = vpop.permute.xlu2 %2194 }
 0x436   : >> { %2581 = vrot.lane.b32.xlu2 %v4825_v19, %s7517_s7  ;;  %2660 = vrot.lane.b32.xlu0 %v6880_v24, %s7505_s14 }
 0x437   : >> { %2624 = vrot.lane.b32.xlu1 %v4833_v25, %s7505_s14  ;;  %s6899_s14 = smov [#allocation18] }
 0x438   : >> { %v2227_v26 = vpop.permute.xlu2 %2226  ;;  %v2184_v52 = vpop.permute.xlu0 %2183  ;;  %v4840_v31 = vld [vmem:[%s6899_s14 + $0x38] sm:$0xff] }
 0x439   : >> { %v2188_v27 = vsel %vm2187_vm6, %v6693_v37, %v2184_v52  ;;  %v2163_v28 = vpop.permute.xlu1 %2162 }
 0x43a   : >> { %2414 = vst [vmem:[%s6626_s12] sm:$0xff] %v2188_v27  ;;  %v2175_v29 = vsel %vm2174_vm7, %v2163_v28, %v2171_v53 }
 0x43b   : >> { %v2181_v30 = vsel %vm4127_vm0, %v2175_v29, 0.0 }
 0x43c   : >> { %2413 = vst [vmem:[%s6677_s16] sm:$0xff] %v2181_v30 }
 0x43e   : >> { %2613 = vrot.lane.b32.xlu2 %v4829_v22, %s7517_s7  ;;  %2677 = vrot.lane.b32.xlu0 %v4840_v31, %s7517_s7 }
 0x43f   : >> { %2656 = vrot.lane.b32.xlu1 %v4840_v31, %s7519_s8  ;;  %s7031_s8 = smov [#allocation15] }
 0x440   : >> { %v2259_v32 = vpop.permute.xlu2 %2258  ;;  %v2216_v33 = vpop.permute.xlu0 %2215 }
 0x441   : >> { %v2220_v34 = vsel %vm2187_vm6, %v6705_v44, %v2216_v33  ;;  %v2199_v35 = vpop.permute.xlu1 %2198 }
 0x442   : >> { %4800 = vst [vmem:[%s6679_s17 + $0x8] sm:$0xff] %v2220_v34  ;;  %v2203_v36 = vsel %vm2170_vm5, %v6705_v44, %v2199_v35 }
 0x443   : >> { %v2207_v37 = vsel %vm2174_vm7, %v2195_v23, %v2203_v36 }
 0x444   : >> { %v2213_v40 = vsel %vm4127_vm0, %v2207_v37, 0.0 }
 0x445   : >> { %4799 = vst [vmem:[%s6686_s2 + $0x8] sm:$0xff] %v2213_v40 }
 0x446   : >> { %2645 = vrot.lane.b32.xlu2 %v4833_v25, %s7517_s7  ;;  %s6997_s7 = smov [#allocation16] }
 0x448   : >> { %v2291_v41 = vpop.permute.xlu2 %2290  ;;  %v2248_v42 = vpop.permute.xlu0 %2247 }
 0x449   : >> { %v2252_v43 = vsel %vm2187_vm6, %v6730_v63, %v2248_v42  ;;  %v2231_v45 = vpop.permute.xlu1 %2230 }
 0x44a   : >> { %4802 = vst [vmem:[%s6717_s18 + $0x10] sm:$0xff] %v2252_v43  ;;  %v2235_v44 = vsel %vm2170_vm5, %v6730_v63, %v2231_v45 }
 0x44b   : >> { %v2239_v46 = vsel %vm2174_vm7, %v2227_v26, %v2235_v44 }
 0x44c   : >> { %v2245_v47 = vsel %vm4127_vm0, %v2239_v46, 0.0 }
 0x44d   : >> { %4801 = vst [vmem:[%s6721_s19 + $0x10] sm:$0xff] %v2245_v47 }
 0x450   : >> { %v2323_v48 = vpop.permute.xlu2 %2322  ;;  %v2280_v49 = vpop.permute.xlu0 %2279 }
 0x451   : >> { %v2284_v50 = vsel %vm2187_vm6, %v6745_v1, %v2280_v49  ;;  %v2263_v51 = vpop.permute.xlu1 %2262 }
 0x452   : >> { %4804 = vst [vmem:[%s6737_s20 + $0x18] sm:$0xff] %v2284_v50  ;;  %v2267_v54 = vsel %vm2170_vm5, %v6745_v1, %v2263_v51 }
 0x453   : >> { %v2271_v55 = vsel %vm2174_vm7, %v2259_v32, %v2267_v54 }
 0x454   : >> { %v2277_v56 = vsel %vm4127_vm0, %v2271_v55, 0.0 }
 0x455   : >> { %4803 = vst [vmem:[%s6739_s21 + $0x18] sm:$0xff] %v2277_v56 }
 0x458   : >> { %v2355_v57 = vpop.permute.xlu2 %2354  ;;  %v2312_v58 = vpop.permute.xlu0 %2311 }
 0x459   : >> { %v2316_v59 = vsel %vm2187_vm6, %v6757_v4, %v2312_v58  ;;  %v2295_v61 = vpop.permute.xlu1 %2294 }
 0x45a   : >> { %4806 = vst [vmem:[%s6749_s3 + $0x20] sm:$0xff] %v2316_v59  ;;  %v2299_v62 = vsel %vm2170_vm5, %v6757_v4, %v2295_v61 }
 0x45b   : >> { %v2303_v63 = vsel %vm2174_vm7, %v2291_v41, %v2299_v62 }
 0x45c   : >> { %v2309_v0 = vsel %vm4127_vm0, %v2303_v63, 0.0 }
 0x45d   : >> { %4805 = vst [vmem:[%s6751_s22 + $0x20] sm:$0xff] %v2309_v0 }
 0x460   : >> { %v2387_v1 = vpop.permute.xlu2 %2386  ;;  %v2344_v2 = vpop.permute.xlu0 %2343 }
 0x461   : >> { %v2348_v5 = vsel %vm2187_vm6, %v6769_v60, %v2344_v2  ;;  %v2327_v6 = vpop.permute.xlu1 %2326 }
 0x462   : >> { %4808 = vst [vmem:[%s6761_s0 + $0x28] sm:$0xff] %v2348_v5  ;;  %v2331_v4 = vsel %vm2170_vm5, %v6769_v60, %v2327_v6 }
 0x463   : >> { %v2335_v3 = vsel %vm2174_vm7, %v2323_v48, %v2331_v4 }
 0x464   : >> { %v2341_v9 = vsel %vm4127_vm0, %v2335_v3, 0.0 }
 0x465   : >> { %4807 = vst [vmem:[%s6763_s23 + $0x28] sm:$0xff] %v2341_v9 }
 0x468   : >> { %v6969_v10 = vpop.permute.xlu2 %2432  ;;  %v2376_v14 = vpop.permute.xlu0 %2375 }
 0x469   : >> { %v2380_v17 = vsel %vm2187_vm6, %v6781_v7, %v2376_v14  ;;  %v2359_v19 = vpop.permute.xlu1 %2358 }
 0x46a   : >> { %4810 = vst [vmem:[%s6773_s24 + $0x30] sm:$0xff] %v2380_v17  ;;  %v2363_v60 = vsel %vm2170_vm5, %v6781_v7, %v2359_v19 }
 0x46b   : >> { %v2367_v20 = vsel %vm2174_vm7, %v2355_v57, %v2363_v60 }
 0x46c   : >> { %v2373_v22 = vsel %vm4127_vm0, %v2367_v20, 0.0 }
 0x46d   : >> { %4809 = vst [vmem:[%s6775_s25 + $0x30] sm:$0xff] %v2373_v22 }
 0x470   : >> { %v6983_v23 = vpop.permute.xlu2 %2464  ;;  %v2408_v25 = vpop.permute.xlu0 %2407 }
 0x471   : >> { %v2412_v26 = vsel %vm2187_vm6, %v6793_v8, %v2408_v25  ;;  %v2391_v52 = vpop.permute.xlu1 %2390 }
 0x472   : >> { %4812 = vst [vmem:[%s6785_s26 + $0x38] sm:$0xff] %v2412_v26  ;;  %v2395_v7 = vsel %vm2170_vm5, %v6793_v8, %v2391_v52 }
 0x473   : >> { %v2399_v53 = vsel %vm2174_vm7, %v2387_v1, %v2395_v7 }
 0x474   : >> { %v2405_v27 = vsel %vm4127_vm0, %v2399_v53, 0.0 }
 0x475   : >> { %4811 = vst [vmem:[%s6787_s27 + $0x38] sm:$0xff] %v2405_v27 }
 0x478   : >> { %v6999_v28 = vpop.permute.xlu2 %2500  ;;  %v2454_v8 = vpop.permute.xlu0 %2453 }
 0x479   : >> { %v2865_v29 = vld [vmem:[%s6997_s7] ss:$0 sm:$0xff]  ;;  %v4902_v31 = vld [vmem:[%s6997_s7 + $0x7] ss:$0 sm:$0xff]  ;;  %v2458_v32 = vsel %vm2187_vm6, %v6805_v11, %v2454_v8  ;;  %v2437_v33 = vpop.permute.xlu1 %2436  ;;  %v4903_v35 = vld [vmem:[%s6997_s7 + $0x7] sm:$0xfe] }
 0x47a   : >> { %v4901_v30 = vld [vmem:[%s6997_s7 - $0x1] sm:$0xfe]  ;;  %v4904_v36 = vld [vmem:[%s6997_s7 + $0xf] ss:$0 sm:$0xff]  ;;  %v4906_v37 = vld [vmem:[%s6997_s7 + $0xf] sm:$0xfe]  ;;  %2684 = vst [vmem:[%s6797_s28] sm:$0xff] %v2458_v32  ;;  %v2883_v40 = vsel %vm2707_vm12, %v4902_v31, %v4903_v35  ;;  %v2441_v53 = vsel %vm2170_vm5, %v6805_v11, %v2437_v33 }
 0x47b   : >> { %v2872_v34 = vsel %vm2707_vm12, %v2865_v29, %v4901_v30  ;;  %v2894_v41 = vsel %vm2707_vm12, %v4904_v36, %v4906_v37  ;;  %v4907_v42 = vld [vmem:[%s6997_s7 + $0x17] ss:$0 sm:$0xff]  ;;  %v4909_v43 = vld [vmem:[%s6997_s7 + $0x17] sm:$0xfe]  ;;  %v4910_v45 = vld [vmem:[%s6997_s7 + $0x1f] ss:$0 sm:$0xff]  ;;  %v2445_v33 = vsel %vm2174_vm7, %v6969_v10, %v2441_v53 }
 0x47c   : >> { %2875 = vst [vmem:[%s6997_s7] sm:$0xff] %v2872_v34  ;;  %v2905_v44 = vsel %vm2707_vm12, %v4907_v42, %v4909_v43  ;;  %v4912_v46 = vld [vmem:[%s6997_s7 + $0x1f] sm:$0xfe]  ;;  %v4913_v47 = vld [vmem:[%s6997_s7 + $0x27] ss:$0 sm:$0xff]  ;;  %v4915_v49 = vld [vmem:[%s6997_s7 + $0x27] sm:$0xfe] }
 0x47d   : >> { %4905 = vst [vmem:[%s6997_s7 + $0x8] sm:$0xff] %v2883_v40  ;;  %v2916_v48 = vsel %vm2707_vm12, %v4910_v45, %v4912_v46  ;;  %v4916_v50 = vld [vmem:[%s6997_s7 + $0x2f] ss:$0 sm:$0xff]  ;;  %v2927_v51 = vsel %vm2707_vm12, %v4913_v47, %v4915_v49  ;;  %v4918_v54 = vld [vmem:[%s6997_s7 + $0x2f] sm:$0xfe]  ;;  %v2505_v40 = vsel %vm2170_vm5, %v6840_v15, %v6999_v28  ;;  %v2451_v42 = vsel %vm4127_vm0, %v2445_v33, 0.0 }
 0x47e   : >> { %4908 = vst [vmem:[%s6997_s7 + $0x10] sm:$0xff] %v2894_v41  ;;  %v4919_v55 = vld [vmem:[%s6997_s7 + $0x37] ss:$0 sm:$0xff]  ;;  %v2938_v56 = vsel %vm2707_vm12, %v4916_v50, %v4918_v54  ;;  %v4921_v57 = vld [vmem:[%s6997_s7 + $0x37] sm:$0xfe] }
 0x47f   : >> { %4911 = vst [vmem:[%s6997_s7 + $0x18] sm:$0xff] %v2905_v44  ;;  %v7043_v58 = vld [vmem:[%s6997_s7 + $0x3f] ss:$0 sm:$0xff]  ;;  %v2949_v59 = vsel %vm2707_vm12, %v4919_v55, %v4921_v57  ;;  %v2701_v61 = vld [vmem:[%s7031_s8] ss:$0 sm:$0xff] }
 0x480   : >> { %4914 = vst [vmem:[%s6997_s7 + $0x20] sm:$0xff] %v2916_v48  ;;  %v4855_v62 = vld [vmem:[%s7031_s8 - $0x1] sm:$0xfe]  ;;  %v2518_v63 = vpop.permute.xlu2 %2517  ;;  %v2486_v0 = vpop.permute.xlu0 %2485  ;;  %v4856_v2 = vld [vmem:[%s7031_s8 + $0x7] ss:$0 sm:$0xff] }
 0x481   : >> { %4917 = vst [vmem:[%s6997_s7 + $0x28] sm:$0xff] %v2927_v51  ;;  %v2708_v1 = vsel %vm2707_vm12, %v2701_v61, %v4855_v62  ;;  %v4857_v5 = vld [vmem:[%s7031_s8 + $0x7] sm:$0xfe]  ;;  %v2469_v6 = vpop.permute.xlu1 %2468  ;;  %v4858_v3 = vld [vmem:[%s7031_s8 + $0xf] ss:$0 sm:$0xff]  ;;  %v2490_v35 = vsel %vm2187_vm6, %v6817_v12, %v2486_v0  ;;  %v2522_v43 = vsel %vm2187_vm6, %v6840_v15, %v2518_v63 }
 0x482   : >> { %4920 = vst [vmem:[%s6997_s7 + $0x30] sm:$0xff] %v2938_v56  ;;  %v2719_v4 = vsel %vm2707_vm12, %v4856_v2, %v4857_v5  ;;  %v4860_v9 = vld [vmem:[%s7031_s8 + $0xf] sm:$0xfe]  ;;  %v4861_v17 = vld [vmem:[%s7031_s8 + $0x17] ss:$0 sm:$0xff]  ;;  %v2473_v30 = vsel %vm2170_vm5, %v6817_v12, %v2469_v6 }
 0x483   : >> { %4923 = vst [vmem:[%s6997_s7 + $0x38] sm:$0xff] %v2949_v59  ;;  %v2730_v14 = vsel %vm2707_vm12, %v4858_v3, %v4860_v9  ;;  %v4863_v19 = vld [vmem:[%s7031_s8 + $0x17] sm:$0xfe]  ;;  %v4864_v60 = vld [vmem:[%s7031_s8 + $0x1f] ss:$0 sm:$0xff]  ;;  %v2477_v41 = vsel %vm2174_vm7, %v6983_v23, %v2473_v30 }
 0x484   : >> { %2711 = vst [vmem:[%s7031_s8] sm:$0xff] %v2708_v1  ;;  %v2741_v20 = vsel %vm2707_vm12, %v4861_v17, %v4863_v19  ;;  %v4866_v22 = vld [vmem:[%s7031_s8 + $0x1f] sm:$0xfe]  ;;  %v4867_v25 = vld [vmem:[%s7031_s8 + $0x27] ss:$0 sm:$0xff]  ;;  %v4869_v52 = vld [vmem:[%s7031_s8 + $0x27] sm:$0xfe] }
 0x485   : >> { %4859 = vst [vmem:[%s7031_s8 + $0x8] sm:$0xff] %v2719_v4  ;;  %v2752_v26 = vsel %vm2707_vm12, %v4864_v60, %v4866_v22  ;;  %v4870_v7 = vld [vmem:[%s7031_s8 + $0x2f] ss:$0 sm:$0xff]  ;;  %v2763_v27 = vsel %vm2707_vm12, %v4867_v25, %v4869_v52  ;;  %v4872_v8 = vld [vmem:[%s7031_s8 + $0x2f] sm:$0xfe]  ;;  %v2483_v23 = vsel %vm4127_vm0, %v2477_v41, 0.0 }
 0x486   : >> { %4862 = vst [vmem:[%s7031_s8 + $0x10] sm:$0xff] %v2730_v14  ;;  %v4873_v29 = vld [vmem:[%s7031_s8 + $0x37] ss:$0 sm:$0xff]  ;;  %v2774_v31 = vsel %vm2707_vm12, %v4870_v7, %v4872_v8  ;;  %v4875_v32 = vld [vmem:[%s7031_s8 + $0x37] sm:$0xfe] }
 0x487   : >> { %4865 = vst [vmem:[%s7031_s8 + $0x18] sm:$0xff] %v2741_v20  ;;  %v7092_v34 = vld [vmem:[%s7031_s8 + $0x3f] ss:$0 sm:$0xff]  ;;  %v2785_v11 = vsel %vm2707_vm12, %v4873_v29, %v4875_v32 }
 0x488   : >> { %4868 = vst [vmem:[%s7031_s8 + $0x20] sm:$0xff] %v2752_v26  ;;  %v2550_v36 = vpop.permute.xlu2 %2549  ;;  %v2533_v37 = vpop.permute.xlu0 %2532 }
 0x489   : >> { %4871 = vst [vmem:[%s7031_s8 + $0x28] sm:$0xff] %v2763_v27  ;;  %v2497_v10 = vpop.permute.xlu1 %2496  ;;  %v2554_v28 = vsel %vm2187_vm6, %v6826_v13, %v2550_v36  ;;  %v2537_v15 = vsel %vm2170_vm5, %v6826_v13, %v2533_v37 }
 0x48a   : >> { %4874 = vst [vmem:[%s7031_s8 + $0x30] sm:$0xff] %v2774_v31  ;;  %v2509_v12 = vsel %vm2174_vm7, %v2497_v10, %v2505_v40 }
 0x48b   : >> { %4877 = vst [vmem:[%s7031_s8 + $0x38] sm:$0xff] %v2785_v11  ;;  %v2515_v45 = vsel %vm4127_vm0, %v2509_v12, 0.0 }
 0x48c   : >> { %4842 = vst [vmem:[%s6809_s30 + $0x8] sm:$0xff] %v2490_v35 }
 0x48d   : >> { %4844 = vst [vmem:[%s6823_s5 + $0x10] sm:$0xff] %v2522_v43  ;;  %s7520_s5 = sld [smem:[#allocation33_spill]] }
 0x48e   : >> { %4846 = vst [vmem:[%s6837_s9 + $0x18] sm:$0xff] %v2554_v28  ;;  %s7521_s9 = sld [smem:[#allocation34_spill]] }
 0x48f   : >> { %2683 = vst [vmem:[%s6799_s29] sm:$0xff] %v2451_v42 }
 0x490   : >> { %4841 = vst [vmem:[%s6811_s1 + $0x8] sm:$0xff] %v2483_v23  ;;  %v2582_v44 = vpop.permute.xlu2 %2581  ;;  %v2565_v46 = vpop.permute.xlu0 %2564 }
 0x491   : >> { %4843 = vst [vmem:[%s6833_s13 + $0x10] sm:$0xff] %v2515_v45  ;;  %v2586_v47 = vsel %vm2187_vm6, %v6843_v16, %v2582_v44  ;;  %v2529_v48 = vpop.permute.xlu1 %2528  ;;  %v2569_v13 = vsel %vm2170_vm5, %v6843_v16, %v2565_v46 }
 0x492   : >> { %4848 = vst [vmem:[%s6853_s6 + $0x20] sm:$0xff] %v2586_v47  ;;  %v2541_v49 = vsel %vm2174_vm7, %v2529_v48, %v2537_v15  ;;  %s7522_s6 = sld [smem:[#allocation35_spill]] }
 0x493   : >> { %v2547_v50 = vsel %vm4127_vm0, %v2541_v49, 0.0 }
 0x494   : >> { %4845 = vst [vmem:[%s6821_s15 + $0x18] sm:$0xff] %v2547_v50 }
 0x498   : >> { %v2614_v51 = vpop.permute.xlu2 %2613  ;;  %v2597_v54 = vpop.permute.xlu0 %2596 }
 0x499   : >> { %v2618_v55 = vsel %vm2187_vm6, %v6856_v18, %v2614_v51  ;;  %v2561_v56 = vpop.permute.xlu1 %2560  ;;  %v2601_v16 = vsel %vm2170_vm5, %v6856_v18, %v2597_v54 }
 0x49a   : >> { %4850 = vst [vmem:[%s6865_s11 + $0x28] sm:$0xff] %v2618_v55  ;;  %v2573_v57 = vsel %vm2174_vm7, %v2561_v56, %v2569_v13  ;;  %s7523_s11 = sld [smem:[#allocation32_spill]] }
 0x49b   : >> { %v2579_v59 = vsel %vm4127_vm0, %v2573_v57, 0.0 }
 0x49c   : >> { %4847 = vst [vmem:[%s7520_s5 + $0x20] sm:$0xff] %v2579_v59 }
 0x4a0   : >> { %v2646_v61 = vpop.permute.xlu2 %2645  ;;  %v2629_v62 = vpop.permute.xlu0 %2628  ;;  %s873_s11 = sadd.s32 1, %s7523_s11  }
 0x4a1   : >> { %v2650_v63 = vsel %vm2187_vm6, %v6868_v21, %v2646_v61  ;;  %v2593_v0 = vpop.permute.xlu1 %2592  ;;  %v2633_v18 = vsel %vm2170_vm5, %v6868_v21, %v2629_v62  ;;  %p870_p9 = scmp.ge.s32.totalorder %s873_s11, 127  }
 0x4a2   : >> { %4852 = vst [vmem:[%s6877_s4 + $0x30] sm:$0xff] %v2650_v63  ;;  %v2605_v1 = vsel %vm2174_vm7, %v2593_v0, %v2601_v16  ;;  %s7188_s4 = smov [#allocation18]  ;;  %s554_s13 = smov (%p870_p9), [#allocation15]  ;;  %v639_v39 = vmov (%p870_p9), %v5777_v39  ;;  %v642_v38 = vmov (%p870_p9), %v5775_v38 }
 0x4a3   : >> { %v2611_v2 = vsel %vm4127_vm0, %v2605_v1, 0.0  ;;  %v698_v39 = vmov (%p870_p9), %v5777_v39  ;;  %v701_v38 = vmov (%p870_p9), %v5775_v38  ;;  %s7333_s16 = smov (%p870_p9), [#allocation17]  ;;  %s7363_s17 = smov (%p870_p9), [#allocation18] }
 0x4a4   : >> { %4849 = vst [vmem:[%s7521_s9 + $0x28] sm:$0xff] %v2611_v2  ;;  %v7302_v39 = vmov (%p870_p9), %v5777_v39  ;;  %v553_v38 = vmov (%p870_p9), %v5775_v38 }
 0x4a5   : > { %vm565_vm12 = vcmp.eq.s32.totalorder (%p870_p9), %v553_v38, %v7302_v39 }
 0x4a8   : >> { %v2661_v5 = vpop.permute.xlu0 %2660 }
 0x4a9   : >> { %v2625_v6 = vpop.permute.xlu1 %2624  ;;  %v2665_v14 = vsel %vm2170_vm5, %v6880_v24, %v2661_v5 }
 0x4aa   : >> { %v2637_v4 = vsel %vm2174_vm7, %v2625_v6, %v2633_v18 }
 0x4ab   : >> { %v2643_v3 = vsel %vm4127_vm0, %v2637_v4, 0.0 }
 0x4ac   : >> { %4851 = vst [vmem:[%s6863_s10 + $0x30] sm:$0xff] %v2643_v3  ;;  %s7214_s10 = smov [#allocation17] }
 0x4b0   : >> { %v2678_v9 = vpop.permute.xlu0 %2677 }
 0x4b1   : >> { %v2682_v17 = vsel %vm2187_vm6, %v6880_v24, %v2678_v9  ;;  %v2657_v19 = vpop.permute.xlu1 %2656 }
 0x4b2   : >> { %4854 = vst [vmem:[%s6899_s14 + $0x38] sm:$0xff] %v2682_v17  ;;  %v2669_v21 = vsel %vm2174_vm7, %v2657_v19, %v2665_v14  ;;  %s7296_s14 = smov (%p870_p9), [#allocation16] }
 0x4b3   : >> { %v2675_v60 = vsel %vm4127_vm0, %v2669_v21, 0.0 }
 0x4b4   : >> { %4853 = vst [vmem:[%s7522_s6 + $0x38] sm:$0xff] %v2675_v60 }
 0x4b9   : >> { %v2953_v24 = vld [vmem:[%s7188_s4] ss:$0 sm:$0xff]  ;;  %v4925_v20 = vld [vmem:[%s7188_s4 + $0x39] sm:$0x7f]  ;;  %v4926_v22 = vld [vmem:[%s7188_s4 + $0x38] ss:$0 sm:$0xff] }
 0x4ba   : >> { %4924 = vst [vmem:[%s6997_s7 + $0x1] sm:$0x1] %v2953_v24  ;;  %v2962_v25 = vsel %vm2797_vm13, %v7043_v58, %v4925_v20  ;;  %v4928_v26 = vld [vmem:[%s7188_s4 + $0x31] sm:$0x7f]  ;;  %v4929_v52 = vld [vmem:[%s7188_s4 + $0x30] ss:$0 sm:$0xff] }
 0x4bb   : >> { %4927 = vst [vmem:[%s7188_s4 + $0x38] sm:$0xff] %v2962_v25  ;;  %v2971_v7 = vsel %vm2797_vm13, %v4926_v22, %v4928_v26  ;;  %v4931_v53 = vld [vmem:[%s7188_s4 + $0x29] sm:$0x7f]  ;;  %v4932_v27 = vld [vmem:[%s7188_s4 + $0x28] ss:$0 sm:$0xff] }
 0x4bc   : >> { %4930 = vst [vmem:[%s7188_s4 + $0x30] sm:$0xff] %v2971_v7  ;;  %v2980_v8 = vsel %vm2797_vm13, %v4929_v52, %v4931_v53  ;;  %v4934_v58 = vld [vmem:[%s7188_s4 + $0x21] sm:$0x7f]  ;;  %v4935_v29 = vld [vmem:[%s7188_s4 + $0x20] ss:$0 sm:$0xff] }
 0x4bd   : >> { %4933 = vst [vmem:[%s7188_s4 + $0x28] sm:$0xff] %v2980_v8  ;;  %v2989_v30 = vsel %vm2797_vm13, %v4932_v27, %v4934_v58  ;;  %v4937_v31 = vld [vmem:[%s7188_s4 + $0x19] sm:$0x7f]  ;;  %v4938_v32 = vld [vmem:[%s7188_s4 + $0x18] ss:$0 sm:$0xff] }
 0x4be   : >> { %4936 = vst [vmem:[%s7188_s4 + $0x20] sm:$0xff] %v2989_v30  ;;  %v2998_v11 = vsel %vm2797_vm13, %v4935_v29, %v4937_v31  ;;  %v4940_v33 = vld [vmem:[%s7188_s4 + $0x11] sm:$0x7f]  ;;  %v4941_v35 = vld [vmem:[%s7188_s4 + $0x10] ss:$0 sm:$0xff] }
 0x4bf   : >> { %4939 = vst [vmem:[%s7188_s4 + $0x18] sm:$0xff] %v2998_v11  ;;  %v3007_v36 = vsel %vm2797_vm13, %v4938_v32, %v4940_v33  ;;  %v4943_v37 = vld [vmem:[%s7188_s4 + $0x9] sm:$0x7f]  ;;  %v4944_v40 = vld [vmem:[%s7188_s4 + $0x8] ss:$0 sm:$0xff]  ;;  %v572_v33 = vadd.s32 (%p870_p9), 8, %v553_v38 }
 0x4c0   : >> { %4942 = vst [vmem:[%s7188_s4 + $0x10] sm:$0xff] %v3007_v36  ;;  %v3016_v41 = vsel %vm2797_vm13, %v4941_v35, %v4943_v37  ;;  %v4946_v10 = vld [vmem:[%s7188_s4 + $0x1] sm:$0x7f]  ;;  %v2789_v12 = vld [vmem:[%s7214_s10] ss:$0 sm:$0xff] }
 0x4c1   : >> { %4945 = vst [vmem:[%s7188_s4 + $0x8] sm:$0xff] %v3016_v41  ;;  %v3024_v42 = vsel %vm2797_vm13, %v4944_v40, %v4946_v10  ;;  %v4879_v43 = vld [vmem:[%s7214_s10 + $0x39] sm:$0x7f]  ;;  %v4880_v23 = vld [vmem:[%s7214_s10 + $0x38] ss:$0 sm:$0xff]  ;;  %v649_v58 = vld [vmem:[%s7296_s14] sm:$0xff] (%p870_p9) }
 0x4c2   : >> { %3026 = vst [vmem:[%s7188_s4] sm:$0xff] %v3024_v42  ;;  %v2798_v28 = vsel %vm2797_vm13, %v7092_v34, %v4879_v43  ;;  %v4882_v45 = vld [vmem:[%s7214_s10 + $0x31] sm:$0x7f]  ;;  %v4883_v44 = vld [vmem:[%s7214_s10 + $0x30] ss:$0 sm:$0xff]  ;;  %v4885_v46 = vld [vmem:[%s7214_s10 + $0x29] sm:$0x7f] }
 0x4c3   : >> { %4878 = vst [vmem:[%s7031_s8 + $0x1] sm:$0x1] %v2789_v12  ;;  %v2807_v15 = vsel %vm2797_vm13, %v4880_v23, %v4882_v45  ;;  %v2816_v47 = vsel %vm2797_vm13, %v4883_v44, %v4885_v46  ;;  %v4886_v48 = vld [vmem:[%s7214_s10 + $0x28] ss:$0 sm:$0xff]  ;;  %v4888_v49 = vld [vmem:[%s7214_s10 + $0x21] sm:$0x7f] }
 0x4c4   : >> { %4881 = vst [vmem:[%s7214_s10 + $0x38] sm:$0xff] %v2798_v28  ;;  %v2825_v34 = vsel %vm2797_vm13, %v4886_v48, %v4888_v49  ;;  %v4889_v50 = vld [vmem:[%s7214_s10 + $0x20] ss:$0 sm:$0xff]  ;;  %v4891_v51 = vld [vmem:[%s7214_s10 + $0x19] sm:$0x7f]  ;;  %v5116_v32 = vld [vmem:[%s7296_s14 + $0x8] sm:$0xff] (%p870_p9) }
 0x4c5   : >> { %4884 = vst [vmem:[%s7214_s10 + $0x30] sm:$0xff] %v2807_v15  ;;  %v2834_v54 = vsel %vm2797_vm13, %v4889_v50, %v4891_v51  ;;  %v4892_v13 = vld [vmem:[%s7214_s10 + $0x18] ss:$0 sm:$0xff]  ;;  %v4894_v55 = vld [vmem:[%s7214_s10 + $0x11] sm:$0x7f]  ;;  %v650_v11 = vsel (%p870_p9), %vm4127_vm0, %v649_v58, 0.0 }
 0x4c6   : >> { %4887 = vst [vmem:[%s7214_s10 + $0x28] sm:$0xff] %v2816_v47  ;;  %v2843_v56 = vsel %vm2797_vm13, %v4892_v13, %v4894_v55  ;;  %v4895_v57 = vld [vmem:[%s7214_s10 + $0x10] ss:$0 sm:$0xff]  ;;  %v4897_v59 = vld [vmem:[%s7214_s10 + $0x9] sm:$0x7f]  ;;  %v656_v40 = vsel (%p870_p9), %vm4127_vm0, %v5116_v32, 0.0  ;;  %v7314_v10 = vmul.f32 (%p870_p9), %v650_v11, %v650_v11 }
 0x4c7   : >> { %4890 = vst [vmem:[%s7214_s10 + $0x20] sm:$0xff] %v2825_v34  ;;  %v2852_v61 = vsel %vm2797_vm13, %v4895_v57, %v4897_v59  ;;  %v4898_v62 = vld [vmem:[%s7214_s10 + $0x8] ss:$0 sm:$0xff]  ;;  %v4900_v16 = vld [vmem:[%s7214_s10 + $0x1] sm:$0x7f]  ;;  %872 = sbr.rel (!%p870_p9) target bundleno = 399 (0x18f), region = 802  ;;  %v657_v44 = vmul.f32 (%p870_p9), %v656_v40, %v656_v40 }
 0x4c8   : >> { %4893 = vst [vmem:[%s7214_s10 + $0x18] sm:$0xff] %v2834_v54  ;;  %v2860_v63 = vsel %vm2797_vm13, %v4898_v62, %v4900_v16  ;;  %v5117_v37 = vld [vmem:[%s7296_s14 + $0x10] sm:$0xff] (%p870_p9)  ;;  %v5118_v12 = vld [vmem:[%s7296_s14 + $0x18] sm:$0xff] (%p870_p9)  ;;  %vm573_vm13 = vcmp.eq.s32.totalorder (%p870_p9), %v572_v33, %v7302_v39  ;;  %v582_v23 = vadd.s32 (%p870_p9), 16, %v553_v38  ;;  %v592_v28 = vadd.s32 (%p870_p9), 24, %v553_v38  ;;  %v5119_v46 = vld [vmem:[%s7296_s14 + $0x20] sm:$0xff] (%p870_p9) }
 0x4c9   : >> { %4896 = vst [vmem:[%s7214_s10 + $0x10] sm:$0xff] %v2843_v56  ;;  %v662_v43 = vsel (%p870_p9), %vm4127_vm0, %v5117_v37, 0.0  ;;  %v602_v47 = vadd.s32 (%p870_p9), 32, %v553_v38  ;;  %v668_v48 = vsel (%p870_p9), %vm4127_vm0, %v5118_v12, 0.0  ;;  %v5120_v51 = vld [vmem:[%s7296_s14 + $0x28] sm:$0xff] (%p870_p9)  ;;  %v674_v55 = vsel (%p870_p9), %vm4127_vm0, %v5119_v46, 0.0 }
 0x4ca   : >> { %4899 = vst [vmem:[%s7214_s10 + $0x8] sm:$0xff] %v2852_v61  ;;  %v560_v0 = vld [vmem:[%s554_s13] sm:$0xff] (%p870_p9)  ;;  %v5109_v1 = vld [vmem:[%s554_s13 + $0x8] sm:$0xff] (%p870_p9)  ;;  %v5110_v2 = vld [vmem:[%s554_s13 + $0x10] sm:$0xff] (%p870_p9)  ;;  %vm583_vm8 = vcmp.eq.s32.totalorder (%p870_p9), %v582_v23, %v7302_v39  ;;  %vm593_vm9 = vcmp.eq.s32.totalorder (%p870_p9), %v592_v28, %v7302_v39  ;;  %v663_v50 = vmul.f32 (%p870_p9), %v662_v43, %v662_v43  ;;  %v612_v57 = vadd.s32 (%p870_p9), 40, %v553_v38 }
 0x4cb   : >> { %2862 = vst [vmem:[%s7214_s10] sm:$0xff] %v2860_v63  ;;  %s7524_s10 = sld [smem:[#allocation31_spill]] (%p870_p9)  ;;  %v561_v5 = vsel (%p870_p9), %vm4127_vm0, %v560_v0, 0.0  ;;  %v569_v18 = vsel (%p870_p9), %vm4127_vm0, %v5109_v1, 0.0  ;;  %v579_v6 = vsel (%p870_p9), %vm4127_vm0, %v5110_v2, 0.0  ;;  %v5111_v4 = vld [vmem:[%s554_s13 + $0x18] sm:$0xff] (%p870_p9)  ;;  %v5112_v3 = vld [vmem:[%s554_s13 + $0x20] sm:$0xff] (%p870_p9)  ;;  %vm603_vm10 = vcmp.eq.s32.totalorder (%p870_p9), %v602_v47, %v7302_v39 }
 0x4cc   : > { %v562_v9 = vmul.f32 %v561_v5, %v561_v5  ;;  %v570_v14 = vmul.f32 %v569_v18, %v569_v18  ;;  %v580_v17 = vmul.f32 %v579_v6, %v579_v6  ;;  %v589_v19 = vsel %vm4127_vm0, %v5111_v4, 0.0  ;;  %v5113_v21 = vld [vmem:[%s554_s13 + $0x28] sm:$0xff]  ;;  %v5114_v22 = vld [vmem:[%s554_s13 + $0x30] sm:$0xff]  ;;  %v5115_v7 = vld [vmem:[%s554_s13 + $0x38] sm:$0xff] }
 0x4cd   : > { %v599_v60 = vsel %vm4127_vm0, %v5112_v3, 0.0  ;;  %v590_v20 = vmul.f32 %v589_v19, %v589_v19  ;;  %v609_v25 = vsel %vm4127_vm0, %v5113_v21, 0.0  ;;  %v619_v53 = vsel %vm4127_vm0, %v5114_v22, 0.0  ;;  %v5121_v62 = vld [vmem:[%s7296_s14 + $0x30] sm:$0xff]  ;;  %v5122_v6 = vld [vmem:[%s7296_s14 + $0x38] sm:$0xff] }
 0x4ce   : > { %v576_v24 = vadd.f32 %v570_v14, %v562_v9  ;;  %v600_v52 = vmul.f32 %v599_v60, %v599_v60  ;;  %v610_v8 = vmul.f32 %v609_v25, %v609_v25  ;;  %v629_v29 = vsel %vm4127_vm0, %v5115_v7, 0.0 }
 0x4cf   : > { %v620_v31 = vmul.f32 %v619_v53, %v619_v53  ;;  %v630_v36 = vmul.f32 %v629_v29, %v629_v29  ;;  %v566_v42 = vsel %vm565_vm12, 0.0, %v562_v9  ;;  %v574_v15 = vsel %vm573_vm13, 0.0, %v570_v14 }
 0x4d0   : > { %v586_v26 = vadd.f32 %v580_v17, %v576_v24  ;;  %v575_v49 = vadd.f32 %v574_v15, %v566_v42  ;;  %v584_v54 = vsel %vm583_vm8, 0.0, %v580_v17  ;;  %v594_v13 = vsel %vm593_vm9, 0.0, %v590_v20 }
 0x4d1   : > { %s3621_s12 = sadd.s32 1, %s7524_s10   ;;  %v669_v61 = vmul.f32 %v668_v48, %v668_v48  ;;  %v604_v16 = vsel %vm603_vm10, 0.0, %v600_v52  ;;  %v622_v63 = vadd.s32 48, %v553_v38  ;;  %v680_v0 = vsel %vm4127_vm0, %v5120_v51, 0.0 }
 0x4d2   : > { %v596_v27 = vadd.f32 %v590_v20, %v586_v26  ;;  %v585_v56 = vadd.f32 %v584_v54, %v575_v49  ;;  %vm613_vm11 = vcmp.eq.s32.totalorder %v612_v57, %v7302_v39  ;;  %v632_v2 = vadd.s32 56, %v553_v38  ;;  %v708_v19 = vld [vmem:[%s7333_s16] sm:$0xff]  ;;  %v5123_v25 = vld [vmem:[%s7333_s16 + $0x8] sm:$0xff]  ;;  %v5125_v32 = vld [vmem:[%s7333_s16 + $0x18] sm:$0xff]  ;;  %p866_p10 = scmp.ge.s32.totalorder %s3621_s12, 15  ;;  %s7525_s10 = smov %s3621_s12 }
 0x4d3   : > { %v675_v18 = vmul.f32 %v674_v55, %v674_v55  ;;  %v614_v4 = vsel %vm613_vm11, 0.0, %v610_v8  ;;  %vm623_vm14 = vcmp.eq.s32.totalorder %v622_v63, %v7302_v39  ;;  %v686_v3 = vsel %vm4127_vm0, %v5121_v62, 0.0  ;;  %v5126_v37 = vld [vmem:[%s7333_s16 + $0x20] sm:$0xff]  ;;  %v5127_v43 = vld [vmem:[%s7333_s16 + $0x28] sm:$0xff]  ;;  %v5128_v15 = vld [vmem:[%s7333_s16 + $0x30] sm:$0xff] }
 0x4d4   : > { %v606_v30 = vadd.f32 %v600_v52, %v596_v27  ;;  %v595_v1 = vadd.f32 %v594_v13, %v585_v56  ;;  %vm633_vm15 = vcmp.eq.s32.totalorder %v632_v2, %v7302_v39  ;;  %v681_v17 = vmul.f32 %v680_v0, %v680_v0  ;;  %v5129_v49 = vld [vmem:[%s7333_s16 + $0x38] sm:$0xff]  ;;  %v767_v13 = vld [vmem:[%s7363_s17] sm:$0xff] }
 0x4d5   : > { %v624_v21 = vsel %vm623_vm14, 0.0, %v620_v31  ;;  %v692_v60 = vsel %vm4127_vm0, %v5122_v6, 0.0  ;;  %v687_v22 = vmul.f32 %v686_v3, %v686_v3  ;;  %v634_v26 = vsel %vm633_vm15, 0.0, %v630_v36 }
 0x4d6   : > { %v616_v35 = vadd.f32 %v610_v8, %v606_v30  ;;  %v605_v9 = vadd.f32 %v604_v16, %v595_v1  ;;  %v709_v52 = vsel %vm4127_vm0, %v708_v19, 0.0  ;;  %v693_v27 = vmul.f32 %v692_v60, %v692_v60  ;;  %v5124_v8 = vld [vmem:[%s7333_s16 + $0x10] sm:$0xff]  ;;  %v5133_v19 = vld [vmem:[%s7363_s17 + $0x20] sm:$0xff] }
 0x4d7   : > { %v715_v58 = vsel %vm4127_vm0, %v5123_v25, 0.0  ;;  %v721_v11 = vsel %vm4127_vm0, %v5124_v8, 0.0  ;;  %v727_v40 = vsel %vm4127_vm0, %v5125_v32, 0.0  ;;  %v733_v23 = vsel %vm4127_vm0, %v5126_v37, 0.0  ;;  %v5131_v1 = vld [vmem:[%s7363_s17 + $0x10] sm:$0xff] }
 0x4d8   : > { %v626_v41 = vadd.f32 %v620_v31, %v616_v35  ;;  %v615_v24 = vadd.f32 %v614_v4, %v605_v9  ;;  %v710_v31 = vmul.f32 %v709_v52, %v709_v52  ;;  %v722_v42 = vmul.f32 %v721_v11, %v721_v11  ;;  %v5132_v4 = vld [vmem:[%s7363_s17 + $0x18] sm:$0xff] }
 0x4d9   : > { %v728_v46 = vmul.f32 %v727_v40, %v727_v40  ;;  %v751_v55 = vsel %vm4127_vm0, %v5129_v49, 0.0  ;;  %v768_v62 = vsel %vm4127_vm0, %v767_v13, 0.0  ;;  %v788_v3 = vsel %vm4127_vm0, %v5131_v1, 0.0 }
 0x4da   : > { %v636_v45 = vadd.f32 %v630_v36, %v626_v41  ;;  %v625_v7 = vadd.f32 %v624_v21, %v615_v24  ;;  %v716_v36 = vmul.f32 %v715_v58, %v715_v58  ;;  %v752_v0 = vmul.f32 %v751_v55, %v751_v55 }
 0x4db   : > { %v769_v6 = vmul.f32 %v768_v62, %v768_v62  ;;  %v798_v21 = vsel %vm4127_vm0, %v5132_v4, 0.0  ;;  %v808_v25 = vsel %vm4127_vm0, %v5133_v19, 0.0  ;;  %v760_v38 = vmov %v5775_v38 }
 0x4dc   : > { %v653_v34 = vadd.f32 %v7314_v10, %v636_v45  ;;  %v635_v29 = vadd.f32 %v634_v26, %v625_v7  ;;  %v799_v7 = vmul.f32 %v798_v21, %v798_v21  ;;  %v757_v39 = vmov %v5777_v39 }
 0x4dd   : > { %v781_v11 = vadd.s32 8, %v760_v38  ;;  %vm772_vm1 = vcmp.eq.s32.totalorder %v760_v38, %v757_v39  ;;  %v791_v40 = vadd.s32 16, %v760_v38  ;;  %v841_v55 = vadd.s32 56, %v760_v38 }
 0x4de   : > { %v659_v59 = vadd.f32 %v657_v44, %v653_v34  ;;  %v652_v33 = vadd.f32 %v7314_v10, %v635_v29  ;;  %v739_v10 = vsel %vm4127_vm0, %v5127_v43, 0.0  ;;  %v745_v34 = vsel %vm4127_vm0, %v5128_v15, 0.0 }
 0x4df   : > { %v740_v54 = vmul.f32 %v739_v10, %v739_v10  ;;  %v809_v29 = vmul.f32 %v808_v25, %v808_v25  ;;  %vm782_vm2 = vcmp.eq.s32.totalorder %v781_v11, %v757_v39  ;;  %v801_v43 = vadd.s32 24, %v760_v38 }
 0x4e0   : > { %v665_v5 = vadd.f32 %v663_v50, %v659_v59  ;;  %v658_v41 = vadd.f32 %v657_v44, %v652_v33  ;;  %v734_v44 = vmul.f32 %v733_v23, %v733_v23  ;;  %v746_v59 = vmul.f32 %v745_v34, %v745_v34 }
 0x4e1   : > { %vm792_vm3 = vcmp.eq.s32.totalorder %v791_v40, %v757_v39  ;;  %v811_v15 = vadd.s32 32, %v760_v38  ;;  %vm802_vm4 = vcmp.eq.s32.totalorder %v801_v43, %v757_v39  ;;  %vm842_vm12 = vcmp.eq.s32.totalorder %v841_v55, %v757_v39 }
 0x4e2   : > { %v671_v14 = vadd.f32 %v669_v61, %v665_v5  ;;  %v664_v28 = vadd.f32 %v663_v50, %v658_v41 }
 0x4e3   : > { %vm812_vm5 = vcmp.eq.s32.totalorder %v811_v15, %v757_v39 }
 0x4e4   : > { %v677_v20 = vadd.f32 %v675_v18, %v671_v14  ;;  %v670_v47 = vadd.f32 %v669_v61, %v664_v28  ;;  %v5130_v61 = vld [vmem:[%s7363_s17 + $0x8] sm:$0xff] }
 0x4e5   : > { %v778_v2 = vsel %vm4127_vm0, %v5130_v61, 0.0 }
 0x4e6   : > { %v683_v53 = vadd.f32 %v681_v17, %v677_v20  ;;  %v676_v51 = vadd.f32 %v675_v18, %v670_v47  ;;  %v789_v20 = vmul.f32 %v788_v3, %v788_v3 }
 0x4e8   : > { %v689_v30 = vadd.f32 %v687_v22, %v683_v53  ;;  %v682_v56 = vadd.f32 %v681_v17, %v676_v51  ;;  %v779_v17 = vmul.f32 %v778_v2, %v778_v2  ;;  %v5135_v53 = vld [vmem:[%s7363_s17 + $0x30] sm:$0xff]  ;;  %v793_v34 = vsel %vm792_vm3, 0.0, %v789_v20 }
 0x4ea   : > { %v695_v35 = vadd.f32 %v693_v27, %v689_v30  ;;  %v688_v16 = vadd.f32 %v687_v22, %v682_v56  ;;  %v5134_v22 = vld [vmem:[%s7363_s17 + $0x28] sm:$0xff]  ;;  %v5136_v30 = vld [vmem:[%s7363_s17 + $0x38] sm:$0xff]  ;;  %v783_v47 = vsel %vm782_vm2, 0.0, %v779_v17  ;;  %v813_v56 = vsel %vm812_vm5, 0.0, %v809_v29 }
 0x4ec   : > { %v712_v12 = vadd.f32 %v710_v31, %v695_v35  ;;  %v694_v5 = vadd.f32 %v693_v27, %v688_v16  ;;  %v818_v27 = vsel %vm4127_vm0, %v5134_v22, 0.0 }
 0x4ed   : > { %v819_v35 = vmul.f32 %v818_v27, %v818_v27 }
 0x4ee   : > { %v718_v45 = vadd.f32 %v716_v36, %v712_v12  ;;  %v711_v9 = vadd.f32 %v710_v31, %v694_v5  ;;  %v828_v31 = vsel %vm4127_vm0, %v5135_v53, 0.0 }
 0x4ef   : > { %v829_v12 = vmul.f32 %v828_v31, %v828_v31 }
 0x4f0   : > { %v724_v48 = vadd.f32 %v722_v42, %v718_v45  ;;  %v717_v60 = vadd.f32 %v716_v36, %v711_v9  ;;  %v838_v36 = vsel %vm4127_vm0, %v5136_v30, 0.0  ;;  %v773_v45 = vsel %vm772_vm1, 0.0, %v769_v6 }
 0x4f1   : > { %v839_v28 = vmul.f32 %v838_v36, %v838_v36 }
 0x4f2   : > { %v730_v50 = vadd.f32 %v728_v46, %v724_v48  ;;  %v723_v26 = vadd.f32 %v722_v42, %v717_v60 }
 0x4f4   : > { %v736_v57 = vadd.f32 %v734_v44, %v730_v50  ;;  %v729_v8 = vadd.f32 %v728_v46, %v723_v26  ;;  %v831_v50 = vadd.s32 48, %v760_v38 }
 0x4f6   : > { %v742_v63 = vadd.f32 %v740_v54, %v736_v57  ;;  %v735_v32 = vadd.f32 %v734_v44, %v729_v8  ;;  %v821_v44 = vadd.s32 40, %v760_v38  ;;  %vm832_vm7 = vcmp.eq.s32.totalorder %v831_v50, %v757_v39 }
 0x4f7   : > { %v833_v62 = vsel %vm832_vm7, 0.0, %v829_v12 }
 0x4f8   : > { %v748_v18 = vadd.f32 %v746_v59, %v742_v63  ;;  %v741_v37 = vadd.f32 %v740_v54, %v735_v32  ;;  %v803_v54 = vsel %vm802_vm4, 0.0, %v799_v7  ;;  %vm822_vm6 = vcmp.eq.s32.totalorder %v821_v44, %v757_v39 }
 0x4f9   : > { %v843_v63 = vsel %vm842_vm12, 0.0, %v839_v28 }
 0x4fa   : > { %v754_v14 = vadd.f32 %v752_v0, %v748_v18  ;;  %v747_v42 = vadd.f32 %v746_v59, %v741_v37  ;;  %v823_v59 = vsel %vm822_vm6, 0.0, %v819_v35 }
 0x4fc   : > { %v775_v24 = vadd.f32 %v769_v6, %v754_v14  ;;  %v753_v46 = vadd.f32 %v752_v0, %v747_v42 }
 0x4fe   : > { %v785_v52 = vadd.f32 %v779_v17, %v775_v24  ;;  %v774_v48 = vadd.f32 %v773_v45, %v753_v46 }
 0x500   : > { %v795_v58 = vadd.f32 %v789_v20, %v785_v52  ;;  %v784_v51 = vadd.f32 %v783_v47, %v774_v48 }
 0x502   : > { %v805_v33 = vadd.f32 %v799_v7, %v795_v58  ;;  %v794_v13 = vadd.f32 %v793_v34, %v784_v51 }
 0x504   : > { %v815_v41 = vadd.f32 %v809_v29, %v805_v33  ;;  %v804_v57 = vadd.f32 %v803_v54, %v794_v13 }
 0x506   : > { %v825_v23 = vadd.f32 %v819_v35, %v815_v41  ;;  %v814_v61 = vadd.f32 %v813_v56, %v804_v57 }
 0x508   : > { %v835_v10 = vadd.f32 %v829_v12, %v825_v23  ;;  %v824_v16 = vadd.f32 %v823_v59, %v814_v61 }
 0x50a   : > { %v845_v49 = vadd.f32 %v839_v28, %v835_v10  ;;  %v834_v0 = vadd.f32 %v833_v62, %v824_v16 }
 0x50c   : > { %846 = vadd.xlane.f32.xlu0 %v845_v49  ;;  %v844_v1 = vadd.f32 %v843_v63, %v834_v0 }
 0x514   : > { %854 = vadd.xlane.f32.xlu0 %v844_v1 }
 0x57f   : > { %v847_v2 = vpop.xlane.xlu0 %846 }
 0x580   : > { %v848_v5 = vrot.slane %v847_v2, 4 }
 0x582   : > { %v849_v18 = vadd.f32 %v848_v5, %v847_v2 }
 0x584   : > { %v850_v6 = vrot.slane %v849_v18, 2 }
 0x586   : > { %v851_v14 = vadd.f32 %v850_v6, %v849_v18 }
 0x587   : > { %v855_v4 = vpop.xlane.xlu0 %854 }
 0x588   : > { %v856_v3 = vrot.slane %v855_v4, 4  ;;  %v852_v21 = vrot.slane %v851_v14, 1 }
 0x58a   : > { %v857_v9 = vadd.f32 %v856_v3, %v855_v4  ;;  %v853_v20 = vadd.f32 %v852_v21, %v851_v14 }
 0x58c   : > { %v858_v17 = vrot.slane %v857_v9, 2 }
 0x58e   : > { %v859_v19 = vadd.f32 %v858_v17, %v857_v9 }
 0x590   : > { %v860_v60 = vrot.slane %v859_v19, 1 }
 0x592   : > { %v861_v24 = vadd.f32 %v860_v60, %v859_v19 }
 0x594   : > { %5161 = vpush %v861_v24 }
 0x595   : > { %5163 = vpush %v853_v20 }
 0x5c5   : > { %s5162_s2 = spop %5161 }
 0x5c6   : > { %s5164_s18 = spop %5163 }
 0x5c7   : > { %s864_s19 = smul.f32 1e-10, %s5164_s18 }
 0x5c9   : > { %p865_p11 = scmp.le.f32.partialorder %s5162_s2, %s864_s19 }
 0x5cb   : > { %p867_p12 = por %p866_p10, %p865_p11 }
 0x5cd   :  { %3623 = sbr.rel (!%p867_p12) target bundleno = 398 (0x18e), region = 813 }
 0x5d2 PF:  { %s7526_s3 = sld [smem:[#allocation39_spill]]  ;;  %v7406_v39 = vmov %v5777_v39  ;;  %v3631_v38 = vmov %v5775_v38  ;;  %s5685_s0 = smov [#allocation10]  }
 0x5d3   :  { %v7410_v39 = vmov %v5777_v39  ;;  %v7413_v38 = vmov %v5775_v38  ;;  %s3888_s23 = sshll.u32 %s5685_s0, 4  ;;  %vm3635_vm0 = vcmp.eq.s32.totalorder %v3631_v38, %v7406_v39  ;;  %v3640_v22 = vadd.s32 8, %v3631_v38  ;;  %s7416_s24 = smov [#allocation15]  ;;  %s3889_s23 = int_to_ptr.vmem [resolvable:$true] %s3888_s23 }
 0x5d4   :  { %v3646_v25 = vadd.s32 16, %v3631_v38  ;;  %v3652_v26 = vadd.s32 24, %v3631_v38  ;;  %v3658_v52 = vadd.s32 32, %v3631_v38  ;;  %v3664_v7 = vadd.s32 40, %v3631_v38  ;;  %v3632_v8 = vld [vmem:[%s7416_s24] sm:$0xff]  ;;  %v5137_v58 = vld [vmem:[%s7416_s24 + $0x8] sm:$0xff] }
 0x5d5   :  { %v3670_v53 = vadd.s32 48, %v3631_v38  ;;  %v3676_v27 = vadd.s32 56, %v3631_v38  ;;  %vm3641_vm13 = vcmp.eq.s32.totalorder %v3640_v22, %v7406_v39  ;;  %v5138_v29 = vld [vmem:[%s7416_s24 + $0x10] sm:$0xff]  ;;  %vm3697_vm10 = vcmp.eq.s32.totalorder %v7413_v38, %v7410_v39  ;;  %v5139_v31 = vld [vmem:[%s7416_s24 + $0x18] sm:$0xff]  ;;  %s7432_s25 = smov [#allocation18]  ;;  %v5140_v11 = vld [vmem:[%s7416_s24 + $0x20] sm:$0xff] }
 0x5d6   :  { %vm3647_vm8 = vcmp.eq.s32.totalorder %v3646_v25, %v7406_v39  ;;  %vm3653_vm9 = vcmp.eq.s32.totalorder %v3652_v26, %v7406_v39  ;;  %v3636_v30 = vsel %vm3635_vm0, %v3632_v8, 0.0  ;;  %vm3659_vm11 = vcmp.eq.s32.totalorder %v3658_v52, %v7406_v39  ;;  %v3694_v33 = vld [vmem:[%s7432_s25] sm:$0xff]  ;;  %v5141_v40 = vld [vmem:[%s7416_s24 + $0x28] sm:$0xff]  ;;  %v5145_v42 = vld [vmem:[%s7432_s25 + $0x10] sm:$0xff]  ;;  %s7527_s28 = sld [smem:[#allocation38_spill]]  ;;  %s5686_s30 = smov [#allocation8]  }
 0x5d7   :  { %vm3665_vm14 = vcmp.eq.s32.totalorder %v3664_v7, %v7406_v39  ;;  %vm3671_vm15 = vcmp.eq.s32.totalorder %v3670_v53, %v7406_v39  ;;  %v3642_v32 = vsel %vm3641_vm13, %v5137_v58, %v3636_v30  ;;  %vm3677_vm1 = vcmp.eq.s32.totalorder %v3676_v27, %v7406_v39  ;;  %v5144_v12 = vld [vmem:[%s7432_s25 + $0x8] sm:$0xff]  ;;  %v5142_v45 = vld [vmem:[%s7416_s24 + $0x30] sm:$0xff]  ;;  %v5146_v46 = vld [vmem:[%s7432_s25 + $0x18] sm:$0xff]  ;;  %s3879_s1 = sshll.u32 %s5686_s30, 4  ;;  %s5687_s15 = smov [#allocation12]   ;;  %s3880_s1 = int_to_ptr.vmem [resolvable:$true] %s3879_s1 }
 0x5d8   :  { %s3890_s22 = sshll.u32 %s7526_s3, 4  ;;  %v3702_v35 = vadd.s32 8, %v7413_v38  ;;  %v3708_v36 = vadd.s32 16, %v7413_v38  ;;  %v3648_v37 = vsel %vm3647_vm8, %v5138_v29, %v3642_v32  ;;  %v3698_v41 = vsel %vm3697_vm10, %v3694_v33, 0.0  ;;  %v5143_v47 = vld [vmem:[%s7416_s24 + $0x38] sm:$0xff]  ;;  %v5147_v44 = vld [vmem:[%s7432_s25 + $0x20] sm:$0xff]  ;;  %s3891_s22 = int_to_ptr.hbm [resolvable:$true] %s3890_s22 }
 0x5d9   :  { %3893 = dma.vmem_to_hbm [thread:$0]  %s3889_s23, 1024, %s3891_s22, [#allocation11]   ;;  %v3714_v43 = vadd.s32 24, %v7413_v38  ;;  %v3720_v23 = vadd.s32 32, %v7413_v38  ;;  %v3654_v28 = vsel %vm3653_vm9, %v5139_v31, %v3648_v37  ;;  %v3726_v15 = vadd.s32 40, %v7413_v38  ;;  %v5148_v51 = vld [vmem:[%s7432_s25 + $0x28] sm:$0xff] }
 0x5da   :  { %vm3703_vm2 = vcmp.eq.s32.totalorder %v3702_v35, %v7410_v39  ;;  %vm3709_vm3 = vcmp.eq.s32.totalorder %v3708_v36, %v7410_v39  ;;  %v3660_v10 = vsel %vm3659_vm11, %v5140_v11, %v3654_v28  ;;  %v3732_v50 = vadd.s32 48, %v7413_v38  ;;  %v5149_v55 = vld [vmem:[%s7432_s25 + $0x30] sm:$0xff]  ;;  %v5150_v61 = vld [vmem:[%s7432_s25 + $0x38] sm:$0xff]  ;;  %s3897_s7 = sshll.u32 %s5687_s15, 4  ;;  %s7528_s9 = sld [smem:[#allocation40_spill]]  ;;  %s3898_s7 = int_to_ptr.vmem [resolvable:$true] %s3897_s7 }
 0x5db   :  { %v3704_v48 = vsel %vm3703_vm2, %v5144_v12, %v3698_v41  ;;  %vm3715_vm4 = vcmp.eq.s32.totalorder %v3714_v43, %v7410_v39  ;;  %vm3721_vm5 = vcmp.eq.s32.totalorder %v3720_v23, %v7410_v39  ;;  %v3666_v49 = vsel %vm3665_vm14, %v5141_v40, %v3660_v10  ;;  %s7529_s11 = sld [smem:[#allocation41_spill]]  ;;  %s5688_s13 = smov [#allocation13]  }
 0x5dc   :  { %s3881_s29 = sshll.u32 %s7527_s28, 4  ;;  %v3710_v34 = vsel %vm3709_vm3, %v5145_v42, %v3704_v48  ;;  %vm3727_vm6 = vcmp.eq.s32.totalorder %v3726_v15, %v7410_v39  ;;  %v3672_v54 = vsel %vm3671_vm15, %v5142_v45, %v3666_v49  ;;  %v3738_v56 = vadd.s32 56, %v7413_v38  ;;  %s3906_s14 = sshll.u32 %s5688_s13, 4  ;;  %s3882_s29 = int_to_ptr.hbm [resolvable:$true] %s3881_s29  ;;  %s3907_s14 = int_to_ptr.vmem [resolvable:$true] %s3906_s14 }
 0x5dd   :  { %v3716_v13 = vsel %vm3715_vm4, %v5146_v46, %v3710_v34  ;;  %3884 = dma.vmem_to_hbm [thread:$0]  %s3880_s1, 1024, %s3882_s29, [#allocation9]   ;;  %v3678_v57 = vsel %vm3677_vm1, %v5143_v47, %v3672_v54  ;;  %vm3733_vm7 = vcmp.eq.s32.totalorder %v3732_v50, %v7410_v39 }
 0x5de   :  { %v3722_v59 = vsel %vm3721_vm5, %v5147_v44, %v3716_v13  ;;  %v3679_v62 = vrot.slane %v3678_v57, 4  ;;  %vm3739_vm12 = vcmp.eq.s32.totalorder %v3738_v56, %v7410_v39  ;;  %s3625_s16 = smov [#allocation4]  ;;  %s3687_s17 = smov [#allocation6] }
 0x5df   :  { %v3728_v38 = vsel %vm3727_vm6, %v5148_v51, %v3722_v59  ;;  %s7530_s19 = sld [smem:[#allocation36_spill]] }
 0x5e0   :  { %s3899_s6 = sshll.u32 %s7528_s9, 4  ;;  %v3734_v16 = vsel %vm3733_vm7, %v5149_v55, %v3728_v38  ;;  %v3680_v63 = vadd.f32 %v3679_v62, %v3678_v57  ;;  %s7531_s3 = sld [smem:[#allocation37_spill]]  ;;  %s3900_s6 = int_to_ptr.hbm [resolvable:$true] %s3899_s6 }
 0x5e1   :  { %3902 = dma.vmem_to_hbm [thread:$0]  %s3898_s7, 1024, %s3900_s6, [#allocation11]   ;;  %v3740_v0 = vsel %vm3739_vm12, %v5150_v61, %v3734_v16 }
 0x5e2   :  { %s3908_s12 = sshll.u32 %s7529_s11, 4  ;;  %v3741_v1 = vrot.slane %v3740_v0, 4  ;;  %v3681_v2 = vrot.slane %v3680_v63, 2  ;;  %s3909_s12 = int_to_ptr.hbm [resolvable:$true] %s3908_s12 }
 0x5e3   :  { %3911 = dma.vmem_to_hbm [thread:$0]  %s3907_s14, 1024, %s3909_s12, [#allocation14]  }
 0x5e4   :  { %v3742_v5 = vadd.f32 %v3741_v1, %v3740_v0  ;;  %v3682_v18 = vadd.f32 %v3681_v2, %v3680_v63 }
 0x5e6   :  { %v3743_v39 = vrot.slane %v3742_v5, 2  ;;  %v3683_v6 = vrot.slane %v3682_v18, 1 }
 0x5e8   :  { %v3744_v4 = vadd.f32 %v3743_v39, %v3742_v5  ;;  %v3684_v3 = vadd.f32 %v3683_v6, %v3682_v18 }
 0x5ea   :  { %v3745_v9 = vrot.slane %v3744_v4, 1  ;;  %3685 = vst [vmem:[%s3625_s16] sm:$0x1] %v3684_v3 }
 0x5ec   :  { %v3746_v14 = vadd.f32 %v3745_v9, %v3744_v4 }
 0x5ee   :  { %3747 = vst [vmem:[%s3687_s17] sm:$0x1] %v3746_v14 }
 0x5f1   :  { %v3750_v17 = vld [vmem:[#allocation4] sm:$0x1] }
 0x5f2   :  { %3753 = vst [vmem:[#allocation5] sm:$0x1] %v3750_v17 }
 0x5f5   :  { %v3756_v19 = vld [vmem:[#allocation6] sm:$0x1] }
 0x5f6   :  { %3759 = vst [vmem:[#allocation7] sm:$0x1] %v3756_v19 }
 0x5f9   :  { %v3816_v21 = vld [vmem:[#allocation5] sm:$0x1] }
 0x5fa   :  { %3817 = vst [vmem:[%s7530_s19] sm:$0x1] %v3816_v21 }
 0x5fd   :  { %v3874_v60 = vld [vmem:[#allocation7] sm:$0x1] }
 0x5fe   :  { %3875 = vst [vmem:[%s7531_s3] sm:$0x1] %v3874_v60 }
 0x5ff   :  { %5636 = dma.done.wait [#allocation9], 1024  }
 0x600   :  { %5637 = vsyncadd [#allocation9], 4294966272 }
 0x601   :  { %5638 = dma.done.wait [#allocation11], 2048  }
 0x602   :  { %5639 = vsyncadd [#allocation11], 4294965248 }
 0x603   :  { %5640 = dma.done.wait [#allocation14], 1024  }
 0x604   :  { %5641 = vsyncadd [#allocation14], 4294966272 }
 0x605   :  { %3924 = vsyncpa [#allocation9], 1 }
 0x606   :  { %3925 = vsyncpa [#allocation11], 1 }
 0x607   :  { %3926 = vsyncpa [#allocation14], 1 }

</bundles_post_ra>
